<compile_context>
chip_gen: v7x
topology: tpu7x:2x2x1
jax: 0.10.0
libtpu: 0.0.40
codegen_flags: <defaults>
</compile_context>

<pallas_src>
import functools

import jax
import jax.numpy as jnp
from jax.experimental import pallas as pl
from jax.experimental.pallas import tpu as pltpu


# ----------------------------- Pallas kernels ------------------------------

def _mm_bias_act_kernel(act, x_ref, w_ref, b_ref, o_ref):
    """y = act(x @ w + b) on one (tm, K) x (K, N) tile. bf16 in, f32 accum."""
    y = jnp.dot(x_ref[...], w_ref[...], preferred_element_type=jnp.float32)
    y = y + b_ref[...]
    if act == "relu":
        y = jnp.maximum(y, 0.0)
    o_ref[...] = y.astype(o_ref.dtype)


def matmul_bias_act(x, w, b, act="none", tm=128, out_dtype=jnp.bfloat16):
    """Row-tiled fused matmul + bias + activation.

    No explicit padding: grid = cdiv(M, tm); the ragged last block reads
    undefined rows whose corresponding output rows are simply never written.
    """
    M, K = x.shape
    Kw, N = w.shape
    assert K == Kw, (K, Kw)
    return pl.pallas_call(
        functools.partial(_mm_bias_act_kernel, act),
        out_shape=jax.ShapeDtypeStruct((M, N), out_dtype),
        grid_spec=pltpu.PrefetchScalarGridSpec(
            num_scalar_prefetch=0,
            grid=(pl.cdiv(M, tm),),
            in_specs=[pl.BlockSpec((tm, K), lambda i: (i, 0)),
                      pl.BlockSpec((K, N), lambda i: (0, 0)),
                      pl.BlockSpec((1, N), lambda i: (0, 0))],
            out_specs=pl.BlockSpec((tm, N), lambda i: (i, 0))),
        compiler_params=pltpu.CompilerParams(
            dimension_semantics=("parallel",)),
    )(x, w, b)


def _conv4_rs_kernel(x_ref, w4_ref, b4_ref, w1_ref, b1_ref, w2_ref, b2_ref,
                     o_ref):
    """Fused: conv4(matmul) -> RS1+ELU -> RS2+sigmoid -> gate -> tail ReLU.

    One image per grid step; all intermediates (f7, g, rs) stay on-chip.
    x_ref: (HoWo, K4) bf16, o_ref: (HoWo, 64) bf16.
    """
    f7 = jnp.dot(x_ref[...], w4_ref[...],
                 preferred_element_type=jnp.float32) + b4_ref[...]        # (R, 64)
    g = jnp.dot(f7.astype(jnp.bfloat16), w1_ref[...],
                preferred_element_type=jnp.float32) + b1_ref[...]         # (R, 512)
    g = jnp.where(g > 0.0, g, jnp.exp(jnp.minimum(g, 0.0)) - 1.0)         # ELU(a=1)
    rs = jnp.dot(g.astype(jnp.bfloat16), w2_ref[...],
                 preferred_element_type=jnp.float32) + b2_ref[...]        # (R, 2)
    rs = pl.reciprocal(1.0 + jnp.exp(-rs), approx=True)                   # sigmoid (EUP)
    gate = rs[:, 0:1] + rs[:, 1:2]        # f7*RS0 + f7*RS1 == f7*(RS0+RS1)
    o_ref[...] = jnp.maximum(f7 * gate, 0.0).astype(o_ref.dtype)          # tail ReLU


def conv4_rs_mask(f5, p):
    """f5: (N, Hi, Wi, 128) bf16 -> masked ReLU'd conv4 map (N, Ho*Wo, 64) bf16."""
    cols, Ho, Wo = _im2col(f5, 3, 1)                       # (N, Ho, Wo, 1152)
    N = f5.shape[0]
    K4 = cols.shape[-1]
    R = Ho * Wo
    x = cols.reshape(N, R, K4).astype(jnp.bfloat16)
    return pl.pallas_call(
        _conv4_rs_kernel,
        out_shape=jax.ShapeDtypeStruct((N, R, 64), jnp.bfloat16),
        grid_spec=pltpu.PrefetchScalarGridSpec(
            num_scalar_prefetch=0,
            grid=(N,),                     # one image per step -> >=2 steps feeds both v7x TCs
            in_specs=[pl.BlockSpec((None, R, K4), lambda i: (i, 0, 0)),
                      pl.BlockSpec((K4, 64), lambda i: (0, 0)),
                      pl.BlockSpec((1, 64), lambda i: (0, 0)),
                      pl.BlockSpec((64, 512), lambda i: (0, 0)),
                      pl.BlockSpec((1, 512), lambda i: (0, 0)),
                      pl.BlockSpec((512, 2), lambda i: (0, 0)),
                      pl.BlockSpec((1, 2), lambda i: (0, 0))],
            out_specs=pl.BlockSpec((None, R, 64), lambda i: (i, 0, 0))),
        compiler_params=pltpu.CompilerParams(
            dimension_semantics=("parallel",)),
    )(x, p["conv4_w"], p["conv4_b"], p["rs1_w"], p["rs1_b"],
      p["rs2_w"], p["rs2_b"])


# ------------------------------- glue (JAX) --------------------------------

def _im2col(x, k, stride):
    """x: (N, H, W, C) -> (N, Ho, Wo, k*k*C) with feature order (kh, kw, cin)."""
    N, H, W, C = x.shape
    Ho = (H - k) // stride + 1
    Wo = (W - k) // stride + 1
    hi = stride * (Ho - 1) + 1
    wi = stride * (Wo - 1) + 1
    if C == 1:
        # Lane-dense special case: one k*k-wide stack instead of k*k width-1 concats.
        x2 = x[..., 0]
        patches = [x2[:, i:i + hi:stride, j:j + wi:stride]
                   for i in range(k) for j in range(k)]
        cols = jnp.stack(patches, axis=-1)
    else:
        patches = [x[:, i:i + hi:stride, j:j + wi:stride, :]
                   for i in range(k) for j in range(k)]
        cols = jnp.concatenate(patches, axis=-1)
    return cols, Ho, Wo


def conv2d(x, w2d, b, k, stride, act, tm):
    """Valid conv as im2col + Pallas matmul. w2d: (k*k*Cin [padded], Cout) bf16."""
    N = x.shape[0]
    cols, Ho, Wo = _im2col(x, k, stride)
    K = cols.shape[-1]
    x2d = cols.reshape(N * Ho * Wo, K).astype(jnp.bfloat16)
    Kw, cout = w2d.shape
    if Kw > K:                       # conv1: contraction zero-padded 64 -> 128
        x2d = jnp.pad(x2d, ((0, 0), (0, Kw - K)))
    y = matmul_bias_act(x2d, w2d, b, act=act, tm=tm, out_dtype=jnp.bfloat16)
    return y.reshape(N, Ho, Wo, cout)


def nature_cnn_amm_forward(params, inputs_nchw, end_with_relu=False):
    x = jnp.transpose(inputs_nchw, (0, 2, 3, 1)).astype(jnp.float32)  # NCHW -> NHWC
    # main[:6]
    h = conv2d(x, params["conv1_w"], params["conv1_b"], 8, 4, "relu", tm=512)
    h = conv2d(h, params["conv2_w"], params["conv2_b"], 4, 2, "relu", tm=512)
    f5 = conv2d(h, params["conv3_w"], params["conv3_b"], 4, 2, "relu", tm=128)
    # main[6:8] + Region_Sensitive_Module + masking + tail ReLU, fully fused.
    masked = conv4_rs_mask(f5, params)                 # (N, 54, 64) bf16
    N = masked.shape[0]
    # fc_w rows are stored in NHWC (h, w, c) flatten order -> no transpose needed.
    out = matmul_bias_act(masked.reshape(N, -1), params["fc_w"], params["fc_b"],
                          act="relu" if end_with_relu else "none",
                          tm=8, out_dtype=jnp.float32)
    return out


def init_params(key, input_channels, feature_size):
    # TODO(synk): PyTorch uses orthogonal init w/ relu gain; deterministic
    # scaled-normal init is used here instead (forward semantics unchanged).
    def norm(k, shape, scale=0.05):
        return (scale * jax.random.normal(k, shape, jnp.float32)).astype(jnp.bfloat16)

    ks = jax.random.split(key, 7)
    # Conv weights are stored matmul-ready as (kh*kw*cin, cout) bf16, i.e. the
    # PyTorch (cout, cin, kh, kw) tensor permuted to (kh, kw, cin, cout) and
    # reshaped. conv1 is additionally zero-padded along K to a multiple of 128.
    k1 = 8 * 8 * input_channels
    k1p = ((k1 + 127) // 128) * 128
    conv1_w = norm(ks[0], (k1, 32))
    if k1p > k1:
        conv1_w = jnp.pad(conv1_w, ((0, k1p - k1), (0, 0)))
    final_conv_size = 64 * 9 * 6
    return {
        "conv1_w": conv1_w,                       "conv1_b": jnp.zeros((1, 32), jnp.float32),
        "conv2_w": norm(ks[1], (4 * 4 * 32, 64)), "conv2_b": jnp.zeros((1, 64), jnp.float32),
        "conv3_w": norm(ks[2], (4 * 4 * 64, 128)),"conv3_b": jnp.zeros((1, 128), jnp.float32),
        "conv4_w": norm(ks[3], (3 * 3 * 128, 64)),"conv4_b": jnp.zeros((1, 64), jnp.float32),
        "rs1_w": norm(ks[4], (64, 512)),          "rs1_b": jnp.zeros((1, 512), jnp.float32),
        "rs2_w": norm(ks[5], (512, 2)),           "rs2_b": jnp.zeros((1, 2), jnp.float32),
        # fc_w rows pre-permuted to NHWC (h, w, c) flatten order (equivalent to
        # PyTorch's fc.weight.T with its (c, h, w) rows permuted once at init).
        "fc_w": norm(ks[6], (final_conv_size, feature_size)),
        "fc_b": jnp.zeros((1, feature_size), jnp.float32),
    }


if __name__ == "__main__":
    key = jax.random.PRNGKey(0)
    kx, kp = jax.random.split(key)
    batch, input_channels, feature_size = 2, 1, 256
    # Non-downsample path implies 210x160 Atari frames (final conv map 64x9x6).
    x = jax.random.normal(kx, (batch, input_channels, 210, 160), jnp.float32)
    params = init_params(kp, input_channels, feature_size)

    out = jax.jit(nature_cnn_amm_forward)(params, x)
    out = jax.block_until_ready(out)
    assert out.shape == (batch, feature_size), out.shape
    assert bool(jnp.all(jnp.isfinite(out)))
    print("KERNEL_OK")
</pallas_src>

<mosaic_0001>
module attributes {stable_mosaic.version = 11 : i64} {
  func.func @_mm_bias_act_kernel(%arg0: i32, %arg1: memref<512x128xbf16, #tpu.memory_space<vmem>>, %arg2: memref<128x32xbf16, #tpu.memory_space<vmem>>, %arg3: memref<1x32xf32, #tpu.memory_space<vmem>>, %arg4: memref<512x32xbf16, #tpu.memory_space<vmem>>) attributes {dimension_semantics = [#tpu.dimension_semantics<parallel>], iteration_bounds = array<i64: 8>, scalar_prefetch = 0 : i64, scratch_operands = 0 : i64, tpu.core_type = #tpu.core_type<tc>, window_params = [{transform_indices = @transform_0, window_bounds = array<i64: 512, 128>}, {pipeline_mode = #tpu.pipeline_mode<synchronous>, transform_indices = @transform_1, window_bounds = array<i64: 128, 32>}, {pipeline_mode = #tpu.pipeline_mode<synchronous>, transform_indices = @transform_2, window_bounds = array<i64: 1, 32>}, {transform_indices = @transform_3, window_bounds = array<i64: 512, 32>}]} {
    %c0 = arith.constant 0 : index
    %c0_0 = arith.constant 0 : index
    %0 = vector.load %arg1[%c0, %c0_0] : memref<512x128xbf16, #tpu.memory_space<vmem>>, vector<512x128xbf16>
    %c0_1 = arith.constant 0 : index
    %c0_2 = arith.constant 0 : index
    %1 = vector.load %arg2[%c0_1, %c0_2] : memref<128x32xbf16, #tpu.memory_space<vmem>>, vector<128x32xbf16>
    %cst = arith.constant dense<0.000000e+00> : vector<512x32xf32>
    %2 = tpu.matmul %0, %1, %cst {dimension_numbers = #tpu.dot_dimension_numbers<[1], [0], [0], [1], [0, 0, 1, 1], [], []>} : vector<512x128xbf16>, vector<128x32xbf16>, vector<512x32xf32> -> vector<512x32xf32>
    %c0_3 = arith.constant 0 : index
    %c0_4 = arith.constant 0 : index
    %3 = vector.load %arg3[%c0_3, %c0_4] : memref<1x32xf32, #tpu.memory_space<vmem>>, vector<1x32xf32>
    %4 = vector.broadcast %3 : vector<1x32xf32> to vector<512x32xf32>
    %5 = arith.addf %2, %4 : vector<512x32xf32>
    %cst_5 = arith.constant 0.000000e+00 : f32
    %6 = vector.broadcast %cst_5 : f32 to vector<512x32xf32>
    %7 = arith.maximumf %5, %6 : vector<512x32xf32>
    %8 = arith.truncf %7 : vector<512x32xf32> to vector<512x32xbf16>
    %c0_6 = arith.constant 0 : index
    %c0_7 = arith.constant 0 : index
    %9 = vector.load %arg4[%c0_6, %c0_7] : memref<512x32xbf16, #tpu.memory_space<vmem>>, vector<512x32xbf16>
    tpu.vector_store %arg4[%c0_6, %c0_7], %8 {strides = array<i32>} : memref<512x32xbf16, #tpu.memory_space<vmem>>, vector<512x32xbf16>,
    return
  }
  func.func @transform_0(%arg0: i32) -> (i32, i32) {
    %c0_i32 = arith.constant 0 : i32
    %c0_i32_0 = arith.constant 0 : i32
    return %arg0, %c0_i32 : i32, i32
  }
  func.func @transform_1(%arg0: i32) -> (i32, i32) {
    %c0_i32 = arith.constant 0 : i32
    %c0_i32_0 = arith.constant 0 : i32
    %c0_i32_1 = arith.constant 0 : i32
    return %c0_i32, %c0_i32_0 : i32, i32
  }
  func.func @transform_2(%arg0: i32) -> (i32, i32) {
    %c0_i32 = arith.constant 0 : i32
    %c0_i32_0 = arith.constant 0 : i32
    %c0_i32_1 = arith.constant 0 : i32
    return %c0_i32, %c0_i32_0 : i32, i32
  }
  func.func @transform_3(%arg0: i32) -> (i32, i32) {
    %c0_i32 = arith.constant 0 : i32
    %c0_i32_0 = arith.constant 0 : i32
    return %arg0, %c0_i32 : i32, i32
  }
}

module attributes {stable_mosaic.version = 11 : i64} {
  func.func @_mm_bias_act_kernel(%arg0: i32, %arg1: memref<512x512xbf16, #tpu.memory_space<vmem>>, %arg2: memref<512x64xbf16, #tpu.memory_space<vmem>>, %arg3: memref<1x64xf32, #tpu.memory_space<vmem>>, %arg4: memref<512x64xbf16, #tpu.memory_space<vmem>>) attributes {dimension_semantics = [#tpu.dimension_semantics<parallel>], iteration_bounds = array<i64: 2>, scalar_prefetch = 0 : i64, scratch_operands = 0 : i64, tpu.core_type = #tpu.core_type<tc>, window_params = [{transform_indices = @transform_0, window_bounds = array<i64: 512, 512>}, {pipeline_mode = #tpu.pipeline_mode<synchronous>, transform_indices = @transform_1, window_bounds = array<i64: 512, 64>}, {pipeline_mode = #tpu.pipeline_mode<synchronous>, transform_indices = @transform_2, window_bounds = array<i64: 1, 64>}, {transform_indices = @transform_3, window_bounds = array<i64: 512, 64>}]} {
    %c0 = arith.constant 0 : index
    %c0_0 = arith.constant 0 : index
    %0 = vector.load %arg1[%c0, %c0_0] : memref<512x512xbf16, #tpu.memory_space<vmem>>, vector<512x512xbf16>
    %c0_1 = arith.constant 0 : index
    %c0_2 = arith.constant 0 : index
    %1 = vector.load %arg2[%c0_1, %c0_2] : memref<512x64xbf16, #tpu.memory_space<vmem>>, vector<512x64xbf16>
    %cst = arith.constant dense<0.000000e+00> : vector<512x64xf32>
    %2 = tpu.matmul %0, %1, %cst {dimension_numbers = #tpu.dot_dimension_numbers<[1], [0], [0], [1], [0, 0, 1, 1], [], []>} : vector<512x512xbf16>, vector<512x64xbf16>, vector<512x64xf32> -> vector<512x64xf32>
    %c0_3 = arith.constant 0 : index
    %c0_4 = arith.constant 0 : index
    %3 = vector.load %arg3[%c0_3, %c0_4] : memref<1x64xf32, #tpu.memory_space<vmem>>, vector<1x64xf32>
    %4 = vector.broadcast %3 : vector<1x64xf32> to vector<512x64xf32>
    %5 = arith.addf %2, %4 : vector<512x64xf32>
    %cst_5 = arith.constant 0.000000e+00 : f32
    %6 = vector.broadcast %cst_5 : f32 to vector<512x64xf32>
    %7 = arith.maximumf %5, %6 : vector<512x64xf32>
    %8 = arith.truncf %7 : vector<512x64xf32> to vector<512x64xbf16>
    %c0_6 = arith.constant 0 : index
    %c0_7 = arith.constant 0 : index
    %9 = vector.load %arg4[%c0_6, %c0_7] : memref<512x64xbf16, #tpu.memory_space<vmem>>, vector<512x64xbf16>
    tpu.vector_store %arg4[%c0_6, %c0_7], %8 {strides = array<i32>} : memref<512x64xbf16, #tpu.memory_space<vmem>>, vector<512x64xbf16>,
    return
  }
  func.func @transform_0(%arg0: i32) -> (i32, i32) {
    %c0_i32 = arith.constant 0 : i32
    %c0_i32_0 = arith.constant 0 : i32
    return %arg0, %c0_i32 : i32, i32
  }
  func.func @transform_1(%arg0: i32) -> (i32, i32) {
    %c0_i32 = arith.constant 0 : i32
    %c0_i32_0 = arith.constant 0 : i32
    %c0_i32_1 = arith.constant 0 : i32
    return %c0_i32, %c0_i32_0 : i32, i32
  }
  func.func @transform_2(%arg0: i32) -> (i32, i32) {
    %c0_i32 = arith.constant 0 : i32
    %c0_i32_0 = arith.constant 0 : i32
    %c0_i32_1 = arith.constant 0 : i32
    return %c0_i32, %c0_i32_0 : i32, i32
  }
  func.func @transform_3(%arg0: i32) -> (i32, i32) {
    %c0_i32 = arith.constant 0 : i32
    %c0_i32_0 = arith.constant 0 : i32
    return %arg0, %c0_i32 : i32, i32
  }
}

module attributes {stable_mosaic.version = 11 : i64} {
  func.func @_mm_bias_act_kernel(%arg0: i32, %arg1: memref<128x1024xbf16, #tpu.memory_space<vmem>>, %arg2: memref<1024x128xbf16, #tpu.memory_space<vmem>>, %arg3: memref<1x128xf32, #tpu.memory_space<vmem>>, %arg4: memref<128x128xbf16, #tpu.memory_space<vmem>>) attributes {dimension_semantics = [#tpu.dimension_semantics<parallel>], iteration_bounds = array<i64: 2>, scalar_prefetch = 0 : i64, scratch_operands = 0 : i64, tpu.core_type = #tpu.core_type<tc>, window_params = [{transform_indices = @transform_0, window_bounds = array<i64: 128, 1024>}, {pipeline_mode = #tpu.pipeline_mode<synchronous>, transform_indices = @transform_1, window_bounds = array<i64: 1024, 128>}, {pipeline_mode = #tpu.pipeline_mode<synchronous>, transform_indices = @transform_2, window_bounds = array<i64: 1, 128>}, {transform_indices = @transform_3, window_bounds = array<i64: 128, 128>}]} {
    %c0 = arith.constant 0 : index
    %c0_0 = arith.constant 0 : index
    %0 = vector.load %arg1[%c0, %c0_0] : memref<128x1024xbf16, #tpu.memory_space<vmem>>, vector<128x1024xbf16>
    %c0_1 = arith.constant 0 : index
    %c0_2 = arith.constant 0 : index
    %1 = vector.load %arg2[%c0_1, %c0_2] : memref<1024x128xbf16, #tpu.memory_space<vmem>>, vector<1024x128xbf16>
    %cst = arith.constant dense<0.000000e+00> : vector<128x128xf32>
    %2 = tpu.matmul %0, %1, %cst {dimension_numbers = #tpu.dot_dimension_numbers<[1], [0], [0], [1], [0, 0, 1, 1], [], []>} : vector<128x1024xbf16>, vector<1024x128xbf16>, vector<128x128xf32> -> vector<128x128xf32>
    %c0_3 = arith.constant 0 : index
    %c0_4 = arith.constant 0 : index
    %3 = vector.load %arg3[%c0_3, %c0_4] : memref<1x128xf32, #tpu.memory_space<vmem>>, vector<1x128xf32>
    %4 = vector.broadcast %3 : vector<1x128xf32> to vector<128x128xf32>
    %5 = arith.addf %2, %4 : vector<128x128xf32>
    %cst_5 = arith.constant 0.000000e+00 : f32
    %6 = vector.broadcast %cst_5 : f32 to vector<128x128xf32>
    %7 = arith.maximumf %5, %6 : vector<128x128xf32>
    %8 = arith.truncf %7 : vector<128x128xf32> to vector<128x128xbf16>
    %c0_6 = arith.constant 0 : index
    %c0_7 = arith.constant 0 : index
    %9 = vector.load %arg4[%c0_6, %c0_7] : memref<128x128xbf16, #tpu.memory_space<vmem>>, vector<128x128xbf16>
    tpu.vector_store %arg4[%c0_6, %c0_7], %8 {strides = array<i32>} : memref<128x128xbf16, #tpu.memory_space<vmem>>, vector<128x128xbf16>,
    return
  }
  func.func @transform_0(%arg0: i32) -> (i32, i32) {
    %c0_i32 = arith.constant 0 : i32
    %c0_i32_0 = arith.constant 0 : i32
    return %arg0, %c0_i32 : i32, i32
  }
  func.func @transform_1(%arg0: i32) -> (i32, i32) {
    %c0_i32 = arith.constant 0 : i32
    %c0_i32_0 = arith.constant 0 : i32
    %c0_i32_1 = arith.constant 0 : i32
    return %c0_i32, %c0_i32_0 : i32, i32
  }
  func.func @transform_2(%arg0: i32) -> (i32, i32) {
    %c0_i32 = arith.constant 0 : i32
    %c0_i32_0 = arith.constant 0 : i32
    %c0_i32_1 = arith.constant 0 : i32
    return %c0_i32, %c0_i32_0 : i32, i32
  }
  func.func @transform_3(%arg0: i32) -> (i32, i32) {
    %c0_i32 = arith.constant 0 : i32
    %c0_i32_0 = arith.constant 0 : i32
    return %arg0, %c0_i32 : i32, i32
  }
}

module attributes {stable_mosaic.version = 11 : i64} {
  func.func @_conv4_rs_kernel(%arg0: i32, %arg1: memref<1x54x1152xbf16, #tpu.memory_space<vmem>>, %arg2: memref<1152x64xbf16, #tpu.memory_space<vmem>>, %arg3: memref<1x64xf32, #tpu.memory_space<vmem>>, %arg4: memref<64x512xbf16, #tpu.memory_space<vmem>>, %arg5: memref<1x512xf32, #tpu.memory_space<vmem>>, %arg6: memref<512x2xbf16, #tpu.memory_space<vmem>>, %arg7: memref<1x2xf32, #tpu.memory_space<vmem>>, %arg8: memref<1x54x64xbf16, #tpu.memory_space<vmem>>) attributes {dimension_semantics = [#tpu.dimension_semantics<parallel>], iteration_bounds = array<i64: 2>, scalar_prefetch = 0 : i64, scratch_operands = 0 : i64, tpu.core_type = #tpu.core_type<tc>, window_params = [{transform_indices = @transform_0, window_bounds = array<i64: 1, 54, 1152>}, {pipeline_mode = #tpu.pipeline_mode<synchronous>, transform_indices = @transform_1, window_bounds = array<i64: 1152, 64>}, {pipeline_mode = #tpu.pipeline_mode<synchronous>, transform_indices = @transform_2, window_bounds = array<i64: 1, 64>}, {pipeline_mode = #tpu.pipeline_mode<synchronous>, transform_indices = @transform_3, window_bounds = array<i64: 64, 512>}, {pipeline_mode = #tpu.pipeline_mode<synchronous>, transform_indices = @transform_4, window_bounds = array<i64: 1, 512>}, {pipeline_mode = #tpu.pipeline_mode<synchronous>, transform_indices = @transform_5, window_bounds = array<i64: 512, 2>}, {pipeline_mode = #tpu.pipeline_mode<synchronous>, transform_indices = @transform_6, window_bounds = array<i64: 1, 2>}, {transform_indices = @transform_7, window_bounds = array<i64: 1, 54, 64>}]} {
    %c0 = arith.constant 0 : index
    %c0_0 = arith.constant 0 : index
    %c0_1 = arith.constant 0 : index
    %0 = vector.load %arg1[%c0, %c0_0, %c0_1] : memref<1x54x1152xbf16, #tpu.memory_space<vmem>>, vector<1x54x1152xbf16>
    %1 = vector.shape_cast %0 : vector<1x54x1152xbf16> to vector<54x1152xbf16>
    %c0_2 = arith.constant 0 : index
    %c0_3 = arith.constant 0 : index
    %2 = vector.load %arg2[%c0_2, %c0_3] : memref<1152x64xbf16, #tpu.memory_space<vmem>>, vector<1152x64xbf16>
    %cst = arith.constant dense<0.000000e+00> : vector<54x64xf32>
    %3 = tpu.matmul %1, %2, %cst {dimension_numbers = #tpu.dot_dimension_numbers<[1], [0], [0], [1], [0, 0, 1, 1], [], []>} : vector<54x1152xbf16>, vector<1152x64xbf16>, vector<54x64xf32> -> vector<54x64xf32>
    %c0_4 = arith.constant 0 : index
    %c0_5 = arith.constant 0 : index
    %4 = vector.load %arg3[%c0_4, %c0_5] : memref<1x64xf32, #tpu.memory_space<vmem>>, vector<1x64xf32>
    %5 = vector.broadcast %4 : vector<1x64xf32> to vector<54x64xf32>
    %6 = arith.addf %3, %5 : vector<54x64xf32>
    %7 = arith.truncf %6 : vector<54x64xf32> to vector<54x64xbf16>
    %c0_6 = arith.constant 0 : index
    %c0_7 = arith.constant 0 : index
    %8 = vector.load %arg4[%c0_6, %c0_7] : memref<64x512xbf16, #tpu.memory_space<vmem>>, vector<64x512xbf16>
    %cst_8 = arith.constant dense<0.000000e+00> : vector<54x512xf32>
    %9 = tpu.matmul %7, %8, %cst_8 {dimension_numbers = #tpu.dot_dimension_numbers<[1], [0], [0], [1], [0, 0, 1, 1], [], []>} : vector<54x64xbf16>, vector<64x512xbf16>, vector<54x512xf32> -> vector<54x512xf32>
    %c0_9 = arith.constant 0 : index
    %c0_10 = arith.constant 0 : index
    %10 = vector.load %arg5[%c0_9, %c0_10] : memref<1x512xf32, #tpu.memory_space<vmem>>, vector<1x512xf32>
    %11 = vector.broadcast %10 : vector<1x512xf32> to vector<54x512xf32>
    %12 = arith.addf %9, %11 : vector<54x512xf32>
    %cst_11 = arith.constant 0.000000e+00 : f32
    %13 = vector.broadcast %cst_11 : f32 to vector<54x512xf32>
    %14 = arith.cmpf ogt, %12, %13 : vector<54x512xf32>
    %cst_12 = arith.constant 0.000000e+00 : f32
    %15 = vector.broadcast %cst_12 : f32 to vector<54x512xf32>
    %16 = arith.minimumf %12, %15 : vector<54x512xf32>
    %17 = math.exp %16 : vector<54x512xf32>
    %cst_13 = arith.constant 1.000000e+00 : f32
    %18 = vector.broadcast %cst_13 : f32 to vector<54x512xf32>
    %19 = arith.subf %17, %18 : vector<54x512xf32>
    %20 = arith.select %14, %12, %19 : vector<54x512xi1>, vector<54x512xf32>
    %21 = arith.truncf %20 : vector<54x512xf32> to vector<54x512xbf16>
    %c0_14 = arith.constant 0 : index
    %c0_15 = arith.constant 0 : index
    %22 = vector.load %arg6[%c0_14, %c0_15] : memref<512x2xbf16, #tpu.memory_space<vmem>>, vector<512x2xbf16>
    %cst_16 = arith.constant dense<0.000000e+00> : vector<54x2xf32>
    %23 = tpu.matmul %21, %22, %cst_16 {dimension_numbers = #tpu.dot_dimension_numbers<[1], [0], [0], [1], [0, 0, 1, 1], [], []>} : vector<54x512xbf16>, vector<512x2xbf16>, vector<54x2xf32> -> vector<54x2xf32>
    %c0_17 = arith.constant 0 : index
    %c0_18 = arith.constant 0 : index
    %24 = vector.load %arg7[%c0_17, %c0_18] : memref<1x2xf32, #tpu.memory_space<vmem>>, vector<1x2xf32>
    %25 = vector.broadcast %24 : vector<1x2xf32> to vector<54x2xf32>
    %26 = arith.addf %23, %25 : vector<54x2xf32>
    %cst_19 = arith.constant 0.000000e+00 : f32
    %27 = vector.broadcast %cst_19 : f32 to vector<54x2xf32>
    %28 = arith.subf %27, %26 : vector<54x2xf32>
    %29 = math.exp %28 : vector<54x2xf32>
    %cst_20 = arith.constant 1.000000e+00 : f32
    %30 = vector.broadcast %cst_20 : f32 to vector<54x2xf32>
    %31 = arith.addf %30, %29 : vector<54x2xf32>
    %32 = tpu.reciprocal %31 {approx = true} : vector<54x2xf32> -> vector<54x2xf32>
    %33 = vector.extract_strided_slice %32 {offsets = [0, 0], sizes = [54, 1], strides = [1, 1]} : vector<54x2xf32> to vector<54x1xf32>
    %34 = vector.extract_strided_slice %32 {offsets = [0, 1], sizes = [54, 1], strides = [1, 1]} : vector<54x2xf32> to vector<54x1xf32>
    %35 = arith.addf %33, %34 : vector<54x1xf32>
    %36 = vector.broadcast %35 : vector<54x1xf32> to vector<54x64xf32>
    %37 = arith.mulf %6, %36 : vector<54x64xf32>
    %cst_21 = arith.constant 0.000000e+00 : f32
    %38 = vector.broadcast %cst_21 : f32 to vector<54x64xf32>
    %39 = arith.maximumf %37, %38 : vector<54x64xf32>
    %40 = arith.truncf %39 : vector<54x64xf32> to vector<54x64xbf16>
    %c0_22 = arith.constant 0 : index
    %c0_23 = arith.constant 0 : index
    %c0_24 = arith.constant 0 : index
    %41 = vector.load %arg8[%c0_22, %c0_23, %c0_24] : memref<1x54x64xbf16, #tpu.memory_space<vmem>>, vector<1x54x64xbf16>
    %42 = vector.shape_cast %41 : vector<1x54x64xbf16> to vector<54x64xbf16>
    %43 = vector.shape_cast %40 : vector<54x64xbf16> to vector<1x54x64xbf16>
    tpu.vector_store %arg8[%c0_22, %c0_23, %c0_24], %43 {strides = array<i32>} : memref<1x54x64xbf16, #tpu.memory_space<vmem>>, vector<1x54x64xbf16>,
    return
  }
  func.func @transform_0(%arg0: i32) -> (i32, i32, i32) {
    %c0_i32 = arith.constant 0 : i32
    %c0_i32_0 = arith.constant 0 : i32
    %c0_i32_1 = arith.constant 0 : i32
    return %arg0, %c0_i32, %c0_i32_0 : i32, i32, i32
  }
  func.func @transform_1(%arg0: i32) -> (i32, i32) {
    %c0_i32 = arith.constant 0 : i32
    %c0_i32_0 = arith.constant 0 : i32
    %c0_i32_1 = arith.constant 0 : i32
    return %c0_i32, %c0_i32_0 : i32, i32
  }
  func.func @transform_2(%arg0: i32) -> (i32, i32) {
    %c0_i32 = arith.constant 0 : i32
    %c0_i32_0 = arith.constant 0 : i32
    %c0_i32_1 = arith.constant 0 : i32
    return %c0_i32, %c0_i32_0 : i32, i32
  }
  func.func @transform_3(%arg0: i32) -> (i32, i32) {
    %c0_i32 = arith.constant 0 : i32
    %c0_i32_0 = arith.constant 0 : i32
    %c0_i32_1 = arith.constant 0 : i32
    return %c0_i32, %c0_i32_0 : i32, i32
  }
  func.func @transform_4(%arg0: i32) -> (i32, i32) {
    %c0_i32 = arith.constant 0 : i32
    %c0_i32_0 = arith.constant 0 : i32
    %c0_i32_1 = arith.constant 0 : i32
    return %c0_i32, %c0_i32_0 : i32, i32
  }
  func.func @transform_5(%arg0: i32) -> (i32, i32) {
    %c0_i32 = arith.constant 0 : i32
    %c0_i32_0 = arith.constant 0 : i32
    %c0_i32_1 = arith.constant 0 : i32
    return %c0_i32, %c0_i32_0 : i32, i32
  }
  func.func @transform_6(%arg0: i32) -> (i32, i32) {
    %c0_i32 = arith.constant 0 : i32
    %c0_i32_0 = arith.constant 0 : i32
    %c0_i32_1 = arith.constant 0 : i32
    return %c0_i32, %c0_i32_0 : i32, i32
  }
  func.func @transform_7(%arg0: i32) -> (i32, i32, i32) {
    %c0_i32 = arith.constant 0 : i32
    %c0_i32_0 = arith.constant 0 : i32
    %c0_i32_1 = arith.constant 0 : i32
    return %arg0, %c0_i32, %c0_i32_0 : i32, i32, i32
  }
}

module attributes {stable_mosaic.version = 11 : i64} {
  func.func @_mm_bias_act_kernel(%arg0: i32, %arg1: memref<8x3456xbf16, #tpu.memory_space<vmem>>, %arg2: memref<3456x256xbf16, #tpu.memory_space<vmem>>, %arg3: memref<1x256xf32, #tpu.memory_space<vmem>>, %arg4: memref<8x256xf32, #tpu.memory_space<vmem>>) attributes {dimension_semantics = [#tpu.dimension_semantics<parallel>], iteration_bounds = array<i64: 1>, scalar_prefetch = 0 : i64, scratch_operands = 0 : i64, tpu.core_type = #tpu.core_type<tc>, window_params = [{transform_indices = @transform_0, window_bounds = array<i64: 8, 3456>}, {pipeline_mode = #tpu.pipeline_mode<synchronous>, transform_indices = @transform_1, window_bounds = array<i64: 3456, 256>}, {pipeline_mode = #tpu.pipeline_mode<synchronous>, transform_indices = @transform_2, window_bounds = array<i64: 1, 256>}, {transform_indices = @transform_3, window_bounds = array<i64: 8, 256>}]} {
    %c0 = arith.constant 0 : index
    %c0_0 = arith.constant 0 : index
    %0 = vector.load %arg1[%c0, %c0_0] : memref<8x3456xbf16, #tpu.memory_space<vmem>>, vector<8x3456xbf16>
    %c0_1 = arith.constant 0 : index
    %c0_2 = arith.constant 0 : index
    %1 = vector.load %arg2[%c0_1, %c0_2] : memref<3456x256xbf16, #tpu.memory_space<vmem>>, vector<3456x256xbf16>
    %cst = arith.constant dense<0.000000e+00> : vector<8x256xf32>
    %2 = tpu.matmul %0, %1, %cst {dimension_numbers = #tpu.dot_dimension_numbers<[1], [0], [0], [1], [0, 0, 1, 1], [], []>} : vector<8x3456xbf16>, vector<3456x256xbf16>, vector<8x256xf32> -> vector<8x256xf32>
    %c0_3 = arith.constant 0 : index
    %c0_4 = arith.constant 0 : index
    %3 = vector.load %arg3[%c0_3, %c0_4] : memref<1x256xf32, #tpu.memory_space<vmem>>, vector<1x256xf32>
    %4 = vector.broadcast %3 : vector<1x256xf32> to vector<8x256xf32>
    %5 = arith.addf %2, %4 : vector<8x256xf32>
    %c0_5 = arith.constant 0 : index
    %c0_6 = arith.constant 0 : index
    %6 = vector.load %arg4[%c0_5, %c0_6] : memref<8x256xf32, #tpu.memory_space<vmem>>, vector<8x256xf32>
    tpu.vector_store %arg4[%c0_5, %c0_6], %5 {strides = array<i32>} : memref<8x256xf32, #tpu.memory_space<vmem>>, vector<8x256xf32>,
    return
  }
  func.func @transform_0(%arg0: i32) -> (i32, i32) {
    %c0_i32 = arith.constant 0 : i32
    %c0_i32_0 = arith.constant 0 : i32
    return %arg0, %c0_i32 : i32, i32
  }
  func.func @transform_1(%arg0: i32) -> (i32, i32) {
    %c0_i32 = arith.constant 0 : i32
    %c0_i32_0 = arith.constant 0 : i32
    %c0_i32_1 = arith.constant 0 : i32
    return %c0_i32, %c0_i32_0 : i32, i32
  }
  func.func @transform_2(%arg0: i32) -> (i32, i32) {
    %c0_i32 = arith.constant 0 : i32
    %c0_i32_0 = arith.constant 0 : i32
    %c0_i32_1 = arith.constant 0 : i32
    return %c0_i32, %c0_i32_0 : i32, i32
  }
  func.func @transform_3(%arg0: i32) -> (i32, i32) {
    %c0_i32 = arith.constant 0 : i32
    %c0_i32_0 = arith.constant 0 : i32
    return %arg0, %c0_i32 : i32, i32
  }
}

</mosaic_0001>

<bundles_post_ra>
// kernel: nature_cnn_amm_forward.5
= control target key start
LH: loop header
LB: loop body
LE: loop exit
PB: predicated region body
PF: predicated region fallthrough
CT: control target
= control target key end

     0   :  { %s2228_s12 = smov 0   ;;  %s2230_s13 = smov 0   ;;  %s2722_s0 = inlined_call_operand.vmem [shape: bf16[3978,128], index: 0, kind: input, shape index: {}]   ;;  %s2723_s1 = inlined_call_operand.vmem [shape: bf16[128,32], index: 1, kind: input, shape index: {}]   ;;  %s2724_s2 = inlined_call_operand.vmem [shape: f32[1,32], index: 2, kind: input, shape index: {}]   ;;  %s2725_s3 = inlined_call_operand.vmem [shape: bf16[3978,32], index: 3, kind: output, shape index: {}]  }
   0x1   :  { %s2232_s14 = smov 0  }
   0x2 LB: > { %s2241_s15 = sadd.s32 4294967295, %s2174_s14   ;;  %s2243_s16 = sadd.s32 1, %s2174_s14   ;;  %s2174_s14 = sphi %s2232_s14, %s2732_s14   ;;  %s2170_s13 = sphi %s2230_s13, %s2731_s13   ;;  %s2166_s12 = sphi %s2228_s12, %s2730_s12  }
   0x3   : > { %s85_s17 = ssub.s32 %s2174_s14, %s2243_s16  ;;  %s88_s18 = sadd.s32 1, %s2170_s13 }
   0x4   : > { %p86_p0 = scmp.eq.s32.totalorder %s85_s17, 0  ;;  %p98_p1 = scmp.ne.s32.totalorder %s2170_s13, %s2166_s12 }
   0x5   : > { %p99_p2 = scmp.eq.s32.totalorder %s2241_s15, 7  ;;  %p1663_p3 = scmp.ge.s32.totalorder %s2174_s14, 1 }
   0x6   : > { %s2251_s19 = scalar_select %p86_p0, %s2170_s13, %s88_s18  }
   0x7   : > { %p2253_p4 = por %p99_p2, %p98_p1  ;;  %p146_p5 = scmp.lt.s32.totalorder %s2174_s14, 9 }
   0x9   : > { %p147_p6 = pnand %p1663_p3, %p146_p5 }
   0xa   : > { %v2080_v0 = vld [vmem:[%s2723_s1] sm:$0xff] (!%p147_p6)   ;;  %s2261_s23 = sshll.u32 (!%p147_p6), %s2241_s15, 6  ;;  %v2081_v1 = vld [vmem:[%s2723_s1 + $0x8] sm:$0xff] (!%p147_p6)   ;;  %v2082_v2 = vld [vmem:[%s2723_s1 + $0x10] sm:$0xff] (!%p147_p6)   ;;  %s170_s22 = sand.u32 (!%p147_p6), 1, %s2166_s12   ;;  %vm1129_vm0 = vcmask (!%p147_p6), 257024  }
   0xb   : > { %150 = sbr.rel (%p147_p6) target bundleno = 413 (0x19d), region = 32  ;;  %p178_p7 = scmp.lt.s32.totalorder (!%p147_p6), %s2261_s23, 497  ;;  %1896 = vmatprep.subr.bf16.mxu0 (!%p147_p6), %v2080_v0  ;;  %1976 = vmatprep.subr.bf16.mxu1 (!%p147_p6), %v2080_v0  ;;  %v2083_v3 = vld [vmem:[%s2723_s1 + $0x18] sm:$0xff] (!%p147_p6)   ;;  %v2084_v6 = vld [vmem:[%s2723_s1 + $0x20] sm:$0xff] (!%p147_p6)   ;;  %v2085_v7 = vld [vmem:[%s2723_s1 + $0x28] sm:$0xff] (!%p147_p6)  }
   0xc   : > { %1897 = vmatpush3.bf16.msra.mxu0 (!%p147_p6), %v2080_v0  ;;  %1984 = vmatpush3.bf16.msra.mxu1 (!%p147_p6), %v2080_v0  ;;  %v2086_v8 = vld [vmem:[%s2723_s1 + $0x30] sm:$0xff] (!%p147_p6)   ;;  %v2087_v9 = vld [vmem:[%s2723_s1 + $0x38] sm:$0xff] (!%p147_p6)   ;;  %v2327_v40 = vld [vmem:[%s2724_s2] ss:$0 sm:$0xff] (!%p147_p6) }
   0xd   : > { %1898 = vmatprep.subr.bf16.mxu0 (!%p147_p6), %v2081_v1  ;;  %1977 = vmatprep.subr.bf16.mxu1 (!%p147_p6), %v2081_v1 }
  0x10   : > { %1899 = vmatpush3.bf16.msra.mxu0 (!%p147_p6), %v2081_v1  ;;  %1985 = vmatpush3.bf16.msra.mxu1 (!%p147_p6), %v2081_v1 }
  0x11   : > { %1900 = vmatprep.subr.bf16.mxu0 (!%p147_p6), %v2082_v2  ;;  %1978 = vmatprep.subr.bf16.mxu1 (!%p147_p6), %v2082_v2 }
  0x12   : > { %s179_s26 = scalar_select %p178_p7, %s2261_s23, 497 }
  0x13   : > { %s1202_s27 = ssub.s32 (%p2253_p4), 498, %s2261_s23  ;;  %s1853_s28 = sshll.u32 (%p2253_p4), %s2241_s15, 8 }
  0x14   : > { %s1666_s29 = sshll.u32 %s179_s26, 2  ;;  %1901 = vmatpush3.bf16.msra.mxu0 %v2082_v2  ;;  %1986 = vmatpush3.bf16.msra.mxu1 %v2082_v2  ;;  %s1664_s26 = sshll.u32 %s170_s22, 8 }
  0x15   : > { %s2274_s5 = scalar_lea.vmem %s2722_s0, %s1666_s29  ;;  %1902 = vmatprep.subr.bf16.mxu0 %v2083_v3  ;;  %1979 = vmatprep.subr.bf16.mxu1 %v2083_v3  ;;  %s2337_s12 = scalar_lea.vmem [#allocation2], %s1664_s26  }
  0x16   : > { %v2088_v4 = vld [vmem:[%s2274_s5] sm:$0xff]   ;;  %v2090_v10 = vld [vmem:[%s2274_s5 + $0x8] sm:$0xff]   ;;  %v2092_v12 = vld [vmem:[%s2274_s5 + $0x10] sm:$0xff]   ;;  %p1203_p8 = scmp.lt.s32.totalorder (%p2253_p4), %s1202_s27, 64  ;;  %s2530_s4 = scalar_lea.vmem (%p2253_p4), %s2725_s3, %s1853_s28  }
  0x17   : > { %v2089_v5 = vld [vmem:[%s2274_s5 + $0x80] sm:$0xff]   ;;  %1912 = vmatprep.mubr.bf16.mxu0 %v2088_v4  ;;  %v2091_v11 = vld [vmem:[%s2274_s5 + $0x88] sm:$0xff]   ;;  %v2093_v13 = vld [vmem:[%s2274_s5 + $0x90] sm:$0xff]  }
  0x18   : > { %1944 = vmatprep.mubr.bf16.mxu1 %v2089_v5  ;;  %1903 = vmatpush3.bf16.msra.mxu0 %v2083_v3  ;;  %v2094_v14 = vld [vmem:[%s2274_s5 + $0x18] sm:$0xff]   ;;  %v2096_v16 = vld [vmem:[%s2274_s5 + $0x20] sm:$0xff]   ;;  %v2098_v18 = vld [vmem:[%s2274_s5 + $0x28] sm:$0xff]  }
  0x19   : > { %1987 = vmatpush3.bf16.msra.mxu1 %v2083_v3  ;;  %1904 = vmatprep.subr.bf16.mxu0 %v2084_v6  ;;  %v2095_v15 = vld [vmem:[%s2274_s5 + $0x98] sm:$0xff]   ;;  %v2097_v17 = vld [vmem:[%s2274_s5 + $0xa0] sm:$0xff]   ;;  %v2099_v19 = vld [vmem:[%s2274_s5 + $0xa8] sm:$0xff]  }
  0x1a   : > { %1980 = vmatprep.subr.bf16.mxu1 %v2084_v6  ;;  %v2100_v20 = vld [vmem:[%s2274_s5 + $0x30] sm:$0xff]   ;;  %v2102_v22 = vld [vmem:[%s2274_s5 + $0x38] sm:$0xff]   ;;  %v2104_v24 = vld [vmem:[%s2274_s5 + $0x40] sm:$0xff]  }
  0x1b   : > { %v2101_v21 = vld [vmem:[%s2274_s5 + $0xb0] sm:$0xff]   ;;  %v2103_v23 = vld [vmem:[%s2274_s5 + $0xb8] sm:$0xff]   ;;  %v2105_v25 = vld [vmem:[%s2274_s5 + $0xc0] sm:$0xff]  }
  0x1c   : > { %1905 = vmatpush3.bf16.msra.mxu0 %v2084_v6  ;;  %v2106_v26 = vld [vmem:[%s2274_s5 + $0x48] sm:$0xff]   ;;  %v2108_v28 = vld [vmem:[%s2274_s5 + $0x50] sm:$0xff]   ;;  %v2110_v30 = vld [vmem:[%s2274_s5 + $0x58] sm:$0xff]  }
  0x1d   : > { %1988 = vmatpush3.bf16.msra.mxu1 %v2084_v6  ;;  %1906 = vmatprep.subr.bf16.mxu0 %v2085_v7  ;;  %v2107_v27 = vld [vmem:[%s2274_s5 + $0xc8] sm:$0xff]   ;;  %v2109_v29 = vld [vmem:[%s2274_s5 + $0xd0] sm:$0xff]   ;;  %v2111_v31 = vld [vmem:[%s2274_s5 + $0xd8] sm:$0xff]  }
  0x1e   : > { %1981 = vmatprep.subr.bf16.mxu1 %v2085_v7  ;;  %v2112_v32 = vld [vmem:[%s2274_s5 + $0x60] sm:$0xff]   ;;  %v2114_v34 = vld [vmem:[%s2274_s5 + $0x68] sm:$0xff]   ;;  %v2116_v36 = vld [vmem:[%s2274_s5 + $0x70] sm:$0xff]  }
  0x1f   : > { %v2113_v33 = vld [vmem:[%s2274_s5 + $0xe0] sm:$0xff]   ;;  %v2115_v35 = vld [vmem:[%s2274_s5 + $0xe8] sm:$0xff]   ;;  %v2117_v37 = vld [vmem:[%s2274_s5 + $0xf0] sm:$0xff]  }
  0x20   : > { %1907 = vmatpush3.bf16.msra.mxu0 %v2085_v7  ;;  %v2118_v38 = vld [vmem:[%s2274_s5 + $0x78] sm:$0xff]  }
  0x21   : > { %1989 = vmatpush3.bf16.msra.mxu1 %v2085_v7  ;;  %1908 = vmatprep.subr.bf16.mxu0 %v2086_v8  ;;  %v2119_v39 = vld [vmem:[%s2274_s5 + $0xf8] sm:$0xff]  }
  0x22   : > { %1982 = vmatprep.subr.bf16.mxu1 %v2086_v8 }
  0x24   : > { %1909 = vmatpush3.bf16.msra.mxu0 %v2086_v8 }
  0x25   : > { %1990 = vmatpush3.bf16.msra.mxu1 %v2086_v8  ;;  %1910 = vmatprep.subr.bf16.mxu0 %v2087_v9 }
  0x26   : > { %1983 = vmatprep.subr.bf16.mxu1 %v2087_v9 }
  0x28   : > { %1911 = vmatpush3.bf16.msra.mxu0 %v2087_v9 }
  0x29   : > { %1991 = vmatpush3.bf16.msra.mxu1 %v2087_v9 }
  0x2b   : > { %1913 = vmatmul.mubr.bf16.vlgmr.msra.gmra.mrb[0].mxu0 %v2090_v10 }
  0x2c   : > { %1945 = vmatmul.mubr.bf16.vlgmr.msra.gmra.mrb[0].mxu1 %v2091_v11  ;;  %1916 = vmatprep.mubr.bf16.mxu0 %v2092_v12 }
  0x2d   : > { %1948 = vmatprep.mubr.bf16.mxu1 %v2093_v13 }
  0x33   : > { %1917 = vmatmul.mubr.bf16.gmra.mrb[4].mxu0 %v2094_v14 }
  0x34   : > { %1949 = vmatmul.mubr.bf16.gmra.mrb[4].mxu1 %v2095_v15  ;;  %1920 = vmatprep.mubr.bf16.mxu0 %v2096_v16 }
  0x35   : > { %1952 = vmatprep.mubr.bf16.mxu1 %v2097_v17 }
  0x3b   : > { %1921 = vmatmul.mubr.bf16.gmra.mrb[8].mxu0 %v2098_v18 }
  0x3c   : > { %1953 = vmatmul.mubr.bf16.gmra.mrb[8].mxu1 %v2099_v19  ;;  %1924 = vmatprep.mubr.bf16.mxu0 %v2100_v20 }
  0x3d   : > { %1956 = vmatprep.mubr.bf16.mxu1 %v2101_v21 }
  0x43   : > { %1925 = vmatmul.mubr.bf16.gmra.mrb[12].mxu0 %v2102_v22 }
  0x44   : > { %1957 = vmatmul.mubr.bf16.gmra.mrb[12].mxu1 %v2103_v23  ;;  %1928 = vmatprep.mubr.bf16.mxu0 %v2104_v24 }
  0x45   : > { %1960 = vmatprep.mubr.bf16.mxu1 %v2105_v25 }
  0x4b   : > { %1929 = vmatmul.mubr.bf16.gmra.mrb[16].mxu0 %v2106_v26 }
  0x4c   : > { %1961 = vmatmul.mubr.bf16.gmra.mrb[16].mxu1 %v2107_v27  ;;  %1932 = vmatprep.mubr.bf16.mxu0 %v2108_v28 }
  0x4d   : > { %1964 = vmatprep.mubr.bf16.mxu1 %v2109_v29 }
  0x53   : > { %1933 = vmatmul.mubr.bf16.gmra.mrb[20].mxu0 %v2110_v30 }
  0x54   : > { %1965 = vmatmul.mubr.bf16.gmra.mrb[20].mxu1 %v2111_v31  ;;  %1936 = vmatprep.mubr.bf16.mxu0 %v2112_v32 }
  0x55   : > { %1968 = vmatprep.mubr.bf16.mxu1 %v2113_v33 }
  0x5b   : > { %1937 = vmatmul.mubr.bf16.gmra.mrb[24].mxu0 %v2114_v34 }
  0x5c   : > { %1969 = vmatmul.mubr.bf16.gmra.mrb[24].mxu1 %v2115_v35  ;;  %1940 = vmatprep.mubr.bf16.mxu0 %v2116_v36 }
  0x5d   : > { %1972 = vmatprep.mubr.bf16.mxu1 %v2117_v37 }
  0x63   : > { %1941 = vmatmul.mubr.bf16.gmra.mrb[28].mxu0 %v2118_v38 }
  0x64   : > { %1973 = vmatmul.mubr.bf16.gmra.mrb[28].mxu1 %v2119_v39 }
  0xfe   : > { %v1914_v41 = vpop.f32.mrb[0].mxu0 }
  0xff   : > { %v1946_v42 = vpop.f32.mrb[0].mxu1  ;;  %v563_v43 = vadd.f32 %v1914_v41, %v2327_v40  ;;  %v554_v45 = vpop.f32.mrb[1].mxu0 }
 0x100   : > { %v691_v44 = vadd.f32 %v1946_v42, %v2327_v40  ;;  %v682_v46 = vpop.f32.mrb[1].mxu1  ;;  %v555_v47 = vadd.f32 %v2327_v40, %v554_v45  ;;  %v1915_v49 = vpop.f32.mrb[2].mxu0 }
 0x101   : > { %v683_v48 = vadd.f32 %v2327_v40, %v682_v46  ;;  %v1947_v50 = vpop.f32.mrb[2].mxu1  ;;  %v811_v51 = vmax.f32 %v563_v43, 0.0  ;;  %v566_v53 = vadd.f32 %v1915_v49, %v2327_v40  ;;  %v557_v55 = vpop.f32.mrb[3].mxu0 }
 0x102   : > { %v843_v52 = vmax.f32 %v691_v44, 0.0  ;;  %v694_v54 = vadd.f32 %v1947_v50, %v2327_v40  ;;  %v685_v56 = vpop.f32.mrb[3].mxu1  ;;  %v809_v57 = vmax.f32 %v555_v47, 0.0  ;;  %v558_v59 = vadd.f32 %v2327_v40, %v557_v55 }
 0x103   : > { %v841_v58 = vmax.f32 %v683_v48, 0.0  ;;  %v686_v60 = vadd.f32 %v2327_v40, %v685_v56  ;;  %v1791_v61 = vpack.c.bf16 %v811_v51, %v811_v51  ;;  %v812_v63 = vmax.f32 %v566_v53, 0.0 }
 0x104   : > { %v1823_v62 = vpack.c.bf16 %v843_v52, %v843_v52  ;;  %v844_v0 = vmax.f32 %v694_v54, 0.0  ;;  %v1789_v1 = vpack.c.bf16 %v809_v57, %v809_v57  ;;  %v810_v3 = vmax.f32 %v558_v59, 0.0 }
 0x105   : > { %v1821_v2 = vpack.c.bf16 %v841_v58, %v841_v58  ;;  %v842_v4 = vmax.f32 %v686_v60, 0.0  ;;  %1132 = vst.msk [vmem:[%s2337_s12 + $0x8] sm:$0xf] %vm1129_vm0, %v1791_v61  ;;  %v1792_v5 = vpack.c.bf16 %v812_v63, %v812_v63 }
 0x106   : > { %1164 = vst.msk [vmem:[%s2337_s12 + $0x88] sm:$0xf] %vm1129_vm0, %v1823_v62  ;;  %v1824_v6 = vpack.c.bf16 %v844_v0, %v844_v0  ;;  %1130 = vst.msk [vmem:[%s2337_s12] sm:$0xf] %vm1129_vm0, %v1789_v1  ;;  %v1790_v7 = vpack.c.bf16 %v810_v3, %v810_v3  ;;  %v1918_v9 = vpop.f32.mrb[4].mxu0 }
 0x107   : > { %1162 = vst.msk [vmem:[%s2337_s12 + $0x80] sm:$0xf] %vm1129_vm0, %v1821_v2  ;;  %v1822_v8 = vpack.c.bf16 %v842_v4, %v842_v4  ;;  %v1950_v10 = vpop.f32.mrb[4].mxu1  ;;  %1133 = vst.msk [vmem:[%s2337_s12 + $0xc] sm:$0xf] %vm1129_vm0, %v1792_v5  ;;  %v579_v11 = vadd.f32 %v1918_v9, %v2327_v40  ;;  %v570_v13 = vpop.f32.mrb[5].mxu0 }
 0x108   : > { %1165 = vst.msk [vmem:[%s2337_s12 + $0x8c] sm:$0xf] %vm1129_vm0, %v1824_v6  ;;  %v707_v12 = vadd.f32 %v1950_v10, %v2327_v40  ;;  %v698_v14 = vpop.f32.mrb[5].mxu1  ;;  %1131 = vst.msk [vmem:[%s2337_s12 + $0x4] sm:$0xf] %vm1129_vm0, %v1790_v7  ;;  %v571_v15 = vadd.f32 %v2327_v40, %v570_v13  ;;  %v1919_v17 = vpop.f32.mrb[6].mxu0 }
 0x109   : > { %1163 = vst.msk [vmem:[%s2337_s12 + $0x84] sm:$0xf] %vm1129_vm0, %v1822_v8  ;;  %v699_v16 = vadd.f32 %v2327_v40, %v698_v14  ;;  %v1951_v18 = vpop.f32.mrb[6].mxu1  ;;  %v815_v19 = vmax.f32 %v579_v11, 0.0  ;;  %v582_v21 = vadd.f32 %v1919_v17, %v2327_v40  ;;  %v573_v23 = vpop.f32.mrb[7].mxu0 }
 0x10a   : > { %v847_v20 = vmax.f32 %v707_v12, 0.0  ;;  %v710_v22 = vadd.f32 %v1951_v18, %v2327_v40  ;;  %v701_v24 = vpop.f32.mrb[7].mxu1  ;;  %v813_v25 = vmax.f32 %v571_v15, 0.0  ;;  %v574_v27 = vadd.f32 %v2327_v40, %v573_v23 }
 0x10b   : > { %v845_v26 = vmax.f32 %v699_v16, 0.0  ;;  %v702_v28 = vadd.f32 %v2327_v40, %v701_v24  ;;  %v1795_v29 = vpack.c.bf16 %v815_v19, %v815_v19  ;;  %v816_v31 = vmax.f32 %v582_v21, 0.0 }
 0x10c   : > { %v1827_v30 = vpack.c.bf16 %v847_v20, %v847_v20  ;;  %v848_v32 = vmax.f32 %v710_v22, 0.0  ;;  %v1793_v33 = vpack.c.bf16 %v813_v25, %v813_v25  ;;  %v814_v35 = vmax.f32 %v574_v27, 0.0 }
 0x10d   : > { %v1825_v34 = vpack.c.bf16 %v845_v26, %v845_v26  ;;  %v846_v36 = vmax.f32 %v702_v28, 0.0  ;;  %1136 = vst.msk [vmem:[%s2337_s12 + $0x18] sm:$0xf] %vm1129_vm0, %v1795_v29  ;;  %v1796_v37 = vpack.c.bf16 %v816_v31, %v816_v31 }
 0x10e   : > { %1168 = vst.msk [vmem:[%s2337_s12 + $0x98] sm:$0xf] %vm1129_vm0, %v1827_v30  ;;  %v1828_v38 = vpack.c.bf16 %v848_v32, %v848_v32  ;;  %1134 = vst.msk [vmem:[%s2337_s12 + $0x10] sm:$0xf] %vm1129_vm0, %v1793_v33  ;;  %v1794_v39 = vpack.c.bf16 %v814_v35, %v814_v35  ;;  %v1922_v42 = vpop.f32.mrb[8].mxu0 }
 0x10f   : > { %1166 = vst.msk [vmem:[%s2337_s12 + $0x90] sm:$0xf] %vm1129_vm0, %v1825_v34  ;;  %v1826_v41 = vpack.c.bf16 %v846_v36, %v846_v36  ;;  %v1954_v43 = vpop.f32.mrb[8].mxu1  ;;  %1137 = vst.msk [vmem:[%s2337_s12 + $0x1c] sm:$0xf] %vm1129_vm0, %v1796_v37  ;;  %v595_v44 = vadd.f32 %v1922_v42, %v2327_v40  ;;  %v586_v46 = vpop.f32.mrb[9].mxu0 }
 0x110   : > { %1169 = vst.msk [vmem:[%s2337_s12 + $0x9c] sm:$0xf] %vm1129_vm0, %v1828_v38  ;;  %v723_v45 = vadd.f32 %v1954_v43, %v2327_v40  ;;  %v714_v47 = vpop.f32.mrb[9].mxu1  ;;  %1135 = vst.msk [vmem:[%s2337_s12 + $0x14] sm:$0xf] %vm1129_vm0, %v1794_v39  ;;  %v587_v48 = vadd.f32 %v2327_v40, %v586_v46  ;;  %v1923_v50 = vpop.f32.mrb[10].mxu0 }
 0x111   : > { %1167 = vst.msk [vmem:[%s2337_s12 + $0x94] sm:$0xf] %vm1129_vm0, %v1826_v41  ;;  %v715_v49 = vadd.f32 %v2327_v40, %v714_v47  ;;  %v1955_v51 = vpop.f32.mrb[10].mxu1  ;;  %v819_v52 = vmax.f32 %v595_v44, 0.0  ;;  %v598_v54 = vadd.f32 %v1923_v50, %v2327_v40  ;;  %v589_v56 = vpop.f32.mrb[11].mxu0 }
 0x112   : > { %v851_v53 = vmax.f32 %v723_v45, 0.0  ;;  %v726_v55 = vadd.f32 %v1955_v51, %v2327_v40  ;;  %v717_v57 = vpop.f32.mrb[11].mxu1  ;;  %v817_v58 = vmax.f32 %v587_v48, 0.0  ;;  %v590_v60 = vadd.f32 %v2327_v40, %v589_v56 }
 0x113   : > { %v849_v59 = vmax.f32 %v715_v49, 0.0  ;;  %v718_v61 = vadd.f32 %v2327_v40, %v717_v57  ;;  %v1799_v62 = vpack.c.bf16 %v819_v52, %v819_v52  ;;  %v820_v0 = vmax.f32 %v598_v54, 0.0 }
 0x114   : > { %v1831_v63 = vpack.c.bf16 %v851_v53, %v851_v53  ;;  %v852_v1 = vmax.f32 %v726_v55, 0.0  ;;  %v1797_v2 = vpack.c.bf16 %v817_v58, %v817_v58  ;;  %v818_v4 = vmax.f32 %v590_v60, 0.0 }
 0x115   : > { %v1829_v3 = vpack.c.bf16 %v849_v59, %v849_v59  ;;  %v850_v5 = vmax.f32 %v718_v61, 0.0  ;;  %1140 = vst.msk [vmem:[%s2337_s12 + $0x28] sm:$0xf] %vm1129_vm0, %v1799_v62  ;;  %v1800_v6 = vpack.c.bf16 %v820_v0, %v820_v0 }
 0x116   : > { %1172 = vst.msk [vmem:[%s2337_s12 + $0xa8] sm:$0xf] %vm1129_vm0, %v1831_v63  ;;  %v1832_v7 = vpack.c.bf16 %v852_v1, %v852_v1  ;;  %1138 = vst.msk [vmem:[%s2337_s12 + $0x20] sm:$0xf] %vm1129_vm0, %v1797_v2  ;;  %v1798_v8 = vpack.c.bf16 %v818_v4, %v818_v4  ;;  %v1926_v10 = vpop.f32.mrb[12].mxu0 }
 0x117   : > { %1170 = vst.msk [vmem:[%s2337_s12 + $0xa0] sm:$0xf] %vm1129_vm0, %v1829_v3  ;;  %v1830_v9 = vpack.c.bf16 %v850_v5, %v850_v5  ;;  %v1958_v11 = vpop.f32.mrb[12].mxu1  ;;  %1141 = vst.msk [vmem:[%s2337_s12 + $0x2c] sm:$0xf] %vm1129_vm0, %v1800_v6  ;;  %v611_v12 = vadd.f32 %v1926_v10, %v2327_v40  ;;  %v602_v14 = vpop.f32.mrb[13].mxu0 }
 0x118   : > { %1173 = vst.msk [vmem:[%s2337_s12 + $0xac] sm:$0xf] %vm1129_vm0, %v1832_v7  ;;  %v739_v13 = vadd.f32 %v1958_v11, %v2327_v40  ;;  %v730_v15 = vpop.f32.mrb[13].mxu1  ;;  %1139 = vst.msk [vmem:[%s2337_s12 + $0x24] sm:$0xf] %vm1129_vm0, %v1798_v8  ;;  %v603_v16 = vadd.f32 %v2327_v40, %v602_v14  ;;  %v1927_v18 = vpop.f32.mrb[14].mxu0 }
 0x119   : > { %1171 = vst.msk [vmem:[%s2337_s12 + $0xa4] sm:$0xf] %vm1129_vm0, %v1830_v9  ;;  %v731_v17 = vadd.f32 %v2327_v40, %v730_v15  ;;  %v1959_v19 = vpop.f32.mrb[14].mxu1  ;;  %v823_v20 = vmax.f32 %v611_v12, 0.0  ;;  %v614_v22 = vadd.f32 %v1927_v18, %v2327_v40  ;;  %v605_v24 = vpop.f32.mrb[15].mxu0 }
 0x11a   : > { %v855_v21 = vmax.f32 %v739_v13, 0.0  ;;  %v742_v23 = vadd.f32 %v1959_v19, %v2327_v40  ;;  %v733_v25 = vpop.f32.mrb[15].mxu1  ;;  %v821_v26 = vmax.f32 %v603_v16, 0.0  ;;  %v606_v28 = vadd.f32 %v2327_v40, %v605_v24 }
 0x11b   : > { %v853_v27 = vmax.f32 %v731_v17, 0.0  ;;  %v734_v29 = vadd.f32 %v2327_v40, %v733_v25  ;;  %v1803_v30 = vpack.c.bf16 %v823_v20, %v823_v20  ;;  %v824_v32 = vmax.f32 %v614_v22, 0.0 }
 0x11c   : > { %v1835_v31 = vpack.c.bf16 %v855_v21, %v855_v21  ;;  %v856_v33 = vmax.f32 %v742_v23, 0.0  ;;  %v1801_v34 = vpack.c.bf16 %v821_v26, %v821_v26  ;;  %v822_v36 = vmax.f32 %v606_v28, 0.0 }
 0x11d   : > { %v1833_v35 = vpack.c.bf16 %v853_v27, %v853_v27  ;;  %v854_v37 = vmax.f32 %v734_v29, 0.0  ;;  %1144 = vst.msk [vmem:[%s2337_s12 + $0x38] sm:$0xf] %vm1129_vm0, %v1803_v30  ;;  %v1804_v38 = vpack.c.bf16 %v824_v32, %v824_v32 }
 0x11e   : > { %1176 = vst.msk [vmem:[%s2337_s12 + $0xb8] sm:$0xf] %vm1129_vm0, %v1835_v31  ;;  %v1836_v39 = vpack.c.bf16 %v856_v33, %v856_v33  ;;  %1142 = vst.msk [vmem:[%s2337_s12 + $0x30] sm:$0xf] %vm1129_vm0, %v1801_v34  ;;  %v1802_v41 = vpack.c.bf16 %v822_v36, %v822_v36  ;;  %v1930_v43 = vpop.f32.mrb[16].mxu0 }
 0x11f   : > { %1174 = vst.msk [vmem:[%s2337_s12 + $0xb0] sm:$0xf] %vm1129_vm0, %v1833_v35  ;;  %v1834_v42 = vpack.c.bf16 %v854_v37, %v854_v37  ;;  %v1962_v44 = vpop.f32.mrb[16].mxu1  ;;  %1145 = vst.msk [vmem:[%s2337_s12 + $0x3c] sm:$0xf] %vm1129_vm0, %v1804_v38  ;;  %v627_v45 = vadd.f32 %v1930_v43, %v2327_v40  ;;  %v618_v47 = vpop.f32.mrb[17].mxu0 }
 0x120   : > { %1177 = vst.msk [vmem:[%s2337_s12 + $0xbc] sm:$0xf] %vm1129_vm0, %v1836_v39  ;;  %v755_v46 = vadd.f32 %v1962_v44, %v2327_v40  ;;  %v746_v48 = vpop.f32.mrb[17].mxu1  ;;  %1143 = vst.msk [vmem:[%s2337_s12 + $0x34] sm:$0xf] %vm1129_vm0, %v1802_v41  ;;  %v619_v49 = vadd.f32 %v2327_v40, %v618_v47  ;;  %v1931_v51 = vpop.f32.mrb[18].mxu0 }
 0x121   : > { %1175 = vst.msk [vmem:[%s2337_s12 + $0xb4] sm:$0xf] %vm1129_vm0, %v1834_v42  ;;  %v747_v50 = vadd.f32 %v2327_v40, %v746_v48  ;;  %v1963_v52 = vpop.f32.mrb[18].mxu1  ;;  %v827_v53 = vmax.f32 %v627_v45, 0.0  ;;  %v630_v55 = vadd.f32 %v1931_v51, %v2327_v40  ;;  %v621_v57 = vpop.f32.mrb[19].mxu0 }
 0x122   : > { %v859_v54 = vmax.f32 %v755_v46, 0.0  ;;  %v758_v56 = vadd.f32 %v1963_v52, %v2327_v40  ;;  %v749_v58 = vpop.f32.mrb[19].mxu1  ;;  %v825_v59 = vmax.f32 %v619_v49, 0.0  ;;  %v622_v61 = vadd.f32 %v2327_v40, %v621_v57 }
 0x123   : > { %v857_v60 = vmax.f32 %v747_v50, 0.0  ;;  %v750_v62 = vadd.f32 %v2327_v40, %v749_v58  ;;  %v1807_v63 = vpack.c.bf16 %v827_v53, %v827_v53  ;;  %v828_v1 = vmax.f32 %v630_v55, 0.0 }
 0x124   : > { %v1839_v0 = vpack.c.bf16 %v859_v54, %v859_v54  ;;  %v860_v2 = vmax.f32 %v758_v56, 0.0  ;;  %v1805_v3 = vpack.c.bf16 %v825_v59, %v825_v59  ;;  %v826_v5 = vmax.f32 %v622_v61, 0.0 }
 0x125   : > { %v1837_v4 = vpack.c.bf16 %v857_v60, %v857_v60  ;;  %v858_v6 = vmax.f32 %v750_v62, 0.0  ;;  %1148 = vst.msk [vmem:[%s2337_s12 + $0x48] sm:$0xf] %vm1129_vm0, %v1807_v63  ;;  %v1808_v7 = vpack.c.bf16 %v828_v1, %v828_v1 }
 0x126   : > { %1180 = vst.msk [vmem:[%s2337_s12 + $0xc8] sm:$0xf] %vm1129_vm0, %v1839_v0  ;;  %v1840_v8 = vpack.c.bf16 %v860_v2, %v860_v2  ;;  %1146 = vst.msk [vmem:[%s2337_s12 + $0x40] sm:$0xf] %vm1129_vm0, %v1805_v3  ;;  %v1806_v9 = vpack.c.bf16 %v826_v5, %v826_v5  ;;  %v1934_v11 = vpop.f32.mrb[20].mxu0 }
 0x127   : > { %1178 = vst.msk [vmem:[%s2337_s12 + $0xc0] sm:$0xf] %vm1129_vm0, %v1837_v4  ;;  %v1838_v10 = vpack.c.bf16 %v858_v6, %v858_v6  ;;  %v1966_v12 = vpop.f32.mrb[20].mxu1  ;;  %1149 = vst.msk [vmem:[%s2337_s12 + $0x4c] sm:$0xf] %vm1129_vm0, %v1808_v7  ;;  %v643_v13 = vadd.f32 %v1934_v11, %v2327_v40  ;;  %v634_v15 = vpop.f32.mrb[21].mxu0 }
 0x128   : > { %1181 = vst.msk [vmem:[%s2337_s12 + $0xcc] sm:$0xf] %vm1129_vm0, %v1840_v8  ;;  %v771_v14 = vadd.f32 %v1966_v12, %v2327_v40  ;;  %v762_v16 = vpop.f32.mrb[21].mxu1  ;;  %1147 = vst.msk [vmem:[%s2337_s12 + $0x44] sm:$0xf] %vm1129_vm0, %v1806_v9  ;;  %v635_v17 = vadd.f32 %v2327_v40, %v634_v15  ;;  %v1935_v19 = vpop.f32.mrb[22].mxu0 }
 0x129   : > { %1179 = vst.msk [vmem:[%s2337_s12 + $0xc4] sm:$0xf] %vm1129_vm0, %v1838_v10  ;;  %v763_v18 = vadd.f32 %v2327_v40, %v762_v16  ;;  %v1967_v20 = vpop.f32.mrb[22].mxu1  ;;  %v831_v21 = vmax.f32 %v643_v13, 0.0  ;;  %v646_v23 = vadd.f32 %v1935_v19, %v2327_v40  ;;  %v637_v25 = vpop.f32.mrb[23].mxu0 }
 0x12a   : > { %v863_v22 = vmax.f32 %v771_v14, 0.0  ;;  %v774_v24 = vadd.f32 %v1967_v20, %v2327_v40  ;;  %v765_v26 = vpop.f32.mrb[23].mxu1  ;;  %v829_v27 = vmax.f32 %v635_v17, 0.0  ;;  %v638_v29 = vadd.f32 %v2327_v40, %v637_v25 }
 0x12b   : > { %v861_v28 = vmax.f32 %v763_v18, 0.0  ;;  %v766_v30 = vadd.f32 %v2327_v40, %v765_v26  ;;  %v1811_v31 = vpack.c.bf16 %v831_v21, %v831_v21  ;;  %v832_v33 = vmax.f32 %v646_v23, 0.0 }
 0x12c   : > { %v1843_v32 = vpack.c.bf16 %v863_v22, %v863_v22  ;;  %v864_v34 = vmax.f32 %v774_v24, 0.0  ;;  %v1809_v35 = vpack.c.bf16 %v829_v27, %v829_v27  ;;  %v830_v37 = vmax.f32 %v638_v29, 0.0 }
 0x12d   : > { %v1841_v36 = vpack.c.bf16 %v861_v28, %v861_v28  ;;  %v862_v38 = vmax.f32 %v766_v30, 0.0  ;;  %1152 = vst.msk [vmem:[%s2337_s12 + $0x58] sm:$0xf] %vm1129_vm0, %v1811_v31  ;;  %v1812_v39 = vpack.c.bf16 %v832_v33, %v832_v33 }
 0x12e   : > { %1184 = vst.msk [vmem:[%s2337_s12 + $0xd8] sm:$0xf] %vm1129_vm0, %v1843_v32  ;;  %v1844_v41 = vpack.c.bf16 %v864_v34, %v864_v34  ;;  %1150 = vst.msk [vmem:[%s2337_s12 + $0x50] sm:$0xf] %vm1129_vm0, %v1809_v35  ;;  %v1810_v42 = vpack.c.bf16 %v830_v37, %v830_v37  ;;  %v1938_v44 = vpop.f32.mrb[24].mxu0 }
 0x12f   : > { %1182 = vst.msk [vmem:[%s2337_s12 + $0xd0] sm:$0xf] %vm1129_vm0, %v1841_v36  ;;  %v1842_v43 = vpack.c.bf16 %v862_v38, %v862_v38  ;;  %v1970_v45 = vpop.f32.mrb[24].mxu1  ;;  %1153 = vst.msk [vmem:[%s2337_s12 + $0x5c] sm:$0xf] %vm1129_vm0, %v1812_v39  ;;  %v659_v46 = vadd.f32 %v1938_v44, %v2327_v40  ;;  %v650_v48 = vpop.f32.mrb[25].mxu0 }
 0x130   : > { %1185 = vst.msk [vmem:[%s2337_s12 + $0xdc] sm:$0xf] %vm1129_vm0, %v1844_v41  ;;  %v787_v47 = vadd.f32 %v1970_v45, %v2327_v40  ;;  %v778_v49 = vpop.f32.mrb[25].mxu1  ;;  %1151 = vst.msk [vmem:[%s2337_s12 + $0x54] sm:$0xf] %vm1129_vm0, %v1810_v42  ;;  %v651_v50 = vadd.f32 %v2327_v40, %v650_v48  ;;  %v1939_v52 = vpop.f32.mrb[26].mxu0 }
 0x131   : > { %1183 = vst.msk [vmem:[%s2337_s12 + $0xd4] sm:$0xf] %vm1129_vm0, %v1842_v43  ;;  %v779_v51 = vadd.f32 %v2327_v40, %v778_v49  ;;  %v1971_v53 = vpop.f32.mrb[26].mxu1  ;;  %v835_v54 = vmax.f32 %v659_v46, 0.0  ;;  %v662_v56 = vadd.f32 %v1939_v52, %v2327_v40  ;;  %v653_v58 = vpop.f32.mrb[27].mxu0 }
 0x132   : > { %v867_v55 = vmax.f32 %v787_v47, 0.0  ;;  %v790_v57 = vadd.f32 %v1971_v53, %v2327_v40  ;;  %v781_v59 = vpop.f32.mrb[27].mxu1  ;;  %v833_v60 = vmax.f32 %v651_v50, 0.0  ;;  %v654_v62 = vadd.f32 %v2327_v40, %v653_v58 }
 0x133   : > { %v865_v61 = vmax.f32 %v779_v51, 0.0  ;;  %v782_v63 = vadd.f32 %v2327_v40, %v781_v59  ;;  %v1815_v0 = vpack.c.bf16 %v835_v54, %v835_v54  ;;  %v836_v2 = vmax.f32 %v662_v56, 0.0 }
 0x134   : > { %v1847_v1 = vpack.c.bf16 %v867_v55, %v867_v55  ;;  %v868_v3 = vmax.f32 %v790_v57, 0.0  ;;  %v1813_v4 = vpack.c.bf16 %v833_v60, %v833_v60  ;;  %v834_v6 = vmax.f32 %v654_v62, 0.0 }
 0x135   : > { %v1845_v5 = vpack.c.bf16 %v865_v61, %v865_v61  ;;  %v866_v7 = vmax.f32 %v782_v63, 0.0  ;;  %1156 = vst.msk [vmem:[%s2337_s12 + $0x68] sm:$0xf] %vm1129_vm0, %v1815_v0  ;;  %v1816_v8 = vpack.c.bf16 %v836_v2, %v836_v2 }
 0x136   : > { %1188 = vst.msk [vmem:[%s2337_s12 + $0xe8] sm:$0xf] %vm1129_vm0, %v1847_v1  ;;  %v1848_v9 = vpack.c.bf16 %v868_v3, %v868_v3  ;;  %1154 = vst.msk [vmem:[%s2337_s12 + $0x60] sm:$0xf] %vm1129_vm0, %v1813_v4  ;;  %v1814_v10 = vpack.c.bf16 %v834_v6, %v834_v6  ;;  %v1942_v12 = vpop.f32.mrb[28].mxu0 }
 0x137   : > { %1186 = vst.msk [vmem:[%s2337_s12 + $0xe0] sm:$0xf] %vm1129_vm0, %v1845_v5  ;;  %v1846_v11 = vpack.c.bf16 %v866_v7, %v866_v7  ;;  %v1974_v13 = vpop.f32.mrb[28].mxu1  ;;  %1157 = vst.msk [vmem:[%s2337_s12 + $0x6c] sm:$0xf] %vm1129_vm0, %v1816_v8  ;;  %v675_v14 = vadd.f32 %v1942_v12, %v2327_v40  ;;  %v666_v16 = vpop.f32.mrb[29].mxu0 }
 0x138   : > { %1189 = vst.msk [vmem:[%s2337_s12 + $0xec] sm:$0xf] %vm1129_vm0, %v1848_v9  ;;  %v803_v15 = vadd.f32 %v1974_v13, %v2327_v40  ;;  %v794_v17 = vpop.f32.mrb[29].mxu1  ;;  %1155 = vst.msk [vmem:[%s2337_s12 + $0x64] sm:$0xf] %vm1129_vm0, %v1814_v10  ;;  %v667_v18 = vadd.f32 %v2327_v40, %v666_v16  ;;  %v1943_v20 = vpop.f32.mrb[30].mxu0 }
 0x139   : > { %1187 = vst.msk [vmem:[%s2337_s12 + $0xe4] sm:$0xf] %vm1129_vm0, %v1846_v11  ;;  %v795_v19 = vadd.f32 %v2327_v40, %v794_v17  ;;  %v1975_v21 = vpop.f32.mrb[30].mxu1  ;;  %v839_v22 = vmax.f32 %v675_v14, 0.0  ;;  %v678_v24 = vadd.f32 %v1943_v20, %v2327_v40  ;;  %v669_v26 = vpop.f32.mrb[31].mxu0 }
 0x13a   : > { %v871_v23 = vmax.f32 %v803_v15, 0.0  ;;  %v806_v25 = vadd.f32 %v1975_v21, %v2327_v40  ;;  %v797_v27 = vpop.f32.mrb[31].mxu1  ;;  %v837_v28 = vmax.f32 %v667_v18, 0.0  ;;  %v670_v30 = vadd.f32 %v2327_v40, %v669_v26 }
 0x13b   : > { %v869_v29 = vmax.f32 %v795_v19, 0.0  ;;  %v798_v31 = vadd.f32 %v2327_v40, %v797_v27  ;;  %v1819_v32 = vpack.c.bf16 %v839_v22, %v839_v22  ;;  %v840_v34 = vmax.f32 %v678_v24, 0.0  ;;  %1200 = sbr.rel (!%p2253_p4) target bundleno = 413 (0x19d), region = 36 }
 0x13c   : > { %v1851_v33 = vpack.c.bf16 %v871_v23, %v871_v23  ;;  %v872_v35 = vmax.f32 %v806_v25, 0.0  ;;  %v1817_v36 = vpack.c.bf16 %v837_v28, %v837_v28  ;;  %v838_v38 = vmax.f32 %v670_v30, 0.0 }
 0x13d   : > { %v1849_v37 = vpack.c.bf16 %v869_v29, %v869_v29  ;;  %v870_v39 = vmax.f32 %v798_v31, 0.0  ;;  %1160 = vst.msk [vmem:[%s2337_s12 + $0x78] sm:$0xf] %vm1129_vm0, %v1819_v32  ;;  %v1820_v41 = vpack.c.bf16 %v840_v34, %v840_v34 }
 0x13e   : > { %1192 = vst.msk [vmem:[%s2337_s12 + $0xf8] sm:$0xf] %vm1129_vm0, %v1851_v33  ;;  %v1852_v42 = vpack.c.bf16 %v872_v35, %v872_v35  ;;  %1158 = vst.msk [vmem:[%s2337_s12 + $0x70] sm:$0xf] %vm1129_vm0, %v1817_v36  ;;  %v1818_v40 = vpack.c.bf16 %v838_v38, %v838_v38 }
 0x13f   : > { %1190 = vst.msk [vmem:[%s2337_s12 + $0xf0] sm:$0xf] %vm1129_vm0, %v1849_v37  ;;  %v1850_v43 = vpack.c.bf16 %v870_v39, %v870_v39  ;;  %1161 = vst.msk [vmem:[%s2337_s12 + $0x7c] sm:$0xf] %vm1129_vm0, %v1820_v41 }
 0x140   : > { %1193 = vst.msk [vmem:[%s2337_s12 + $0xfc] sm:$0xf] %vm1129_vm0, %v1852_v42  ;;  %1159 = vst.msk [vmem:[%s2337_s12 + $0x74] sm:$0xf] %vm1129_vm0, %v1818_v40 }
 0x141   : > { %1191 = vst.msk [vmem:[%s2337_s12 + $0xf4] sm:$0xf] %vm1129_vm0, %v1850_v43 }
 0x142   : > { %s2734_s27 = smov (!%p1203_p8, %s1202_s27), 64 }
 0x143   : > { %s1774_s5 = sshll.u32 %s2734_s27, 6 }
 0x144   : > { %p1777_p9 = scmp.eq.s32.totalorder %s1774_s5, 0 }
 0x145   : > { %s2536_s6 = sshrl.u32 (!%p1777_p9), %s2734_s27, 6 }
 0x146   : > { %1211 = sbr.rel (%p1777_p9) target bundleno = 413 (0x19d), region = 40  ;;  %p1778_p10 = scmp.le.s32.totalorder (!%p1777_p9), %s2536_s6, 0 }
 0x14d   : > { %1616 = sbr.rel (%p1778_p10) target bundleno = 392 (0x188), region = 112  ;;  %s2727_s15 = smov (!%p1778_p10), %s2530_s4 }
 0x14e   : > { %s2728_s20 = smov (!%p1778_p10), %s2337_s12  ;;  %s2545_s23 = smov (!%p1778_p10), 0  }
 0x14f   : > { %s2547_s7 = smov (!%p1778_p10), 0  }
 0x154 LB: >> { %v1227_v44 = vld [vmem:[%s2182_s20] sm:$0xf]  ;;  %v1229_v45 = vld [vmem:[%s2182_s20 + $0x4] sm:$0xf]  ;;  %v1231_v46 = vld [vmem:[%s2182_s20 + $0x8] sm:$0xf]  ;;  %s2190_s7 = sphi %s2547_s7, %s1221_s7   ;;  %s2186_s23 = sphi %s2545_s23, %s2729_s23   ;;  %s2182_s20 = sphi %s2728_s20, %s1360_s20   ;;  %s2178_s15 = sphi %s2727_s15, %s1361_s15  }
 0x155   : >> { %1228 = vst [vmem:[%s2178_s15] sm:$0xf] %v1227_v44  ;;  %1230 = vst [vmem:[%s2178_s15 + $0x4] sm:$0xf] %v1229_v45  ;;  %v1233_v47 = vld [vmem:[%s2182_s20 + $0xc] sm:$0xf]  ;;  %s1355_s8 = sadd.s32 1, %s2186_s23 }
 0x156   : >> { %1232 = vst [vmem:[%s2178_s15 + $0x8] sm:$0xf] %v1231_v46  ;;  %v1235_v48 = vld [vmem:[%s2182_s20 + $0x10] sm:$0xf]  ;;  %v1237_v49 = vld [vmem:[%s2182_s20 + $0x14] sm:$0xf]  ;;  %p1356_p11 = scmp.ge.s32.totalorder %s1355_s8, %s2536_s6 }
 0x157   : >> { %1234 = vst [vmem:[%s2178_s15 + $0xc] sm:$0xf] %v1233_v47  ;;  %1236 = vst [vmem:[%s2178_s15 + $0x10] sm:$0xf] %v1235_v48  ;;  %v1239_v50 = vld [vmem:[%s2182_s20 + $0x18] sm:$0xf] }
 0x158   : >> { %1238 = vst [vmem:[%s2178_s15 + $0x14] sm:$0xf] %v1237_v49  ;;  %v1241_v51 = vld [vmem:[%s2182_s20 + $0x1c] sm:$0xf]  ;;  %v1243_v52 = vld [vmem:[%s2182_s20 + $0x20] sm:$0xf] }
 0x159   : >> { %1240 = vst [vmem:[%s2178_s15 + $0x18] sm:$0xf] %v1239_v50  ;;  %1242 = vst [vmem:[%s2178_s15 + $0x1c] sm:$0xf] %v1241_v51  ;;  %v1245_v53 = vld [vmem:[%s2182_s20 + $0x24] sm:$0xf] }
 0x15a   : >> { %1244 = vst [vmem:[%s2178_s15 + $0x20] sm:$0xf] %v1243_v52  ;;  %v1247_v54 = vld [vmem:[%s2182_s20 + $0x28] sm:$0xf]  ;;  %v1249_v55 = vld [vmem:[%s2182_s20 + $0x2c] sm:$0xf] }
 0x15b   : >> { %1246 = vst [vmem:[%s2178_s15 + $0x24] sm:$0xf] %v1245_v53  ;;  %1248 = vst [vmem:[%s2178_s15 + $0x28] sm:$0xf] %v1247_v54  ;;  %v1251_v56 = vld [vmem:[%s2182_s20 + $0x30] sm:$0xf] }
 0x15c   : >> { %1250 = vst [vmem:[%s2178_s15 + $0x2c] sm:$0xf] %v1249_v55  ;;  %v1253_v57 = vld [vmem:[%s2182_s20 + $0x34] sm:$0xf]  ;;  %v1255_v58 = vld [vmem:[%s2182_s20 + $0x38] sm:$0xf] }
 0x15d   : >> { %1252 = vst [vmem:[%s2178_s15 + $0x30] sm:$0xf] %v1251_v56  ;;  %1254 = vst [vmem:[%s2178_s15 + $0x34] sm:$0xf] %v1253_v57  ;;  %v1257_v59 = vld [vmem:[%s2182_s20 + $0x3c] sm:$0xf] }
 0x15e   : >> { %1256 = vst [vmem:[%s2178_s15 + $0x38] sm:$0xf] %v1255_v58  ;;  %v1259_v60 = vld [vmem:[%s2182_s20 + $0x40] sm:$0xf]  ;;  %v1261_v61 = vld [vmem:[%s2182_s20 + $0x44] sm:$0xf] }
 0x15f   : >> { %1258 = vst [vmem:[%s2178_s15 + $0x3c] sm:$0xf] %v1257_v59  ;;  %1260 = vst [vmem:[%s2178_s15 + $0x40] sm:$0xf] %v1259_v60  ;;  %v1263_v62 = vld [vmem:[%s2182_s20 + $0x48] sm:$0xf] }
 0x160   : >> { %1262 = vst [vmem:[%s2178_s15 + $0x44] sm:$0xf] %v1261_v61  ;;  %v1265_v63 = vld [vmem:[%s2182_s20 + $0x4c] sm:$0xf]  ;;  %v1267_v0 = vld [vmem:[%s2182_s20 + $0x50] sm:$0xf] }
 0x161   : >> { %1264 = vst [vmem:[%s2178_s15 + $0x48] sm:$0xf] %v1263_v62  ;;  %1266 = vst [vmem:[%s2178_s15 + $0x4c] sm:$0xf] %v1265_v63  ;;  %v1269_v1 = vld [vmem:[%s2182_s20 + $0x54] sm:$0xf] }
 0x162   : >> { %1268 = vst [vmem:[%s2178_s15 + $0x50] sm:$0xf] %v1267_v0  ;;  %v1271_v2 = vld [vmem:[%s2182_s20 + $0x58] sm:$0xf]  ;;  %v1273_v3 = vld [vmem:[%s2182_s20 + $0x5c] sm:$0xf] }
 0x163   : >> { %1270 = vst [vmem:[%s2178_s15 + $0x54] sm:$0xf] %v1269_v1  ;;  %1272 = vst [vmem:[%s2178_s15 + $0x58] sm:$0xf] %v1271_v2  ;;  %v1275_v4 = vld [vmem:[%s2182_s20 + $0x60] sm:$0xf] }
 0x164   : >> { %1274 = vst [vmem:[%s2178_s15 + $0x5c] sm:$0xf] %v1273_v3  ;;  %v1277_v5 = vld [vmem:[%s2182_s20 + $0x64] sm:$0xf]  ;;  %v1279_v6 = vld [vmem:[%s2182_s20 + $0x68] sm:$0xf] }
 0x165   : >> { %1276 = vst [vmem:[%s2178_s15 + $0x60] sm:$0xf] %v1275_v4  ;;  %1278 = vst [vmem:[%s2178_s15 + $0x64] sm:$0xf] %v1277_v5  ;;  %v1281_v7 = vld [vmem:[%s2182_s20 + $0x6c] sm:$0xf] }
 0x166   : >> { %1280 = vst [vmem:[%s2178_s15 + $0x68] sm:$0xf] %v1279_v6  ;;  %v1283_v8 = vld [vmem:[%s2182_s20 + $0x70] sm:$0xf]  ;;  %v1285_v9 = vld [vmem:[%s2182_s20 + $0x74] sm:$0xf] }
 0x167   : >> { %1282 = vst [vmem:[%s2178_s15 + $0x6c] sm:$0xf] %v1281_v7  ;;  %1284 = vst [vmem:[%s2178_s15 + $0x70] sm:$0xf] %v1283_v8  ;;  %v1287_v10 = vld [vmem:[%s2182_s20 + $0x78] sm:$0xf] }
 0x168   : >> { %1286 = vst [vmem:[%s2178_s15 + $0x74] sm:$0xf] %v1285_v9  ;;  %v1289_v11 = vld [vmem:[%s2182_s20 + $0x7c] sm:$0xf]  ;;  %v1291_v12 = vld [vmem:[%s2182_s20 + $0x80] sm:$0xf] }
 0x169   : >> { %1288 = vst [vmem:[%s2178_s15 + $0x78] sm:$0xf] %v1287_v10  ;;  %1290 = vst [vmem:[%s2178_s15 + $0x7c] sm:$0xf] %v1289_v11  ;;  %v1293_v13 = vld [vmem:[%s2182_s20 + $0x84] sm:$0xf] }
 0x16a   : >> { %1292 = vst [vmem:[%s2178_s15 + $0x80] sm:$0xf] %v1291_v12  ;;  %v1295_v14 = vld [vmem:[%s2182_s20 + $0x88] sm:$0xf]  ;;  %v1297_v15 = vld [vmem:[%s2182_s20 + $0x8c] sm:$0xf] }
 0x16b   : >> { %1294 = vst [vmem:[%s2178_s15 + $0x84] sm:$0xf] %v1293_v13  ;;  %1296 = vst [vmem:[%s2178_s15 + $0x88] sm:$0xf] %v1295_v14  ;;  %v1299_v16 = vld [vmem:[%s2182_s20 + $0x90] sm:$0xf] }
 0x16c   : >> { %1298 = vst [vmem:[%s2178_s15 + $0x8c] sm:$0xf] %v1297_v15  ;;  %v1301_v17 = vld [vmem:[%s2182_s20 + $0x94] sm:$0xf]  ;;  %v1303_v18 = vld [vmem:[%s2182_s20 + $0x98] sm:$0xf] }
 0x16d   : >> { %1300 = vst [vmem:[%s2178_s15 + $0x90] sm:$0xf] %v1299_v16  ;;  %1302 = vst [vmem:[%s2178_s15 + $0x94] sm:$0xf] %v1301_v17  ;;  %v1305_v19 = vld [vmem:[%s2182_s20 + $0x9c] sm:$0xf] }
 0x16e   : >> { %1304 = vst [vmem:[%s2178_s15 + $0x98] sm:$0xf] %v1303_v18  ;;  %v1307_v20 = vld [vmem:[%s2182_s20 + $0xa0] sm:$0xf]  ;;  %v1309_v21 = vld [vmem:[%s2182_s20 + $0xa4] sm:$0xf] }
 0x16f   : >> { %1306 = vst [vmem:[%s2178_s15 + $0x9c] sm:$0xf] %v1305_v19  ;;  %1308 = vst [vmem:[%s2178_s15 + $0xa0] sm:$0xf] %v1307_v20  ;;  %v1311_v22 = vld [vmem:[%s2182_s20 + $0xa8] sm:$0xf] }
 0x170   : >> { %1310 = vst [vmem:[%s2178_s15 + $0xa4] sm:$0xf] %v1309_v21  ;;  %v1313_v23 = vld [vmem:[%s2182_s20 + $0xac] sm:$0xf]  ;;  %v1315_v24 = vld [vmem:[%s2182_s20 + $0xb0] sm:$0xf] }
 0x171   : >> { %1312 = vst [vmem:[%s2178_s15 + $0xa8] sm:$0xf] %v1311_v22  ;;  %1314 = vst [vmem:[%s2178_s15 + $0xac] sm:$0xf] %v1313_v23  ;;  %v1317_v25 = vld [vmem:[%s2182_s20 + $0xb4] sm:$0xf] }
 0x172   : >> { %1316 = vst [vmem:[%s2178_s15 + $0xb0] sm:$0xf] %v1315_v24  ;;  %v1319_v26 = vld [vmem:[%s2182_s20 + $0xb8] sm:$0xf]  ;;  %v1321_v27 = vld [vmem:[%s2182_s20 + $0xbc] sm:$0xf] }
 0x173   : >> { %1318 = vst [vmem:[%s2178_s15 + $0xb4] sm:$0xf] %v1317_v25  ;;  %1320 = vst [vmem:[%s2178_s15 + $0xb8] sm:$0xf] %v1319_v26  ;;  %v1323_v28 = vld [vmem:[%s2182_s20 + $0xc0] sm:$0xf] }
 0x174   : >> { %1322 = vst [vmem:[%s2178_s15 + $0xbc] sm:$0xf] %v1321_v27  ;;  %v1325_v29 = vld [vmem:[%s2182_s20 + $0xc4] sm:$0xf]  ;;  %v1327_v30 = vld [vmem:[%s2182_s20 + $0xc8] sm:$0xf] }
 0x175   : >> { %1324 = vst [vmem:[%s2178_s15 + $0xc0] sm:$0xf] %v1323_v28  ;;  %1326 = vst [vmem:[%s2178_s15 + $0xc4] sm:$0xf] %v1325_v29  ;;  %v1329_v31 = vld [vmem:[%s2182_s20 + $0xcc] sm:$0xf] }
 0x176   : >> { %1328 = vst [vmem:[%s2178_s15 + $0xc8] sm:$0xf] %v1327_v30  ;;  %v1331_v32 = vld [vmem:[%s2182_s20 + $0xd0] sm:$0xf]  ;;  %v1333_v33 = vld [vmem:[%s2182_s20 + $0xd4] sm:$0xf] }
 0x177   : >> { %1330 = vst [vmem:[%s2178_s15 + $0xcc] sm:$0xf] %v1329_v31  ;;  %1332 = vst [vmem:[%s2178_s15 + $0xd0] sm:$0xf] %v1331_v32  ;;  %v1335_v34 = vld [vmem:[%s2182_s20 + $0xd8] sm:$0xf] }
 0x178   : >> { %1334 = vst [vmem:[%s2178_s15 + $0xd4] sm:$0xf] %v1333_v33  ;;  %v1337_v35 = vld [vmem:[%s2182_s20 + $0xdc] sm:$0xf]  ;;  %v1339_v36 = vld [vmem:[%s2182_s20 + $0xe0] sm:$0xf] }
 0x179   : >> { %1336 = vst [vmem:[%s2178_s15 + $0xd8] sm:$0xf] %v1335_v34  ;;  %1338 = vst [vmem:[%s2178_s15 + $0xdc] sm:$0xf] %v1337_v35  ;;  %v1341_v37 = vld [vmem:[%s2182_s20 + $0xe4] sm:$0xf] }
 0x17a   : >> { %1340 = vst [vmem:[%s2178_s15 + $0xe0] sm:$0xf] %v1339_v36  ;;  %v1343_v38 = vld [vmem:[%s2182_s20 + $0xe8] sm:$0xf]  ;;  %v1345_v39 = vld [vmem:[%s2182_s20 + $0xec] sm:$0xf] }
 0x17b   : >> { %1342 = vst [vmem:[%s2178_s15 + $0xe4] sm:$0xf] %v1341_v37  ;;  %1344 = vst [vmem:[%s2178_s15 + $0xe8] sm:$0xf] %v1343_v38  ;;  %v1347_v41 = vld [vmem:[%s2182_s20 + $0xf0] sm:$0xf] }
 0x17c   : >> { %1346 = vst [vmem:[%s2178_s15 + $0xec] sm:$0xf] %v1345_v39  ;;  %v1349_v42 = vld [vmem:[%s2182_s20 + $0xf4] sm:$0xf]  ;;  %v1351_v40 = vld [vmem:[%s2182_s20 + $0xf8] sm:$0xf] }
 0x17d   : >> { %1348 = vst [vmem:[%s2178_s15 + $0xf0] sm:$0xf] %v1347_v41  ;;  %1350 = vst [vmem:[%s2178_s15 + $0xf4] sm:$0xf] %v1349_v42  ;;  %v1353_v43 = vld [vmem:[%s2182_s20 + $0xfc] sm:$0xf] }
 0x17e   : >> { %1352 = vst [vmem:[%s2178_s15 + $0xf8] sm:$0xf] %v1351_v40  ;;  %1354 = vst [vmem:[%s2178_s15 + $0xfc] sm:$0xf] %v1353_v43  ;;  %s2736_s8 = smov (%p1356_p11, %s1355_s8), 0  ;;  %s1221_s7 = sadd.s32 1, %s2190_s7  }
 0x17f   : >> { %s1779_s9 = sshll.u32 %s2736_s8, 8  ;;  %p1220_p12 = scmp.ge.s32.totalorder %s1221_s7, %s2536_s6 }
 0x180   : >> { %s1360_s20 = scalar_lea.vmem %s2337_s12, %s1779_s9 [#allocation2]   ;;  %s1361_s15 = scalar_lea.vmem %s2530_s4, %s1779_s9  }
 0x181   : >> { %s2729_s23 = smov %s2736_s8  ;;  %1223 = sbr.rel (!%p1220_p12) target bundleno = 340 (0x154), region = 118 }
 0x188 PF: > { %s2704_s10 = sand.u32 63, %s2734_s27   ;;  %s1854_s11 = sshll.u32 %s2536_s6, 8 }
 0x189   : > { %s1366_s14 = scalar_lea.vmem %s2337_s12, %s1854_s11 [#allocation2]   ;;  %s1368_s17 = scalar_lea.vmem %s2530_s4, %s1854_s11  }
 0x18a   : > { %p1784_p13 = scmp.le.s32.totalorder %s2704_s10, 0 }
 0x18b   : > { %s2192_s18 = smov (!%p1784_p13), %s1368_s17   ;;  %s2196_s21 = smov (!%p1784_p13), %s1366_s14  }
 0x18c   : > { %1630 = sbr.rel (%p1784_p13) target bundleno = 413 (0x19d), region = 123  ;;  %s2200_s22 = smov (!%p1784_p13), 0  }
 0x18d   : > { %s2204_s24 = smov (!%p1784_p13), 0  }
 0x193 LB: >> { %v1378_v44 = vld [vmem:[%s2198_s21] sm:$0xf]  ;;  %s1380_s25 = sadd.s32 1, %s2202_s22  ;;  %s1372_s24 = sadd.s32 1, %s2206_s24   ;;  %s2206_s24 = sphi %s2204_s24, %s1372_s24   ;;  %s2202_s22 = sphi %s2200_s22, %s2201_s22   ;;  %s2198_s21 = sphi %s2196_s21, %s1385_s21   ;;  %s2194_s18 = sphi %s2192_s18, %s1386_s18  }
 0x194   : >> { %1379 = vst [vmem:[%s2194_s18] sm:$0xf] %v1378_v44  ;;  %p1381_p0 = scmp.ge.s32.totalorder %s1380_s25, %s2704_s10  ;;  %p1371_p1 = scmp.ge.s32.totalorder %s1372_s24, %s2704_s10 }
 0x196   : >> { %s2738_s25 = smov (%p1381_p0, %s1380_s25), 0  ;;  %1374 = sbr.rel (!%p1371_p1) target bundleno = 403 (0x193), region = 129 }
 0x197   : >> { %s1785_s26 = sshll.u32 %s2738_s25, 2  ;;  %s2201_s22 = smov %s2738_s25  }
 0x198   : >> { %s1385_s21 = scalar_lea.vmem %s1366_s14, %s1785_s26 [#allocation2]   ;;  %s1386_s18 = scalar_lea.vmem %s1368_s17, %s1785_s26  }
 0x19d PF: > { %p10_p2 = scmp.ge.s32.totalorder %s2243_s16, 10   ;;  %s2730_s12 = smov %s2170_s13 }
 0x19e   : > { %s2731_s13 = smov %s2251_s19  ;;  %s2732_s14 = smov %s2243_s16 }
 0x19f   :  { %12 = sbr.rel (!%p10_p2) target bundleno = 2 (0x2), region = 140 }

// kernel: nature_cnn_amm_forward.6
= control target key start
LH: loop header
LB: loop body
LE: loop exit
PB: predicated region body
PF: predicated region fallthrough
CT: control target
= control target key end

     0   :  { %s3530_s12 = smov 0   ;;  %s3532_s13 = smov 0   ;;  %s4229_s0 = inlined_call_operand.vmem [shape: bf16[864,512], index: 0, kind: input, shape index: {}]   ;;  %s4230_s1 = inlined_call_operand.vmem [shape: bf16[512,64], index: 1, kind: input, shape index: {}]   ;;  %s4231_s2 = inlined_call_operand.vmem [shape: f32[1,64], index: 2, kind: input, shape index: {}]   ;;  %s4232_s3 = inlined_call_operand.vmem [shape: bf16[864,64], index: 3, kind: output, shape index: {}]  }
   0x1   :  { %s3534_s14 = smov 0  }
   0x2 LB: > { %s3543_s15 = sadd.s32 4294967295, %s3475_s14   ;;  %s3545_s16 = sadd.s32 1, %s3475_s14   ;;  %s3475_s14 = sphi %s3534_s14, %s4239_s14   ;;  %s3471_s13 = sphi %s3532_s13, %s4238_s13   ;;  %s3467_s12 = sphi %s3530_s12, %s4237_s12  }
   0x3   : > { %s85_s17 = ssub.s32 %s3475_s14, %s3545_s16  ;;  %s88_s18 = sadd.s32 1, %s3471_s13 }
   0x4   : > { %p86_p0 = scmp.eq.s32.totalorder %s85_s17, 0  ;;  %p98_p1 = scmp.ne.s32.totalorder %s3471_s13, %s3467_s12 }
   0x5   : > { %p99_p2 = scmp.eq.s32.totalorder %s3543_s15, 1  ;;  %p2664_p3 = scmp.ge.s32.totalorder %s3475_s14, 1 }
   0x6   : > { %s3553_s19 = scalar_select %p86_p0, %s3471_s13, %s88_s18  }
   0x7   : > { %p3555_p4 = por %p99_p2, %p98_p1  ;;  %p149_p5 = scmp.lt.s32.totalorder %s3475_s14, 3 }
   0x9   : > { %p150_p6 = pnand %p2664_p3, %p149_p5 }
   0xa   : > { %v3196_v0 = vld [vmem:[%s4230_s1] sm:$0xff] (!%p150_p6)   ;;  %v3509_v1 = vmov (!%p150_p6), 0   ;;  %v3198_v3 = vld [vmem:[%s4230_s1 + $0x8] sm:$0xff] (!%p150_p6)   ;;  %v3200_v5 = vld [vmem:[%s4230_s1 + $0x10] sm:$0xff] (!%p150_p6)   ;;  %s3600_s18 = sshll.u32 (!%p150_p6), %s3543_s15, 6  ;;  %s175_s6 = sand.u32 (!%p150_p6), 1, %s3467_s12  }
   0xb   : > { %153 = sbr.rel (%p150_p6) target bundleno = 637 (0x27d), region = 32  ;;  %1232 = vmatprep.subr.bf16.mxu1 (!%p150_p6), %v3509_v1  ;;  %1521 = vmatprep.subr.bf16.mxu0 (!%p150_p6), %v3509_v1  ;;  %v3197_v2 = vld [vmem:[%s4230_s1 + $0x80] sm:$0xff] (!%p150_p6)   ;;  %v3199_v4 = vld [vmem:[%s4230_s1 + $0x88] sm:$0xff] (!%p150_p6)   ;;  %v3201_v6 = vld [vmem:[%s4230_s1 + $0x90] sm:$0xff] (!%p150_p6)   ;;  %p184_p7 = scmp.lt.s32.totalorder (!%p150_p6), %s3600_s18, 107  ;;  %vm2130_vm0 = vcmask (!%p150_p6), 519168  }
   0xc   : > { %1233 = vmatpush1.bf16.msra.mxu1 (!%p150_p6), %v3196_v0  ;;  %1522 = vmatpush1.bf16.msra.mxu0 (!%p150_p6), %v3197_v2  ;;  %v3202_v7 = vld [vmem:[%s4230_s1 + $0x18] sm:$0xff] (!%p150_p6)   ;;  %v3204_v9 = vld [vmem:[%s4230_s1 + $0x20] sm:$0xff] (!%p150_p6)   ;;  %v3206_v11 = vld [vmem:[%s4230_s1 + $0x28] sm:$0xff] (!%p150_p6)  }
   0xd   : > { %1234 = vmatprep.subr.bf16.mxu1 (!%p150_p6), %v3509_v1  ;;  %1523 = vmatprep.subr.bf16.mxu0 (!%p150_p6), %v3509_v1  ;;  %v3203_v8 = vld [vmem:[%s4230_s1 + $0x98] sm:$0xff] (!%p150_p6)   ;;  %v3205_v10 = vld [vmem:[%s4230_s1 + $0xa0] sm:$0xff] (!%p150_p6)   ;;  %v3207_v12 = vld [vmem:[%s4230_s1 + $0xa8] sm:$0xff] (!%p150_p6)  }
   0xe   : > { %v3208_v13 = vld [vmem:[%s4230_s1 + $0x30] sm:$0xff] (!%p150_p6)   ;;  %v3210_v15 = vld [vmem:[%s4230_s1 + $0x38] sm:$0xff] (!%p150_p6)   ;;  %v3212_v17 = vld [vmem:[%s4230_s1 + $0x40] sm:$0xff] (!%p150_p6)  }
   0xf   : > { %v3209_v14 = vld [vmem:[%s4230_s1 + $0xb0] sm:$0xff] (!%p150_p6)   ;;  %v3211_v16 = vld [vmem:[%s4230_s1 + $0xb8] sm:$0xff] (!%p150_p6)   ;;  %v3213_v18 = vld [vmem:[%s4230_s1 + $0xc0] sm:$0xff] (!%p150_p6)  }
  0x10   : > { %1235 = vmatpush1.bf16.msra.mxu1 (!%p150_p6), %v3198_v3  ;;  %1524 = vmatpush1.bf16.msra.mxu0 (!%p150_p6), %v3199_v4  ;;  %v3214_v20 = vld [vmem:[%s4230_s1 + $0x48] sm:$0xff] (!%p150_p6)   ;;  %v3216_v23 = vld [vmem:[%s4230_s1 + $0x50] sm:$0xff] (!%p150_p6)   ;;  %v3218_v25 = vld [vmem:[%s4230_s1 + $0x58] sm:$0xff] (!%p150_p6)  }
  0x11   : > { %1236 = vmatprep.subr.bf16.mxu1 (!%p150_p6), %v3509_v1  ;;  %1525 = vmatprep.subr.bf16.mxu0 (!%p150_p6), %v3509_v1  ;;  %v3215_v22 = vld [vmem:[%s4230_s1 + $0xc8] sm:$0xff] (!%p150_p6)   ;;  %v3217_v24 = vld [vmem:[%s4230_s1 + $0xd0] sm:$0xff] (!%p150_p6)   ;;  %v3219_v26 = vld [vmem:[%s4230_s1 + $0xd8] sm:$0xff] (!%p150_p6)  }
  0x12   : > { %s185_s29 = scalar_select %p184_p7, %s3600_s18, 107  ;;  %v3220_v27 = vld [vmem:[%s4230_s1 + $0x60] sm:$0xff]   ;;  %v3222_v29 = vld [vmem:[%s4230_s1 + $0x68] sm:$0xff]   ;;  %v3224_v31 = vld [vmem:[%s4230_s1 + $0x70] sm:$0xff]  }
  0x13   : > { %v3221_v28 = vld [vmem:[%s4230_s1 + $0xe0] sm:$0xff]   ;;  %v3223_v30 = vld [vmem:[%s4230_s1 + $0xe8] sm:$0xff]   ;;  %v3225_v32 = vld [vmem:[%s4230_s1 + $0xf0] sm:$0xff]   ;;  %s2203_s9 = ssub.s32 (%p3555_p4), 108, %s3600_s18  ;;  %s2976_s10 = sshll.u32 (%p3555_p4), %s3543_s15, 8 }
  0x14   : > { %1237 = vmatpush1.bf16.msra.mxu1 %v3200_v5  ;;  %1526 = vmatpush1.bf16.msra.mxu0 %v3201_v6  ;;  %s2911_s7 = sshll.u32 %s185_s29, 4  ;;  %v3226_v33 = vld [vmem:[%s4230_s1 + $0x78] sm:$0xff]   ;;  %p2204_p8 = scmp.lt.s32.totalorder (%p3555_p4), %s2203_s9, 64 }
  0x15   : > { %1238 = vmatprep.subr.bf16.mxu1 %v3509_v1  ;;  %1527 = vmatprep.subr.bf16.mxu0 %v3509_v1  ;;  %s3634_s14 = scalar_lea.vmem %s4229_s0, %s2911_s7  ;;  %v3227_v34 = vld [vmem:[%s4230_s1 + $0xf8] sm:$0xff]   ;;  %s2665_s7 = sshll.u32 %s175_s6, 8 }
  0x16   : > { %v3230_v19 = vld [vmem:[%s3634_s14 + $0x4] ss:$16 sps:$4 sm:$0xff]   ;;  %v3233_v21 = vld [vmem:[%s3634_s14 + $0xc] ss:$16 sps:$4 sm:$0xff]   ;;  %v3228_v35 = vld [vmem:[%s3634_s14] ss:$16 sps:$4 sm:$0xff]   ;;  %s4037_s21 = scalar_lea.vmem (%p3555_p4), %s4232_s3, %s2976_s10  }
  0x17   : > { %1264 = vmatprep.mubr.bf16.mxu1 %v3230_v19  ;;  %1553 = vmatprep.mubr.bf16.mxu0 %v3233_v21  ;;  %v3231_v36 = vld [vmem:[%s3634_s14 + $0x8] ss:$16 sps:$4 sm:$0xff]   ;;  %v3234_v37 = vld [vmem:[%s3634_s14 + $0x24] ss:$16 sps:$4 sm:$0xff]   ;;  %v3236_v38 = vld [vmem:[%s3634_s14 + $0x2c] ss:$16 sps:$4 sm:$0xff]  }
  0x18   : > { %1239 = vmatpush1.bf16.msra.mxu1 %v3202_v7  ;;  %1528 = vmatpush1.bf16.msra.mxu0 %v3203_v8  ;;  %v3238_v39 = vld [vmem:[%s3634_s14 + $0x20] ss:$16 sps:$4 sm:$0xff]   ;;  %v3239_v40 = vld [vmem:[%s3634_s14 + $0x28] ss:$16 sps:$4 sm:$0xff]   ;;  %v3240_v41 = vld [vmem:[%s3634_s14 + $0x44] ss:$16 sps:$4 sm:$0xff]  }
  0x19   : > { %1240 = vmatprep.subr.bf16.mxu1 %v3509_v1  ;;  %1529 = vmatprep.subr.bf16.mxu0 %v3509_v1  ;;  %v3242_v42 = vld [vmem:[%s3634_s14 + $0x4c] ss:$16 sps:$4 sm:$0xff]   ;;  %v3244_v43 = vld [vmem:[%s3634_s14 + $0x40] ss:$16 sps:$4 sm:$0xff]   ;;  %v3245_v44 = vld [vmem:[%s3634_s14 + $0x48] ss:$16 sps:$4 sm:$0xff]  }
  0x1a   : > { %v3246_v45 = vld [vmem:[%s3634_s14 + $0x64] ss:$16 sps:$4 sm:$0xff]   ;;  %v3248_v46 = vld [vmem:[%s3634_s14 + $0x6c] ss:$16 sps:$4 sm:$0xff]   ;;  %v3250_v47 = vld [vmem:[%s3634_s14 + $0x60] ss:$16 sps:$4 sm:$0xff]  }
  0x1b   : > { %v3251_v48 = vld [vmem:[%s3634_s14 + $0x68] ss:$16 sps:$4 sm:$0xff]   ;;  %v3252_v49 = vld [vmem:[%s3634_s14 + $0x84] ss:$16 sps:$4 sm:$0xff]   ;;  %v3254_v50 = vld [vmem:[%s3634_s14 + $0x8c] ss:$16 sps:$4 sm:$0xff]  }
  0x1c   : > { %1241 = vmatpush1.bf16.msra.mxu1 %v3204_v9  ;;  %1530 = vmatpush1.bf16.msra.mxu0 %v3205_v10  ;;  %v3256_v51 = vld [vmem:[%s3634_s14 + $0x80] ss:$16 sps:$4 sm:$0xff]   ;;  %v3257_v52 = vld [vmem:[%s3634_s14 + $0x88] ss:$16 sps:$4 sm:$0xff]   ;;  %v3258_v53 = vld [vmem:[%s3634_s14 + $0xa4] ss:$16 sps:$4 sm:$0xff]  }
  0x1d   : > { %1242 = vmatprep.subr.bf16.mxu1 %v3509_v1  ;;  %1531 = vmatprep.subr.bf16.mxu0 %v3509_v1  ;;  %v3260_v54 = vld [vmem:[%s3634_s14 + $0xac] ss:$16 sps:$4 sm:$0xff]   ;;  %v3262_v55 = vld [vmem:[%s3634_s14 + $0xa0] ss:$16 sps:$4 sm:$0xff]   ;;  %v3263_v56 = vld [vmem:[%s3634_s14 + $0xa8] ss:$16 sps:$4 sm:$0xff]  }
  0x1e   : > { %v3264_v57 = vld [vmem:[%s3634_s14 + $0xc4] ss:$16 sps:$4 sm:$0xff]   ;;  %v3266_v58 = vld [vmem:[%s3634_s14 + $0xcc] ss:$16 sps:$4 sm:$0xff]   ;;  %v3268_v59 = vld [vmem:[%s3634_s14 + $0xc0] ss:$16 sps:$4 sm:$0xff]  }
  0x1f   : > { %v3269_v60 = vld [vmem:[%s3634_s14 + $0xc8] ss:$16 sps:$4 sm:$0xff]   ;;  %v3270_v61 = vld [vmem:[%s3634_s14 + $0xe4] ss:$16 sps:$4 sm:$0xff]   ;;  %v3272_v62 = vld [vmem:[%s3634_s14 + $0xec] ss:$16 sps:$4 sm:$0xff]  }
  0x20   : > { %1243 = vmatpush1.bf16.msra.mxu1 %v3206_v11  ;;  %1532 = vmatpush1.bf16.msra.mxu0 %v3207_v12  ;;  %v3274_v63 = vld [vmem:[%s3634_s14 + $0xe0] ss:$16 sps:$4 sm:$0xff]   ;;  %v3275_v0 = vld [vmem:[%s3634_s14 + $0xe8] ss:$16 sps:$4 sm:$0xff]   ;;  %v3278_v2 = vld [vmem:[%s3634_s14 + $0x10c] ss:$16 sps:$4 sm:$0xff]  }
  0x21   : > { %1244 = vmatprep.subr.bf16.mxu1 %v3509_v1  ;;  %1533 = vmatprep.subr.bf16.mxu0 %v3509_v1  ;;  %v3280_v3 = vld [vmem:[%s3634_s14 + $0x100] ss:$16 sps:$4 sm:$0xff]   ;;  %v3281_v4 = vld [vmem:[%s3634_s14 + $0x108] ss:$16 sps:$4 sm:$0xff]   ;;  %v3282_v5 = vld [vmem:[%s3634_s14 + $0x124] ss:$16 sps:$4 sm:$0xff]  }
  0x22   : > { %v3284_v6 = vld [vmem:[%s3634_s14 + $0x12c] ss:$16 sps:$4 sm:$0xff]   ;;  %v3286_v7 = vld [vmem:[%s3634_s14 + $0x120] ss:$16 sps:$4 sm:$0xff]   ;;  %v3287_v8 = vld [vmem:[%s3634_s14 + $0x128] ss:$16 sps:$4 sm:$0xff]  }
  0x23   : > { %v3288_v9 = vld [vmem:[%s3634_s14 + $0x144] ss:$16 sps:$4 sm:$0xff]   ;;  %v3290_v10 = vld [vmem:[%s3634_s14 + $0x14c] ss:$16 sps:$4 sm:$0xff]   ;;  %v3292_v11 = vld [vmem:[%s3634_s14 + $0x140] ss:$16 sps:$4 sm:$0xff]  }
  0x24   : > { %1245 = vmatpush1.bf16.msra.mxu1 %v3208_v13  ;;  %1534 = vmatpush1.bf16.msra.mxu0 %v3209_v14  ;;  %v3293_v12 = vld [vmem:[%s3634_s14 + $0x148] ss:$16 sps:$4 sm:$0xff]   ;;  %v3294_v13 = vld [vmem:[%s3634_s14 + $0x164] ss:$16 sps:$4 sm:$0xff]   ;;  %v3296_v14 = vld [vmem:[%s3634_s14 + $0x16c] ss:$16 sps:$4 sm:$0xff]  }
  0x25   : > { %1246 = vmatprep.subr.bf16.mxu1 %v3509_v1  ;;  %1535 = vmatprep.subr.bf16.mxu0 %v3509_v1  ;;  %v3304_v19 = vld [vmem:[%s3634_s14 + $0x180] ss:$16 sps:$4 sm:$0xff]   ;;  %v3306_v21 = vld [vmem:[%s3634_s14 + $0x1a4] ss:$16 sps:$4 sm:$0xff]   ;;  %s3819_s12 = scalar_lea.vmem [#allocation2], %s2665_s7  }
  0x28   : > { %1247 = vmatpush1.bf16.msra.mxu1 %v3210_v15  ;;  %1536 = vmatpush1.bf16.msra.mxu0 %v3211_v16  ;;  %v3298_v15 = vld [vmem:[%s3634_s14 + $0x160] ss:$16 sps:$4 sm:$0xff]   ;;  %v3299_v16 = vld [vmem:[%s3634_s14 + $0x168] ss:$16 sps:$4 sm:$0xff]  }
  0x29   : > { %1248 = vmatprep.subr.bf16.mxu1 %v3509_v1  ;;  %1537 = vmatprep.subr.bf16.mxu0 %v3509_v1 }
  0x2c   : > { %1249 = vmatpush1.bf16.msra.mxu1 %v3212_v17  ;;  %1538 = vmatpush1.bf16.msra.mxu0 %v3213_v18  ;;  %v3300_v17 = vld [vmem:[%s3634_s14 + $0x184] ss:$16 sps:$4 sm:$0xff]   ;;  %v3302_v18 = vld [vmem:[%s3634_s14 + $0x18c] ss:$16 sps:$4 sm:$0xff]  }
  0x2d   : > { %1250 = vmatprep.subr.bf16.mxu1 %v3509_v1  ;;  %1539 = vmatprep.subr.bf16.mxu0 %v3509_v1 }
  0x30   : > { %1251 = vmatpush1.bf16.msra.mxu1 %v3214_v20  ;;  %1540 = vmatpush1.bf16.msra.mxu0 %v3215_v22  ;;  %v3305_v20 = vld [vmem:[%s3634_s14 + $0x188] ss:$16 sps:$4 sm:$0xff]   ;;  %v3308_v22 = vld [vmem:[%s3634_s14 + $0x1ac] ss:$16 sps:$4 sm:$0xff]  }
  0x31   : > { %1252 = vmatprep.subr.bf16.mxu1 %v3509_v1  ;;  %1541 = vmatprep.subr.bf16.mxu0 %v3509_v1 }
  0x34   : > { %1253 = vmatpush1.bf16.msra.mxu1 %v3216_v23  ;;  %1542 = vmatpush1.bf16.msra.mxu0 %v3217_v24  ;;  %v3310_v23 = vld [vmem:[%s3634_s14 + $0x1a0] ss:$16 sps:$4 sm:$0xff]   ;;  %v3311_v24 = vld [vmem:[%s3634_s14 + $0x1a8] ss:$16 sps:$4 sm:$0xff]  }
  0x35   : > { %1254 = vmatprep.subr.bf16.mxu1 %v3509_v1  ;;  %1543 = vmatprep.subr.bf16.mxu0 %v3509_v1 }
  0x38   : > { %1255 = vmatpush1.bf16.msra.mxu1 %v3218_v25  ;;  %1544 = vmatpush1.bf16.msra.mxu0 %v3219_v26  ;;  %v3312_v25 = vld [vmem:[%s3634_s14 + $0x1c4] ss:$16 sps:$4 sm:$0xff]   ;;  %v3314_v26 = vld [vmem:[%s3634_s14 + $0x1cc] ss:$16 sps:$4 sm:$0xff]  }
  0x39   : > { %1256 = vmatprep.subr.bf16.mxu1 %v3509_v1  ;;  %1545 = vmatprep.subr.bf16.mxu0 %v3509_v1 }
  0x3c   : > { %1257 = vmatpush1.bf16.msra.mxu1 %v3220_v27  ;;  %1546 = vmatpush1.bf16.msra.mxu0 %v3221_v28  ;;  %v3316_v27 = vld [vmem:[%s3634_s14 + $0x1c0] ss:$16 sps:$4 sm:$0xff]   ;;  %v3317_v28 = vld [vmem:[%s3634_s14 + $0x1c8] ss:$16 sps:$4 sm:$0xff]  }
  0x3d   : > { %1258 = vmatprep.subr.bf16.mxu1 %v3509_v1  ;;  %1547 = vmatprep.subr.bf16.mxu0 %v3509_v1 }
  0x40   : > { %1259 = vmatpush1.bf16.msra.mxu1 %v3222_v29  ;;  %1548 = vmatpush1.bf16.msra.mxu0 %v3223_v30  ;;  %v3318_v29 = vld [vmem:[%s3634_s14 + $0x1e4] ss:$16 sps:$4 sm:$0xff]   ;;  %v3320_v30 = vld [vmem:[%s3634_s14 + $0x1ec] ss:$16 sps:$4 sm:$0xff]  }
  0x41   : > { %1260 = vmatprep.subr.bf16.mxu1 %v3509_v1  ;;  %1549 = vmatprep.subr.bf16.mxu0 %v3509_v1 }
  0x44   : > { %1261 = vmatpush1.bf16.msra.mxu1 %v3224_v31  ;;  %1550 = vmatpush1.bf16.msra.mxu0 %v3225_v32  ;;  %v3322_v31 = vld [vmem:[%s3634_s14 + $0x1e0] ss:$16 sps:$4 sm:$0xff]   ;;  %v3323_v32 = vld [vmem:[%s3634_s14 + $0x1e8] ss:$16 sps:$4 sm:$0xff]  }
  0x45   : > { %1262 = vmatprep.subr.bf16.mxu1 %v3509_v1  ;;  %1551 = vmatprep.subr.bf16.mxu0 %v3509_v1  ;;  %v3276_v1 = vld [vmem:[%s3634_s14 + $0x104] ss:$16 sps:$4 sm:$0xff]  }
  0x48   : > { %1263 = vmatpush1.bf16.msra.mxu1 %v3226_v33  ;;  %1552 = vmatpush1.bf16.msra.mxu0 %v3227_v34  ;;  %v3324_v33 = vld [vmem:[%s3634_s14 + $0x204] ss:$16 sps:$4 sm:$0xff]   ;;  %v3326_v34 = vld [vmem:[%s3634_s14 + $0x20c] ss:$16 sps:$4 sm:$0xff]  }
  0x4b   : > { %1265 = vmatmul.mubr.bf16.vlgmr.msra.gmra.mrb[0].mxu1 %v3228_v35  ;;  %1554 = vmatmul.mubr.bf16.vlgmr.msra.gmra.mrb[0].mxu0 %v3231_v36  ;;  %v3328_v35 = vld [vmem:[%s3634_s14 + $0x200] ss:$16 sps:$4 sm:$0xff]   ;;  %v3329_v36 = vld [vmem:[%s3634_s14 + $0x208] ss:$16 sps:$4 sm:$0xff]  }
  0x4c   : > { %1272 = vmatprep.mubr.bf16.mxu1 %v3234_v37  ;;  %1561 = vmatprep.mubr.bf16.mxu0 %v3236_v38  ;;  %v3330_v37 = vld [vmem:[%s3634_s14 + $0x224] ss:$16 sps:$4 sm:$0xff]   ;;  %v3332_v38 = vld [vmem:[%s3634_s14 + $0x22c] ss:$16 sps:$4 sm:$0xff]  }
  0x53   : > { %1273 = vmatmul.mubr.bf16.gmra.mrb[4].mxu1 %v3238_v39  ;;  %1562 = vmatmul.mubr.bf16.gmra.mrb[4].mxu0 %v3239_v40  ;;  %v3334_v39 = vld [vmem:[%s3634_s14 + $0x220] ss:$16 sps:$4 sm:$0xff]   ;;  %v3335_v40 = vld [vmem:[%s3634_s14 + $0x228] ss:$16 sps:$4 sm:$0xff]  }
  0x54   : > { %1280 = vmatprep.mubr.bf16.mxu1 %v3240_v41  ;;  %1569 = vmatprep.mubr.bf16.mxu0 %v3242_v42  ;;  %v3336_v41 = vld [vmem:[%s3634_s14 + $0x244] ss:$16 sps:$4 sm:$0xff]   ;;  %v3338_v42 = vld [vmem:[%s3634_s14 + $0x24c] ss:$16 sps:$4 sm:$0xff]  }
  0x5b   : > { %1281 = vmatmul.mubr.bf16.gmra.mrb[8].mxu1 %v3244_v43  ;;  %1570 = vmatmul.mubr.bf16.gmra.mrb[8].mxu0 %v3245_v44  ;;  %v3340_v43 = vld [vmem:[%s3634_s14 + $0x240] ss:$16 sps:$4 sm:$0xff]   ;;  %v3341_v44 = vld [vmem:[%s3634_s14 + $0x248] ss:$16 sps:$4 sm:$0xff]  }
  0x5c   : > { %1288 = vmatprep.mubr.bf16.mxu1 %v3246_v45  ;;  %1577 = vmatprep.mubr.bf16.mxu0 %v3248_v46  ;;  %v3342_v45 = vld [vmem:[%s3634_s14 + $0x264] ss:$16 sps:$4 sm:$0xff]   ;;  %v3344_v46 = vld [vmem:[%s3634_s14 + $0x26c] ss:$16 sps:$4 sm:$0xff]  }
  0x63   : > { %1289 = vmatmul.mubr.bf16.gmra.mrb[12].mxu1 %v3250_v47  ;;  %1578 = vmatmul.mubr.bf16.gmra.mrb[12].mxu0 %v3251_v48  ;;  %v3346_v47 = vld [vmem:[%s3634_s14 + $0x260] ss:$16 sps:$4 sm:$0xff]   ;;  %v3347_v48 = vld [vmem:[%s3634_s14 + $0x268] ss:$16 sps:$4 sm:$0xff]  }
  0x64   : > { %1296 = vmatprep.mubr.bf16.mxu1 %v3252_v49  ;;  %1585 = vmatprep.mubr.bf16.mxu0 %v3254_v50  ;;  %v3348_v49 = vld [vmem:[%s3634_s14 + $0x284] ss:$16 sps:$4 sm:$0xff]   ;;  %v3350_v50 = vld [vmem:[%s3634_s14 + $0x28c] ss:$16 sps:$4 sm:$0xff]  }
  0x6b   : > { %1297 = vmatmul.mubr.bf16.gmra.mrb[16].mxu1 %v3256_v51  ;;  %1586 = vmatmul.mubr.bf16.gmra.mrb[16].mxu0 %v3257_v52  ;;  %v3352_v51 = vld [vmem:[%s3634_s14 + $0x280] ss:$16 sps:$4 sm:$0xff]   ;;  %v3353_v52 = vld [vmem:[%s3634_s14 + $0x288] ss:$16 sps:$4 sm:$0xff]  }
  0x6c   : > { %1304 = vmatprep.mubr.bf16.mxu1 %v3258_v53  ;;  %1593 = vmatprep.mubr.bf16.mxu0 %v3260_v54  ;;  %v3354_v53 = vld [vmem:[%s3634_s14 + $0x2a4] ss:$16 sps:$4 sm:$0xff]   ;;  %v3356_v54 = vld [vmem:[%s3634_s14 + $0x2ac] ss:$16 sps:$4 sm:$0xff]  }
  0x73   : > { %1305 = vmatmul.mubr.bf16.gmra.mrb[20].mxu1 %v3262_v55  ;;  %1594 = vmatmul.mubr.bf16.gmra.mrb[20].mxu0 %v3263_v56  ;;  %v3358_v55 = vld [vmem:[%s3634_s14 + $0x2a0] ss:$16 sps:$4 sm:$0xff]   ;;  %v3359_v56 = vld [vmem:[%s3634_s14 + $0x2a8] ss:$16 sps:$4 sm:$0xff]  }
  0x74   : > { %1312 = vmatprep.mubr.bf16.mxu1 %v3264_v57  ;;  %1601 = vmatprep.mubr.bf16.mxu0 %v3266_v58  ;;  %v3360_v57 = vld [vmem:[%s3634_s14 + $0x2c4] ss:$16 sps:$4 sm:$0xff]   ;;  %v3362_v58 = vld [vmem:[%s3634_s14 + $0x2cc] ss:$16 sps:$4 sm:$0xff]  }
  0x7b   : > { %1313 = vmatmul.mubr.bf16.gmra.mrb[24].mxu1 %v3268_v59  ;;  %1602 = vmatmul.mubr.bf16.gmra.mrb[24].mxu0 %v3269_v60  ;;  %v3364_v59 = vld [vmem:[%s3634_s14 + $0x2c0] ss:$16 sps:$4 sm:$0xff]   ;;  %v3365_v60 = vld [vmem:[%s3634_s14 + $0x2c8] ss:$16 sps:$4 sm:$0xff]  }
  0x7c   : > { %1320 = vmatprep.mubr.bf16.mxu1 %v3270_v61  ;;  %1609 = vmatprep.mubr.bf16.mxu0 %v3272_v62  ;;  %v3366_v61 = vld [vmem:[%s3634_s14 + $0x2e4] ss:$16 sps:$4 sm:$0xff]   ;;  %v3368_v62 = vld [vmem:[%s3634_s14 + $0x2ec] ss:$16 sps:$4 sm:$0xff]  }
  0x83   : > { %1321 = vmatmul.mubr.bf16.gmra.mrb[28].mxu1 %v3274_v63  ;;  %1610 = vmatmul.mubr.bf16.gmra.mrb[28].mxu0 %v3275_v0  ;;  %v3370_v63 = vld [vmem:[%s3634_s14 + $0x2e0] ss:$16 sps:$4 sm:$0xff]   ;;  %v3371_v0 = vld [vmem:[%s3634_s14 + $0x2e8] ss:$16 sps:$4 sm:$0xff]  }
  0x84   : > { %1328 = vmatprep.mubr.bf16.mxu1 %v3276_v1  ;;  %1617 = vmatprep.mubr.bf16.mxu0 %v3278_v2  ;;  %v3372_v1 = vld [vmem:[%s3634_s14 + $0x304] ss:$16 sps:$4 sm:$0xff]   ;;  %v3374_v2 = vld [vmem:[%s3634_s14 + $0x30c] ss:$16 sps:$4 sm:$0xff]  }
  0x8b   : > { %1329 = vmatmul.mubr.bf16.gmra.mrb[32].mxu1 %v3280_v3  ;;  %1618 = vmatmul.mubr.bf16.gmra.mrb[32].mxu0 %v3281_v4  ;;  %v3376_v3 = vld [vmem:[%s3634_s14 + $0x300] ss:$16 sps:$4 sm:$0xff]   ;;  %v3377_v4 = vld [vmem:[%s3634_s14 + $0x308] ss:$16 sps:$4 sm:$0xff]  }
  0x8c   : > { %1336 = vmatprep.mubr.bf16.mxu1 %v3282_v5  ;;  %1625 = vmatprep.mubr.bf16.mxu0 %v3284_v6  ;;  %v3378_v5 = vld [vmem:[%s3634_s14 + $0x324] ss:$16 sps:$4 sm:$0xff]   ;;  %v3380_v6 = vld [vmem:[%s3634_s14 + $0x32c] ss:$16 sps:$4 sm:$0xff]  }
  0x93   : > { %1337 = vmatmul.mubr.bf16.gmra.mrb[36].mxu1 %v3286_v7  ;;  %1626 = vmatmul.mubr.bf16.gmra.mrb[36].mxu0 %v3287_v8  ;;  %v3382_v7 = vld [vmem:[%s3634_s14 + $0x320] ss:$16 sps:$4 sm:$0xff]   ;;  %v3383_v8 = vld [vmem:[%s3634_s14 + $0x328] ss:$16 sps:$4 sm:$0xff]  }
  0x94   : > { %1344 = vmatprep.mubr.bf16.mxu1 %v3288_v9  ;;  %1633 = vmatprep.mubr.bf16.mxu0 %v3290_v10  ;;  %v3384_v9 = vld [vmem:[%s3634_s14 + $0x344] ss:$16 sps:$4 sm:$0xff]   ;;  %v3386_v10 = vld [vmem:[%s3634_s14 + $0x34c] ss:$16 sps:$4 sm:$0xff]  }
  0x9b   : > { %1345 = vmatmul.mubr.bf16.gmra.mrb[40].mxu1 %v3292_v11  ;;  %1634 = vmatmul.mubr.bf16.gmra.mrb[40].mxu0 %v3293_v12  ;;  %v3388_v11 = vld [vmem:[%s3634_s14 + $0x340] ss:$16 sps:$4 sm:$0xff]   ;;  %v3389_v12 = vld [vmem:[%s3634_s14 + $0x348] ss:$16 sps:$4 sm:$0xff]  }
  0x9c   : > { %1352 = vmatprep.mubr.bf16.mxu1 %v3294_v13  ;;  %1641 = vmatprep.mubr.bf16.mxu0 %v3296_v14  ;;  %v3390_v13 = vld [vmem:[%s3634_s14 + $0x364] ss:$16 sps:$4 sm:$0xff]   ;;  %v3392_v14 = vld [vmem:[%s3634_s14 + $0x36c] ss:$16 sps:$4 sm:$0xff]  }
  0xa3   : > { %1353 = vmatmul.mubr.bf16.gmra.mrb[44].mxu1 %v3298_v15  ;;  %1642 = vmatmul.mubr.bf16.gmra.mrb[44].mxu0 %v3299_v16  ;;  %v3810_v15 = vld [vmem:[%s4231_s2] ss:$0 sm:$0xff] }
  0xa4   : > { %1360 = vmatprep.mubr.bf16.mxu1 %v3300_v17  ;;  %1649 = vmatprep.mubr.bf16.mxu0 %v3302_v18 }
  0xab   : > { %1361 = vmatmul.mubr.bf16.gmra.mrb[48].mxu1 %v3304_v19  ;;  %1650 = vmatmul.mubr.bf16.gmra.mrb[48].mxu0 %v3305_v20  ;;  %v3394_v20 = vld [vmem:[%s3634_s14 + $0x360] ss:$16 sps:$4 sm:$0xff]  }
  0xac   : > { %1368 = vmatprep.mubr.bf16.mxu1 %v3306_v21  ;;  %1657 = vmatprep.mubr.bf16.mxu0 %v3308_v22 }
  0xb3   : > { %1369 = vmatmul.mubr.bf16.gmra.mrb[52].mxu1 %v3310_v23  ;;  %1658 = vmatmul.mubr.bf16.gmra.mrb[52].mxu0 %v3311_v24  ;;  %v3395_v23 = vld [vmem:[%s3634_s14 + $0x368] ss:$16 sps:$4 sm:$0xff]   ;;  %v3396_v24 = vld [vmem:[%s3634_s14 + $0x384] ss:$16 sps:$4 sm:$0xff]  }
  0xb4   : > { %1376 = vmatprep.mubr.bf16.mxu1 %v3312_v25  ;;  %1665 = vmatprep.mubr.bf16.mxu0 %v3314_v26 }
  0xbb   : > { %1377 = vmatmul.mubr.bf16.gmra.mrb[56].mxu1 %v3316_v27  ;;  %1666 = vmatmul.mubr.bf16.gmra.mrb[56].mxu0 %v3317_v28 }
  0xbc   : > { %1384 = vmatprep.mubr.bf16.mxu1 %v3318_v29  ;;  %1673 = vmatprep.mubr.bf16.mxu0 %v3320_v30  ;;  %v3398_v29 = vld [vmem:[%s3634_s14 + $0x38c] ss:$16 sps:$4 sm:$0xff]  }
  0xc3   : > { %1385 = vmatmul.mubr.bf16.gmra.mrb[60].mxu1 %v3322_v31  ;;  %1674 = vmatmul.mubr.bf16.gmra.mrb[60].mxu0 %v3323_v32 }
  0xc4   : > { %1392 = vmatprep.mubr.bf16.mxu1 %v3324_v33  ;;  %1681 = vmatprep.mubr.bf16.mxu0 %v3326_v34 }
  0xcb   : > { %1393 = vmatmul.mubr.bf16.gmra.mrb[64].mxu1 %v3328_v35  ;;  %1682 = vmatmul.mubr.bf16.gmra.mrb[64].mxu0 %v3329_v36 }
  0xcc   : > { %1400 = vmatprep.mubr.bf16.mxu1 %v3330_v37  ;;  %1689 = vmatprep.mubr.bf16.mxu0 %v3332_v38 }
  0xd3   : > { %1401 = vmatmul.mubr.bf16.gmra.mrb[68].mxu1 %v3334_v39  ;;  %1690 = vmatmul.mubr.bf16.gmra.mrb[68].mxu0 %v3335_v40  ;;  %v3400_v40 = vld [vmem:[%s3634_s14 + $0x380] ss:$16 sps:$4 sm:$0xff]  }
  0xd4   : > { %1408 = vmatprep.mubr.bf16.mxu1 %v3336_v41  ;;  %1697 = vmatprep.mubr.bf16.mxu0 %v3338_v42 }
  0xdb   : > { %1409 = vmatmul.mubr.bf16.gmra.mrb[72].mxu1 %v3340_v43  ;;  %1698 = vmatmul.mubr.bf16.gmra.mrb[72].mxu0 %v3341_v44  ;;  %v3401_v43 = vld [vmem:[%s3634_s14 + $0x388] ss:$16 sps:$4 sm:$0xff]   ;;  %v3402_v44 = vld [vmem:[%s3634_s14 + $0x3a4] ss:$16 sps:$4 sm:$0xff]  }
  0xdc   : > { %1416 = vmatprep.mubr.bf16.mxu1 %v3342_v45  ;;  %1705 = vmatprep.mubr.bf16.mxu0 %v3344_v46 }
  0xe3   : > { %1417 = vmatmul.mubr.bf16.gmra.mrb[76].mxu1 %v3346_v47  ;;  %1706 = vmatmul.mubr.bf16.gmra.mrb[76].mxu0 %v3347_v48 }
  0xe4   : > { %1424 = vmatprep.mubr.bf16.mxu1 %v3348_v49  ;;  %1713 = vmatprep.mubr.bf16.mxu0 %v3350_v50  ;;  %v3404_v49 = vld [vmem:[%s3634_s14 + $0x3ac] ss:$16 sps:$4 sm:$0xff]  }
  0xeb   : > { %1425 = vmatmul.mubr.bf16.gmra.mrb[80].mxu1 %v3352_v51  ;;  %1714 = vmatmul.mubr.bf16.gmra.mrb[80].mxu0 %v3353_v52 }
  0xec   : > { %1432 = vmatprep.mubr.bf16.mxu1 %v3354_v53  ;;  %1721 = vmatprep.mubr.bf16.mxu0 %v3356_v54 }
  0xf3   : > { %1433 = vmatmul.mubr.bf16.gmra.mrb[84].mxu1 %v3358_v55  ;;  %1722 = vmatmul.mubr.bf16.gmra.mrb[84].mxu0 %v3359_v56 }
  0xf4   : > { %1440 = vmatprep.mubr.bf16.mxu1 %v3360_v57  ;;  %1729 = vmatprep.mubr.bf16.mxu0 %v3362_v58 }
  0xfb   : > { %1441 = vmatmul.mubr.bf16.gmra.mrb[88].mxu1 %v3364_v59  ;;  %1730 = vmatmul.mubr.bf16.gmra.mrb[88].mxu0 %v3365_v60  ;;  %v3406_v60 = vld [vmem:[%s3634_s14 + $0x3a0] ss:$16 sps:$4 sm:$0xff]  }
  0xfc   : > { %1448 = vmatprep.mubr.bf16.mxu1 %v3366_v61  ;;  %1737 = vmatprep.mubr.bf16.mxu0 %v3368_v62 }
 0x103   : > { %1449 = vmatmul.mubr.bf16.gmra.mrb[92].mxu1 %v3370_v63  ;;  %1738 = vmatmul.mubr.bf16.gmra.mrb[92].mxu0 %v3371_v0  ;;  %v3407_v63 = vld [vmem:[%s3634_s14 + $0x3a8] ss:$16 sps:$4 sm:$0xff]   ;;  %v3408_v0 = vld [vmem:[%s3634_s14 + $0x3c4] ss:$16 sps:$4 sm:$0xff]  }
 0x104   : > { %1456 = vmatprep.mubr.bf16.mxu1 %v3372_v1  ;;  %1745 = vmatprep.mubr.bf16.mxu0 %v3374_v2 }
 0x10b   : > { %1457 = vmatmul.mubr.bf16.gmra.mrb[96].mxu1 %v3376_v3  ;;  %1746 = vmatmul.mubr.bf16.gmra.mrb[96].mxu0 %v3377_v4 }
 0x10c   : > { %1464 = vmatprep.mubr.bf16.mxu1 %v3378_v5  ;;  %1753 = vmatprep.mubr.bf16.mxu0 %v3380_v6  ;;  %v3410_v5 = vld [vmem:[%s3634_s14 + $0x3cc] ss:$16 sps:$4 sm:$0xff]  }
 0x113   : > { %1465 = vmatmul.mubr.bf16.gmra.mrb[100].mxu1 %v3382_v7  ;;  %1754 = vmatmul.mubr.bf16.gmra.mrb[100].mxu0 %v3383_v8 }
 0x114   : > { %1472 = vmatprep.mubr.bf16.mxu1 %v3384_v9  ;;  %1761 = vmatprep.mubr.bf16.mxu0 %v3386_v10 }
 0x11b   : > { %1473 = vmatmul.mubr.bf16.gmra.mrb[104].mxu1 %v3388_v11  ;;  %1762 = vmatmul.mubr.bf16.gmra.mrb[104].mxu0 %v3389_v12 }
 0x11c   : > { %1480 = vmatprep.mubr.bf16.mxu1 %v3390_v13  ;;  %1769 = vmatprep.mubr.bf16.mxu0 %v3392_v14 }
 0x11e   : > { %v1266_v16 = vpop.f32.mrb[0].mxu1  ;;  %v1555_v18 = vpop.f32.mrb[0].mxu0 }
 0x11f   : > { %v1267_v17 = vadd.f32 %v3810_v15, %v1266_v16  ;;  %v1268_v19 = vpop.f32.mrb[1].mxu1  ;;  %v1557_v21 = vpop.f32.mrb[1].mxu0 }
 0x120   : > { %v1269_v22 = vpop.f32.mrb[2].mxu1  ;;  %v1558_v27 = vpop.f32.mrb[2].mxu0  ;;  %v3414_v21 = vld [vmem:[%s3634_s14 + $0x3e4] ss:$16 sps:$4 sm:$0xff]  }
 0x121   : > { %v1556_v25 = vadd.f32 %v1555_v18, %v1267_v17  ;;  %v1270_v26 = vadd.f32 %v3810_v15, %v1269_v22  ;;  %v1271_v28 = vpop.f32.mrb[3].mxu1  ;;  %v1560_v30 = vpop.f32.mrb[3].mxu0  ;;  %v3412_v17 = vld [vmem:[%s3634_s14 + $0x3c0] ss:$16 sps:$4 sm:$0xff]  }
 0x123   : > { %v1810_v31 = vmax.f32 %v1556_v25, 0.0  ;;  %v1559_v32 = vadd.f32 %v1558_v27, %v1270_v26  ;;  %1481 = vmatmul.mubr.bf16.gmra.mrb[108].mxu1 %v3394_v20  ;;  %1770 = vmatmul.mubr.bf16.gmra.mrb[108].mxu0 %v3395_v23  ;;  %v3413_v20 = vld [vmem:[%s3634_s14 + $0x3c8] ss:$16 sps:$4 sm:$0xff]   ;;  %v3416_v26 = vld [vmem:[%s3634_s14 + $0x3ec] ss:$16 sps:$4 sm:$0xff]  }
 0x124   : > { %1488 = vmatprep.mubr.bf16.mxu1 %v3396_v24  ;;  %1777 = vmatprep.mubr.bf16.mxu0 %v3398_v29 }
 0x125   : > { %v2912_v33 = vpack.c.bf16 %v1810_v31, %v1810_v31  ;;  %v1811_v34 = vmax.f32 %v1559_v32, 0.0 }
 0x126   : > { %v1274_v35 = vpop.f32.mrb[4].mxu1  ;;  %v1563_v38 = vpop.f32.mrb[4].mxu0 }
 0x127   : > { %2131 = vst.msk [vmem:[%s3819_s12] sm:$0xf] %vm2130_vm0, %v2912_v33  ;;  %v2913_v36 = vpack.c.bf16 %v1811_v34, %v1811_v34  ;;  %v1275_v37 = vadd.f32 %v3810_v15, %v1274_v35  ;;  %v1276_v39 = vpop.f32.mrb[5].mxu1  ;;  %v1565_v41 = vpop.f32.mrb[5].mxu0 }
 0x128   : > { %v1277_v42 = vpop.f32.mrb[6].mxu1  ;;  %v1566_v47 = vpop.f32.mrb[6].mxu0 }
 0x129   : > { %2132 = vst.msk [vmem:[%s3819_s12 + $0x4] sm:$0xf] %vm2130_vm0, %v2913_v36  ;;  %v1564_v45 = vadd.f32 %v1563_v38, %v1275_v37  ;;  %v1278_v46 = vadd.f32 %v3810_v15, %v1277_v42  ;;  %v1279_v48 = vpop.f32.mrb[7].mxu1  ;;  %v1568_v50 = vpop.f32.mrb[7].mxu0  ;;  %v3418_v37 = vld [vmem:[%s3634_s14 + $0x3e0] ss:$16 sps:$4 sm:$0xff]  }
 0x12b   : > { %v1812_v51 = vmax.f32 %v1564_v45, 0.0  ;;  %v1567_v52 = vadd.f32 %v1566_v47, %v1278_v46  ;;  %1489 = vmatmul.mubr.bf16.gmra.mrb[112].mxu1 %v3400_v40  ;;  %1778 = vmatmul.mubr.bf16.gmra.mrb[112].mxu0 %v3401_v43  ;;  %v3419_v40 = vld [vmem:[%s3634_s14 + $0x3e8] ss:$16 sps:$4 sm:$0xff]  }
 0x12c   : > { %1496 = vmatprep.mubr.bf16.mxu1 %v3402_v44  ;;  %1785 = vmatprep.mubr.bf16.mxu0 %v3404_v49 }
 0x12d   : > { %v2914_v53 = vpack.c.bf16 %v1812_v51, %v1812_v51  ;;  %v1813_v54 = vmax.f32 %v1567_v52, 0.0 }
 0x12e   : > { %v1282_v55 = vpop.f32.mrb[8].mxu1  ;;  %v1571_v58 = vpop.f32.mrb[8].mxu0 }
 0x12f   : > { %2133 = vst.msk [vmem:[%s3819_s12 + $0x8] sm:$0xf] %vm2130_vm0, %v2914_v53  ;;  %v2915_v56 = vpack.c.bf16 %v1813_v54, %v1813_v54  ;;  %v1283_v57 = vadd.f32 %v3810_v15, %v1282_v55  ;;  %v1284_v59 = vpop.f32.mrb[9].mxu1  ;;  %v1573_v61 = vpop.f32.mrb[9].mxu0 }
 0x130   : > { %v1285_v62 = vpop.f32.mrb[10].mxu1  ;;  %v1574_v3 = vpop.f32.mrb[10].mxu0 }
 0x131   : > { %2134 = vst.msk [vmem:[%s3819_s12 + $0xc] sm:$0xf] %vm2130_vm0, %v2915_v56  ;;  %v1572_v1 = vadd.f32 %v1571_v58, %v1283_v57  ;;  %v1286_v2 = vadd.f32 %v3810_v15, %v1285_v62  ;;  %v1287_v4 = vpop.f32.mrb[11].mxu1  ;;  %v1576_v6 = vpop.f32.mrb[11].mxu0 }
 0x133   : > { %v1814_v7 = vmax.f32 %v1572_v1, 0.0  ;;  %v1575_v8 = vadd.f32 %v1574_v3, %v1286_v2  ;;  %1497 = vmatmul.mubr.bf16.gmra.mrb[116].mxu1 %v3406_v60  ;;  %1786 = vmatmul.mubr.bf16.gmra.mrb[116].mxu0 %v3407_v63 }
 0x134   : > { %1504 = vmatprep.mubr.bf16.mxu1 %v3408_v0  ;;  %1793 = vmatprep.mubr.bf16.mxu0 %v3410_v5 }
 0x135   : > { %v2916_v9 = vpack.c.bf16 %v1814_v7, %v1814_v7  ;;  %v1815_v10 = vmax.f32 %v1575_v8, 0.0 }
 0x136   : > { %v1290_v11 = vpop.f32.mrb[12].mxu1  ;;  %v1579_v14 = vpop.f32.mrb[12].mxu0 }
 0x137   : > { %2135 = vst.msk [vmem:[%s3819_s12 + $0x10] sm:$0xf] %vm2130_vm0, %v2916_v9  ;;  %v2917_v12 = vpack.c.bf16 %v1815_v10, %v1815_v10  ;;  %v1291_v13 = vadd.f32 %v3810_v15, %v1290_v11  ;;  %v1292_v16 = vpop.f32.mrb[13].mxu1  ;;  %v1581_v18 = vpop.f32.mrb[13].mxu0 }
 0x138   : > { %v1293_v19 = vpop.f32.mrb[14].mxu1  ;;  %v1582_v24 = vpop.f32.mrb[14].mxu0 }
 0x139   : > { %2136 = vst.msk [vmem:[%s3819_s12 + $0x14] sm:$0xf] %vm2130_vm0, %v2917_v12  ;;  %v1580_v22 = vadd.f32 %v1579_v14, %v1291_v13  ;;  %v1294_v23 = vadd.f32 %v3810_v15, %v1293_v19  ;;  %v1295_v25 = vpop.f32.mrb[15].mxu1  ;;  %v1584_v27 = vpop.f32.mrb[15].mxu0 }
 0x13b   : > { %v1816_v28 = vmax.f32 %v1580_v22, 0.0  ;;  %v1583_v29 = vadd.f32 %v1582_v24, %v1294_v23  ;;  %1505 = vmatmul.mubr.bf16.gmra.mrb[120].mxu1 %v3412_v17  ;;  %1794 = vmatmul.mubr.bf16.gmra.mrb[120].mxu0 %v3413_v20 }
 0x13c   : > { %1512 = vmatprep.mubr.bf16.mxu1 %v3414_v21  ;;  %1801 = vmatprep.mubr.bf16.mxu0 %v3416_v26 }
 0x13d   : > { %v2918_v30 = vpack.c.bf16 %v1816_v28, %v1816_v28  ;;  %v1817_v31 = vmax.f32 %v1583_v29, 0.0 }
 0x13e   : > { %v1298_v32 = vpop.f32.mrb[16].mxu1  ;;  %v1587_v35 = vpop.f32.mrb[16].mxu0 }
 0x13f   : > { %2137 = vst.msk [vmem:[%s3819_s12 + $0x18] sm:$0xf] %vm2130_vm0, %v2918_v30  ;;  %v2919_v33 = vpack.c.bf16 %v1817_v31, %v1817_v31  ;;  %v1299_v34 = vadd.f32 %v3810_v15, %v1298_v32  ;;  %v1300_v36 = vpop.f32.mrb[17].mxu1  ;;  %v1589_v38 = vpop.f32.mrb[17].mxu0 }
 0x140   : > { %v1301_v39 = vpop.f32.mrb[18].mxu1  ;;  %v1590_v43 = vpop.f32.mrb[18].mxu0 }
 0x141   : > { %2138 = vst.msk [vmem:[%s3819_s12 + $0x1c] sm:$0xf] %vm2130_vm0, %v2919_v33  ;;  %v1588_v41 = vadd.f32 %v1587_v35, %v1299_v34  ;;  %v1302_v42 = vadd.f32 %v3810_v15, %v1301_v39  ;;  %v1303_v44 = vpop.f32.mrb[19].mxu1  ;;  %v1592_v45 = vpop.f32.mrb[19].mxu0 }
 0x143   : > { %v1818_v46 = vmax.f32 %v1588_v41, 0.0  ;;  %v1591_v47 = vadd.f32 %v1590_v43, %v1302_v42  ;;  %1513 = vmatmul.mubr.bf16.gmra.mrb[124].mxu1 %v3418_v37  ;;  %1802 = vmatmul.mubr.bf16.gmra.mrb[124].mxu0 %v3419_v40 }
 0x145   : > { %v2920_v48 = vpack.c.bf16 %v1818_v46, %v1818_v46  ;;  %v1819_v49 = vmax.f32 %v1591_v47, 0.0 }
 0x146   : > { %v1306_v50 = vpop.f32.mrb[20].mxu1  ;;  %v1595_v53 = vpop.f32.mrb[20].mxu0 }
 0x147   : > { %2139 = vst.msk [vmem:[%s3819_s12 + $0x20] sm:$0xf] %vm2130_vm0, %v2920_v48  ;;  %v2921_v51 = vpack.c.bf16 %v1819_v49, %v1819_v49  ;;  %v1307_v52 = vadd.f32 %v3810_v15, %v1306_v50  ;;  %v1308_v54 = vpop.f32.mrb[21].mxu1  ;;  %v1597_v55 = vpop.f32.mrb[21].mxu0 }
 0x148   : > { %v1309_v56 = vpop.f32.mrb[22].mxu1  ;;  %v1598_v59 = vpop.f32.mrb[22].mxu0 }
 0x149   : > { %2140 = vst.msk [vmem:[%s3819_s12 + $0x24] sm:$0xf] %vm2130_vm0, %v2921_v51  ;;  %v1596_v57 = vadd.f32 %v1595_v53, %v1307_v52  ;;  %v1310_v58 = vadd.f32 %v3810_v15, %v1309_v56  ;;  %v1311_v60 = vpop.f32.mrb[23].mxu1  ;;  %v1600_v61 = vpop.f32.mrb[23].mxu0 }
 0x14b   : > { %v1820_v62 = vmax.f32 %v1596_v57, 0.0  ;;  %v1599_v63 = vadd.f32 %v1598_v59, %v1310_v58 }
 0x14d   : > { %v2922_v0 = vpack.c.bf16 %v1820_v62, %v1820_v62  ;;  %v1821_v1 = vmax.f32 %v1599_v63, 0.0 }
 0x14e   : > { %v1314_v2 = vpop.f32.mrb[24].mxu1  ;;  %v1603_v5 = vpop.f32.mrb[24].mxu0 }
 0x14f   : > { %2141 = vst.msk [vmem:[%s3819_s12 + $0x28] sm:$0xf] %vm2130_vm0, %v2922_v0  ;;  %v2923_v3 = vpack.c.bf16 %v1821_v1, %v1821_v1  ;;  %v1315_v4 = vadd.f32 %v3810_v15, %v1314_v2  ;;  %v1316_v6 = vpop.f32.mrb[25].mxu1  ;;  %v1605_v7 = vpop.f32.mrb[25].mxu0 }
 0x150   : > { %v1317_v8 = vpop.f32.mrb[26].mxu1  ;;  %v1606_v11 = vpop.f32.mrb[26].mxu0 }
 0x151   : > { %2142 = vst.msk [vmem:[%s3819_s12 + $0x2c] sm:$0xf] %vm2130_vm0, %v2923_v3  ;;  %v1604_v9 = vadd.f32 %v1603_v5, %v1315_v4  ;;  %v1318_v10 = vadd.f32 %v3810_v15, %v1317_v8  ;;  %v1319_v12 = vpop.f32.mrb[27].mxu1  ;;  %v1608_v13 = vpop.f32.mrb[27].mxu0 }
 0x153   : > { %v1822_v14 = vmax.f32 %v1604_v9, 0.0  ;;  %v1607_v16 = vadd.f32 %v1606_v11, %v1318_v10 }
 0x155   : > { %v2924_v17 = vpack.c.bf16 %v1822_v14, %v1822_v14  ;;  %v1823_v18 = vmax.f32 %v1607_v16, 0.0 }
 0x156   : > { %v1322_v19 = vpop.f32.mrb[28].mxu1  ;;  %v1611_v22 = vpop.f32.mrb[28].mxu0 }
 0x157   : > { %2143 = vst.msk [vmem:[%s3819_s12 + $0x30] sm:$0xf] %vm2130_vm0, %v2924_v17  ;;  %v2925_v20 = vpack.c.bf16 %v1823_v18, %v1823_v18  ;;  %v1323_v21 = vadd.f32 %v3810_v15, %v1322_v19  ;;  %v1324_v23 = vpop.f32.mrb[29].mxu1  ;;  %v1613_v24 = vpop.f32.mrb[29].mxu0 }
 0x158   : > { %v1325_v25 = vpop.f32.mrb[30].mxu1  ;;  %v1614_v28 = vpop.f32.mrb[30].mxu0 }
 0x159   : > { %2144 = vst.msk [vmem:[%s3819_s12 + $0x34] sm:$0xf] %vm2130_vm0, %v2925_v20  ;;  %v1612_v26 = vadd.f32 %v1611_v22, %v1323_v21  ;;  %v1326_v27 = vadd.f32 %v3810_v15, %v1325_v25  ;;  %v1327_v29 = vpop.f32.mrb[31].mxu1  ;;  %v1616_v30 = vpop.f32.mrb[31].mxu0 }
 0x15b   : > { %v1824_v31 = vmax.f32 %v1612_v26, 0.0  ;;  %v1615_v32 = vadd.f32 %v1614_v28, %v1326_v27 }
 0x15d   : > { %v2926_v33 = vpack.c.bf16 %v1824_v31, %v1824_v31  ;;  %v1825_v34 = vmax.f32 %v1615_v32, 0.0 }
 0x15e   : > { %v1330_v35 = vpop.f32.mrb[32].mxu1  ;;  %v1619_v38 = vpop.f32.mrb[32].mxu0 }
 0x15f   : > { %2145 = vst.msk [vmem:[%s3819_s12 + $0x38] sm:$0xf] %vm2130_vm0, %v2926_v33  ;;  %v2927_v36 = vpack.c.bf16 %v1825_v34, %v1825_v34  ;;  %v1331_v37 = vadd.f32 %v3810_v15, %v1330_v35  ;;  %v1332_v39 = vpop.f32.mrb[33].mxu1  ;;  %v1621_v40 = vpop.f32.mrb[33].mxu0 }
 0x160   : > { %v1333_v41 = vpop.f32.mrb[34].mxu1  ;;  %v1622_v44 = vpop.f32.mrb[34].mxu0 }
 0x161   : > { %2146 = vst.msk [vmem:[%s3819_s12 + $0x3c] sm:$0xf] %vm2130_vm0, %v2927_v36  ;;  %v1620_v42 = vadd.f32 %v1619_v38, %v1331_v37  ;;  %v1334_v43 = vadd.f32 %v3810_v15, %v1333_v41  ;;  %v1335_v45 = vpop.f32.mrb[35].mxu1  ;;  %v1624_v46 = vpop.f32.mrb[35].mxu0 }
 0x163   : > { %v1826_v47 = vmax.f32 %v1620_v42, 0.0  ;;  %v1623_v48 = vadd.f32 %v1622_v44, %v1334_v43 }
 0x165   : > { %v2928_v49 = vpack.c.bf16 %v1826_v47, %v1826_v47  ;;  %v1827_v50 = vmax.f32 %v1623_v48, 0.0 }
 0x166   : > { %v1338_v51 = vpop.f32.mrb[36].mxu1  ;;  %v1627_v54 = vpop.f32.mrb[36].mxu0 }
 0x167   : > { %2147 = vst.msk [vmem:[%s3819_s12 + $0x40] sm:$0xf] %vm2130_vm0, %v2928_v49  ;;  %v2929_v52 = vpack.c.bf16 %v1827_v50, %v1827_v50  ;;  %v1339_v53 = vadd.f32 %v3810_v15, %v1338_v51  ;;  %v1340_v55 = vpop.f32.mrb[37].mxu1  ;;  %v1629_v56 = vpop.f32.mrb[37].mxu0 }
 0x168   : > { %v1341_v57 = vpop.f32.mrb[38].mxu1  ;;  %v1630_v60 = vpop.f32.mrb[38].mxu0 }
 0x169   : > { %2148 = vst.msk [vmem:[%s3819_s12 + $0x44] sm:$0xf] %vm2130_vm0, %v2929_v52  ;;  %v1628_v58 = vadd.f32 %v1627_v54, %v1339_v53  ;;  %v1342_v59 = vadd.f32 %v3810_v15, %v1341_v57  ;;  %v1343_v61 = vpop.f32.mrb[39].mxu1  ;;  %v1632_v62 = vpop.f32.mrb[39].mxu0 }
 0x16b   : > { %v1828_v63 = vmax.f32 %v1628_v58, 0.0  ;;  %v1631_v0 = vadd.f32 %v1630_v60, %v1342_v59 }
 0x16d   : > { %v2930_v1 = vpack.c.bf16 %v1828_v63, %v1828_v63  ;;  %v1829_v2 = vmax.f32 %v1631_v0, 0.0 }
 0x16e   : > { %v1346_v3 = vpop.f32.mrb[40].mxu1  ;;  %v1635_v6 = vpop.f32.mrb[40].mxu0 }
 0x16f   : > { %2149 = vst.msk [vmem:[%s3819_s12 + $0x48] sm:$0xf] %vm2130_vm0, %v2930_v1  ;;  %v2931_v4 = vpack.c.bf16 %v1829_v2, %v1829_v2  ;;  %v1347_v5 = vadd.f32 %v3810_v15, %v1346_v3  ;;  %v1348_v7 = vpop.f32.mrb[41].mxu1  ;;  %v1637_v8 = vpop.f32.mrb[41].mxu0 }
 0x170   : > { %v1349_v9 = vpop.f32.mrb[42].mxu1  ;;  %v1638_v12 = vpop.f32.mrb[42].mxu0 }
 0x171   : > { %2150 = vst.msk [vmem:[%s3819_s12 + $0x4c] sm:$0xf] %vm2130_vm0, %v2931_v4  ;;  %v1636_v10 = vadd.f32 %v1635_v6, %v1347_v5  ;;  %v1350_v11 = vadd.f32 %v3810_v15, %v1349_v9  ;;  %v1351_v13 = vpop.f32.mrb[43].mxu1  ;;  %v1640_v14 = vpop.f32.mrb[43].mxu0 }
 0x173   : > { %v1830_v16 = vmax.f32 %v1636_v10, 0.0  ;;  %v1639_v17 = vadd.f32 %v1638_v12, %v1350_v11 }
 0x175   : > { %v2932_v18 = vpack.c.bf16 %v1830_v16, %v1830_v16  ;;  %v1831_v19 = vmax.f32 %v1639_v17, 0.0 }
 0x176   : > { %v1354_v20 = vpop.f32.mrb[44].mxu1  ;;  %v1643_v23 = vpop.f32.mrb[44].mxu0 }
 0x177   : > { %2151 = vst.msk [vmem:[%s3819_s12 + $0x50] sm:$0xf] %vm2130_vm0, %v2932_v18  ;;  %v2933_v21 = vpack.c.bf16 %v1831_v19, %v1831_v19  ;;  %v1355_v22 = vadd.f32 %v3810_v15, %v1354_v20  ;;  %v1356_v24 = vpop.f32.mrb[45].mxu1  ;;  %v1645_v25 = vpop.f32.mrb[45].mxu0 }
 0x178   : > { %v1357_v26 = vpop.f32.mrb[46].mxu1  ;;  %v1646_v29 = vpop.f32.mrb[46].mxu0 }
 0x179   : > { %2152 = vst.msk [vmem:[%s3819_s12 + $0x54] sm:$0xf] %vm2130_vm0, %v2933_v21  ;;  %v1644_v27 = vadd.f32 %v1643_v23, %v1355_v22  ;;  %v1358_v28 = vadd.f32 %v3810_v15, %v1357_v26  ;;  %v1359_v30 = vpop.f32.mrb[47].mxu1  ;;  %v1648_v31 = vpop.f32.mrb[47].mxu0 }
 0x17b   : > { %v1832_v32 = vmax.f32 %v1644_v27, 0.0  ;;  %v1647_v33 = vadd.f32 %v1646_v29, %v1358_v28 }
 0x17d   : > { %v2934_v34 = vpack.c.bf16 %v1832_v32, %v1832_v32  ;;  %v1833_v35 = vmax.f32 %v1647_v33, 0.0 }
 0x17e   : > { %v1362_v36 = vpop.f32.mrb[48].mxu1  ;;  %v1651_v39 = vpop.f32.mrb[48].mxu0 }
 0x17f   : > { %2153 = vst.msk [vmem:[%s3819_s12 + $0x58] sm:$0xf] %vm2130_vm0, %v2934_v34  ;;  %v2935_v37 = vpack.c.bf16 %v1833_v35, %v1833_v35  ;;  %v1363_v38 = vadd.f32 %v3810_v15, %v1362_v36  ;;  %v1364_v40 = vpop.f32.mrb[49].mxu1  ;;  %v1653_v41 = vpop.f32.mrb[49].mxu0 }
 0x180   : > { %v1365_v42 = vpop.f32.mrb[50].mxu1  ;;  %v1654_v45 = vpop.f32.mrb[50].mxu0 }
 0x181   : > { %2154 = vst.msk [vmem:[%s3819_s12 + $0x5c] sm:$0xf] %vm2130_vm0, %v2935_v37  ;;  %v1652_v43 = vadd.f32 %v1651_v39, %v1363_v38  ;;  %v1366_v44 = vadd.f32 %v3810_v15, %v1365_v42  ;;  %v1367_v46 = vpop.f32.mrb[51].mxu1  ;;  %v1656_v47 = vpop.f32.mrb[51].mxu0 }
 0x183   : > { %v1834_v48 = vmax.f32 %v1652_v43, 0.0  ;;  %v1655_v49 = vadd.f32 %v1654_v45, %v1366_v44 }
 0x185   : > { %v2936_v50 = vpack.c.bf16 %v1834_v48, %v1834_v48  ;;  %v1835_v51 = vmax.f32 %v1655_v49, 0.0 }
 0x186   : > { %v1370_v52 = vpop.f32.mrb[52].mxu1  ;;  %v1659_v55 = vpop.f32.mrb[52].mxu0 }
 0x187   : > { %2155 = vst.msk [vmem:[%s3819_s12 + $0x60] sm:$0xf] %vm2130_vm0, %v2936_v50  ;;  %v2937_v53 = vpack.c.bf16 %v1835_v51, %v1835_v51  ;;  %v1371_v54 = vadd.f32 %v3810_v15, %v1370_v52  ;;  %v1372_v56 = vpop.f32.mrb[53].mxu1  ;;  %v1661_v57 = vpop.f32.mrb[53].mxu0 }
 0x188   : > { %v1373_v58 = vpop.f32.mrb[54].mxu1  ;;  %v1662_v61 = vpop.f32.mrb[54].mxu0 }
 0x189   : > { %2156 = vst.msk [vmem:[%s3819_s12 + $0x64] sm:$0xf] %vm2130_vm0, %v2937_v53  ;;  %v1660_v59 = vadd.f32 %v1659_v55, %v1371_v54  ;;  %v1374_v60 = vadd.f32 %v3810_v15, %v1373_v58  ;;  %v1375_v62 = vpop.f32.mrb[55].mxu1  ;;  %v1664_v63 = vpop.f32.mrb[55].mxu0 }
 0x18b   : > { %v1836_v0 = vmax.f32 %v1660_v59, 0.0  ;;  %v1663_v1 = vadd.f32 %v1662_v61, %v1374_v60 }
 0x18d   : > { %v2938_v2 = vpack.c.bf16 %v1836_v0, %v1836_v0  ;;  %v1837_v3 = vmax.f32 %v1663_v1, 0.0 }
 0x18e   : > { %v1378_v4 = vpop.f32.mrb[56].mxu1  ;;  %v1667_v7 = vpop.f32.mrb[56].mxu0 }
 0x18f   : > { %2157 = vst.msk [vmem:[%s3819_s12 + $0x68] sm:$0xf] %vm2130_vm0, %v2938_v2  ;;  %v2939_v5 = vpack.c.bf16 %v1837_v3, %v1837_v3  ;;  %v1379_v6 = vadd.f32 %v3810_v15, %v1378_v4  ;;  %v1380_v8 = vpop.f32.mrb[57].mxu1  ;;  %v1669_v9 = vpop.f32.mrb[57].mxu0 }
 0x190   : > { %v1381_v10 = vpop.f32.mrb[58].mxu1  ;;  %v1670_v13 = vpop.f32.mrb[58].mxu0 }
 0x191   : > { %2158 = vst.msk [vmem:[%s3819_s12 + $0x6c] sm:$0xf] %vm2130_vm0, %v2939_v5  ;;  %v1668_v11 = vadd.f32 %v1667_v7, %v1379_v6  ;;  %v1382_v12 = vadd.f32 %v3810_v15, %v1381_v10  ;;  %v1383_v14 = vpop.f32.mrb[59].mxu1  ;;  %v1672_v16 = vpop.f32.mrb[59].mxu0 }
 0x193   : > { %v1838_v17 = vmax.f32 %v1668_v11, 0.0  ;;  %v1671_v18 = vadd.f32 %v1670_v13, %v1382_v12 }
 0x195   : > { %v2940_v19 = vpack.c.bf16 %v1838_v17, %v1838_v17  ;;  %v1839_v20 = vmax.f32 %v1671_v18, 0.0 }
 0x196   : > { %v1386_v21 = vpop.f32.mrb[60].mxu1  ;;  %v1675_v24 = vpop.f32.mrb[60].mxu0 }
 0x197   : > { %2159 = vst.msk [vmem:[%s3819_s12 + $0x70] sm:$0xf] %vm2130_vm0, %v2940_v19  ;;  %v2941_v22 = vpack.c.bf16 %v1839_v20, %v1839_v20  ;;  %v1387_v23 = vadd.f32 %v3810_v15, %v1386_v21  ;;  %v1388_v25 = vpop.f32.mrb[61].mxu1  ;;  %v1677_v26 = vpop.f32.mrb[61].mxu0 }
 0x198   : > { %v1389_v27 = vpop.f32.mrb[62].mxu1  ;;  %v1678_v30 = vpop.f32.mrb[62].mxu0 }
 0x199   : > { %2160 = vst.msk [vmem:[%s3819_s12 + $0x74] sm:$0xf] %vm2130_vm0, %v2941_v22  ;;  %v1676_v28 = vadd.f32 %v1675_v24, %v1387_v23  ;;  %v1390_v29 = vadd.f32 %v3810_v15, %v1389_v27  ;;  %v1391_v31 = vpop.f32.mrb[63].mxu1  ;;  %v1680_v32 = vpop.f32.mrb[63].mxu0 }
 0x19b   : > { %v1840_v33 = vmax.f32 %v1676_v28, 0.0  ;;  %v1679_v34 = vadd.f32 %v1678_v30, %v1390_v29 }
 0x19d   : > { %v2942_v35 = vpack.c.bf16 %v1840_v33, %v1840_v33  ;;  %v1841_v36 = vmax.f32 %v1679_v34, 0.0 }
 0x19e   : > { %v1394_v37 = vpop.f32.mrb[64].mxu1  ;;  %v1683_v40 = vpop.f32.mrb[64].mxu0 }
 0x19f   : > { %2161 = vst.msk [vmem:[%s3819_s12 + $0x78] sm:$0xf] %vm2130_vm0, %v2942_v35  ;;  %v2943_v38 = vpack.c.bf16 %v1841_v36, %v1841_v36  ;;  %v1395_v39 = vadd.f32 %v3810_v15, %v1394_v37  ;;  %v1396_v41 = vpop.f32.mrb[65].mxu1  ;;  %v1685_v42 = vpop.f32.mrb[65].mxu0 }
 0x1a0   : > { %v1397_v43 = vpop.f32.mrb[66].mxu1  ;;  %v1686_v46 = vpop.f32.mrb[66].mxu0 }
 0x1a1   : > { %2162 = vst.msk [vmem:[%s3819_s12 + $0x7c] sm:$0xf] %vm2130_vm0, %v2943_v38  ;;  %v1684_v44 = vadd.f32 %v1683_v40, %v1395_v39  ;;  %v1398_v45 = vadd.f32 %v3810_v15, %v1397_v43  ;;  %v1399_v47 = vpop.f32.mrb[67].mxu1  ;;  %v1688_v48 = vpop.f32.mrb[67].mxu0 }
 0x1a3   : > { %v1842_v49 = vmax.f32 %v1684_v44, 0.0  ;;  %v1687_v50 = vadd.f32 %v1686_v46, %v1398_v45 }
 0x1a5   : > { %v2944_v51 = vpack.c.bf16 %v1842_v49, %v1842_v49  ;;  %v1843_v52 = vmax.f32 %v1687_v50, 0.0 }
 0x1a6   : > { %v1402_v53 = vpop.f32.mrb[68].mxu1  ;;  %v1691_v56 = vpop.f32.mrb[68].mxu0 }
 0x1a7   : > { %2163 = vst.msk [vmem:[%s3819_s12 + $0x80] sm:$0xf] %vm2130_vm0, %v2944_v51  ;;  %v2945_v54 = vpack.c.bf16 %v1843_v52, %v1843_v52  ;;  %v1403_v55 = vadd.f32 %v3810_v15, %v1402_v53  ;;  %v1404_v57 = vpop.f32.mrb[69].mxu1  ;;  %v1693_v58 = vpop.f32.mrb[69].mxu0 }
 0x1a8   : > { %v1405_v59 = vpop.f32.mrb[70].mxu1  ;;  %v1694_v62 = vpop.f32.mrb[70].mxu0 }
 0x1a9   : > { %2164 = vst.msk [vmem:[%s3819_s12 + $0x84] sm:$0xf] %vm2130_vm0, %v2945_v54  ;;  %v1692_v60 = vadd.f32 %v1691_v56, %v1403_v55  ;;  %v1406_v61 = vadd.f32 %v3810_v15, %v1405_v59  ;;  %v1407_v63 = vpop.f32.mrb[71].mxu1  ;;  %v1696_v0 = vpop.f32.mrb[71].mxu0 }
 0x1ab   : > { %v1844_v1 = vmax.f32 %v1692_v60, 0.0  ;;  %v1695_v2 = vadd.f32 %v1694_v62, %v1406_v61 }
 0x1ad   : > { %v2946_v3 = vpack.c.bf16 %v1844_v1, %v1844_v1  ;;  %v1845_v4 = vmax.f32 %v1695_v2, 0.0 }
 0x1ae   : > { %v1410_v5 = vpop.f32.mrb[72].mxu1  ;;  %v1699_v8 = vpop.f32.mrb[72].mxu0 }
 0x1af   : > { %2165 = vst.msk [vmem:[%s3819_s12 + $0x88] sm:$0xf] %vm2130_vm0, %v2946_v3  ;;  %v2947_v6 = vpack.c.bf16 %v1845_v4, %v1845_v4  ;;  %v1411_v7 = vadd.f32 %v3810_v15, %v1410_v5  ;;  %v1412_v9 = vpop.f32.mrb[73].mxu1  ;;  %v1701_v10 = vpop.f32.mrb[73].mxu0 }
 0x1b0   : > { %v1413_v11 = vpop.f32.mrb[74].mxu1  ;;  %v1702_v14 = vpop.f32.mrb[74].mxu0 }
 0x1b1   : > { %2166 = vst.msk [vmem:[%s3819_s12 + $0x8c] sm:$0xf] %vm2130_vm0, %v2947_v6  ;;  %v1700_v12 = vadd.f32 %v1699_v8, %v1411_v7  ;;  %v1414_v13 = vadd.f32 %v3810_v15, %v1413_v11  ;;  %v1415_v16 = vpop.f32.mrb[75].mxu1  ;;  %v1704_v17 = vpop.f32.mrb[75].mxu0 }
 0x1b3   : > { %v1846_v18 = vmax.f32 %v1700_v12, 0.0  ;;  %v1703_v19 = vadd.f32 %v1702_v14, %v1414_v13 }
 0x1b5   : > { %v2948_v20 = vpack.c.bf16 %v1846_v18, %v1846_v18  ;;  %v1847_v21 = vmax.f32 %v1703_v19, 0.0 }
 0x1b6   : > { %v1418_v22 = vpop.f32.mrb[76].mxu1  ;;  %v1707_v25 = vpop.f32.mrb[76].mxu0 }
 0x1b7   : > { %2167 = vst.msk [vmem:[%s3819_s12 + $0x90] sm:$0xf] %vm2130_vm0, %v2948_v20  ;;  %v2949_v23 = vpack.c.bf16 %v1847_v21, %v1847_v21  ;;  %v1419_v24 = vadd.f32 %v3810_v15, %v1418_v22  ;;  %v1420_v26 = vpop.f32.mrb[77].mxu1  ;;  %v1709_v27 = vpop.f32.mrb[77].mxu0 }
 0x1b8   : > { %v1421_v28 = vpop.f32.mrb[78].mxu1  ;;  %v1710_v31 = vpop.f32.mrb[78].mxu0 }
 0x1b9   : > { %2168 = vst.msk [vmem:[%s3819_s12 + $0x94] sm:$0xf] %vm2130_vm0, %v2949_v23  ;;  %v1708_v29 = vadd.f32 %v1707_v25, %v1419_v24  ;;  %v1422_v30 = vadd.f32 %v3810_v15, %v1421_v28  ;;  %v1423_v32 = vpop.f32.mrb[79].mxu1  ;;  %v1712_v33 = vpop.f32.mrb[79].mxu0 }
 0x1bb   : > { %v1848_v34 = vmax.f32 %v1708_v29, 0.0  ;;  %v1711_v35 = vadd.f32 %v1710_v31, %v1422_v30 }
 0x1bd   : > { %v2950_v36 = vpack.c.bf16 %v1848_v34, %v1848_v34  ;;  %v1849_v37 = vmax.f32 %v1711_v35, 0.0 }
 0x1be   : > { %v1426_v38 = vpop.f32.mrb[80].mxu1  ;;  %v1715_v41 = vpop.f32.mrb[80].mxu0 }
 0x1bf   : > { %2169 = vst.msk [vmem:[%s3819_s12 + $0x98] sm:$0xf] %vm2130_vm0, %v2950_v36  ;;  %v2951_v39 = vpack.c.bf16 %v1849_v37, %v1849_v37  ;;  %v1427_v40 = vadd.f32 %v3810_v15, %v1426_v38  ;;  %v1428_v42 = vpop.f32.mrb[81].mxu1  ;;  %v1717_v43 = vpop.f32.mrb[81].mxu0 }
 0x1c0   : > { %v1429_v44 = vpop.f32.mrb[82].mxu1  ;;  %v1718_v47 = vpop.f32.mrb[82].mxu0 }
 0x1c1   : > { %2170 = vst.msk [vmem:[%s3819_s12 + $0x9c] sm:$0xf] %vm2130_vm0, %v2951_v39  ;;  %v1716_v45 = vadd.f32 %v1715_v41, %v1427_v40  ;;  %v1430_v46 = vadd.f32 %v3810_v15, %v1429_v44  ;;  %v1431_v48 = vpop.f32.mrb[83].mxu1  ;;  %v1720_v49 = vpop.f32.mrb[83].mxu0 }
 0x1c3   : > { %v1850_v50 = vmax.f32 %v1716_v45, 0.0  ;;  %v1719_v51 = vadd.f32 %v1718_v47, %v1430_v46 }
 0x1c5   : > { %v2952_v52 = vpack.c.bf16 %v1850_v50, %v1850_v50  ;;  %v1851_v53 = vmax.f32 %v1719_v51, 0.0 }
 0x1c6   : > { %v1434_v54 = vpop.f32.mrb[84].mxu1  ;;  %v1723_v57 = vpop.f32.mrb[84].mxu0 }
 0x1c7   : > { %2171 = vst.msk [vmem:[%s3819_s12 + $0xa0] sm:$0xf] %vm2130_vm0, %v2952_v52  ;;  %v2953_v55 = vpack.c.bf16 %v1851_v53, %v1851_v53  ;;  %v1435_v56 = vadd.f32 %v3810_v15, %v1434_v54  ;;  %v1436_v58 = vpop.f32.mrb[85].mxu1  ;;  %v1725_v59 = vpop.f32.mrb[85].mxu0 }
 0x1c8   : > { %v1437_v60 = vpop.f32.mrb[86].mxu1  ;;  %v1726_v63 = vpop.f32.mrb[86].mxu0 }
 0x1c9   : > { %2172 = vst.msk [vmem:[%s3819_s12 + $0xa4] sm:$0xf] %vm2130_vm0, %v2953_v55  ;;  %v1724_v61 = vadd.f32 %v1723_v57, %v1435_v56  ;;  %v1438_v62 = vadd.f32 %v3810_v15, %v1437_v60  ;;  %v1439_v0 = vpop.f32.mrb[87].mxu1  ;;  %v1728_v1 = vpop.f32.mrb[87].mxu0 }
 0x1cb   : > { %v1852_v2 = vmax.f32 %v1724_v61, 0.0  ;;  %v1727_v3 = vadd.f32 %v1726_v63, %v1438_v62 }
 0x1cd   : > { %v2954_v4 = vpack.c.bf16 %v1852_v2, %v1852_v2  ;;  %v1853_v5 = vmax.f32 %v1727_v3, 0.0 }
 0x1ce   : > { %v1442_v6 = vpop.f32.mrb[88].mxu1  ;;  %v1731_v9 = vpop.f32.mrb[88].mxu0 }
 0x1cf   : > { %2173 = vst.msk [vmem:[%s3819_s12 + $0xa8] sm:$0xf] %vm2130_vm0, %v2954_v4  ;;  %v2955_v7 = vpack.c.bf16 %v1853_v5, %v1853_v5  ;;  %v1443_v8 = vadd.f32 %v3810_v15, %v1442_v6  ;;  %v1444_v10 = vpop.f32.mrb[89].mxu1  ;;  %v1733_v11 = vpop.f32.mrb[89].mxu0 }
 0x1d0   : > { %v1445_v12 = vpop.f32.mrb[90].mxu1  ;;  %v1734_v16 = vpop.f32.mrb[90].mxu0 }
 0x1d1   : > { %2174 = vst.msk [vmem:[%s3819_s12 + $0xac] sm:$0xf] %vm2130_vm0, %v2955_v7  ;;  %v1732_v13 = vadd.f32 %v1731_v9, %v1443_v8  ;;  %v1446_v14 = vadd.f32 %v3810_v15, %v1445_v12  ;;  %v1447_v17 = vpop.f32.mrb[91].mxu1  ;;  %v1736_v18 = vpop.f32.mrb[91].mxu0 }
 0x1d3   : > { %v1854_v19 = vmax.f32 %v1732_v13, 0.0  ;;  %v1735_v20 = vadd.f32 %v1734_v16, %v1446_v14  ;;  %v3993_v16 = vld [vmem:[%s4231_s2] ss:$0 sm:$0xff] }
 0x1d5   : > { %v2956_v21 = vpack.c.bf16 %v1854_v19, %v1854_v19  ;;  %v1855_v22 = vmax.f32 %v1735_v20, 0.0 }
 0x1d6   : > { %v1450_v23 = vpop.f32.mrb[92].mxu1  ;;  %v1739_v26 = vpop.f32.mrb[92].mxu0 }
 0x1d7   : > { %2175 = vst.msk [vmem:[%s3819_s12 + $0xb0] sm:$0xf] %vm2130_vm0, %v2956_v21  ;;  %v2957_v24 = vpack.c.bf16 %v1855_v22, %v1855_v22  ;;  %v1451_v25 = vadd.f32 %v3810_v15, %v1450_v23  ;;  %v1452_v27 = vpop.f32.mrb[93].mxu1  ;;  %v1741_v28 = vpop.f32.mrb[93].mxu0 }
 0x1d8   : > { %v1453_v29 = vpop.f32.mrb[94].mxu1  ;;  %v1742_v32 = vpop.f32.mrb[94].mxu0 }
 0x1d9   : > { %2176 = vst.msk [vmem:[%s3819_s12 + $0xb4] sm:$0xf] %vm2130_vm0, %v2957_v24  ;;  %v1740_v30 = vadd.f32 %v1739_v26, %v1451_v25  ;;  %v1454_v31 = vadd.f32 %v3810_v15, %v1453_v29  ;;  %v1455_v33 = vpop.f32.mrb[95].mxu1  ;;  %v1744_v34 = vpop.f32.mrb[95].mxu0 }
 0x1db   : > { %v1856_v35 = vmax.f32 %v1740_v30, 0.0  ;;  %v1743_v36 = vadd.f32 %v1742_v32, %v1454_v31 }
 0x1dd   : > { %v2958_v37 = vpack.c.bf16 %v1856_v35, %v1856_v35  ;;  %v1857_v38 = vmax.f32 %v1743_v36, 0.0 }
 0x1de   : > { %v1458_v39 = vpop.f32.mrb[96].mxu1  ;;  %v1747_v42 = vpop.f32.mrb[96].mxu0 }
 0x1df   : > { %2177 = vst.msk [vmem:[%s3819_s12 + $0xb8] sm:$0xf] %vm2130_vm0, %v2958_v37  ;;  %v2959_v40 = vpack.c.bf16 %v1857_v38, %v1857_v38  ;;  %v1459_v41 = vadd.f32 %v3810_v15, %v1458_v39  ;;  %v1460_v43 = vpop.f32.mrb[97].mxu1  ;;  %v1749_v44 = vpop.f32.mrb[97].mxu0 }
 0x1e0   : > { %v1461_v45 = vpop.f32.mrb[98].mxu1  ;;  %v1750_v48 = vpop.f32.mrb[98].mxu0 }
 0x1e1   : > { %2178 = vst.msk [vmem:[%s3819_s12 + $0xbc] sm:$0xf] %vm2130_vm0, %v2959_v40  ;;  %v1748_v46 = vadd.f32 %v1747_v42, %v1459_v41  ;;  %v1462_v47 = vadd.f32 %v3810_v15, %v1461_v45  ;;  %v1463_v49 = vpop.f32.mrb[99].mxu1  ;;  %v1752_v50 = vpop.f32.mrb[99].mxu0 }
 0x1e3   : > { %v1858_v51 = vmax.f32 %v1748_v46, 0.0  ;;  %v1751_v52 = vadd.f32 %v1750_v48, %v1462_v47 }
 0x1e5   : > { %v2960_v53 = vpack.c.bf16 %v1858_v51, %v1858_v51  ;;  %v1859_v54 = vmax.f32 %v1751_v52, 0.0 }
 0x1e6   : > { %v1466_v55 = vpop.f32.mrb[100].mxu1  ;;  %v1755_v58 = vpop.f32.mrb[100].mxu0 }
 0x1e7   : > { %2179 = vst.msk [vmem:[%s3819_s12 + $0xc0] sm:$0xf] %vm2130_vm0, %v2960_v53  ;;  %v2961_v56 = vpack.c.bf16 %v1859_v54, %v1859_v54  ;;  %v1467_v57 = vadd.f32 %v3810_v15, %v1466_v55  ;;  %v1468_v59 = vpop.f32.mrb[101].mxu1  ;;  %v1757_v60 = vpop.f32.mrb[101].mxu0 }
 0x1e8   : > { %v1469_v61 = vpop.f32.mrb[102].mxu1  ;;  %v1758_v0 = vpop.f32.mrb[102].mxu0 }
 0x1e9   : > { %2180 = vst.msk [vmem:[%s3819_s12 + $0xc4] sm:$0xf] %vm2130_vm0, %v2961_v56  ;;  %v1756_v62 = vadd.f32 %v1755_v58, %v1467_v57  ;;  %v1470_v63 = vadd.f32 %v3810_v15, %v1469_v61  ;;  %v1471_v1 = vpop.f32.mrb[103].mxu1  ;;  %v1760_v2 = vpop.f32.mrb[103].mxu0 }
 0x1eb   : > { %v1860_v3 = vmax.f32 %v1756_v62, 0.0  ;;  %v1759_v4 = vadd.f32 %v1758_v0, %v1470_v63 }
 0x1ed   : > { %v2962_v5 = vpack.c.bf16 %v1860_v3, %v1860_v3  ;;  %v1861_v6 = vmax.f32 %v1759_v4, 0.0 }
 0x1ee   : > { %v1474_v7 = vpop.f32.mrb[104].mxu1  ;;  %v1763_v10 = vpop.f32.mrb[104].mxu0 }
 0x1ef   : > { %2181 = vst.msk [vmem:[%s3819_s12 + $0xc8] sm:$0xf] %vm2130_vm0, %v2962_v5  ;;  %v2963_v8 = vpack.c.bf16 %v1861_v6, %v1861_v6  ;;  %v1475_v9 = vadd.f32 %v3810_v15, %v1474_v7  ;;  %v1476_v11 = vpop.f32.mrb[105].mxu1  ;;  %v1765_v12 = vpop.f32.mrb[105].mxu0 }
 0x1f0   : > { %v1477_v13 = vpop.f32.mrb[106].mxu1  ;;  %v1766_v18 = vpop.f32.mrb[106].mxu0 }
 0x1f1   : > { %2182 = vst.msk [vmem:[%s3819_s12 + $0xcc] sm:$0xf] %vm2130_vm0, %v2963_v8  ;;  %v1764_v14 = vadd.f32 %v1763_v10, %v1475_v9  ;;  %v1478_v17 = vadd.f32 %v3993_v16, %v1477_v13  ;;  %v1479_v19 = vpop.f32.mrb[107].mxu1  ;;  %v1768_v20 = vpop.f32.mrb[107].mxu0 }
 0x1f3   : > { %v1862_v15 = vmax.f32 %v1764_v14, 0.0  ;;  %v1767_v21 = vadd.f32 %v1766_v18, %v1478_v17 }
 0x1f5   : > { %v2964_v22 = vpack.c.bf16 %v1862_v15, %v1862_v15  ;;  %v1863_v23 = vmax.f32 %v1767_v21, 0.0 }
 0x1f6   : > { %v1482_v24 = vpop.f32.mrb[108].mxu1  ;;  %v1771_v27 = vpop.f32.mrb[108].mxu0 }
 0x1f7   : > { %2183 = vst.msk [vmem:[%s3819_s12 + $0xd0] sm:$0xf] %vm2130_vm0, %v2964_v22  ;;  %v2965_v25 = vpack.c.bf16 %v1863_v23, %v1863_v23  ;;  %v1483_v26 = vadd.f32 %v3993_v16, %v1482_v24  ;;  %v1484_v28 = vpop.f32.mrb[109].mxu1  ;;  %v1773_v29 = vpop.f32.mrb[109].mxu0 }
 0x1f8   : > { %v1485_v30 = vpop.f32.mrb[110].mxu1  ;;  %v1774_v33 = vpop.f32.mrb[110].mxu0 }
 0x1f9   : > { %2184 = vst.msk [vmem:[%s3819_s12 + $0xd4] sm:$0xf] %vm2130_vm0, %v2965_v25  ;;  %v1772_v31 = vadd.f32 %v1771_v27, %v1483_v26  ;;  %v1486_v32 = vadd.f32 %v3993_v16, %v1485_v30  ;;  %v1487_v34 = vpop.f32.mrb[111].mxu1  ;;  %v1776_v35 = vpop.f32.mrb[111].mxu0 }
 0x1fb   : > { %v1864_v36 = vmax.f32 %v1772_v31, 0.0  ;;  %v1775_v37 = vadd.f32 %v1774_v33, %v1486_v32 }
 0x1fd   : > { %v2966_v38 = vpack.c.bf16 %v1864_v36, %v1864_v36  ;;  %v1865_v39 = vmax.f32 %v1775_v37, 0.0 }
 0x1fe   : > { %v1490_v40 = vpop.f32.mrb[112].mxu1  ;;  %v1779_v43 = vpop.f32.mrb[112].mxu0 }
 0x1ff   : > { %2185 = vst.msk [vmem:[%s3819_s12 + $0xd8] sm:$0xf] %vm2130_vm0, %v2966_v38  ;;  %v2967_v41 = vpack.c.bf16 %v1865_v39, %v1865_v39  ;;  %v1491_v42 = vadd.f32 %v3993_v16, %v1490_v40  ;;  %v1492_v44 = vpop.f32.mrb[113].mxu1  ;;  %v1781_v45 = vpop.f32.mrb[113].mxu0 }
 0x200   : > { %v1493_v46 = vpop.f32.mrb[114].mxu1  ;;  %v1782_v49 = vpop.f32.mrb[114].mxu0 }
 0x201   : > { %2186 = vst.msk [vmem:[%s3819_s12 + $0xdc] sm:$0xf] %vm2130_vm0, %v2967_v41  ;;  %v1780_v47 = vadd.f32 %v1779_v43, %v1491_v42  ;;  %v1494_v48 = vadd.f32 %v3993_v16, %v1493_v46  ;;  %v1495_v50 = vpop.f32.mrb[115].mxu1  ;;  %v1784_v51 = vpop.f32.mrb[115].mxu0 }
 0x203   : > { %v1866_v52 = vmax.f32 %v1780_v47, 0.0  ;;  %v1783_v53 = vadd.f32 %v1782_v49, %v1494_v48 }
 0x205   : > { %v2968_v54 = vpack.c.bf16 %v1866_v52, %v1866_v52  ;;  %v1867_v55 = vmax.f32 %v1783_v53, 0.0 }
 0x206   : > { %v1498_v56 = vpop.f32.mrb[116].mxu1  ;;  %v1787_v59 = vpop.f32.mrb[116].mxu0 }
 0x207   : > { %2187 = vst.msk [vmem:[%s3819_s12 + $0xe0] sm:$0xf] %vm2130_vm0, %v2968_v54  ;;  %v2969_v57 = vpack.c.bf16 %v1867_v55, %v1867_v55  ;;  %v1499_v58 = vadd.f32 %v3993_v16, %v1498_v56  ;;  %v1500_v60 = vpop.f32.mrb[117].mxu1  ;;  %v1789_v61 = vpop.f32.mrb[117].mxu0 }
 0x208   : > { %v1501_v62 = vpop.f32.mrb[118].mxu1  ;;  %v1790_v1 = vpop.f32.mrb[118].mxu0 }
 0x209   : > { %2188 = vst.msk [vmem:[%s3819_s12 + $0xe4] sm:$0xf] %vm2130_vm0, %v2969_v57  ;;  %v1788_v63 = vadd.f32 %v1787_v59, %v1499_v58  ;;  %v1502_v0 = vadd.f32 %v3993_v16, %v1501_v62  ;;  %v1503_v2 = vpop.f32.mrb[119].mxu1  ;;  %v1792_v3 = vpop.f32.mrb[119].mxu0 }
 0x20b   : > { %v1868_v4 = vmax.f32 %v1788_v63, 0.0  ;;  %v1791_v5 = vadd.f32 %v1790_v1, %v1502_v0 }
 0x20d   : > { %v2970_v6 = vpack.c.bf16 %v1868_v4, %v1868_v4  ;;  %v1869_v7 = vmax.f32 %v1791_v5, 0.0 }
 0x20e   : > { %v1506_v8 = vpop.f32.mrb[120].mxu1  ;;  %v1795_v11 = vpop.f32.mrb[120].mxu0 }
 0x20f   : > { %2189 = vst.msk [vmem:[%s3819_s12 + $0xe8] sm:$0xf] %vm2130_vm0, %v2970_v6  ;;  %v2971_v9 = vpack.c.bf16 %v1869_v7, %v1869_v7  ;;  %v1507_v10 = vadd.f32 %v3993_v16, %v1506_v8  ;;  %v1508_v12 = vpop.f32.mrb[121].mxu1  ;;  %v1797_v13 = vpop.f32.mrb[121].mxu0 }
 0x210   : > { %v1509_v14 = vpop.f32.mrb[122].mxu1  ;;  %v1798_v19 = vpop.f32.mrb[122].mxu0 }
 0x211   : > { %2190 = vst.msk [vmem:[%s3819_s12 + $0xec] sm:$0xf] %vm2130_vm0, %v2971_v9  ;;  %v1796_v17 = vadd.f32 %v1795_v11, %v1507_v10  ;;  %v1510_v18 = vadd.f32 %v3993_v16, %v1509_v14  ;;  %v1511_v20 = vpop.f32.mrb[123].mxu1  ;;  %v1800_v15 = vpop.f32.mrb[123].mxu0 }
 0x213   : > { %v1870_v21 = vmax.f32 %v1796_v17, 0.0  ;;  %v1799_v22 = vadd.f32 %v1798_v19, %v1510_v18 }
 0x215   : > { %v2972_v23 = vpack.c.bf16 %v1870_v21, %v1870_v21  ;;  %v1871_v24 = vmax.f32 %v1799_v22, 0.0 }
 0x216   : > { %v1514_v25 = vpop.f32.mrb[124].mxu1  ;;  %v1803_v28 = vpop.f32.mrb[124].mxu0 }
 0x217   : > { %2191 = vst.msk [vmem:[%s3819_s12 + $0xf0] sm:$0xf] %vm2130_vm0, %v2972_v23  ;;  %v2973_v26 = vpack.c.bf16 %v1871_v24, %v1871_v24  ;;  %v1515_v27 = vadd.f32 %v3993_v16, %v1514_v25  ;;  %v1516_v29 = vpop.f32.mrb[125].mxu1  ;;  %v1805_v30 = vpop.f32.mrb[125].mxu0 }
 0x218   : > { %v1517_v31 = vpop.f32.mrb[126].mxu1  ;;  %v1806_v34 = vpop.f32.mrb[126].mxu0 }
 0x219   : > { %2192 = vst.msk [vmem:[%s3819_s12 + $0xf4] sm:$0xf] %vm2130_vm0, %v2973_v26  ;;  %v1804_v32 = vadd.f32 %v1803_v28, %v1515_v27  ;;  %v1518_v33 = vadd.f32 %v3993_v16, %v1517_v31  ;;  %v1519_v35 = vpop.f32.mrb[127].mxu1  ;;  %v1808_v36 = vpop.f32.mrb[127].mxu0 }
 0x21b   : > { %v1872_v37 = vmax.f32 %v1804_v32, 0.0  ;;  %v1807_v38 = vadd.f32 %v1806_v34, %v1518_v33  ;;  %2201 = sbr.rel (!%p3555_p4) target bundleno = 637 (0x27d), region = 36 }
 0x21d   : > { %v2974_v39 = vpack.c.bf16 %v1872_v37, %v1872_v37  ;;  %v1873_v40 = vmax.f32 %v1807_v38, 0.0 }
 0x21f   : > { %2193 = vst.msk [vmem:[%s3819_s12 + $0xf8] sm:$0xf] %vm2130_vm0, %v2974_v39  ;;  %v2975_v41 = vpack.c.bf16 %v1873_v40, %v1873_v40 }
 0x221   : > { %2194 = vst.msk [vmem:[%s3819_s12 + $0xfc] sm:$0xf] %vm2130_vm0, %v2975_v41 }
 0x222   : > { %s4241_s9 = smov (!%p2204_p8, %s2203_s9), 64 }
 0x223   : > { %s2896_s22 = sshll.u32 %s4241_s9, 6 }
 0x224   : > { %p2899_p9 = scmp.eq.s32.totalorder %s2896_s22, 0 }
 0x225   : > { %s4043_s23 = sshrl.u32 (!%p2899_p9), %s4241_s9, 6 }
 0x226   : > { %2212 = sbr.rel (%p2899_p9) target bundleno = 637 (0x27d), region = 40  ;;  %p2900_p10 = scmp.le.s32.totalorder (!%p2899_p9), %s4043_s23, 0 }
 0x22d   : > { %2617 = sbr.rel (%p2900_p10) target bundleno = 616 (0x268), region = 112  ;;  %s4234_s15 = smov (!%p2900_p10), %s4037_s21 }
 0x22e   : > { %s4235_s20 = smov (!%p2900_p10), %s3819_s12  ;;  %s4052_s18 = smov (!%p2900_p10), 0  }
 0x22f   : > { %s4054_s24 = smov (!%p2900_p10), 0  }
 0x234 LB: >> { %v2228_v16 = vld [vmem:[%s3483_s20] sm:$0xf]  ;;  %v2230_v42 = vld [vmem:[%s3483_s20 + $0x4] sm:$0xf]  ;;  %v2232_v43 = vld [vmem:[%s3483_s20 + $0x8] sm:$0xf]  ;;  %s3491_s24 = sphi %s4054_s24, %s2222_s24   ;;  %s3487_s18 = sphi %s4052_s18, %s4236_s18   ;;  %s3483_s20 = sphi %s4235_s20, %s2361_s20   ;;  %s3479_s15 = sphi %s4234_s15, %s2362_s15  }
 0x235   : >> { %2229 = vst [vmem:[%s3479_s15] sm:$0xf] %v2228_v16  ;;  %2231 = vst [vmem:[%s3479_s15 + $0x4] sm:$0xf] %v2230_v42  ;;  %v2234_v44 = vld [vmem:[%s3483_s20 + $0xc] sm:$0xf]  ;;  %s2356_s25 = sadd.s32 1, %s3487_s18 }
 0x236   : >> { %2233 = vst [vmem:[%s3479_s15 + $0x8] sm:$0xf] %v2232_v43  ;;  %v2236_v45 = vld [vmem:[%s3483_s20 + $0x10] sm:$0xf]  ;;  %v2238_v46 = vld [vmem:[%s3483_s20 + $0x14] sm:$0xf]  ;;  %p2357_p11 = scmp.ge.s32.totalorder %s2356_s25, %s4043_s23 }
 0x237   : >> { %2235 = vst [vmem:[%s3479_s15 + $0xc] sm:$0xf] %v2234_v44  ;;  %2237 = vst [vmem:[%s3479_s15 + $0x10] sm:$0xf] %v2236_v45  ;;  %v2240_v47 = vld [vmem:[%s3483_s20 + $0x18] sm:$0xf] }
 0x238   : >> { %2239 = vst [vmem:[%s3479_s15 + $0x14] sm:$0xf] %v2238_v46  ;;  %v2242_v48 = vld [vmem:[%s3483_s20 + $0x1c] sm:$0xf]  ;;  %v2244_v49 = vld [vmem:[%s3483_s20 + $0x20] sm:$0xf] }
 0x239   : >> { %2241 = vst [vmem:[%s3479_s15 + $0x18] sm:$0xf] %v2240_v47  ;;  %2243 = vst [vmem:[%s3479_s15 + $0x1c] sm:$0xf] %v2242_v48  ;;  %v2246_v50 = vld [vmem:[%s3483_s20 + $0x24] sm:$0xf] }
 0x23a   : >> { %2245 = vst [vmem:[%s3479_s15 + $0x20] sm:$0xf] %v2244_v49  ;;  %v2248_v51 = vld [vmem:[%s3483_s20 + $0x28] sm:$0xf]  ;;  %v2250_v52 = vld [vmem:[%s3483_s20 + $0x2c] sm:$0xf] }
 0x23b   : >> { %2247 = vst [vmem:[%s3479_s15 + $0x24] sm:$0xf] %v2246_v50  ;;  %2249 = vst [vmem:[%s3479_s15 + $0x28] sm:$0xf] %v2248_v51  ;;  %v2252_v53 = vld [vmem:[%s3483_s20 + $0x30] sm:$0xf] }
 0x23c   : >> { %2251 = vst [vmem:[%s3479_s15 + $0x2c] sm:$0xf] %v2250_v52  ;;  %v2254_v54 = vld [vmem:[%s3483_s20 + $0x34] sm:$0xf]  ;;  %v2256_v55 = vld [vmem:[%s3483_s20 + $0x38] sm:$0xf] }
 0x23d   : >> { %2253 = vst [vmem:[%s3479_s15 + $0x30] sm:$0xf] %v2252_v53  ;;  %2255 = vst [vmem:[%s3479_s15 + $0x34] sm:$0xf] %v2254_v54  ;;  %v2258_v56 = vld [vmem:[%s3483_s20 + $0x3c] sm:$0xf] }
 0x23e   : >> { %2257 = vst [vmem:[%s3479_s15 + $0x38] sm:$0xf] %v2256_v55  ;;  %v2260_v57 = vld [vmem:[%s3483_s20 + $0x40] sm:$0xf]  ;;  %v2262_v58 = vld [vmem:[%s3483_s20 + $0x44] sm:$0xf] }
 0x23f   : >> { %2259 = vst [vmem:[%s3479_s15 + $0x3c] sm:$0xf] %v2258_v56  ;;  %2261 = vst [vmem:[%s3479_s15 + $0x40] sm:$0xf] %v2260_v57  ;;  %v2264_v59 = vld [vmem:[%s3483_s20 + $0x48] sm:$0xf] }
 0x240   : >> { %2263 = vst [vmem:[%s3479_s15 + $0x44] sm:$0xf] %v2262_v58  ;;  %v2266_v60 = vld [vmem:[%s3483_s20 + $0x4c] sm:$0xf]  ;;  %v2268_v61 = vld [vmem:[%s3483_s20 + $0x50] sm:$0xf] }
 0x241   : >> { %2265 = vst [vmem:[%s3479_s15 + $0x48] sm:$0xf] %v2264_v59  ;;  %2267 = vst [vmem:[%s3479_s15 + $0x4c] sm:$0xf] %v2266_v60  ;;  %v2270_v62 = vld [vmem:[%s3483_s20 + $0x54] sm:$0xf] }
 0x242   : >> { %2269 = vst [vmem:[%s3479_s15 + $0x50] sm:$0xf] %v2268_v61  ;;  %v2272_v63 = vld [vmem:[%s3483_s20 + $0x58] sm:$0xf]  ;;  %v2274_v0 = vld [vmem:[%s3483_s20 + $0x5c] sm:$0xf] }
 0x243   : >> { %2271 = vst [vmem:[%s3479_s15 + $0x54] sm:$0xf] %v2270_v62  ;;  %2273 = vst [vmem:[%s3479_s15 + $0x58] sm:$0xf] %v2272_v63  ;;  %v2276_v1 = vld [vmem:[%s3483_s20 + $0x60] sm:$0xf] }
 0x244   : >> { %2275 = vst [vmem:[%s3479_s15 + $0x5c] sm:$0xf] %v2274_v0  ;;  %v2278_v2 = vld [vmem:[%s3483_s20 + $0x64] sm:$0xf]  ;;  %v2280_v3 = vld [vmem:[%s3483_s20 + $0x68] sm:$0xf] }
 0x245   : >> { %2277 = vst [vmem:[%s3479_s15 + $0x60] sm:$0xf] %v2276_v1  ;;  %2279 = vst [vmem:[%s3479_s15 + $0x64] sm:$0xf] %v2278_v2  ;;  %v2282_v4 = vld [vmem:[%s3483_s20 + $0x6c] sm:$0xf] }
 0x246   : >> { %2281 = vst [vmem:[%s3479_s15 + $0x68] sm:$0xf] %v2280_v3  ;;  %v2284_v5 = vld [vmem:[%s3483_s20 + $0x70] sm:$0xf]  ;;  %v2286_v6 = vld [vmem:[%s3483_s20 + $0x74] sm:$0xf] }
 0x247   : >> { %2283 = vst [vmem:[%s3479_s15 + $0x6c] sm:$0xf] %v2282_v4  ;;  %2285 = vst [vmem:[%s3479_s15 + $0x70] sm:$0xf] %v2284_v5  ;;  %v2288_v7 = vld [vmem:[%s3483_s20 + $0x78] sm:$0xf] }
 0x248   : >> { %2287 = vst [vmem:[%s3479_s15 + $0x74] sm:$0xf] %v2286_v6  ;;  %v2290_v8 = vld [vmem:[%s3483_s20 + $0x7c] sm:$0xf]  ;;  %v2292_v9 = vld [vmem:[%s3483_s20 + $0x80] sm:$0xf] }
 0x249   : >> { %2289 = vst [vmem:[%s3479_s15 + $0x78] sm:$0xf] %v2288_v7  ;;  %2291 = vst [vmem:[%s3479_s15 + $0x7c] sm:$0xf] %v2290_v8  ;;  %v2294_v10 = vld [vmem:[%s3483_s20 + $0x84] sm:$0xf] }
 0x24a   : >> { %2293 = vst [vmem:[%s3479_s15 + $0x80] sm:$0xf] %v2292_v9  ;;  %v2296_v11 = vld [vmem:[%s3483_s20 + $0x88] sm:$0xf]  ;;  %v2298_v12 = vld [vmem:[%s3483_s20 + $0x8c] sm:$0xf] }
 0x24b   : >> { %2295 = vst [vmem:[%s3479_s15 + $0x84] sm:$0xf] %v2294_v10  ;;  %2297 = vst [vmem:[%s3479_s15 + $0x88] sm:$0xf] %v2296_v11  ;;  %v2300_v13 = vld [vmem:[%s3483_s20 + $0x90] sm:$0xf] }
 0x24c   : >> { %2299 = vst [vmem:[%s3479_s15 + $0x8c] sm:$0xf] %v2298_v12  ;;  %v2302_v14 = vld [vmem:[%s3483_s20 + $0x94] sm:$0xf]  ;;  %v2304_v17 = vld [vmem:[%s3483_s20 + $0x98] sm:$0xf] }
 0x24d   : >> { %2301 = vst [vmem:[%s3479_s15 + $0x90] sm:$0xf] %v2300_v13  ;;  %2303 = vst [vmem:[%s3479_s15 + $0x94] sm:$0xf] %v2302_v14  ;;  %v2306_v18 = vld [vmem:[%s3483_s20 + $0x9c] sm:$0xf] }
 0x24e   : >> { %2305 = vst [vmem:[%s3479_s15 + $0x98] sm:$0xf] %v2304_v17  ;;  %v2308_v19 = vld [vmem:[%s3483_s20 + $0xa0] sm:$0xf]  ;;  %v2310_v20 = vld [vmem:[%s3483_s20 + $0xa4] sm:$0xf] }
 0x24f   : >> { %2307 = vst [vmem:[%s3479_s15 + $0x9c] sm:$0xf] %v2306_v18  ;;  %2309 = vst [vmem:[%s3479_s15 + $0xa0] sm:$0xf] %v2308_v19  ;;  %v2312_v15 = vld [vmem:[%s3483_s20 + $0xa8] sm:$0xf] }
 0x250   : >> { %2311 = vst [vmem:[%s3479_s15 + $0xa4] sm:$0xf] %v2310_v20  ;;  %v2314_v21 = vld [vmem:[%s3483_s20 + $0xac] sm:$0xf]  ;;  %v2316_v22 = vld [vmem:[%s3483_s20 + $0xb0] sm:$0xf] }
 0x251   : >> { %2313 = vst [vmem:[%s3479_s15 + $0xa8] sm:$0xf] %v2312_v15  ;;  %2315 = vst [vmem:[%s3479_s15 + $0xac] sm:$0xf] %v2314_v21  ;;  %v2318_v23 = vld [vmem:[%s3483_s20 + $0xb4] sm:$0xf] }
 0x252   : >> { %2317 = vst [vmem:[%s3479_s15 + $0xb0] sm:$0xf] %v2316_v22  ;;  %v2320_v24 = vld [vmem:[%s3483_s20 + $0xb8] sm:$0xf]  ;;  %v2322_v25 = vld [vmem:[%s3483_s20 + $0xbc] sm:$0xf] }
 0x253   : >> { %2319 = vst [vmem:[%s3479_s15 + $0xb4] sm:$0xf] %v2318_v23  ;;  %2321 = vst [vmem:[%s3479_s15 + $0xb8] sm:$0xf] %v2320_v24  ;;  %v2324_v26 = vld [vmem:[%s3483_s20 + $0xc0] sm:$0xf] }
 0x254   : >> { %2323 = vst [vmem:[%s3479_s15 + $0xbc] sm:$0xf] %v2322_v25  ;;  %v2326_v27 = vld [vmem:[%s3483_s20 + $0xc4] sm:$0xf]  ;;  %v2328_v28 = vld [vmem:[%s3483_s20 + $0xc8] sm:$0xf] }
 0x255   : >> { %2325 = vst [vmem:[%s3479_s15 + $0xc0] sm:$0xf] %v2324_v26  ;;  %2327 = vst [vmem:[%s3479_s15 + $0xc4] sm:$0xf] %v2326_v27  ;;  %v2330_v29 = vld [vmem:[%s3483_s20 + $0xcc] sm:$0xf] }
 0x256   : >> { %2329 = vst [vmem:[%s3479_s15 + $0xc8] sm:$0xf] %v2328_v28  ;;  %v2332_v30 = vld [vmem:[%s3483_s20 + $0xd0] sm:$0xf]  ;;  %v2334_v31 = vld [vmem:[%s3483_s20 + $0xd4] sm:$0xf] }
 0x257   : >> { %2331 = vst [vmem:[%s3479_s15 + $0xcc] sm:$0xf] %v2330_v29  ;;  %2333 = vst [vmem:[%s3479_s15 + $0xd0] sm:$0xf] %v2332_v30  ;;  %v2336_v32 = vld [vmem:[%s3483_s20 + $0xd8] sm:$0xf] }
 0x258   : >> { %2335 = vst [vmem:[%s3479_s15 + $0xd4] sm:$0xf] %v2334_v31  ;;  %v2338_v33 = vld [vmem:[%s3483_s20 + $0xdc] sm:$0xf]  ;;  %v2340_v34 = vld [vmem:[%s3483_s20 + $0xe0] sm:$0xf] }
 0x259   : >> { %2337 = vst [vmem:[%s3479_s15 + $0xd8] sm:$0xf] %v2336_v32  ;;  %2339 = vst [vmem:[%s3479_s15 + $0xdc] sm:$0xf] %v2338_v33  ;;  %v2342_v35 = vld [vmem:[%s3483_s20 + $0xe4] sm:$0xf] }
 0x25a   : >> { %2341 = vst [vmem:[%s3479_s15 + $0xe0] sm:$0xf] %v2340_v34  ;;  %v2344_v36 = vld [vmem:[%s3483_s20 + $0xe8] sm:$0xf]  ;;  %v2346_v37 = vld [vmem:[%s3483_s20 + $0xec] sm:$0xf] }
 0x25b   : >> { %2343 = vst [vmem:[%s3479_s15 + $0xe4] sm:$0xf] %v2342_v35  ;;  %2345 = vst [vmem:[%s3479_s15 + $0xe8] sm:$0xf] %v2344_v36  ;;  %v2348_v38 = vld [vmem:[%s3483_s20 + $0xf0] sm:$0xf] }
 0x25c   : >> { %2347 = vst [vmem:[%s3479_s15 + $0xec] sm:$0xf] %v2346_v37  ;;  %v2350_v39 = vld [vmem:[%s3483_s20 + $0xf4] sm:$0xf]  ;;  %v2352_v40 = vld [vmem:[%s3483_s20 + $0xf8] sm:$0xf] }
 0x25d   : >> { %2349 = vst [vmem:[%s3479_s15 + $0xf0] sm:$0xf] %v2348_v38  ;;  %2351 = vst [vmem:[%s3479_s15 + $0xf4] sm:$0xf] %v2350_v39  ;;  %v2354_v41 = vld [vmem:[%s3483_s20 + $0xfc] sm:$0xf] }
 0x25e   : >> { %2353 = vst [vmem:[%s3479_s15 + $0xf8] sm:$0xf] %v2352_v40  ;;  %2355 = vst [vmem:[%s3479_s15 + $0xfc] sm:$0xf] %v2354_v41  ;;  %s4243_s25 = smov (%p2357_p11, %s2356_s25), 0  ;;  %s2222_s24 = sadd.s32 1, %s3491_s24  }
 0x25f   : >> { %s2901_s26 = sshll.u32 %s4243_s25, 8  ;;  %p2221_p12 = scmp.ge.s32.totalorder %s2222_s24, %s4043_s23 }
 0x260   : >> { %s2361_s20 = scalar_lea.vmem %s3819_s12, %s2901_s26 [#allocation2]   ;;  %s2362_s15 = scalar_lea.vmem %s4037_s21, %s2901_s26  }
 0x261   : >> { %s4236_s18 = smov %s4243_s25  ;;  %2224 = sbr.rel (!%p2221_p12) target bundleno = 564 (0x234), region = 118 }
 0x268 PF: > { %s4211_s27 = sand.u32 63, %s4241_s9   ;;  %s2977_s28 = sshll.u32 %s4043_s23, 8 }
 0x269   : > { %s2367_s29 = scalar_lea.vmem %s3819_s12, %s2977_s28 [#allocation2]   ;;  %s2369_s30 = scalar_lea.vmem %s4037_s21, %s2977_s28  }
 0x26a   : > { %p2906_p13 = scmp.le.s32.totalorder %s4211_s27, 0 }
 0x26b   : > { %s3493_s4 = smov (!%p2906_p13), %s2369_s30   ;;  %s3497_s5 = smov (!%p2906_p13), %s2367_s29  }
 0x26c   : > { %2631 = sbr.rel (%p2906_p13) target bundleno = 637 (0x27d), region = 123  ;;  %s3501_s6 = smov (!%p2906_p13), 0  }
 0x26d   : > { %s3505_s7 = smov (!%p2906_p13), 0  }
 0x273 LB: >> { %v2379_v16 = vld [vmem:[%s3499_s5] sm:$0xf]  ;;  %s2381_s14 = sadd.s32 1, %s3503_s6  ;;  %s2373_s7 = sadd.s32 1, %s3507_s7   ;;  %s3507_s7 = sphi %s3505_s7, %s2373_s7   ;;  %s3503_s6 = sphi %s3501_s6, %s3502_s6   ;;  %s3499_s5 = sphi %s3497_s5, %s2386_s5   ;;  %s3495_s4 = sphi %s3493_s4, %s2387_s4  }
 0x274   : >> { %2380 = vst [vmem:[%s3495_s4] sm:$0xf] %v2379_v16  ;;  %p2382_p0 = scmp.ge.s32.totalorder %s2381_s14, %s4211_s27  ;;  %p2372_p1 = scmp.ge.s32.totalorder %s2373_s7, %s4211_s27 }
 0x276   : >> { %s4245_s14 = smov (%p2382_p0, %s2381_s14), 0  ;;  %2375 = sbr.rel (!%p2372_p1) target bundleno = 627 (0x273), region = 129 }
 0x277   : >> { %s2907_s12 = sshll.u32 %s4245_s14, 2  ;;  %s3502_s6 = smov %s4245_s14  }
 0x278   : >> { %s2386_s5 = scalar_lea.vmem %s2367_s29, %s2907_s12 [#allocation2]   ;;  %s2387_s4 = scalar_lea.vmem %s2369_s30, %s2907_s12  }
 0x27d PF: > { %p10_p2 = scmp.ge.s32.totalorder %s3545_s16, 4   ;;  %s4237_s12 = smov %s3471_s13 }
 0x27e   : > { %s4238_s13 = smov %s3553_s19  ;;  %s4239_s14 = smov %s3545_s16 }
 0x27f   :  { %12 = sbr.rel (!%p10_p2) target bundleno = 2 (0x2), region = 140 }

// kernel: nature_cnn_amm_forward.7
= control target key start
LH: loop header
LB: loop body
LE: loop exit
PB: predicated region body
PF: predicated region fallthrough
CT: control target
= control target key end

     0   :  { %s2615_s12 = smov 0   ;;  %s2617_s13 = smov 0   ;;  %s3093_s0 = inlined_call_operand.vmem [shape: bf16[176,1024], index: 0, kind: input, shape index: {}]   ;;  %s3094_s1 = inlined_call_operand.vmem [shape: bf16[1024,128], index: 1, kind: input, shape index: {}]   ;;  %s3095_s2 = inlined_call_operand.vmem [shape: f32[1,128], index: 2, kind: input, shape index: {}]   ;;  %s3096_s3 = inlined_call_operand.vmem [shape: bf16[176,128], index: 3, kind: output, shape index: {}]  }
   0x1   :  { %s2619_s14 = smov 0  }
   0x2 LB: > { %s2628_s15 = sadd.s32 4294967295, %s2561_s14   ;;  %s2630_s16 = sadd.s32 1, %s2561_s14   ;;  %s2561_s14 = sphi %s2619_s14, %s3103_s14   ;;  %s2557_s13 = sphi %s2617_s13, %s3102_s13   ;;  %s2553_s12 = sphi %s2615_s12, %s3101_s12  }
   0x3   : > { %s85_s17 = ssub.s32 %s2561_s14, %s2630_s16  ;;  %s88_s18 = sadd.s32 1, %s2557_s13 }
   0x4   : > { %p86_p0 = scmp.eq.s32.totalorder %s85_s17, 0  ;;  %p98_p1 = scmp.ne.s32.totalorder %s2557_s13, %s2553_s12 }
   0x5   : > { %p99_p2 = scmp.eq.s32.totalorder %s2628_s15, 1  ;;  %p1865_p3 = scmp.ge.s32.totalorder %s2561_s14, 1 }
   0x6   : > { %s2638_s19 = scalar_select %p86_p0, %s2557_s13, %s88_s18  }
   0x7   : > { %p2640_p4 = por %p99_p2, %p98_p1  ;;  %p149_p5 = scmp.lt.s32.totalorder %s2561_s14, 3 }
   0x9   : > { %p150_p6 = pnand %p1865_p3, %p149_p5 }
   0xa   : > { %v2443_v0 = vld [vmem:[%s3094_s1 + $0x40] sm:$0xff] (!%p150_p6)   ;;  %v2447_v4 = vld [vmem:[%s3094_s1 + $0x48] sm:$0xff] (!%p150_p6)   ;;  %v2451_v8 = vld [vmem:[%s3094_s1 + $0x50] sm:$0xff] (!%p150_p6)   ;;  %s2693_s5 = sshll.u32 (!%p150_p6), %s2628_s15, 4 }
   0xb   : > { %153 = sbr.rel (%p150_p6) target bundleno = 449 (0x1c1), region = 32  ;;  %v2444_v1 = vld [vmem:[%s3094_s1 + $0xc0] sm:$0xff] (!%p150_p6)   ;;  %2099 = vmatprep.subr.bf16.mxu0 (!%p150_p6), %v2443_v0  ;;  %v2448_v5 = vld [vmem:[%s3094_s1 + $0xc8] sm:$0xff] (!%p150_p6)   ;;  %v2452_v9 = vld [vmem:[%s3094_s1 + $0xd0] sm:$0xff] (!%p150_p6)   ;;  %p184_p7 = scmp.lt.s32.totalorder (!%p150_p6), %s2693_s5, 21 }
   0xc   : > { %v2445_v2 = vld [vmem:[%s3094_s1] sm:$0xff] (!%p150_p6)   ;;  %2163 = vmatprep.subr.bf16.mxu1 (!%p150_p6), %v2444_v1  ;;  %v2449_v6 = vld [vmem:[%s3094_s1 + $0x8] sm:$0xff] (!%p150_p6)   ;;  %v2453_v10 = vld [vmem:[%s3094_s1 + $0x10] sm:$0xff] (!%p150_p6)  }
   0xd   : > { %v2446_v3 = vld [vmem:[%s3094_s1 + $0x80] sm:$0xff] (!%p150_p6)   ;;  %2100 = vmatpush3.bf16.msra.mxu0 (!%p150_p6), %v2445_v2  ;;  %v2450_v7 = vld [vmem:[%s3094_s1 + $0x88] sm:$0xff] (!%p150_p6)   ;;  %v2454_v11 = vld [vmem:[%s3094_s1 + $0x90] sm:$0xff] (!%p150_p6)  }
   0xe   : > { %2164 = vmatpush3.bf16.msra.mxu1 (!%p150_p6), %v2446_v3  ;;  %2101 = vmatprep.subr.bf16.mxu0 (!%p150_p6), %v2447_v4  ;;  %v2455_v12 = vld [vmem:[%s3094_s1 + $0x58] sm:$0xff] (!%p150_p6)   ;;  %v2459_v16 = vld [vmem:[%s3094_s1 + $0x60] sm:$0xff] (!%p150_p6)   ;;  %v2463_v20 = vld [vmem:[%s3094_s1 + $0x68] sm:$0xff] (!%p150_p6)  }
   0xf   : > { %2165 = vmatprep.subr.bf16.mxu1 (!%p150_p6), %v2448_v5  ;;  %v2456_v13 = vld [vmem:[%s3094_s1 + $0xd8] sm:$0xff] (!%p150_p6)   ;;  %v2460_v17 = vld [vmem:[%s3094_s1 + $0xe0] sm:$0xff] (!%p150_p6)   ;;  %v2464_v21 = vld [vmem:[%s3094_s1 + $0xe8] sm:$0xff] (!%p150_p6)  }
  0x10   : > { %v2457_v14 = vld [vmem:[%s3094_s1 + $0x18] sm:$0xff] (!%p150_p6)   ;;  %v2461_v18 = vld [vmem:[%s3094_s1 + $0x20] sm:$0xff] (!%p150_p6)   ;;  %v2465_v22 = vld [vmem:[%s3094_s1 + $0x28] sm:$0xff] (!%p150_p6)  }
  0x11   : > { %2102 = vmatpush3.bf16.msra.mxu0 (!%p150_p6), %v2449_v6  ;;  %v2458_v15 = vld [vmem:[%s3094_s1 + $0x98] sm:$0xff] (!%p150_p6)   ;;  %v2462_v19 = vld [vmem:[%s3094_s1 + $0xa0] sm:$0xff] (!%p150_p6)   ;;  %v2466_v23 = vld [vmem:[%s3094_s1 + $0xa8] sm:$0xff] (!%p150_p6)  }
  0x12   : > { %2166 = vmatpush3.bf16.msra.mxu1 %v2450_v7  ;;  %2103 = vmatprep.subr.bf16.mxu0 %v2451_v8  ;;  %s185_s26 = scalar_select %p184_p7, %s2693_s5, 21  ;;  %v2467_v24 = vld [vmem:[%s3094_s1 + $0x70] sm:$0xff]   ;;  %v2471_v28 = vld [vmem:[%s3094_s1 + $0x78] sm:$0xff]   ;;  %v2475_v40 = vld [vmem:[%s3094_s1 + $0x140] sm:$0xff]  }
  0x13   : > { %2167 = vmatprep.subr.bf16.mxu1 %v2452_v9  ;;  %v2468_v25 = vld [vmem:[%s3094_s1 + $0xf0] sm:$0xff]   ;;  %v2472_v29 = vld [vmem:[%s3094_s1 + $0xf8] sm:$0xff]   ;;  %v2476_v41 = vld [vmem:[%s3094_s1 + $0x100] sm:$0xff]   ;;  %s1596_s17 = ssub.s32 (%p2640_p4), 22, %s2693_s5  ;;  %s2049_s18 = sshll.u32 (%p2640_p4), %s2628_s15, 6 }
  0x14   : > { %v2469_v26 = vld [vmem:[%s3094_s1 + $0x30] sm:$0xff]   ;;  %s2032_s9 = sshll.u32 %s185_s26, 5  ;;  %v2473_v30 = vld [vmem:[%s3094_s1 + $0x38] sm:$0xff]   ;;  %v2477_v42 = vld [vmem:[%s3094_s1 + $0x1c0] sm:$0xff]   ;;  %p1597_p8 = scmp.lt.s32.totalorder (%p2640_p4), %s1596_s17, 16 }
  0x15   : > { %2104 = vmatpush3.bf16.msra.mxu0 %v2453_v10  ;;  %v2470_v27 = vld [vmem:[%s3094_s1 + $0xb0] sm:$0xff]   ;;  %s2742_s24 = scalar_lea.vmem %s3093_s0, %s2032_s9  ;;  %v2474_v31 = vld [vmem:[%s3094_s1 + $0xb8] sm:$0xff]   ;;  %v2478_v43 = vld [vmem:[%s3094_s1 + $0x180] sm:$0xff]   ;;  %s2997_s23 = scalar_lea.vmem (%p2640_p4), %s3096_s3, %s2049_s18  }
  0x16   : > { %2168 = vmatpush3.bf16.msra.mxu1 %v2454_v11  ;;  %2105 = vmatprep.subr.bf16.mxu0 %v2455_v12  ;;  %v201_v32 = vld [vmem:[%s2742_s24] sm:$0xff]  ;;  %v202_v34 = vld [vmem:[%s2742_s24 + $0x8] sm:$0xff]  ;;  %v2483_v62 = vld [vmem:[%s3094_s1 + $0x150] sm:$0xff]  }
  0x17   : > { %2169 = vmatprep.subr.bf16.mxu1 %v2456_v13  ;;  %v205_v33 = vld [vmem:[%s2742_s24 + $0x20] sm:$0xff]  ;;  %v206_v37 = vld [vmem:[%s2742_s24 + $0x28] sm:$0xff]  ;;  %v2484_v63 = vld [vmem:[%s3094_s1 + $0x110] sm:$0xff]  }
  0x18   : > { %v1871_v35 = vcombine.low %v201_v32, %v205_v33  ;;  %v1872_v36 = vcombine.high %v201_v32, %v205_v33  ;;  %v1873_v38 = vcombine.low %v202_v34, %v206_v37  ;;  %v1874_v39 = vcombine.high %v202_v34, %v206_v37  ;;  %v209_v44 = vld [vmem:[%s2742_s24 + $0x40] sm:$0xff]  ;;  %v210_v47 = vld [vmem:[%s2742_s24 + $0x48] sm:$0xff]  ;;  %v2485_v0 = vld [vmem:[%s3094_s1 + $0x1d0] sm:$0xff]  }
  0x19   : > { %2106 = vmatpush3.bf16.msra.mxu0 %v2457_v14  ;;  %v213_v45 = vld [vmem:[%s2742_s24 + $0x60] sm:$0xff]  ;;  %v214_v48 = vld [vmem:[%s2742_s24 + $0x68] sm:$0xff]  ;;  %v2486_v1 = vld [vmem:[%s3094_s1 + $0x190] sm:$0xff]  }
  0x1a   : > { %2170 = vmatpush3.bf16.msra.mxu1 %v2458_v15  ;;  %2107 = vmatprep.subr.bf16.mxu0 %v2459_v16  ;;  %v1880_v46 = vcombine.high %v209_v44, %v213_v45  ;;  %v1882_v49 = vcombine.high %v210_v47, %v214_v48  ;;  %v2479_v50 = vld [vmem:[%s3094_s1 + $0x148] sm:$0xff]   ;;  %v1879_v51 = vcombine.low %v209_v44, %v213_v45  ;;  %v217_v56 = vld [vmem:[%s2742_s24 + $0x80] sm:$0xff]  ;;  %v2487_v10 = vld [vmem:[%s3094_s1 + $0x158] sm:$0xff]  }
  0x1b   : > { %2171 = vmatprep.subr.bf16.mxu1 %v2460_v17  ;;  %1136 = vmatprep.mubr.bf16.mxu0 %v1872_v36  ;;  %v2480_v52 = vld [vmem:[%s3094_s1 + $0x108] sm:$0xff]   ;;  %v1881_v53 = vcombine.low %v210_v47, %v214_v48  ;;  %v221_v57 = vld [vmem:[%s2742_s24 + $0xa0] sm:$0xff]  ;;  %v2488_v11 = vld [vmem:[%s3094_s1 + $0x118] sm:$0xff]  }
  0x1c   : > { %1233 = vmatprep.mubr.bf16.mxu1 %v1874_v39  ;;  %v2481_v54 = vld [vmem:[%s3094_s1 + $0x1c8] sm:$0xff]   ;;  %v1888_v60 = vcombine.high %v217_v56, %v221_v57  ;;  %v1887_v2 = vcombine.low %v217_v56, %v221_v57  ;;  %v225_v3 = vld [vmem:[%s2742_s24 + $0xc0] sm:$0xff]  ;;  %v2489_v12 = vld [vmem:[%s3094_s1 + $0x1d8] sm:$0xff]  }
  0x1d   : > { %2108 = vmatpush3.bf16.msra.mxu0 %v2461_v18  ;;  %v2482_v55 = vld [vmem:[%s3094_s1 + $0x188] sm:$0xff]   ;;  %v229_v4 = vld [vmem:[%s2742_s24 + $0xe0] sm:$0xff]  ;;  %v2490_v13 = vld [vmem:[%s3094_s1 + $0x198] sm:$0xff]  }
  0x1e   : > { %2172 = vmatpush3.bf16.msra.mxu1 %v2462_v19  ;;  %2109 = vmatprep.subr.bf16.mxu0 %v2463_v20  ;;  %v218_v58 = vld [vmem:[%s2742_s24 + $0x88] sm:$0xff]  ;;  %v1896_v7 = vcombine.high %v225_v3, %v229_v4  ;;  %v233_v14 = vld [vmem:[%s2742_s24 + $0x100] sm:$0xff]  ;;  %v1895_v19 = vcombine.low %v225_v3, %v229_v4  ;;  %v2500_v39 = vld [vmem:[%s3094_s1 + $0x130] sm:$0xff]  }
  0x1f   : > { %2173 = vmatprep.subr.bf16.mxu1 %v2464_v21  ;;  %v222_v59 = vld [vmem:[%s2742_s24 + $0xa8] sm:$0xff]  ;;  %v237_v15 = vld [vmem:[%s2742_s24 + $0x120] sm:$0xff]  ;;  %v2504_v48 = vld [vmem:[%s3094_s1 + $0x138] sm:$0xff]  }
  0x20   : > { %v1890_v61 = vcombine.high %v218_v58, %v222_v59  ;;  %v226_v5 = vld [vmem:[%s2742_s24 + $0xc8] sm:$0xff]  ;;  %v1889_v6 = vcombine.low %v218_v58, %v222_v59  ;;  %v2491_v18 = vld [vmem:[%s3094_s1 + $0x160] sm:$0xff]   ;;  %v1903_v34 = vcombine.low %v233_v14, %v237_v15 }
  0x21   : > { %2110 = vmatpush3.bf16.msra.mxu0 %v2465_v22  ;;  %v230_v8 = vld [vmem:[%s2742_s24 + $0xe8] sm:$0xff]  ;;  %v2492_v20 = vld [vmem:[%s3094_s1 + $0x120] sm:$0xff]   ;;  %v1904_v22 = vcombine.high %v233_v14, %v237_v15  ;;  %v219_v14 = vld [vmem:[%s2742_s24 + $0x90] sm:$0xff] }
  0x22   : > { %2174 = vmatpush3.bf16.msra.mxu1 %v2466_v23  ;;  %2111 = vmatprep.subr.bf16.mxu0 %v2467_v24  ;;  %v1898_v9 = vcombine.high %v226_v5, %v230_v8  ;;  %v234_v16 = vld [vmem:[%s2742_s24 + $0x108] sm:$0xff]  ;;  %v1897_v21 = vcombine.low %v226_v5, %v230_v8  ;;  %v2493_v23 = vld [vmem:[%s3094_s1 + $0x1e0] sm:$0xff]   ;;  %v212_v8 = vld [vmem:[%s2742_s24 + $0x58] sm:$0xff] }
  0x23   : > { %2175 = vmatprep.subr.bf16.mxu1 %v2468_v25  ;;  %v238_v17 = vld [vmem:[%s2742_s24 + $0x128] sm:$0xff]  ;;  %v2494_v25 = vld [vmem:[%s3094_s1 + $0x1a0] sm:$0xff]   ;;  %v223_v15 = vld [vmem:[%s2742_s24 + $0xb0] sm:$0xff] }
  0x24   : > { %v1906_v24 = vcombine.high %v234_v16, %v238_v17  ;;  %v2497_v32 = vld [vmem:[%s3094_s1 + $0x1e8] sm:$0xff]  }
  0x25   : > { %2112 = vmatpush3.bf16.msra.mxu0 %v2469_v26  ;;  %v241_v26 = vld [vmem:[%s2742_s24 + $0x140] sm:$0xff]  ;;  %v2498_v33 = vld [vmem:[%s3094_s1 + $0x1a8] sm:$0xff]  }
  0x26   : > { %2176 = vmatpush3.bf16.msra.mxu1 %v2470_v27  ;;  %2113 = vmatprep.subr.bf16.mxu0 %v2471_v28  ;;  %v245_v27 = vld [vmem:[%s2742_s24 + $0x160] sm:$0xff]  ;;  %v2495_v28 = vld [vmem:[%s3094_s1 + $0x168] sm:$0xff]  }
  0x27   : > { %2177 = vmatprep.subr.bf16.mxu1 %v2472_v29  ;;  %v242_v29 = vld [vmem:[%s2742_s24 + $0x148] sm:$0xff]  ;;  %v1912_v36 = vcombine.high %v241_v26, %v245_v27  ;;  %v1911_v47 = vcombine.low %v241_v26, %v245_v27  ;;  %v1891_v26 = vcombine.low %v219_v14, %v223_v15 }
  0x28   : > { %v250_v44 = vld [vmem:[%s2742_s24 + $0x188] sm:$0xff] }
  0x29   : > { %2114 = vmatpush3.bf16.msra.mxu0 %v2473_v30  ;;  %v246_v30 = vld [vmem:[%s2742_s24 + $0x168] sm:$0xff] }
  0x2a   : > { %2178 = vmatpush3.bf16.msra.mxu1 %v2474_v31  ;;  %2227 = vmatprep.subr.bf16.mxu0 %v2475_v40  ;;  %v2496_v31 = vld [vmem:[%s3094_s1 + $0x128] sm:$0xff]   ;;  %v1914_v37 = vcombine.high %v242_v29, %v246_v30  ;;  %v2501_v40 = vld [vmem:[%s3094_s1 + $0x1f0] sm:$0xff]  }
  0x2b   : > { %2291 = vmatprep.subr.bf16.mxu1 %v2477_v42  ;;  %v253_v42 = vld [vmem:[%s2742_s24 + $0x1a0] sm:$0xff]  ;;  %v254_v45 = vld [vmem:[%s2742_s24 + $0x1a8] sm:$0xff] }
  0x2c   : > { %1137 = vmatmul.mubr.bf16.vlgmr.msra.gmra.mrb[0].mxu0 %v1871_v35  ;;  %v1905_v35 = vcombine.low %v234_v16, %v238_v17  ;;  %v258_v56 = vld [vmem:[%s2742_s24 + $0x1c8] sm:$0xff]  ;;  %v1921_v59 = vcombine.low %v250_v44, %v254_v45  ;;  %v220_v16 = vld [vmem:[%s2742_s24 + $0x98] sm:$0xff] }
  0x2d   : > { %1234 = vmatmul.mubr.bf16.vlgmr.msra.gmra.mrb[0].mxu1 %v1873_v38  ;;  %2228 = vmatpush3.bf16.msra.mxu0 %v2476_v41  ;;  %v2499_v38 = vld [vmem:[%s3094_s1 + $0x170] sm:$0xff]   ;;  %v249_v41 = vld [vmem:[%s2742_s24 + $0x180] sm:$0xff]  ;;  %v262_v57 = vld [vmem:[%s2742_s24 + $0x1e8] sm:$0xff] }
  0x2e   : > { %2292 = vmatpush3.bf16.msra.mxu1 %v2478_v43  ;;  %1144 = vmatprep.mubr.bf16.mxu0 %v1880_v46  ;;  %v2502_v43 = vld [vmem:[%s3094_s1 + $0x1b0] sm:$0xff]   ;;  %v2503_v46 = vld [vmem:[%s3094_s1 + $0x178] sm:$0xff]   ;;  %v1919_v58 = vcombine.low %v249_v41, %v253_v42  ;;  %v1929_v3 = vcombine.low %v258_v56, %v262_v57 }
  0x2f   : > { %1241 = vmatprep.mubr.bf16.mxu1 %v1882_v49  ;;  %2229 = vmatprep.subr.bf16.mxu0 %v2479_v50  ;;  %v1913_v49 = vcombine.low %v242_v29, %v246_v30  ;;  %v1920_v50 = vcombine.high %v249_v41, %v253_v42  ;;  %v224_v17 = vld [vmem:[%s2742_s24 + $0xb8] sm:$0xff]  ;;  %v235_v30 = vld [vmem:[%s2742_s24 + $0x110] sm:$0xff] }
  0x30   : > { %2293 = vmatprep.subr.bf16.mxu1 %v2481_v54  ;;  %v257_v54 = vld [vmem:[%s2742_s24 + $0x1c0] sm:$0xff]  ;;  %v1893_v27 = vcombine.low %v220_v16, %v224_v17  ;;  %v248_v41 = vld [vmem:[%s2742_s24 + $0x178] sm:$0xff] }
  0x31   : > { %2230 = vmatpush3.bf16.msra.mxu0 %v2480_v52  ;;  %v1922_v52 = vcombine.high %v250_v44, %v254_v45 }
  0x32   : > { %2294 = vmatpush3.bf16.msra.mxu1 %v2482_v55  ;;  %2231 = vmatprep.subr.bf16.mxu0 %v2483_v62  ;;  %v261_v55 = vld [vmem:[%s2742_s24 + $0x1e0] sm:$0xff]  ;;  %v203_v62 = vld [vmem:[%s2742_s24 + $0x10] sm:$0xff] }
  0x33   : > { %2295 = vmatprep.subr.bf16.mxu1 %v2485_v0  ;;  %v204_v0 = vld [vmem:[%s2742_s24 + $0x18] sm:$0xff] }
  0x34   : > { %1145 = vmatmul.mubr.bf16.gmra.mrb[4].mxu0 %v1879_v51  ;;  %v2505_v51 = vld [vmem:[%s3094_s1 + $0x1f8] sm:$0xff]  }
  0x35   : > { %1242 = vmatmul.mubr.bf16.gmra.mrb[4].mxu1 %v1881_v53  ;;  %1152 = vmatprep.mubr.bf16.mxu0 %v1888_v60  ;;  %v2506_v53 = vld [vmem:[%s3094_s1 + $0x1b8] sm:$0xff]   ;;  %v1928_v60 = vcombine.high %v257_v54, %v261_v55 }
  0x36   : > { %1249 = vmatprep.mubr.bf16.mxu1 %v1890_v61  ;;  %2232 = vmatpush3.bf16.msra.mxu0 %v2484_v63  ;;  %v1930_v61 = vcombine.high %v258_v56, %v262_v57  ;;  %v207_v63 = vld [vmem:[%s2742_s24 + $0x30] sm:$0xff]  ;;  %v260_v56 = vld [vmem:[%s2742_s24 + $0x1d8] sm:$0xff] }
  0x37   : > { %2296 = vmatpush3.bf16.msra.mxu1 %v2486_v1  ;;  %2233 = vmatprep.subr.bf16.mxu0 %v2487_v10  ;;  %v208_v1 = vld [vmem:[%s2742_s24 + $0x38] sm:$0xff]  ;;  %v1876_v4 = vcombine.high %v203_v62, %v207_v63  ;;  %v1875_v10 = vcombine.low %v203_v62, %v207_v63 }
  0x38   : > { %2297 = vmatprep.subr.bf16.mxu1 %v2489_v12  ;;  %v1878_v5 = vcombine.high %v204_v0, %v208_v1  ;;  %v264_v57 = vld [vmem:[%s2742_s24 + $0x1f8] sm:$0xff] }
  0x39   : > { %v1933_v63 = vcombine.low %v260_v56, %v264_v57 }
  0x3a   : > { %2234 = vmatpush3.bf16.msra.mxu0 %v2488_v11  ;;  %v1877_v11 = vcombine.low %v204_v0, %v208_v1 }
  0x3b   : > { %2298 = vmatpush3.bf16.msra.mxu1 %v2490_v13  ;;  %2235 = vmatprep.subr.bf16.mxu0 %v2491_v18 }
  0x3c   : > { %1153 = vmatmul.mubr.bf16.gmra.mrb[8].mxu0 %v1887_v2  ;;  %2299 = vmatprep.subr.bf16.mxu1 %v2493_v23  ;;  %v1927_v2 = vcombine.low %v257_v54, %v261_v55  ;;  %v231_v23 = vld [vmem:[%s2742_s24 + $0xf0] sm:$0xff] }
  0x3d   : > { %1250 = vmatmul.mubr.bf16.gmra.mrb[8].mxu1 %v1889_v6  ;;  %1160 = vmatprep.mubr.bf16.mxu0 %v1896_v7  ;;  %v211_v6 = vld [vmem:[%s2742_s24 + $0x50] sm:$0xff] }
  0x3e   : > { %1257 = vmatprep.mubr.bf16.mxu1 %v1898_v9  ;;  %2236 = vmatpush3.bf16.msra.mxu0 %v2492_v20  ;;  %v215_v7 = vld [vmem:[%s2742_s24 + $0x70] sm:$0xff]  ;;  %v216_v9 = vld [vmem:[%s2742_s24 + $0x78] sm:$0xff]  ;;  %v1892_v20 = vcombine.high %v219_v14, %v223_v15 }
  0x3f   : > { %2300 = vmatpush3.bf16.msra.mxu1 %v2494_v25  ;;  %2237 = vmatprep.subr.bf16.mxu0 %v2495_v28  ;;  %v1884_v12 = vcombine.high %v211_v6, %v215_v7  ;;  %v1886_v13 = vcombine.high %v212_v8, %v216_v9  ;;  %v1883_v18 = vcombine.low %v211_v6, %v215_v7  ;;  %v232_v25 = vld [vmem:[%s2742_s24 + $0xf8] sm:$0xff]  ;;  %v259_v54 = vld [vmem:[%s2742_s24 + $0x1d0] sm:$0xff] }
  0x40   : > { %2301 = vmatprep.subr.bf16.mxu1 %v2497_v32  ;;  %v236_v32 = vld [vmem:[%s2742_s24 + $0x118] sm:$0xff]  ;;  %v263_v55 = vld [vmem:[%s2742_s24 + $0x1f0] sm:$0xff] }
  0x41   : > { %v1931_v62 = vcombine.low %v259_v54, %v263_v55 }
  0x42   : > { %2238 = vmatpush3.bf16.msra.mxu0 %v2496_v31  ;;  %v239_v31 = vld [vmem:[%s2742_s24 + $0x130] sm:$0xff] }
  0x43   : > { %2302 = vmatpush3.bf16.msra.mxu1 %v2498_v33  ;;  %2239 = vmatprep.subr.bf16.mxu0 %v2499_v38  ;;  %v240_v33 = vld [vmem:[%s2742_s24 + $0x138] sm:$0xff]  ;;  %v243_v38 = vld [vmem:[%s2742_s24 + $0x150] sm:$0xff]  ;;  %v1907_v42 = vcombine.low %v235_v30, %v239_v31 }
  0x44   : > { %1161 = vmatmul.mubr.bf16.gmra.mrb[12].mxu0 %v1895_v19  ;;  %2303 = vmatprep.subr.bf16.mxu1 %v2501_v40  ;;  %v1885_v19 = vcombine.low %v212_v8, %v216_v9  ;;  %v244_v40 = vld [vmem:[%s2742_s24 + $0x158] sm:$0xff] }
  0x45   : > { %1258 = vmatmul.mubr.bf16.gmra.mrb[12].mxu1 %v1897_v21  ;;  %1168 = vmatprep.mubr.bf16.mxu0 %v1904_v22  ;;  %v1894_v21 = vcombine.high %v220_v16, %v224_v17  ;;  %v227_v22 = vld [vmem:[%s2742_s24 + $0xd0] sm:$0xff]  ;;  %v1918_v45 = vcombine.high %v244_v40, %v248_v41 }
  0x46   : > { %1265 = vmatprep.mubr.bf16.mxu1 %v1906_v24  ;;  %2240 = vmatpush3.bf16.msra.mxu0 %v2500_v39  ;;  %v228_v24 = vld [vmem:[%s2742_s24 + $0xd8] sm:$0xff]  ;;  %v1900_v28 = vcombine.high %v227_v22, %v231_v23  ;;  %v247_v39 = vld [vmem:[%s2742_s24 + $0x170] sm:$0xff] }
  0x47   : > { %2304 = vmatpush3.bf16.msra.mxu1 %v2502_v43  ;;  %2241 = vmatprep.subr.bf16.mxu0 %v2503_v46  ;;  %v1902_v29 = vcombine.high %v228_v24, %v232_v25  ;;  %v1909_v43 = vcombine.low %v236_v32, %v240_v33  ;;  %v1916_v44 = vcombine.high %v243_v38, %v247_v39  ;;  %v251_v46 = vld [vmem:[%s2742_s24 + $0x190] sm:$0xff] }
  0x48   : > { %2305 = vmatprep.subr.bf16.mxu1 %v2505_v51  ;;  %v1917_v51 = vcombine.low %v244_v40, %v248_v41 }
  0x4a   : > { %2242 = vmatpush3.bf16.msra.mxu0 %v2504_v48  ;;  %v252_v48 = vld [vmem:[%s2742_s24 + $0x198] sm:$0xff] }
  0x4b   : > { %2306 = vmatpush3.bf16.msra.mxu1 %v2506_v53 }
  0x4c   : > { %1169 = vmatmul.mubr.bf16.gmra.mrb[16].mxu0 %v1903_v34  ;;  %v1899_v34 = vcombine.low %v227_v22, %v231_v23 }
  0x4d   : > { %1266 = vmatmul.mubr.bf16.gmra.mrb[16].mxu1 %v1905_v35  ;;  %1176 = vmatprep.mubr.bf16.mxu0 %v1912_v36  ;;  %v1901_v35 = vcombine.low %v228_v24, %v232_v25  ;;  %v1908_v36 = vcombine.high %v235_v30, %v239_v31 }
  0x4e   : > { %1273 = vmatprep.mubr.bf16.mxu1 %v1914_v37  ;;  %v1910_v37 = vcombine.high %v236_v32, %v240_v33 }
  0x54   : > { %1177 = vmatmul.mubr.bf16.gmra.mrb[20].mxu0 %v1911_v47  ;;  %v255_v47 = vld [vmem:[%s2742_s24 + $0x1b0] sm:$0xff] }
  0x55   : > { %1274 = vmatmul.mubr.bf16.gmra.mrb[20].mxu1 %v1913_v49  ;;  %1184 = vmatprep.mubr.bf16.mxu0 %v1920_v50  ;;  %v256_v49 = vld [vmem:[%s2742_s24 + $0x1b8] sm:$0xff]  ;;  %v1915_v50 = vcombine.low %v243_v38, %v247_v39  ;;  %s175_s24 = sand.u32 1, %s2553_s12  }
  0x56   : > { %1281 = vmatprep.mubr.bf16.mxu1 %v1922_v52  ;;  %v1924_v52 = vcombine.high %v251_v46, %v255_v47  ;;  %v1926_v53 = vcombine.high %v252_v48, %v256_v49  ;;  %s1866_s14 = sshll.u32 %s175_s24, 6 }
  0x57   : > { %s2967_s12 = scalar_lea.vmem [#allocation2], %s1866_s14  }
  0x5c   : > { %1185 = vmatmul.mubr.bf16.gmra.mrb[24].mxu0 %v1919_v58  ;;  %v1923_v58 = vcombine.low %v251_v46, %v255_v47 }
  0x5d   : > { %1282 = vmatmul.mubr.bf16.gmra.mrb[24].mxu1 %v1921_v59  ;;  %1192 = vmatprep.mubr.bf16.mxu0 %v1928_v60  ;;  %v1925_v59 = vcombine.low %v252_v48, %v256_v49  ;;  %v1932_v60 = vcombine.high %v259_v54, %v263_v55 }
  0x5e   : > { %1289 = vmatprep.mubr.bf16.mxu1 %v1930_v61  ;;  %v1934_v61 = vcombine.high %v260_v56, %v264_v57 }
  0x64   : > { %1193 = vmatmul.mubr.bf16.gmra.mrb[28].mxu0 %v1927_v2  ;;  %v2913_v2 = vld [vmem:[%s3095_s2] ss:$0 sm:$0xff] }
  0x65   : > { %1290 = vmatmul.mubr.bf16.gmra.mrb[28].mxu1 %v1929_v3  ;;  %1330 = vmatprep.mubr.bf16.mxu0 %v1876_v4 }
  0x66   : > { %1427 = vmatprep.mubr.bf16.mxu1 %v1878_v5 }
  0x6c   : > { %1331 = vmatmul.mubr.bf16.vlgmr.msra.gmra.mrb[32].mxu0 %v1875_v10 }
  0x6d   : > { %1428 = vmatmul.mubr.bf16.vlgmr.msra.gmra.mrb[32].mxu1 %v1877_v11  ;;  %1338 = vmatprep.mubr.bf16.mxu0 %v1884_v12 }
  0x6e   : > { %1435 = vmatprep.mubr.bf16.mxu1 %v1886_v13 }
  0x74   : > { %1339 = vmatmul.mubr.bf16.gmra.mrb[36].mxu0 %v1883_v18 }
  0x75   : > { %1436 = vmatmul.mubr.bf16.gmra.mrb[36].mxu1 %v1885_v19  ;;  %1346 = vmatprep.mubr.bf16.mxu0 %v1892_v20 }
  0x76   : > { %1443 = vmatprep.mubr.bf16.mxu1 %v1894_v21 }
  0x7c   : > { %1347 = vmatmul.mubr.bf16.gmra.mrb[40].mxu0 %v1891_v26 }
  0x7d   : > { %1444 = vmatmul.mubr.bf16.gmra.mrb[40].mxu1 %v1893_v27  ;;  %1354 = vmatprep.mubr.bf16.mxu0 %v1900_v28 }
  0x7e   : > { %1451 = vmatprep.mubr.bf16.mxu1 %v1902_v29 }
  0x84   : > { %1355 = vmatmul.mubr.bf16.gmra.mrb[44].mxu0 %v1899_v34 }
  0x85   : > { %1452 = vmatmul.mubr.bf16.gmra.mrb[44].mxu1 %v1901_v35  ;;  %1362 = vmatprep.mubr.bf16.mxu0 %v1908_v36 }
  0x86   : > { %1459 = vmatprep.mubr.bf16.mxu1 %v1910_v37 }
  0x8c   : > { %1363 = vmatmul.mubr.bf16.gmra.mrb[48].mxu0 %v1907_v42 }
  0x8d   : > { %1460 = vmatmul.mubr.bf16.gmra.mrb[48].mxu1 %v1909_v43  ;;  %1370 = vmatprep.mubr.bf16.mxu0 %v1916_v44 }
  0x8e   : > { %1467 = vmatprep.mubr.bf16.mxu1 %v1918_v45 }
  0x94   : > { %1371 = vmatmul.mubr.bf16.gmra.mrb[52].mxu0 %v1915_v50 }
  0x95   : > { %1468 = vmatmul.mubr.bf16.gmra.mrb[52].mxu1 %v1917_v51  ;;  %1378 = vmatprep.mubr.bf16.mxu0 %v1924_v52 }
  0x96   : > { %1475 = vmatprep.mubr.bf16.mxu1 %v1926_v53 }
  0x9c   : > { %1379 = vmatmul.mubr.bf16.gmra.mrb[56].mxu0 %v1923_v58 }
  0x9d   : > { %1476 = vmatmul.mubr.bf16.gmra.mrb[56].mxu1 %v1925_v59  ;;  %1386 = vmatprep.mubr.bf16.mxu0 %v1932_v60 }
  0x9e   : > { %1483 = vmatprep.mubr.bf16.mxu1 %v1934_v61 }
  0xa4   : > { %1387 = vmatmul.mubr.bf16.gmra.mrb[60].mxu0 %v1931_v62 }
  0xa5   : > { %1484 = vmatmul.mubr.bf16.gmra.mrb[60].mxu1 %v1933_v63 }
  0xff   : > { %v2115_v0 = vpop.f32.mrb[0].mxu0 }
 0x100   : > { %v2179_v1 = vpop.f32.mrb[0].mxu1  ;;  %v2116_v3 = vpop.f32.mrb[1].mxu0 }
 0x101   : > { %v2117_v4 = vadd.f32 %v2116_v3, %v2115_v0  ;;  %v2180_v5 = vpop.f32.mrb[1].mxu1  ;;  %v2118_v6 = vpop.f32.mrb[2].mxu0 }
 0x102   : > { %v2181_v7 = vadd.f32 %v2180_v5, %v2179_v1  ;;  %v2182_v8 = vpop.f32.mrb[2].mxu1  ;;  %v2119_v9 = vpop.f32.mrb[3].mxu0 }
 0x103   : > { %v1139_v10 = vadd.f32 %v2117_v4, %v2913_v2  ;;  %v2120_v11 = vadd.f32 %v2119_v9, %v2118_v6  ;;  %v2183_v12 = vpop.f32.mrb[3].mxu1 }
 0x104   : > { %v2184_v13 = vadd.f32 %v2183_v12, %v2182_v8 }
 0x105   : > { %v2916_v14 = vadd.f32 %v2181_v7, %v1139_v10  ;;  %v1142_v15 = vadd.f32 %v2120_v11, %v2913_v2 }
 0x107   : > { %v2919_v16 = vadd.f32 %v2184_v13, %v1142_v15  ;;  %v2121_v17 = vpop.f32.mrb[4].mxu0 }
 0x108   : > { %v2185_v18 = vpop.f32.mrb[4].mxu1  ;;  %v2122_v19 = vpop.f32.mrb[5].mxu0 }
 0x109   : > { %v2123_v20 = vadd.f32 %v2122_v19, %v2121_v17  ;;  %v2186_v21 = vpop.f32.mrb[5].mxu1  ;;  %v2124_v22 = vpop.f32.mrb[6].mxu0 }
 0x10a   : > { %v2187_v23 = vadd.f32 %v2186_v21, %v2185_v18  ;;  %v2188_v24 = vpop.f32.mrb[6].mxu1  ;;  %v2125_v25 = vpop.f32.mrb[7].mxu0 }
 0x10b   : > { %v1147_v26 = vadd.f32 %v2123_v20, %v2913_v2  ;;  %v2126_v27 = vadd.f32 %v2125_v25, %v2124_v22  ;;  %v2189_v28 = vpop.f32.mrb[7].mxu1 }
 0x10c   : > { %v2190_v29 = vadd.f32 %v2189_v28, %v2188_v24 }
 0x10d   : > { %v2922_v30 = vadd.f32 %v2187_v23, %v1147_v26  ;;  %v1150_v31 = vadd.f32 %v2126_v27, %v2913_v2 }
 0x10f   : > { %v2925_v32 = vadd.f32 %v2190_v29, %v1150_v31  ;;  %v2127_v33 = vpop.f32.mrb[8].mxu0 }
 0x110   : > { %v2191_v34 = vpop.f32.mrb[8].mxu1  ;;  %v2128_v35 = vpop.f32.mrb[9].mxu0 }
 0x111   : > { %v2129_v36 = vadd.f32 %v2128_v35, %v2127_v33  ;;  %v2192_v37 = vpop.f32.mrb[9].mxu1  ;;  %v2130_v38 = vpop.f32.mrb[10].mxu0 }
 0x112   : > { %v2193_v39 = vadd.f32 %v2192_v37, %v2191_v34  ;;  %v2194_v40 = vpop.f32.mrb[10].mxu1  ;;  %v2131_v41 = vpop.f32.mrb[11].mxu0 }
 0x113   : > { %v1155_v42 = vadd.f32 %v2129_v36, %v2913_v2  ;;  %v2132_v43 = vadd.f32 %v2131_v41, %v2130_v38  ;;  %v2195_v44 = vpop.f32.mrb[11].mxu1 }
 0x114   : > { %v2196_v45 = vadd.f32 %v2195_v44, %v2194_v40 }
 0x115   : > { %v2928_v46 = vadd.f32 %v2193_v39, %v1155_v42  ;;  %v1158_v47 = vadd.f32 %v2132_v43, %v2913_v2 }
 0x117   : > { %v2931_v48 = vadd.f32 %v2196_v45, %v1158_v47  ;;  %v2133_v49 = vpop.f32.mrb[12].mxu0 }
 0x118   : > { %v2197_v50 = vpop.f32.mrb[12].mxu1  ;;  %v2134_v51 = vpop.f32.mrb[13].mxu0 }
 0x119   : > { %v2135_v52 = vadd.f32 %v2134_v51, %v2133_v49  ;;  %v2198_v53 = vpop.f32.mrb[13].mxu1  ;;  %v2136_v54 = vpop.f32.mrb[14].mxu0 }
 0x11a   : > { %v2199_v55 = vadd.f32 %v2198_v53, %v2197_v50  ;;  %v2200_v56 = vpop.f32.mrb[14].mxu1  ;;  %v2137_v57 = vpop.f32.mrb[15].mxu0 }
 0x11b   : > { %v1163_v58 = vadd.f32 %v2135_v52, %v2913_v2  ;;  %v2138_v59 = vadd.f32 %v2137_v57, %v2136_v54  ;;  %v2201_v60 = vpop.f32.mrb[15].mxu1 }
 0x11c   : > { %v2202_v61 = vadd.f32 %v2201_v60, %v2200_v56 }
 0x11d   : > { %v2934_v62 = vadd.f32 %v2199_v55, %v1163_v58  ;;  %v1166_v63 = vadd.f32 %v2138_v59, %v2913_v2 }
 0x11f   : > { %v2937_v0 = vadd.f32 %v2202_v61, %v1166_v63  ;;  %v2139_v1 = vpop.f32.mrb[16].mxu0 }
 0x120   : > { %v2203_v3 = vpop.f32.mrb[16].mxu1  ;;  %v2140_v4 = vpop.f32.mrb[17].mxu0 }
 0x121   : > { %v2141_v5 = vadd.f32 %v2140_v4, %v2139_v1  ;;  %v2204_v6 = vpop.f32.mrb[17].mxu1  ;;  %v2142_v7 = vpop.f32.mrb[18].mxu0 }
 0x122   : > { %v2205_v8 = vadd.f32 %v2204_v6, %v2203_v3  ;;  %v2206_v9 = vpop.f32.mrb[18].mxu1  ;;  %v2143_v10 = vpop.f32.mrb[19].mxu0 }
 0x123   : > { %v1171_v11 = vadd.f32 %v2141_v5, %v2913_v2  ;;  %v2144_v12 = vadd.f32 %v2143_v10, %v2142_v7  ;;  %v2207_v13 = vpop.f32.mrb[19].mxu1 }
 0x124   : > { %v2208_v15 = vadd.f32 %v2207_v13, %v2206_v9 }
 0x125   : > { %v2940_v17 = vadd.f32 %v2205_v8, %v1171_v11  ;;  %v1174_v18 = vadd.f32 %v2144_v12, %v2913_v2 }
 0x127   : > { %v2943_v19 = vadd.f32 %v2208_v15, %v1174_v18  ;;  %v2145_v20 = vpop.f32.mrb[20].mxu0 }
 0x128   : > { %v2209_v21 = vpop.f32.mrb[20].mxu1  ;;  %v2146_v22 = vpop.f32.mrb[21].mxu0 }
 0x129   : > { %v2147_v23 = vadd.f32 %v2146_v22, %v2145_v20  ;;  %v2210_v24 = vpop.f32.mrb[21].mxu1  ;;  %v2148_v25 = vpop.f32.mrb[22].mxu0 }
 0x12a   : > { %v2211_v26 = vadd.f32 %v2210_v24, %v2209_v21  ;;  %v2212_v27 = vpop.f32.mrb[22].mxu1  ;;  %v2149_v28 = vpop.f32.mrb[23].mxu0 }
 0x12b   : > { %v1179_v29 = vadd.f32 %v2147_v23, %v2913_v2  ;;  %v2150_v31 = vadd.f32 %v2149_v28, %v2148_v25  ;;  %v2213_v33 = vpop.f32.mrb[23].mxu1 }
 0x12c   : > { %v2214_v34 = vadd.f32 %v2213_v33, %v2212_v27 }
 0x12d   : > { %v2946_v35 = vadd.f32 %v2211_v26, %v1179_v29  ;;  %v1182_v36 = vadd.f32 %v2150_v31, %v2913_v2 }
 0x12f   : > { %v2949_v37 = vadd.f32 %v2214_v34, %v1182_v36  ;;  %v2151_v38 = vpop.f32.mrb[24].mxu0 }
 0x130   : > { %v2215_v39 = vpop.f32.mrb[24].mxu1  ;;  %v2152_v40 = vpop.f32.mrb[25].mxu0 }
 0x131   : > { %v2153_v41 = vadd.f32 %v2152_v40, %v2151_v38  ;;  %v2216_v42 = vpop.f32.mrb[25].mxu1  ;;  %v2154_v43 = vpop.f32.mrb[26].mxu0 }
 0x132   : > { %v2217_v44 = vadd.f32 %v2216_v42, %v2215_v39  ;;  %v2218_v45 = vpop.f32.mrb[26].mxu1  ;;  %v2155_v47 = vpop.f32.mrb[27].mxu0 }
 0x133   : > { %v1187_v49 = vadd.f32 %v2153_v41, %v2913_v2  ;;  %v2156_v50 = vadd.f32 %v2155_v47, %v2154_v43  ;;  %v2219_v51 = vpop.f32.mrb[27].mxu1 }
 0x134   : > { %v2220_v52 = vadd.f32 %v2219_v51, %v2218_v45 }
 0x135   : > { %v2952_v53 = vadd.f32 %v2217_v44, %v1187_v49  ;;  %v1190_v54 = vadd.f32 %v2156_v50, %v2913_v2 }
 0x137   : > { %v2955_v55 = vadd.f32 %v2220_v52, %v1190_v54  ;;  %v2157_v56 = vpop.f32.mrb[28].mxu0 }
 0x138   : > { %v2221_v57 = vpop.f32.mrb[28].mxu1  ;;  %v2158_v58 = vpop.f32.mrb[29].mxu0 }
 0x139   : > { %v2159_v59 = vadd.f32 %v2158_v58, %v2157_v56  ;;  %v2222_v60 = vpop.f32.mrb[29].mxu1  ;;  %v2160_v61 = vpop.f32.mrb[30].mxu0 }
 0x13a   : > { %v2223_v63 = vadd.f32 %v2222_v60, %v2221_v57  ;;  %v2224_v1 = vpop.f32.mrb[30].mxu1  ;;  %v2161_v3 = vpop.f32.mrb[31].mxu0 }
 0x13b   : > { %v1195_v4 = vadd.f32 %v2159_v59, %v2913_v2  ;;  %v2162_v5 = vadd.f32 %v2161_v3, %v2160_v61  ;;  %v2225_v6 = vpop.f32.mrb[31].mxu1 }
 0x13c   : > { %v2226_v7 = vadd.f32 %v2225_v6, %v2224_v1 }
 0x13d   : > { %v2958_v8 = vadd.f32 %v2223_v63, %v1195_v4  ;;  %v1198_v9 = vadd.f32 %v2162_v5, %v2913_v2 }
 0x13f   : > { %v2961_v10 = vadd.f32 %v2226_v7, %v1198_v9  ;;  %v2243_v11 = vpop.f32.mrb[32].mxu0 }
 0x140   : > { %v2307_v12 = vpop.f32.mrb[32].mxu1  ;;  %v2244_v13 = vpop.f32.mrb[33].mxu0 }
 0x141   : > { %v2245_v15 = vadd.f32 %v2244_v13, %v2243_v11  ;;  %v2308_v18 = vpop.f32.mrb[33].mxu1  ;;  %v2246_v20 = vpop.f32.mrb[34].mxu0 }
 0x142   : > { %v2309_v21 = vadd.f32 %v2308_v18, %v2307_v12  ;;  %v2310_v22 = vpop.f32.mrb[34].mxu1  ;;  %v2247_v23 = vpop.f32.mrb[35].mxu0 }
 0x143   : > { %v1333_v24 = vadd.f32 %v2245_v15, %v2916_v14  ;;  %v2248_v25 = vadd.f32 %v2247_v23, %v2246_v20  ;;  %v2311_v26 = vpop.f32.mrb[35].mxu1 }
 0x144   : > { %v2312_v27 = vadd.f32 %v2311_v26, %v2310_v22 }
 0x145   : > { %v1430_v28 = vadd.f32 %v2309_v21, %v1333_v24  ;;  %v1336_v2 = vadd.f32 %v2248_v25, %v2919_v16 }
 0x147   : > { %v1433_v29 = vadd.f32 %v2312_v27, %v1336_v2  ;;  %v2249_v31 = vpop.f32.mrb[36].mxu0  ;;  %v1492_v36 = vmax.f32 %v1430_v28, 0.0 }
 0x148   : > { %v2313_v33 = vpop.f32.mrb[36].mxu1  ;;  %v2250_v34 = vpop.f32.mrb[37].mxu0 }
 0x149   : > { %v1493_v38 = vmax.f32 %v1433_v29, 0.0  ;;  %v2251_v39 = vadd.f32 %v2250_v34, %v2249_v31  ;;  %v2314_v40 = vpop.f32.mrb[37].mxu1  ;;  %v2252_v41 = vpop.f32.mrb[38].mxu0 }
 0x14a   : > { %v2315_v42 = vadd.f32 %v2314_v40, %v2313_v33  ;;  %v2316_v43 = vpop.f32.mrb[38].mxu1  ;;  %v2253_v14 = vpop.f32.mrb[39].mxu0 }
 0x14b   : > { %v2055_v44 = vpack.c.bf16 %v1493_v38, %v1492_v36  ;;  %v1341_v45 = vadd.f32 %v2251_v39, %v2922_v30  ;;  %v2254_v47 = vadd.f32 %v2253_v14, %v2252_v41  ;;  %v2317_v49 = vpop.f32.mrb[39].mxu1 }
 0x14c   : > { %v2318_v50 = vadd.f32 %v2317_v49, %v2316_v43 }
 0x14d   : > { %2056 = vst [vmem:[%s2967_s12] sm:$0xff] %v2055_v44   ;;  %v1438_v16 = vadd.f32 %v2315_v42, %v1341_v45  ;;  %v1344_v51 = vadd.f32 %v2254_v47, %v2925_v32 }
 0x14f   : > { %v1441_v52 = vadd.f32 %v2318_v50, %v1344_v51  ;;  %v2255_v54 = vpop.f32.mrb[40].mxu0  ;;  %v1494_v58 = vmax.f32 %v1438_v16, 0.0 }
 0x150   : > { %v2319_v56 = vpop.f32.mrb[40].mxu1  ;;  %v2256_v57 = vpop.f32.mrb[41].mxu0 }
 0x151   : > { %v1495_v59 = vmax.f32 %v1441_v52, 0.0  ;;  %v2257_v60 = vadd.f32 %v2256_v57, %v2255_v54  ;;  %v2320_v61 = vpop.f32.mrb[41].mxu1  ;;  %v2258_v30 = vpop.f32.mrb[42].mxu0 }
 0x152   : > { %v2321_v63 = vadd.f32 %v2320_v61, %v2319_v56  ;;  %v2322_v1 = vpop.f32.mrb[42].mxu1  ;;  %v2259_v3 = vpop.f32.mrb[43].mxu0 }
 0x153   : > { %v2060_v4 = vpack.c.bf16 %v1495_v59, %v1494_v58  ;;  %v1349_v5 = vadd.f32 %v2257_v60, %v2928_v46  ;;  %v2260_v6 = vadd.f32 %v2259_v3, %v2258_v30  ;;  %v2323_v7 = vpop.f32.mrb[43].mxu1 }
 0x154   : > { %v2324_v9 = vadd.f32 %v2323_v7, %v2322_v1 }
 0x155   : > { %2092 = vst [vmem:[%s2967_s12 + $0x8] sm:$0xff] %v2060_v4   ;;  %v1446_v32 = vadd.f32 %v2321_v63, %v1349_v5  ;;  %v1352_v11 = vadd.f32 %v2260_v6, %v2931_v48 }
 0x157   : > { %v1449_v12 = vadd.f32 %v2324_v9, %v1352_v11  ;;  %v2261_v13 = vpop.f32.mrb[44].mxu0  ;;  %v1496_v20 = vmax.f32 %v1446_v32, 0.0 }
 0x158   : > { %v2325_v15 = vpop.f32.mrb[44].mxu1  ;;  %v2262_v18 = vpop.f32.mrb[45].mxu0 }
 0x159   : > { %v1497_v21 = vmax.f32 %v1449_v12, 0.0  ;;  %v2263_v22 = vadd.f32 %v2262_v18, %v2261_v13  ;;  %v2326_v23 = vpop.f32.mrb[45].mxu1  ;;  %v2264_v24 = vpop.f32.mrb[46].mxu0 }
 0x15a   : > { %v2327_v25 = vadd.f32 %v2326_v23, %v2325_v15  ;;  %v2328_v26 = vpop.f32.mrb[46].mxu1  ;;  %v2265_v46 = vpop.f32.mrb[47].mxu0 }
 0x15b   : > { %v2065_v27 = vpack.c.bf16 %v1497_v21, %v1496_v20  ;;  %v1357_v28 = vadd.f32 %v2263_v22, %v2934_v62  ;;  %v2266_v2 = vadd.f32 %v2265_v46, %v2264_v24  ;;  %v2329_v29 = vpop.f32.mrb[47].mxu1 }
 0x15c   : > { %v2330_v31 = vadd.f32 %v2329_v29, %v2328_v26 }
 0x15d   : > { %2093 = vst [vmem:[%s2967_s12 + $0x10] sm:$0xff] %v2065_v27   ;;  %v1454_v48 = vadd.f32 %v2327_v25, %v1357_v28  ;;  %v1360_v33 = vadd.f32 %v2266_v2, %v2937_v0 }
 0x15f   : > { %v1457_v34 = vadd.f32 %v2330_v31, %v1360_v33  ;;  %v2267_v36 = vpop.f32.mrb[48].mxu0  ;;  %v1498_v40 = vmax.f32 %v1454_v48, 0.0 }
 0x160   : > { %v2331_v38 = vpop.f32.mrb[48].mxu1  ;;  %v2268_v39 = vpop.f32.mrb[49].mxu0 }
 0x161   : > { %v1499_v41 = vmax.f32 %v1457_v34, 0.0  ;;  %v2269_v42 = vadd.f32 %v2268_v39, %v2267_v36  ;;  %v2332_v43 = vpop.f32.mrb[49].mxu1  ;;  %v2270_v14 = vpop.f32.mrb[50].mxu0 }
 0x162   : > { %v2333_v44 = vadd.f32 %v2332_v43, %v2331_v38  ;;  %v2334_v45 = vpop.f32.mrb[50].mxu1  ;;  %v2271_v62 = vpop.f32.mrb[51].mxu0 }
 0x163   : > { %v2070_v47 = vpack.c.bf16 %v1499_v41, %v1498_v40  ;;  %v1365_v49 = vadd.f32 %v2269_v42, %v2940_v17  ;;  %v2272_v50 = vadd.f32 %v2271_v62, %v2270_v14  ;;  %v2335_v16 = vpop.f32.mrb[51].mxu1 }
 0x164   : > { %v2336_v51 = vadd.f32 %v2335_v16, %v2334_v45 }
 0x165   : > { %2094 = vst [vmem:[%s2967_s12 + $0x18] sm:$0xff] %v2070_v47   ;;  %v1462_v0 = vadd.f32 %v2333_v44, %v1365_v49  ;;  %v1368_v52 = vadd.f32 %v2272_v50, %v2943_v19 }
 0x167   : > { %v1465_v54 = vadd.f32 %v2336_v51, %v1368_v52  ;;  %v2273_v56 = vpop.f32.mrb[52].mxu0  ;;  %v1500_v59 = vmax.f32 %v1462_v0, 0.0 }
 0x168   : > { %v2337_v57 = vpop.f32.mrb[52].mxu1  ;;  %v2274_v58 = vpop.f32.mrb[53].mxu0 }
 0x169   : > { %v1501_v60 = vmax.f32 %v1465_v54, 0.0  ;;  %v2275_v61 = vadd.f32 %v2274_v58, %v2273_v56  ;;  %v2338_v30 = vpop.f32.mrb[53].mxu1  ;;  %v2276_v63 = vpop.f32.mrb[54].mxu0 }
 0x16a   : > { %v2339_v1 = vadd.f32 %v2338_v30, %v2337_v57  ;;  %v2340_v3 = vpop.f32.mrb[54].mxu1  ;;  %v2277_v17 = vpop.f32.mrb[55].mxu0 }
 0x16b   : > { %v2075_v4 = vpack.c.bf16 %v1501_v60, %v1500_v59  ;;  %v1373_v5 = vadd.f32 %v2275_v61, %v2946_v35  ;;  %v2278_v6 = vadd.f32 %v2277_v17, %v2276_v63  ;;  %v2341_v7 = vpop.f32.mrb[55].mxu1 }
 0x16c   : > { %v2342_v9 = vadd.f32 %v2341_v7, %v2340_v3 }
 0x16d   : > { %2095 = vst [vmem:[%s2967_s12 + $0x20] sm:$0xff] %v2075_v4   ;;  %v1470_v19 = vadd.f32 %v2339_v1, %v1373_v5  ;;  %v1376_v32 = vadd.f32 %v2278_v6, %v2949_v37 }
 0x16f   : > { %v1473_v11 = vadd.f32 %v2342_v9, %v1376_v32  ;;  %v2279_v12 = vpop.f32.mrb[56].mxu0  ;;  %v1502_v18 = vmax.f32 %v1470_v19, 0.0 }
 0x170   : > { %v2343_v13 = vpop.f32.mrb[56].mxu1  ;;  %v2280_v15 = vpop.f32.mrb[57].mxu0 }
 0x171   : > { %v1503_v20 = vmax.f32 %v1473_v11, 0.0  ;;  %v2281_v21 = vadd.f32 %v2280_v15, %v2279_v12  ;;  %v2344_v22 = vpop.f32.mrb[57].mxu1  ;;  %v2282_v23 = vpop.f32.mrb[58].mxu0 }
 0x172   : > { %v2345_v24 = vadd.f32 %v2344_v22, %v2343_v13  ;;  %v2346_v25 = vpop.f32.mrb[58].mxu1  ;;  %v2283_v35 = vpop.f32.mrb[59].mxu0 }
 0x173   : > { %v2080_v26 = vpack.c.bf16 %v1503_v20, %v1502_v18  ;;  %v1381_v46 = vadd.f32 %v2281_v21, %v2952_v53  ;;  %v2284_v27 = vadd.f32 %v2283_v35, %v2282_v23  ;;  %v2347_v28 = vpop.f32.mrb[59].mxu1 }
 0x174   : > { %v2348_v2 = vadd.f32 %v2347_v28, %v2346_v25 }
 0x175   : > { %2096 = vst [vmem:[%s2967_s12 + $0x28] sm:$0xff] %v2080_v26   ;;  %v1478_v37 = vadd.f32 %v2345_v24, %v1381_v46  ;;  %v1384_v29 = vadd.f32 %v2284_v27, %v2955_v55 }
 0x177   : > { %v1481_v31 = vadd.f32 %v2348_v2, %v1384_v29  ;;  %v2285_v48 = vpop.f32.mrb[60].mxu0  ;;  %v1504_v36 = vmax.f32 %v1478_v37, 0.0 }
 0x178   : > { %v2349_v33 = vpop.f32.mrb[60].mxu1  ;;  %v2286_v34 = vpop.f32.mrb[61].mxu0 }
 0x179   : > { %v1505_v38 = vmax.f32 %v1481_v31, 0.0  ;;  %v2287_v39 = vadd.f32 %v2286_v34, %v2285_v48  ;;  %v2350_v40 = vpop.f32.mrb[61].mxu1  ;;  %v2288_v41 = vpop.f32.mrb[62].mxu0 }
 0x17a   : > { %v2351_v42 = vadd.f32 %v2350_v40, %v2349_v33  ;;  %v2352_v53 = vpop.f32.mrb[62].mxu1  ;;  %v2289_v43 = vpop.f32.mrb[63].mxu0 }
 0x17b   : > { %v2085_v14 = vpack.c.bf16 %v1505_v38, %v1504_v36  ;;  %v1389_v44 = vadd.f32 %v2287_v39, %v2958_v8  ;;  %v2290_v45 = vadd.f32 %v2289_v43, %v2288_v41  ;;  %v2353_v62 = vpop.f32.mrb[63].mxu1 }
 0x17c   : > { %v2354_v55 = vadd.f32 %v2353_v62, %v2352_v53 }
 0x17d   : > { %2097 = vst [vmem:[%s2967_s12 + $0x30] sm:$0xff] %v2085_v14   ;;  %v1486_v47 = vadd.f32 %v2351_v42, %v1389_v44  ;;  %v1392_v49 = vadd.f32 %v2290_v45, %v2961_v10 }
 0x17f   : > { %v1489_v50 = vadd.f32 %v2354_v55, %v1392_v49  ;;  %v1506_v16 = vmax.f32 %v1486_v47, 0.0  ;;  %1594 = sbr.rel (!%p2640_p4) target bundleno = 449 (0x1c1), region = 36 }
 0x181   : > { %v1507_v51 = vmax.f32 %v1489_v50, 0.0 }
 0x183   : > { %v2090_v0 = vpack.c.bf16 %v1507_v51, %v1506_v16 }
 0x185   : > { %2098 = vst [vmem:[%s2967_s12 + $0x38] sm:$0xff] %v2090_v0  }
 0x186   : > { %s3105_s17 = smov (!%p1597_p8, %s1596_s17), 16 }
 0x187   : > { %s2017_s25 = sshll.u32 %s3105_s17, 6 }
 0x188   : > { %p2020_p9 = scmp.eq.s32.totalorder %s2017_s25, 0 }
 0x189   : > { %s3003_s26 = sshrl.u32 (!%p2020_p9), %s3105_s17, 4 }
 0x18a   : > { %1605 = sbr.rel (%p2020_p9) target bundleno = 449 (0x1c1), region = 40  ;;  %p2021_p10 = scmp.le.s32.totalorder (!%p2020_p9), %s3003_s26, 0 }
 0x191   : > { %1818 = sbr.rel (%p2021_p10) target bundleno = 428 (0x1ac), region = 112  ;;  %s3098_s15 = smov (!%p2021_p10), %s2997_s23 }
 0x192   : > { %s3099_s20 = smov (!%p2021_p10), %s2967_s12  ;;  %s3012_s5 = smov (!%p2021_p10), 0  }
 0x193   : > { %s3014_s27 = smov (!%p2021_p10), 0  }
 0x198 LB: >> { %v1621_v8 = vld [vmem:[%s2569_s20] sm:$0xf]  ;;  %v1623_v10 = vld [vmem:[%s2569_s20 + $0x4] sm:$0xf]  ;;  %v1625_v52 = vld [vmem:[%s2569_s20 + $0x8] sm:$0xf]  ;;  %s2577_s27 = sphi %s3014_s27, %s1615_s27   ;;  %s2573_s5 = sphi %s3012_s5, %s3100_s5   ;;  %s2569_s20 = sphi %s3099_s20, %s1658_s20   ;;  %s2565_s15 = sphi %s3098_s15, %s1659_s15  }
 0x199   : >> { %1622 = vst [vmem:[%s2565_s15] sm:$0xf] %v1621_v8  ;;  %1624 = vst [vmem:[%s2565_s15 + $0x4] sm:$0xf] %v1623_v10  ;;  %v1627_v54 = vld [vmem:[%s2569_s20 + $0xc] sm:$0xf]  ;;  %s1653_s28 = sadd.s32 1, %s2573_s5 }
 0x19a   : >> { %1626 = vst [vmem:[%s2565_s15 + $0x8] sm:$0xf] %v1625_v52  ;;  %v1629_v56 = vld [vmem:[%s2569_s20 + $0x10] sm:$0xf]  ;;  %v1631_v57 = vld [vmem:[%s2569_s20 + $0x14] sm:$0xf]  ;;  %p1654_p11 = scmp.ge.s32.totalorder %s1653_s28, %s3003_s26 }
 0x19b   : >> { %1628 = vst [vmem:[%s2565_s15 + $0xc] sm:$0xf] %v1627_v54  ;;  %1630 = vst [vmem:[%s2565_s15 + $0x10] sm:$0xf] %v1629_v56  ;;  %v1633_v58 = vld [vmem:[%s2569_s20 + $0x18] sm:$0xf] }
 0x19c   : >> { %1632 = vst [vmem:[%s2565_s15 + $0x14] sm:$0xf] %v1631_v57  ;;  %v1635_v59 = vld [vmem:[%s2569_s20 + $0x1c] sm:$0xf]  ;;  %v1637_v60 = vld [vmem:[%s2569_s20 + $0x20] sm:$0xf] }
 0x19d   : >> { %1634 = vst [vmem:[%s2565_s15 + $0x18] sm:$0xf] %v1633_v58  ;;  %1636 = vst [vmem:[%s2565_s15 + $0x1c] sm:$0xf] %v1635_v59  ;;  %v1639_v61 = vld [vmem:[%s2569_s20 + $0x24] sm:$0xf] }
 0x19e   : >> { %1638 = vst [vmem:[%s2565_s15 + $0x20] sm:$0xf] %v1637_v60  ;;  %v1641_v30 = vld [vmem:[%s2569_s20 + $0x28] sm:$0xf]  ;;  %v1643_v63 = vld [vmem:[%s2569_s20 + $0x2c] sm:$0xf] }
 0x19f   : >> { %1640 = vst [vmem:[%s2565_s15 + $0x24] sm:$0xf] %v1639_v61  ;;  %1642 = vst [vmem:[%s2565_s15 + $0x28] sm:$0xf] %v1641_v30  ;;  %v1645_v1 = vld [vmem:[%s2569_s20 + $0x30] sm:$0xf] }
 0x1a0   : >> { %1644 = vst [vmem:[%s2565_s15 + $0x2c] sm:$0xf] %v1643_v63  ;;  %v1647_v3 = vld [vmem:[%s2569_s20 + $0x34] sm:$0xf]  ;;  %v1649_v17 = vld [vmem:[%s2569_s20 + $0x38] sm:$0xf] }
 0x1a1   : >> { %1646 = vst [vmem:[%s2565_s15 + $0x30] sm:$0xf] %v1645_v1  ;;  %1648 = vst [vmem:[%s2565_s15 + $0x34] sm:$0xf] %v1647_v3  ;;  %v1651_v4 = vld [vmem:[%s2569_s20 + $0x3c] sm:$0xf] }
 0x1a2   : >> { %1650 = vst [vmem:[%s2565_s15 + $0x38] sm:$0xf] %v1649_v17  ;;  %1652 = vst [vmem:[%s2565_s15 + $0x3c] sm:$0xf] %v1651_v4  ;;  %s3107_s28 = smov (%p1654_p11, %s1653_s28), 0  ;;  %s1615_s27 = sadd.s32 1, %s2577_s27  }
 0x1a3   : >> { %s2022_s29 = sshll.u32 %s3107_s28, 6  ;;  %p1614_p12 = scmp.ge.s32.totalorder %s1615_s27, %s3003_s26 }
 0x1a4   : >> { %s1658_s20 = scalar_lea.vmem %s2967_s12, %s2022_s29 [#allocation2]   ;;  %s1659_s15 = scalar_lea.vmem %s2997_s23, %s2022_s29  }
 0x1a5   : >> { %s3100_s5 = smov %s3107_s28  ;;  %1617 = sbr.rel (!%p1614_p12) target bundleno = 408 (0x198), region = 118 }
 0x1ac PF: > { %s3075_s30 = sand.u32 15, %s3105_s17   ;;  %s2050_s4 = sshll.u32 %s3003_s26, 6 }
 0x1ad   : > { %s1664_s6 = scalar_lea.vmem %s2967_s12, %s2050_s4 [#allocation2]   ;;  %s1666_s7 = scalar_lea.vmem %s2997_s23, %s2050_s4  }
 0x1ae   : > { %p2027_p13 = scmp.le.s32.totalorder %s3075_s30, 0 }
 0x1af   : > { %s2579_s8 = smov (!%p2027_p13), %s1666_s7   ;;  %s2583_s9 = smov (!%p2027_p13), %s1664_s6  }
 0x1b0   : > { %1832 = sbr.rel (%p2027_p13) target bundleno = 449 (0x1c1), region = 123  ;;  %s2587_s10 = smov (!%p2027_p13), 0  }
 0x1b1   : > { %s2591_s11 = smov (!%p2027_p13), 0  }
 0x1b7 LB: >> { %v1676_v5 = vld [vmem:[%s2585_s9] sm:$0xf]  ;;  %s1678_s24 = sadd.s32 1, %s2589_s10  ;;  %s1670_s11 = sadd.s32 1, %s2593_s11   ;;  %s2593_s11 = sphi %s2591_s11, %s1670_s11   ;;  %s2589_s10 = sphi %s2587_s10, %s2588_s10   ;;  %s2585_s9 = sphi %s2583_s9, %s1683_s9   ;;  %s2581_s8 = sphi %s2579_s8, %s1684_s8  }
 0x1b8   : >> { %1677 = vst [vmem:[%s2581_s8] sm:$0xf] %v1676_v5  ;;  %p1679_p0 = scmp.ge.s32.totalorder %s1678_s24, %s3075_s30  ;;  %p1669_p1 = scmp.ge.s32.totalorder %s1670_s11, %s3075_s30 }
 0x1ba   : >> { %s3109_s24 = smov (%p1679_p0, %s1678_s24), 0  ;;  %1672 = sbr.rel (!%p1669_p1) target bundleno = 439 (0x1b7), region = 129 }
 0x1bb   : >> { %s2028_s14 = sshll.u32 %s3109_s24, 2  ;;  %s2588_s10 = smov %s3109_s24  }
 0x1bc   : >> { %s1683_s9 = scalar_lea.vmem %s1664_s6, %s2028_s14 [#allocation2]   ;;  %s1684_s8 = scalar_lea.vmem %s1666_s7, %s2028_s14  }
 0x1c1 PF: > { %p10_p2 = scmp.ge.s32.totalorder %s2630_s16, 4   ;;  %s3101_s12 = smov %s2557_s13 }
 0x1c2   : > { %s3102_s13 = smov %s2638_s19  ;;  %s3103_s14 = smov %s2630_s16 }
 0x1c3   :  { %12 = sbr.rel (!%p10_p2) target bundleno = 2 (0x2), region = 140 }

// kernel: nature_cnn_amm_forward.8
= control target key start
LH: loop header
LB: loop body
LE: loop exit
PB: predicated region body
PF: predicated region fallthrough
CT: control target
= control target key end

     0   :  { %s3285_s24 = smov 0   ;;  %s4103_s0 = inlined_call_operand.vmem [shape: bf16[2,54,1152], index: 0, kind: input, shape index: {}]   ;;  %s4104_s1 = inlined_call_operand.vmem [shape: bf16[1152,64], index: 1, kind: input, shape index: {}]   ;;  %s4105_s2 = inlined_call_operand.vmem [shape: f32[1,64], index: 2, kind: input, shape index: {}]   ;;  %s4106_s3 = inlined_call_operand.vmem [shape: bf16[64,512], index: 3, kind: input, shape index: {}]   ;;  %s4107_s4 = inlined_call_operand.vmem [shape: f32[1,512], index: 4, kind: input, shape index: {}]   ;;  %s4108_s5 = inlined_call_operand.vmem [shape: bf16[512,2], index: 5, kind: input, shape index: {}]   ;;  %s4109_s6 = inlined_call_operand.vmem [shape: f32[1,2], index: 6, kind: input, shape index: {}]   ;;  %s4110_s7 = inlined_call_operand.vmem [shape: bf16[2,54,64], index: 7, kind: output, shape index: {}]  }
   0x1 LB: > { %s2452_s25 = sadd.s32 4294967295, %s3241_s24   ;;  %p2456_p0 = scmp.ge.s32.totalorder %s3241_s24, 1  ;;  %s3241_s24 = sphi %s3285_s24, %s17_s24  }
   0x2   : > { %p237_p1 = scmp.lt.s32.totalorder %s3241_s24, 3 }
   0x4   : > { %p238_p2 = pnand %p2456_p0, %p237_p1 }
   0x6   : > { %241 = sbr.rel (%p238_p2) target bundleno = 1113 (0x459), region = 48 }
   0xd   : > { %v2975_v0 = vld [vmem:[%s4104_s1 + $0x40] sm:$0xff]   ;;  %v2979_v4 = vld [vmem:[%s4104_s1 + $0x48] sm:$0xff]   ;;  %v2983_v8 = vld [vmem:[%s4104_s1 + $0x50] sm:$0xff]   ;;  %p269_p3 = scmp.lt.s32.totalorder %s2452_s25, 1  ;;  %vm1510_vm0 = vcmask 523264   ;;  %s3244_s28 = smov 127  }
   0xe   : > { %v2976_v1 = vld [vmem:[%s4104_s1] sm:$0xff]   ;;  %2669 = vmatprep.subr.bf16.mxu0 %v2975_v0  ;;  %v2980_v5 = vld [vmem:[%s4104_s1 + $0x8] sm:$0xff]   ;;  %v2984_v9 = vld [vmem:[%s4104_s1 + $0x10] sm:$0xff]  }
   0xf   : > { %v2977_v2 = vld [vmem:[%s4104_s1 + $0xc0] sm:$0xff]   ;;  %2670 = vmatpush3.bf16.msra.mxu0 %v2976_v1  ;;  %v2981_v6 = vld [vmem:[%s4104_s1 + $0xc8] sm:$0xff]   ;;  %v2985_v10 = vld [vmem:[%s4104_s1 + $0xd0] sm:$0xff]   ;;  %s4150_s25 = smov (!%p269_p3, %s2452_s25), 1 }
  0x10   : > { %v2978_v3 = vld [vmem:[%s4104_s1 + $0x80] sm:$0xff]   ;;  %2709 = vmatprep.subr.bf16.mxu1 %v2977_v2  ;;  %2671 = vmatprep.subr.bf16.mxu0 %v2979_v4  ;;  %v2982_v7 = vld [vmem:[%s4104_s1 + $0x88] sm:$0xff]   ;;  %v2986_v11 = vld [vmem:[%s4104_s1 + $0x90] sm:$0xff]   ;;  %s2961_s11 = smul.u32 252, %s4150_s25 }
  0x11   : > { %2710 = vmatpush3.bf16.msra.mxu1 %v2978_v3  ;;  %v2987_v12 = vld [vmem:[%s4104_s1 + $0x58] sm:$0xff]   ;;  %v2991_v16 = vld [vmem:[%s4104_s1 + $0x60] sm:$0xff]   ;;  %v2995_v20 = vld [vmem:[%s4104_s1 + $0x68] sm:$0xff]   ;;  %s2962_s29 = smul.u32 28, %s4150_s25 }
  0x12   : > { %2711 = vmatprep.subr.bf16.mxu1 %v2981_v6  ;;  %v2988_v13 = vld [vmem:[%s4104_s1 + $0x18] sm:$0xff]   ;;  %v2992_v17 = vld [vmem:[%s4104_s1 + $0x20] sm:$0xff]   ;;  %v2996_v21 = vld [vmem:[%s4104_s1 + $0x28] sm:$0xff]   ;;  %s3390_s22 = scalar_lea.vmem %s4103_s0, %s2961_s11 }
  0x13   : > { %2672 = vmatpush3.bf16.msra.mxu0 %v2980_v5  ;;  %v2989_v14 = vld [vmem:[%s4104_s1 + $0xd8] sm:$0xff]   ;;  %v2993_v18 = vld [vmem:[%s4104_s1 + $0xe0] sm:$0xff]   ;;  %v2997_v22 = vld [vmem:[%s4104_s1 + $0xe8] sm:$0xff]   ;;  %s4079_s9 = scalar_lea.vmem %s4110_s7, %s2962_s29 }
  0x14   : > { %2673 = vmatprep.subr.bf16.mxu0 %v2983_v8  ;;  %v2990_v15 = vld [vmem:[%s4104_s1 + $0x98] sm:$0xff]   ;;  %v2994_v19 = vld [vmem:[%s4104_s1 + $0xa0] sm:$0xff]   ;;  %v2998_v23 = vld [vmem:[%s4104_s1 + $0xa8] sm:$0xff]  }
  0x15   : > { %2712 = vmatpush3.bf16.msra.mxu1 %v2982_v7  ;;  %v2999_v24 = vld [vmem:[%s4104_s1 + $0x70] sm:$0xff]   ;;  %v3003_v28 = vld [vmem:[%s4104_s1 + $0x78] sm:$0xff]   ;;  %v3006_v31 = vld [vmem:[%s3390_s22] ss:$36 sps:$4 sm:$0xff]  }
  0x16   : > { %2713 = vmatprep.subr.bf16.mxu1 %v2985_v10  ;;  %v3000_v25 = vld [vmem:[%s4104_s1 + $0x30] sm:$0xff]   ;;  %v3004_v29 = vld [vmem:[%s4104_s1 + $0x38] sm:$0xff]   ;;  %v3008_v32 = vld [vmem:[%s3390_s22 + $0x4] ss:$36 sps:$4 sm:$0xff]  }
  0x17   : > { %2674 = vmatpush3.bf16.msra.mxu0 %v2984_v9  ;;  %v3001_v26 = vld [vmem:[%s4104_s1 + $0xf0] sm:$0xff]   ;;  %v3005_v30 = vld [vmem:[%s4104_s1 + $0xf8] sm:$0xff]   ;;  %1100 = vmatprep.mubr.bf16.mxu0 %v3008_v32  ;;  %v3010_v34 = vld [vmem:[%s4104_s1 + $0x140] sm:$0xff]  }
  0x18   : > { %2675 = vmatprep.subr.bf16.mxu0 %v2987_v12  ;;  %v3002_v27 = vld [vmem:[%s4104_s1 + $0xb0] sm:$0xff]   ;;  %v3009_v33 = vld [vmem:[%s4104_s1 + $0xb8] sm:$0xff]   ;;  %v3011_v35 = vld [vmem:[%s3390_s22 + $0x8] ss:$36 sps:$4 sm:$0xff]  }
  0x19   : > { %2714 = vmatpush3.bf16.msra.mxu1 %v2986_v11  ;;  %v3013_v36 = vld [vmem:[%s3390_s22 + $0xc] ss:$36 sps:$4 sm:$0xff]   ;;  %v3014_v37 = vld [vmem:[%s4104_s1 + $0x100] sm:$0xff]   ;;  %v3025_v47 = vld [vmem:[%s3390_s22 + $0x54] ss:$36 sps:$4 sm:$0xff]  }
  0x1a   : > { %2715 = vmatprep.subr.bf16.mxu1 %v2989_v14  ;;  %1164 = vmatprep.mubr.bf16.mxu1 %v3013_v36  ;;  %v3015_v38 = vld [vmem:[%s4104_s1 + $0x1c0] sm:$0xff]   ;;  %v3017_v40 = vld [vmem:[%s4104_s1 + $0x148] sm:$0xff]   ;;  %v3024_v46 = vld [vmem:[%s4104_s1 + $0x150] sm:$0xff]  }
  0x1b   : > { %2676 = vmatpush3.bf16.msra.mxu0 %v2988_v13  ;;  %v3016_v39 = vld [vmem:[%s4104_s1 + $0x180] sm:$0xff]   ;;  %v3018_v41 = vld [vmem:[%s4104_s1 + $0x108] sm:$0xff]   ;;  %v3027_v48 = vld [vmem:[%s4104_s1 + $0x110] sm:$0xff]  }
  0x1c   : > { %2677 = vmatprep.subr.bf16.mxu0 %v2991_v16  ;;  %v3019_v42 = vld [vmem:[%s4104_s1 + $0x1c8] sm:$0xff]   ;;  %v3028_v49 = vld [vmem:[%s3390_s22 + $0x50] ss:$36 sps:$4 sm:$0xff]   ;;  %v3031_v52 = vld [vmem:[%s4104_s1 + $0x158] sm:$0xff]  }
  0x1d   : > { %2716 = vmatpush3.bf16.msra.mxu1 %v2990_v15  ;;  %v3020_v43 = vld [vmem:[%s3390_s22 + $0x4c] ss:$36 sps:$4 sm:$0xff]   ;;  %v3032_v53 = vld [vmem:[%s4104_s1 + $0x118] sm:$0xff]   ;;  %v3038_v58 = vld [vmem:[%s4104_s1 + $0x160] sm:$0xff]  }
  0x1e   : > { %2717 = vmatprep.subr.bf16.mxu1 %v2993_v18  ;;  %v3022_v44 = vld [vmem:[%s4104_s1 + $0x188] sm:$0xff]   ;;  %v3029_v50 = vld [vmem:[%s4104_s1 + $0x1d0] sm:$0xff]   ;;  %v3033_v54 = vld [vmem:[%s4104_s1 + $0x1d8] sm:$0xff]  }
  0x1f   : > { %2678 = vmatpush3.bf16.msra.mxu0 %v2992_v17  ;;  %v3023_v45 = vld [vmem:[%s3390_s22 + $0x48] ss:$36 sps:$4 sm:$0xff]   ;;  %v3030_v51 = vld [vmem:[%s4104_s1 + $0x190] sm:$0xff]   ;;  %v3036_v56 = vld [vmem:[%s4104_s1 + $0x198] sm:$0xff]  }
  0x20   : > { %2679 = vmatprep.subr.bf16.mxu0 %v2995_v20  ;;  %v3034_v55 = vld [vmem:[%s3390_s22 + $0x94] ss:$36 sps:$4 sm:$0xff]   ;;  %v3039_v59 = vld [vmem:[%s3390_s22 + $0x9c] ss:$36 sps:$4 sm:$0xff]   ;;  %v3045_v0 = vld [vmem:[%s4104_s1 + $0x168] sm:$0xff]  }
  0x21   : > { %2718 = vmatpush3.bf16.msra.mxu1 %v2994_v19  ;;  %v3037_v57 = vld [vmem:[%s3390_s22 + $0x90] ss:$36 sps:$4 sm:$0xff]   ;;  %v3041_v60 = vld [vmem:[%s4104_s1 + $0x120] sm:$0xff]   ;;  %v3042_v61 = vld [vmem:[%s3390_s22 + $0x98] ss:$36 sps:$4 sm:$0xff]  }
  0x22   : > { %2719 = vmatprep.subr.bf16.mxu1 %v2997_v22  ;;  %v3043_v62 = vld [vmem:[%s4104_s1 + $0x1e0] sm:$0xff]   ;;  %v3046_v1 = vld [vmem:[%s4104_s1 + $0x128] sm:$0xff]   ;;  %v310_v3 = vld [vmem:[%s3390_s22 + $0xd8] sm:$0x77] }
  0x23   : > { %2680 = vmatpush3.bf16.msra.mxu0 %v2996_v21  ;;  %v3044_v63 = vld [vmem:[%s4104_s1 + $0x1a0] sm:$0xff]   ;;  %v3047_v2 = vld [vmem:[%s4104_s1 + $0x1e8] sm:$0xff]   ;;  %v2488_v4 = vcombine.high %v310_v3, %v310_v3  ;;  %v2487_v6 = vcombine.low %v310_v3, %v310_v3  ;;  %v3051_v7 = vld [vmem:[%s4104_s1 + $0x170] sm:$0xff]  }
  0x24   : > { %2681 = vmatprep.subr.bf16.mxu0 %v2999_v24  ;;  %v3049_v5 = vld [vmem:[%s4104_s1 + $0x1a8] sm:$0xff]   ;;  %v311_v8 = vld [vmem:[%s3390_s22 + $0xe0] sm:$0x77]  ;;  %v3053_v10 = vld [vmem:[%s4104_s1 + $0x130] sm:$0xff]  }
  0x25   : > { %2720 = vmatpush3.bf16.msra.mxu1 %v2998_v23  ;;  %v2490_v9 = vcombine.high %v311_v8, %v311_v8  ;;  %v2489_v11 = vcombine.low %v311_v8, %v311_v8  ;;  %v3055_v12 = vld [vmem:[%s4104_s1 + $0x1f0] sm:$0xff]   ;;  %v3057_v14 = vld [vmem:[%s4104_s1 + $0x178] sm:$0xff]   ;;  %v3064_v20 = vld [vmem:[%s4104_s1 + $0x200] sm:$0xff]  }
  0x26   : > { %2721 = vmatprep.subr.bf16.mxu1 %v3001_v26  ;;  %v3056_v13 = vld [vmem:[%s4104_s1 + $0x1b0] sm:$0xff]   ;;  %v3058_v15 = vld [vmem:[%s4104_s1 + $0x138] sm:$0xff]   ;;  %v3068_v23 = vld [vmem:[%s4104_s1 + $0x208] sm:$0xff]  }
  0x27   : > { %2682 = vmatpush3.bf16.msra.mxu0 %v3000_v25  ;;  %v3059_v16 = vld [vmem:[%s4104_s1 + $0x1f8] sm:$0xff]   ;;  %v3060_v17 = vld [vmem:[%s3390_s22 + $0x10] ss:$36 sps:$4 sm:$0xff]   ;;  %v3080_v32 = vld [vmem:[%s4104_s1 + $0x220] sm:$0xff]  }
  0x28   : > { %2683 = vmatprep.subr.bf16.mxu0 %v3003_v28  ;;  %v3062_v18 = vld [vmem:[%s3390_s22 + $0x14] ss:$36 sps:$4 sm:$0xff]   ;;  %v3067_v22 = vld [vmem:[%s3390_s22 + $0x1c] ss:$36 sps:$4 sm:$0xff]  }
  0x29   : > { %2722 = vmatpush3.bf16.msra.mxu1 %v3002_v27  ;;  %v3063_v19 = vld [vmem:[%s4104_s1 + $0x1b8] sm:$0xff]   ;;  %v3072_v26 = vld [vmem:[%s4104_s1 + $0x210] sm:$0xff]   ;;  %v3073_v27 = vld [vmem:[%s3390_s22 + $0x64] ss:$36 sps:$4 sm:$0xff]  }
  0x2a   : > { %2723 = vmatprep.subr.bf16.mxu1 %v3005_v30  ;;  %v3065_v21 = vld [vmem:[%s3390_s22 + $0x18] ss:$36 sps:$4 sm:$0xff]   ;;  %v3075_v30 = vld [vmem:[%s3390_s22 + $0x60] ss:$36 sps:$4 sm:$0xff]   ;;  %v313_v36 = vld [vmem:[%s3390_s22 + $0xf0] sm:$0x77] }
  0x2b   : > { %2684 = vmatpush3.bf16.msra.mxu0 %v3004_v29  ;;  %v3069_v24 = vld [vmem:[%s3390_s22 + $0x5c] ss:$36 sps:$4 sm:$0xff]   ;;  %v3077_v29 = vld [vmem:[%s3390_s22 + $0xa4] ss:$36 sps:$4 sm:$0xff]  }
  0x2c   : > { %2749 = vmatprep.subr.bf16.mxu0 %v3010_v34  ;;  %v3071_v25 = vld [vmem:[%s3390_s22 + $0x58] ss:$36 sps:$4 sm:$0xff]   ;;  %v3079_v34 = vld [vmem:[%s3390_s22 + $0xa0] ss:$36 sps:$4 sm:$0xff]  }
  0x2d   : > { %2724 = vmatpush3.bf16.msra.mxu1 %v3009_v33  ;;  %v3076_v28 = vld [vmem:[%s4104_s1 + $0x218] sm:$0xff]   ;;  %v312_v33 = vld [vmem:[%s3390_s22 + $0xe8] sm:$0x77] }
  0x2e   : > { %1101 = vmatmul.mubr.bf16.vlgmr.msra.gmra.mrb[0].mxu0 %v3006_v31  ;;  %2789 = vmatprep.subr.bf16.mxu1 %v3015_v38  ;;  %v3081_v31 = vld [vmem:[%s3390_s22 + $0xac] ss:$36 sps:$4 sm:$0xff]  }
  0x2f   : > { %2750 = vmatpush3.bf16.msra.mxu0 %v3014_v37  ;;  %1108 = vmatprep.mubr.bf16.mxu0 %v3020_v43  ;;  %v3084_v37 = vld [vmem:[%s4104_s1 + $0x228] sm:$0xff]   ;;  %v3090_v43 = vld [vmem:[%s4104_s1 + $0x238] sm:$0xff]  }
  0x30   : > { %1165 = vmatmul.mubr.bf16.vlgmr.msra.gmra.mrb[0].mxu1 %v3011_v35  ;;  %2751 = vmatprep.subr.bf16.mxu0 %v3017_v40  ;;  %v2492_v35 = vcombine.high %v312_v33, %v312_v33  ;;  %v3083_v38 = vld [vmem:[%s3390_s22 + $0xa8] ss:$36 sps:$4 sm:$0xff]   ;;  %v3087_v40 = vld [vmem:[%s4104_s1 + $0x230] sm:$0xff]  }
  0x31   : > { %2790 = vmatpush3.bf16.msra.mxu1 %v3016_v39  ;;  %1172 = vmatprep.mubr.bf16.mxu1 %v3025_v47  ;;  %v2494_v39 = vcombine.high %v313_v36, %v313_v36  ;;  %v3094_v47 = vld [vmem:[%s3390_s22 + $0xf8] ss:$0 sps:$4 sm:$0x77]  }
  0x32   : > { %2791 = vmatprep.subr.bf16.mxu1 %v3019_v42  ;;  %v2491_v42 = vcombine.low %v312_v33, %v312_v33 }
  0x33   : > { %2752 = vmatpush3.bf16.msra.mxu0 %v3018_v41  ;;  %v3091_v41 = vld [vmem:[%s3390_s22 + $0x20] ss:$36 sps:$4 sm:$0xff]  }
  0x34   : > { %2753 = vmatprep.subr.bf16.mxu0 %v3024_v46  ;;  %v3093_v46 = vld [vmem:[%s3390_s22 + $0xb0] ss:$36 sps:$4 sm:$0xff]  }
  0x35   : > { %2792 = vmatpush3.bf16.msra.mxu1 %v3022_v44  ;;  %v2493_v44 = vcombine.low %v313_v36, %v313_v36 }
  0x36   : > { %1109 = vmatmul.mubr.bf16.gmra.mrb[4].mxu0 %v3023_v45  ;;  %2793 = vmatprep.subr.bf16.mxu1 %v3029_v50  ;;  %v3092_v45 = vld [vmem:[%s3390_s22 + $0x68] ss:$36 sps:$4 sm:$0xff]   ;;  %v3098_v50 = vld [vmem:[%s4106_s3 + $0x20] ss:$16 sps:$4 sm:$0xff]  }
  0x37   : > { %2754 = vmatpush3.bf16.msra.mxu0 %v3027_v48  ;;  %1116 = vmatprep.mubr.bf16.mxu0 %v3034_v55  ;;  %v3095_v48 = vld [vmem:[%s4106_s3] ss:$16 sps:$4 sm:$0xff]   ;;  %v3106_v55 = vld [vmem:[%s4106_s3 + $0xc] ss:$16 sps:$4 sm:$0xff]  }
  0x38   : > { %1173 = vmatmul.mubr.bf16.gmra.mrb[4].mxu1 %v3028_v49  ;;  %2755 = vmatprep.subr.bf16.mxu0 %v3031_v52  ;;  %v3097_v49 = vld [vmem:[%s4106_s3 + $0x4] ss:$16 sps:$4 sm:$0xff]   ;;  %v3101_v52 = vld [vmem:[%s4106_s3 + $0x40] ss:$16 sps:$4 sm:$0xff]  }
  0x39   : > { %2794 = vmatpush3.bf16.msra.mxu1 %v3030_v51  ;;  %1180 = vmatprep.mubr.bf16.mxu1 %v3039_v59  ;;  %v3100_v51 = vld [vmem:[%s4106_s3 + $0x24] ss:$16 sps:$4 sm:$0xff]   ;;  %v3113_v59 = vld [vmem:[%s4106_s3 + $0x48] ss:$16 sps:$4 sm:$0xff]  }
  0x3a   : > { %2795 = vmatprep.subr.bf16.mxu1 %v3033_v54  ;;  %v3104_v54 = vld [vmem:[%s4106_s3 + $0x8] ss:$16 sps:$4 sm:$0xff]  }
  0x3b   : > { %2756 = vmatpush3.bf16.msra.mxu0 %v3032_v53  ;;  %v3103_v53 = vld [vmem:[%s4106_s3 + $0x44] ss:$16 sps:$4 sm:$0xff]  }
  0x3c   : > { %2757 = vmatprep.subr.bf16.mxu0 %v3038_v58  ;;  %v3115_v58 = vld [vmem:[%s4106_s3 + $0x4c] ss:$16 sps:$4 sm:$0xff]  }
  0x3d   : > { %2796 = vmatpush3.bf16.msra.mxu1 %v3036_v56  ;;  %v3109_v56 = vld [vmem:[%s4106_s3 + $0x2c] ss:$16 sps:$4 sm:$0xff]  }
  0x3e   : > { %1117 = vmatmul.mubr.bf16.gmra.mrb[8].mxu0 %v3037_v57  ;;  %2797 = vmatprep.subr.bf16.mxu1 %v3043_v62  ;;  %v3107_v57 = vld [vmem:[%s4106_s3 + $0x28] ss:$16 sps:$4 sm:$0xff]   ;;  %v3118_v62 = vld [vmem:[%s4106_s3 + $0x6c] ss:$16 sps:$4 sm:$0xff]  }
  0x3f   : > { %2758 = vmatpush3.bf16.msra.mxu0 %v3041_v60  ;;  %1124 = vmatprep.mubr.bf16.mxu0 %v2488_v4  ;;  %v3110_v60 = vld [vmem:[%s4106_s3 + $0x60] ss:$16 sps:$4 sm:$0xff]  }
  0x40   : > { %1181 = vmatmul.mubr.bf16.gmra.mrb[8].mxu1 %v3042_v61  ;;  %2759 = vmatprep.subr.bf16.mxu0 %v3045_v0  ;;  %v3112_v61 = vld [vmem:[%s4106_s3 + $0x64] ss:$16 sps:$4 sm:$0xff]   ;;  %v3243_v0 = vmov 0   ;;  %v2459_v4 = vld [vmem:[%s4105_s2] ss:$0 sm:$0xff] }
  0x41   : > { %2798 = vmatpush3.bf16.msra.mxu1 %v3044_v63  ;;  %1188 = vmatprep.mubr.bf16.mxu1 %v2490_v9  ;;  %v3116_v63 = vld [vmem:[%s4106_s3 + $0x68] ss:$16 sps:$4 sm:$0xff]  }
  0x42   : > { %2799 = vmatprep.subr.bf16.mxu1 %v3047_v2  ;;  %2973 = vset.pattern.permute.xlu1 %v3243_v0  ;;  %v3611_v2 = vld [vmem:[%s4108_s5 + $0xc0] sm:$0xff]  }
  0x43   : > { %2760 = vmatpush3.bf16.msra.mxu0 %v3046_v1  ;;  %2974 = vset.pattern.permute.xlu0 %v3243_v0  ;;  %v3119_v1 = vld [vmem:[%s4108_s5 + $0x40] sm:$0xff]  }
  0x44   : > { %2761 = vmatprep.subr.bf16.mxu0 %v3051_v7 }
  0x45   : > { %2800 = vmatpush3.bf16.msra.mxu1 %v3049_v5 }
  0x46   : > { %1125 = vmatmul.mubr.bf16.gmra.mrb[12].mxu0 %v2487_v6  ;;  %2801 = vmatprep.subr.bf16.mxu1 %v3055_v12 }
  0x47   : > { %2762 = vmatpush3.bf16.msra.mxu0 %v3053_v10  ;;  %1228 = vmatprep.mubr.bf16.mxu0 %v3062_v18 }
  0x48   : > { %1189 = vmatmul.mubr.bf16.gmra.mrb[12].mxu1 %v2489_v11  ;;  %2763 = vmatprep.subr.bf16.mxu0 %v3057_v14 }
  0x49   : > { %2802 = vmatpush3.bf16.msra.mxu1 %v3056_v13  ;;  %1292 = vmatprep.mubr.bf16.mxu1 %v3067_v22 }
  0x4a   : > { %2803 = vmatprep.subr.bf16.mxu1 %v3059_v16 }
  0x4b   : > { %2764 = vmatpush3.bf16.msra.mxu0 %v3058_v15 }
  0x4c   : > { %2921 = vmatprep.subr.bf16.mxu0 %v3064_v20 }
  0x4d   : > { %2804 = vmatpush3.bf16.msra.mxu1 %v3063_v19 }
  0x4e   : > { %1229 = vmatmul.mubr.bf16.vlgmr.msra.gmra.mrb[16].mxu0 %v3060_v17  ;;  %1523 = vmatprep.subr.bf16.mxu1 %v3097_v49 }
  0x4f   : > { %2922 = vmatpush3.bf16.msra.mxu0 %v3064_v20  ;;  %1236 = vmatprep.mubr.bf16.mxu0 %v3069_v24 }
  0x50   : > { %1293 = vmatmul.mubr.bf16.vlgmr.msra.gmra.mrb[16].mxu1 %v3065_v21  ;;  %2923 = vmatprep.subr.bf16.mxu0 %v3068_v23 }
  0x51   : > { %1300 = vmatprep.mubr.bf16.mxu1 %v3073_v27  ;;  %1524 = vmatpush1.bf16.msra.mxu1 %v3095_v48 }
  0x52   : > { %1525 = vmatprep.subr.bf16.mxu1 %v3100_v51 }
  0x53   : > { %2924 = vmatpush3.bf16.msra.mxu0 %v3068_v23 }
  0x54   : > { %2925 = vmatprep.subr.bf16.mxu0 %v3072_v26 }
  0x55   : > { %1526 = vmatpush1.bf16.msra.mxu1 %v3098_v50 }
  0x56   : > { %1237 = vmatmul.mubr.bf16.gmra.mrb[20].mxu0 %v3071_v25  ;;  %1527 = vmatprep.subr.bf16.mxu1 %v3103_v53 }
  0x57   : > { %1244 = vmatprep.mubr.bf16.mxu0 %v3077_v29  ;;  %2926 = vmatpush3.bf16.msra.mxu0 %v3072_v26 }
  0x58   : > { %2927 = vmatprep.subr.bf16.mxu0 %v3076_v28  ;;  %1301 = vmatmul.mubr.bf16.gmra.mrb[20].mxu1 %v3075_v30 }
  0x59   : > { %1308 = vmatprep.mubr.bf16.mxu1 %v3081_v31  ;;  %1528 = vmatpush1.bf16.msra.mxu1 %v3101_v52 }
  0x5a   : > { %1529 = vmatprep.subr.bf16.mxu1 %v3112_v61 }
  0x5b   : > { %2928 = vmatpush3.bf16.msra.mxu0 %v3076_v28 }
  0x5c   : > { %2929 = vmatprep.subr.bf16.mxu0 %v3080_v32 }
  0x5d   : > { %1530 = vmatpush1.bf16.msra.mxu1 %v3110_v60 }
  0x5e   : > { %1245 = vmatmul.mubr.bf16.gmra.mrb[24].mxu0 %v3079_v34  ;;  %2841 = vmatprep.subr.bf16.mxu1 %v3119_v1 }
  0x5f   : > { %1252 = vmatprep.mubr.bf16.mxu0 %v2492_v35  ;;  %2930 = vmatpush3.bf16.msra.mxu0 %v3080_v32 }
  0x60   : > { %2931 = vmatprep.subr.bf16.mxu0 %v3084_v37  ;;  %1309 = vmatmul.mubr.bf16.gmra.mrb[24].mxu1 %v3083_v38 }
  0x61   : > { %1316 = vmatprep.mubr.bf16.mxu1 %v2494_v39 }
  0x63   : > { %2932 = vmatpush3.bf16.msra.mxu0 %v3084_v37 }
  0x64   : > { %2933 = vmatprep.subr.bf16.mxu0 %v3087_v40 }
  0x66   : > { %1253 = vmatmul.mubr.bf16.gmra.mrb[28].mxu0 %v2491_v42 }
  0x67   : > { %2937 = vmatprep.mubr.bf16.mxu0 %v3091_v41  ;;  %2934 = vmatpush3.bf16.msra.mxu0 %v3087_v40 }
  0x68   : > { %2935 = vmatprep.subr.bf16.mxu0 %v3090_v43  ;;  %1317 = vmatmul.mubr.bf16.gmra.mrb[28].mxu1 %v2493_v44 }
  0x69   : > { %1555 = vmatprep.mubr.bf16.mxu1 %v3243_v0 }
  0x6b   : > { %2936 = vmatpush3.bf16.msra.mxu0 %v3090_v43 }
  0x6c   : > { %1594 = vmatprep.subr.bf16.mxu0 %v3106_v55 }
  0x6e   : > { %2938 = vmatmul.mubr.bf16.vlgmr.msra.gmra.mrb[32].mxu0 %v3092_v45 }
  0x6f   : > { %2941 = vmatprep.mubr.bf16.mxu0 %v3093_v46  ;;  %1595 = vmatpush1.bf16.msra.mxu0 %v3104_v54 }
  0x70   : > { %1596 = vmatprep.subr.bf16.mxu0 %v3109_v56 }
  0x73   : > { %1597 = vmatpush1.bf16.msra.mxu0 %v3107_v57 }
  0x74   : > { %1598 = vmatprep.subr.bf16.mxu0 %v3115_v58 }
  0x76   : > { %2942 = vmatmul.mubr.bf16.gmra.mrb[36].mxu0 %v3094_v47 }
  0x77   : > { %1599 = vmatpush1.bf16.msra.mxu0 %v3113_v59  ;;  %1626 = vmatprep.mubr.bf16.mxu0 %v3243_v0 }
  0x78   : > { %1600 = vmatprep.subr.bf16.mxu0 %v3118_v62 }
  0x7b   : > { %1601 = vmatpush1.bf16.msra.mxu0 %v3116_v63 }
  0x7c   : > { %2881 = vmatprep.subr.bf16.mxu0 %v3611_v2 }
 0x101   : > { %v2685_v3 = vpop.f32.mrb[0].mxu0 }
 0x102   : > { %v2686_v5 = vpop.f32.mrb[1].mxu0 }
 0x103   : > { %v2687_v6 = vadd.f32 %v2686_v5, %v2685_v3  ;;  %v2688_v7 = vpop.f32.mrb[2].mxu0  ;;  %v2725_v8 = vpop.f32.mrb[0].mxu1 }
 0x104   : > { %v2689_v9 = vpop.f32.mrb[3].mxu0  ;;  %v2726_v12 = vpop.f32.mrb[1].mxu1 }
 0x105   : > { %v1103_v10 = vadd.f32 %v2687_v6, %v2459_v4  ;;  %v2690_v11 = vadd.f32 %v2689_v9, %v2688_v7  ;;  %v2727_v13 = vadd.f32 %v2726_v12, %v2725_v8  ;;  %v2728_v14 = vpop.f32.mrb[2].mxu1 }
 0x106   : > { %v2729_v16 = vpop.f32.mrb[3].mxu1 }
 0x107   : > { %v1106_v15 = vadd.f32 %v2690_v11, %v2459_v4  ;;  %v1167_v17 = vadd.f32 %v2727_v13, %v1103_v10  ;;  %v2730_v18 = vadd.f32 %v2729_v16, %v2728_v14 }
 0x109   : > { %v1170_v19 = vadd.f32 %v2730_v18, %v1106_v15  ;;  %v2691_v20 = vpop.f32.mrb[4].mxu0 }
 0x10a   : > { %v2692_v21 = vpop.f32.mrb[5].mxu0 }
 0x10b   : > { %v2693_v22 = vadd.f32 %v2692_v21, %v2691_v20  ;;  %v2694_v23 = vpop.f32.mrb[6].mxu0  ;;  %v2731_v26 = vpop.f32.mrb[4].mxu1 }
 0x10c   : > { %v2695_v24 = vpop.f32.mrb[7].mxu0  ;;  %v2732_v28 = vpop.f32.mrb[5].mxu1 }
 0x10d   : > { %v1111_v25 = vadd.f32 %v2693_v22, %v2459_v4  ;;  %v2696_v27 = vadd.f32 %v2695_v24, %v2694_v23  ;;  %v2733_v30 = vadd.f32 %v2732_v28, %v2731_v26  ;;  %v2734_v31 = vpop.f32.mrb[6].mxu1 }
 0x10e   : > { %v2735_v32 = vpop.f32.mrb[7].mxu1 }
 0x10f   : > { %v1114_v29 = vadd.f32 %v2696_v27, %v2459_v4  ;;  %v1175_v33 = vadd.f32 %v2733_v30, %v1111_v25  ;;  %v2736_v34 = vadd.f32 %v2735_v32, %v2734_v31 }
 0x111   : > { %v1178_v35 = vadd.f32 %v2736_v34, %v1114_v29  ;;  %v2697_v36 = vpop.f32.mrb[8].mxu0 }
 0x112   : > { %v2698_v37 = vpop.f32.mrb[9].mxu0 }
 0x113   : > { %v2699_v38 = vadd.f32 %v2698_v37, %v2697_v36  ;;  %v2700_v39 = vpop.f32.mrb[10].mxu0  ;;  %v2737_v40 = vpop.f32.mrb[8].mxu1 }
 0x114   : > { %v2701_v41 = vpop.f32.mrb[11].mxu0  ;;  %v2738_v44 = vpop.f32.mrb[9].mxu1 }
 0x115   : > { %v1119_v42 = vadd.f32 %v2699_v38, %v2459_v4  ;;  %v2702_v43 = vadd.f32 %v2701_v41, %v2700_v39  ;;  %v2739_v45 = vadd.f32 %v2738_v44, %v2737_v40  ;;  %v2740_v46 = vpop.f32.mrb[10].mxu1 }
 0x116   : > { %v2741_v48 = vpop.f32.mrb[11].mxu1 }
 0x117   : > { %v1122_v47 = vadd.f32 %v2702_v43, %v2459_v4  ;;  %v1183_v49 = vadd.f32 %v2739_v45, %v1119_v42  ;;  %v2742_v50 = vadd.f32 %v2741_v48, %v2740_v46 }
 0x119   : > { %v1186_v51 = vadd.f32 %v2742_v50, %v1122_v47  ;;  %v2703_v52 = vpop.f32.mrb[12].mxu0 }
 0x11a   : > { %v2704_v53 = vpop.f32.mrb[13].mxu0 }
 0x11b   : > { %v2705_v54 = vadd.f32 %v2704_v53, %v2703_v52  ;;  %v2706_v55 = vpop.f32.mrb[14].mxu0  ;;  %v2743_v56 = vpop.f32.mrb[12].mxu1 }
 0x11c   : > { %v2707_v57 = vpop.f32.mrb[15].mxu0  ;;  %v2744_v58 = vpop.f32.mrb[13].mxu1 }
 0x11d   : > { %v1127_v59 = vadd.f32 %v2705_v54, %v2459_v4  ;;  %v2745_v60 = vadd.f32 %v2744_v58, %v2743_v56  ;;  %v2746_v61 = vpop.f32.mrb[14].mxu1 }
 0x11e   : > { %v2747_v62 = vpop.f32.mrb[15].mxu1 }
 0x11f   : > { %v1191_v63 = vadd.f32 %v2745_v60, %v1127_v59 }
 0x121   : > { %v2765_v1 = vpop.f32.mrb[16].mxu0 }
 0x122   : > { %v2766_v3 = vpop.f32.mrb[17].mxu0 }
 0x123   : > { %v2767_v5 = vadd.f32 %v2766_v3, %v2765_v1  ;;  %v2768_v6 = vpop.f32.mrb[18].mxu0  ;;  %v2805_v9 = vpop.f32.mrb[16].mxu1 }
 0x124   : > { %v2769_v7 = vpop.f32.mrb[19].mxu0  ;;  %v2806_v11 = vpop.f32.mrb[17].mxu1 }
 0x125   : > { %v1231_v8 = vadd.f32 %v2767_v5, %v1167_v17  ;;  %v2770_v10 = vadd.f32 %v2769_v7, %v2768_v6  ;;  %v2807_v13 = vadd.f32 %v2806_v11, %v2805_v9  ;;  %v2808_v14 = vpop.f32.mrb[18].mxu1  ;;  %v3633_v11 = vld [vmem:[%s4108_s5 + $0x80] sm:$0xff]  }
 0x126   : > { %v2809_v15 = vpop.f32.mrb[19].mxu1 }
 0x127   : > { %v1234_v12 = vadd.f32 %v2770_v10, %v1170_v19  ;;  %v2810_v16 = vadd.f32 %v2809_v15, %v2808_v14  ;;  %v1295_v4 = vadd.f32 %v2807_v13, %v1231_v8  ;;  %v3121_v10 = vld [vmem:[%s4108_s5] sm:$0xff]   ;;  %v3641_v13 = vld [vmem:[%s4108_s5 + $0xc8] sm:$0xff]  }
 0x129   : > { %v2771_v18 = vpop.f32.mrb[20].mxu0  ;;  %v1298_v23 = vadd.f32 %v2810_v16, %v1234_v12  ;;  %v3123_v12 = vld [vmem:[%s4108_s5 + $0x48] sm:$0xff]  }
 0x12a   : > { %v2772_v20 = vpop.f32.mrb[21].mxu0 }
 0x12b   : > { %v2773_v21 = vadd.f32 %v2772_v20, %v2771_v18  ;;  %v2774_v22 = vpop.f32.mrb[22].mxu0  ;;  %v2811_v26 = vpop.f32.mrb[20].mxu1 }
 0x12c   : > { %v2775_v24 = vpop.f32.mrb[23].mxu0  ;;  %v2812_v28 = vpop.f32.mrb[21].mxu1 }
 0x12d   : > { %v1239_v25 = vadd.f32 %v2773_v21, %v1175_v33  ;;  %v2776_v27 = vadd.f32 %v2775_v24, %v2774_v22  ;;  %v2813_v29 = vadd.f32 %v2812_v28, %v2811_v26  ;;  %v2814_v30 = vpop.f32.mrb[22].mxu1  ;;  %v3677_v26 = vld [vmem:[%s4108_s5 + $0x88] sm:$0xff]   ;;  %v3129_v28 = vld [vmem:[%s4108_s5 + $0x10] sm:$0xff]  }
 0x12e   : > { %v2815_v31 = vpop.f32.mrb[23].mxu1 }
 0x12f   : > { %v1242_v17 = vadd.f32 %v2776_v27, %v1178_v35  ;;  %v2816_v19 = vadd.f32 %v2815_v31, %v2814_v30  ;;  %v1303_v34 = vadd.f32 %v2813_v29, %v1239_v25  ;;  %v3125_v25 = vld [vmem:[%s4108_s5 + $0x8] sm:$0xff]   ;;  %v3686_v27 = vld [vmem:[%s4108_s5 + $0xd0] sm:$0xff]   ;;  %v3131_v29 = vld [vmem:[%s4108_s5 + $0x58] sm:$0xff]  }
 0x130   : > { %v3704_v30 = vld [vmem:[%s4108_s5 + $0xd8] sm:$0xff]  }
 0x131   : > { %v2777_v32 = vpop.f32.mrb[24].mxu0  ;;  %v1306_v39 = vadd.f32 %v2816_v19, %v1242_v17  ;;  %v3694_v17 = vld [vmem:[%s4108_s5 + $0x90] sm:$0xff]   ;;  %v3133_v31 = vld [vmem:[%s4108_s5 + $0x18] sm:$0xff]  }
 0x132   : > { %v2778_v36 = vpop.f32.mrb[25].mxu0  ;;  %v3712_v19 = vld [vmem:[%s4108_s5 + $0x98] sm:$0xff]  }
 0x133   : > { %v2779_v37 = vadd.f32 %v2778_v36, %v2777_v32  ;;  %v2780_v38 = vpop.f32.mrb[26].mxu0  ;;  %v2817_v42 = vpop.f32.mrb[24].mxu1  ;;  %v3135_v32 = vld [vmem:[%s4108_s5 + $0x60] sm:$0xff]  }
 0x134   : > { %v2781_v40 = vpop.f32.mrb[27].mxu0  ;;  %v2818_v44 = vpop.f32.mrb[25].mxu1  ;;  %v3137_v36 = vld [vmem:[%s4108_s5 + $0x20] sm:$0xff]  }
 0x135   : > { %v1247_v41 = vadd.f32 %v2779_v37, %v1183_v49  ;;  %v2782_v43 = vadd.f32 %v2781_v40, %v2780_v38  ;;  %v2819_v45 = vadd.f32 %v2818_v44, %v2817_v42  ;;  %v2820_v46 = vpop.f32.mrb[26].mxu1  ;;  %v3730_v37 = vld [vmem:[%s4108_s5 + $0xa0] sm:$0xff]   ;;  %v3139_v38 = vld [vmem:[%s4108_s5 + $0x68] sm:$0xff]   ;;  %v3143_v42 = vld [vmem:[%s4108_s5 + $0x70] sm:$0xff]  }
 0x136   : > { %v2821_v47 = vpop.f32.mrb[27].mxu1  ;;  %v3141_v40 = vld [vmem:[%s4108_s5 + $0x28] sm:$0xff]   ;;  %v3145_v44 = vld [vmem:[%s4108_s5 + $0x30] sm:$0xff]  }
 0x137   : > { %v1250_v33 = vadd.f32 %v2782_v43, %v1186_v51  ;;  %v2822_v35 = vadd.f32 %v2821_v47, %v2820_v46  ;;  %v1311_v50 = vadd.f32 %v2819_v45, %v1247_v41  ;;  %v3748_v41 = vld [vmem:[%s4108_s5 + $0xa8] sm:$0xff]   ;;  %v3758_v43 = vld [vmem:[%s4108_s5 + $0xf0] sm:$0xff]   ;;  %v3147_v45 = vld [vmem:[%s4108_s5 + $0x78] sm:$0xff]  }
 0x138   : > { %4130 = vst [vmem:[#allocation9_spill] sm:$0xff] %v3748_v41  ;;  %4131 = vst [vmem:[#allocation10_spill] sm:$0xff] %v3758_v43  ;;  %v3776_v46 = vld [vmem:[%s4108_s5 + $0xf8] sm:$0xff]  }
 0x139   : > { %v2783_v48 = vpop.f32.mrb[28].mxu0  ;;  %v1314_v55 = vadd.f32 %v2822_v35, %v1250_v33  ;;  %v3766_v33 = vld [vmem:[%s4108_s5 + $0xb0] sm:$0xff]   ;;  %4133 = vst [vmem:[#allocation12_spill] sm:$0xff] %v3776_v46  ;;  %v3149_v47 = vld [vmem:[%s4108_s5 + $0x38] sm:$0xff]  }
 0x13a   : > { %v2784_v52 = vpop.f32.mrb[29].mxu0  ;;  %4132 = vst [vmem:[#allocation11_spill] sm:$0xff] %v3766_v33  ;;  %v3784_v35 = vld [vmem:[%s4108_s5 + $0xb8] sm:$0xff]  }
 0x13b   : > { %v2785_v53 = vadd.f32 %v2784_v52, %v2783_v48  ;;  %v2786_v54 = vpop.f32.mrb[30].mxu0  ;;  %v2823_v58 = vpop.f32.mrb[28].mxu1  ;;  %4134 = vst [vmem:[#allocation13_spill] sm:$0xff] %v3784_v35  ;;  %v1410_v48 = vlaneseq }
 0x13c   : > { %v2787_v56 = vpop.f32.mrb[31].mxu0  ;;  %v2824_v59 = vpop.f32.mrb[29].mxu1  ;;  %v1408_v54 = vld [vmem:[%s4107_s4] sm:$0xf] }
 0x13d   : > { %v1255_v57 = vadd.f32 %v2785_v53, %v1191_v63  ;;  %v2825_v60 = vadd.f32 %v2824_v59, %v2823_v58  ;;  %v2826_v49 = vpop.f32.mrb[30].mxu1 }
 0x13e   : > { %v2827_v61 = vpop.f32.mrb[31].mxu1 }
 0x13f   : > { %v1319_v62 = vadd.f32 %v2825_v60, %v1255_v57 }
 0x141   : > { %v2939_v1 = vpop.f32.mrb[32].mxu0 }
 0x142   : > { %v3617_v51 = vadd.f32 %v2939_v1, %v1303_v34  ;;  %v1358_v3 = vpop.f32.mrb[33].mxu0  ;;  %v3722_v34 = vld [vmem:[%s4108_s5 + $0xe0] sm:$0xff]  }
 0x143   : > { %v3619_v5 = vadd.f32 %v1358_v3, %v1295_v4  ;;  %v2940_v6 = vpop.f32.mrb[34].mxu0 }
 0x144   : > { %4123 = vst [vmem:[#allocation2_spill] sm:$0xff] %v3617_v51  ;;  %v3621_v7 = vadd.f32 %v2940_v6, %v1306_v39  ;;  %v1361_v8 = vpop.f32.mrb[35].mxu0  ;;  %v3740_v39 = vld [vmem:[%s4108_s5 + $0xe8] sm:$0xff]  }
 0x145   : > { %4124 = vst [vmem:[#allocation3_spill] sm:$0xff] %v3619_v5  ;;  %v3623_v9 = vadd.f32 %v1361_v8, %v1298_v23 }
 0x146   : > { %4125 = vst [vmem:[#allocation4_spill] sm:$0xff] %v3621_v7  ;;  %v1389_v22 = vpack.c.bf16 %v3621_v7, %v3617_v51 }
 0x147   : > { %4126 = vst [vmem:[#allocation5_spill] sm:$0xff] %v3623_v9  ;;  %v1388_v63 = vpack.c.bf16 %v3623_v9, %v3619_v5 }
 0x149   : > { %v2943_v14 = vpop.f32.mrb[36].mxu0  ;;  %2584 = vmatmul.mubr.msk.bf16.vlgmr.msra.gmra.mrb[32].mxu1 %vm1510_vm0, %v1388_v63  ;;  %2588 = vmatmul.mubr.msk.bf16.vlgmr.msra.gmra.mrb[40].mxu0 %vm1510_vm0, %v1388_v63 }
 0x14a   : > { %v3645_v15 = vadd.f32 %v2943_v14, %v1319_v62  ;;  %v1374_v16 = vpop.f32.mrb[37].mxu0  ;;  %1565 = vmatprep.mubr.bf16.mxu1 %v3243_v0  ;;  %1636 = vmatprep.mubr.bf16.mxu0 %v3243_v0 }
 0x14b   : > { %v3649_v18 = vadd.f32 %v1374_v16, %v1311_v50  ;;  %v2944_v4 = vpop.f32.mrb[38].mxu0  ;;  %2842 = vmatpush3.bf16.msra.mxu1 %v3121_v10  ;;  %2882 = vmatpush3.bf16.msra.mxu0 %v3633_v11  ;;  %v1411_v50 = vshrl.u32 %v1410_v48, 7 }
 0x14c   : > { %4127 = vst [vmem:[#allocation6_spill] sm:$0xff] %v3645_v15  ;;  %v1377_v20 = vpop.f32.mrb[39].mxu0  ;;  %2843 = vmatprep.subr.bf16.mxu1 %v3123_v12  ;;  %2883 = vmatprep.subr.bf16.mxu0 %v3641_v13  ;;  %v1391_v24 = vpack.c.bf16 %v3645_v15, %v3645_v15 }
 0x14d   : > { %4128 = vst [vmem:[#allocation7_spill] sm:$0xff] %v3649_v18  ;;  %v3653_v21 = vadd.f32 %v1377_v20, %v1314_v55  ;;  %v1412_v52 = vsub.s32 0, %v1411_v50  ;;  %v1420_v53 = vsub.s32 2, %v1411_v50  ;;  %v1416_v55 = vsub.s32 1, %v1411_v50 }
 0x14e   : > { %v1424_v56 = vsub.s32 3, %v1411_v50 }
 0x14f   : > { %4129 = vst [vmem:[#allocation8_spill] sm:$0xff] %v3653_v21  ;;  %v1390_v23 = vpack.c.bf16 %v3653_v21, %v3649_v18  ;;  %2844 = vmatpush3.bf16.msra.mxu1 %v3125_v25  ;;  %2884 = vmatpush3.bf16.msra.mxu0 %v3677_v26  ;;  %v3792_v57 = vrot.slane %v1408_v54, %v1412_v52 }
 0x150   : > { %2885 = vmatprep.subr.bf16.mxu0 %v3686_v27  ;;  %v3794_v58 = vrot.slane %v1408_v54, %v1420_v53  ;;  %v3796_v59 = vrot.slane %v1408_v54, %v1416_v55  ;;  %v3798_v61 = vrot.slane %v1408_v54, %v1424_v56 }
 0x151   : > { %2585 = vmatmul.mubr.msk.bf16.gmra.mrb[36].mxu1 %vm1510_vm0, %v1389_v22  ;;  %2589 = vmatmul.mubr.msk.bf16.gmra.mrb[44].mxu0 %vm1510_vm0, %v1389_v22 }
 0x152   : > { %1575 = vmatprep.mubr.bf16.mxu1 %v3243_v0  ;;  %1646 = vmatprep.mubr.bf16.mxu0 %v3243_v0 }
 0x153   : > { %2886 = vmatpush3.bf16.msra.mxu0 %v3694_v17 }
 0x154   : > { %2887 = vmatprep.subr.bf16.mxu0 %v3704_v30 }
 0x157   : > { %2888 = vmatpush3.bf16.msra.mxu0 %v3712_v19 }
 0x158   : > { %2889 = vmatprep.subr.bf16.mxu0 %v3722_v34 }
 0x159   : > { %2586 = vmatmul.mubr.msk.bf16.gmra.mrb[40].mxu1 %vm1510_vm0, %v1390_v23  ;;  %2590 = vmatmul.mubr.msk.bf16.gmra.mrb[48].mxu0 %vm1510_vm0, %v1390_v23 }
 0x15a   : > { %1585 = vmatprep.mubr.bf16.mxu1 %v3243_v0  ;;  %1656 = vmatprep.mubr.bf16.mxu0 %v3243_v0  ;;  %v3127_v0 = vld [vmem:[%s4108_s5 + $0x50] sm:$0xff]  }
 0x15b   : > { %2845 = vmatprep.subr.bf16.mxu1 %v3127_v0  ;;  %2890 = vmatpush3.bf16.msra.mxu0 %v3730_v37 }
 0x15c   : > { %2846 = vmatpush3.bf16.msra.mxu1 %v3129_v28  ;;  %2891 = vmatprep.subr.bf16.mxu0 %v3740_v39 }
 0x15d   : > { %2847 = vmatprep.subr.bf16.mxu1 %v3131_v29 }
 0x15f   : > { %2892 = vmatpush3.bf16.msra.mxu0 %v3748_v41 }
 0x160   : > { %2848 = vmatpush3.bf16.msra.mxu1 %v3133_v31  ;;  %2893 = vmatprep.subr.bf16.mxu0 %v3758_v43 }
 0x161   : > { %2587 = vmatmul.mubr.msk.bf16.gmra.mrb[44].mxu1 %vm1510_vm0, %v1391_v24  ;;  %2591 = vmatmul.mubr.msk.bf16.gmra.mrb[52].mxu0 %vm1510_vm0, %v1391_v24 }
 0x162   : > { %2849 = vmatprep.subr.bf16.mxu1 %v3135_v32 }
 0x163   : > { %2894 = vmatpush3.bf16.msra.mxu0 %v3766_v33 }
 0x164   : > { %2850 = vmatpush3.bf16.msra.mxu1 %v3137_v36  ;;  %2895 = vmatprep.subr.bf16.mxu0 %v3776_v46 }
 0x165   : > { %2851 = vmatprep.subr.bf16.mxu1 %v3139_v38 }
 0x167   : > { %2896 = vmatpush3.bf16.msra.mxu0 %v3784_v35 }
 0x168   : > { %2852 = vmatpush3.bf16.msra.mxu1 %v3141_v40 }
 0x169   : > { %2853 = vmatprep.subr.bf16.mxu1 %v3143_v42 }
 0x16c   : > { %2854 = vmatpush3.bf16.msra.mxu1 %v3145_v44 }
 0x16d   : > { %2855 = vmatprep.subr.bf16.mxu1 %v3147_v45 }
 0x170   : > { %2856 = vmatpush3.bf16.msra.mxu1 %v3149_v47 }
 0x171   : > { %2945 = vmatprep.subr.bf16.mxu1 %v3611_v2 }
 0x21c   : > { %v1557_v60 = vpop.f32.mrb[32].mxu1  ;;  %v1628_v49 = vpop.f32.mrb[40].mxu0 }
 0x21d   : > { %v3801_v2 = vadd.f32 %v1557_v60, %v3792_v57  ;;  %v3804_v62 = vadd.f32 %v1628_v49, %v3794_v58  ;;  %v1559_v1 = vpop.f32.mrb[33].mxu1  ;;  %v1630_v3 = vpop.f32.mrb[41].mxu0 }
 0x21e   : > { %v1561_v6 = vpop.f32.mrb[34].mxu1  ;;  %v1632_v8 = vpop.f32.mrb[42].mxu0  ;;  %v3809_v12 = vadd.f32 %v1559_v1, %v3796_v59  ;;  %v3812_v4 = vadd.f32 %v1630_v3, %v3798_v61 }
 0x21f   : > { %v1693_v63 = vmin.f32 %v3801_v2, 0.0  ;;  %v1695_v10 = vmin.f32 %v3804_v62, 0.0  ;;  %v1563_v14 = vpop.f32.mrb[35].mxu1  ;;  %v1634_v16 = vpop.f32.mrb[43].mxu0  ;;  %v3815_v23 = vadd.f32 %v1561_v6, %v3792_v57  ;;  %v3818_v24 = vadd.f32 %v1632_v8, %v3794_v58 }
 0x220   : > { %v3821_v25 = vadd.f32 %v1563_v14, %v3796_v59  ;;  %v3824_v0 = vadd.f32 %v1634_v16, %v3798_v61  ;;  %v1694_v28 = vmin.f32 %v3809_v12, 0.0  ;;  %v1696_v31 = vmin.f32 %v3812_v4, 0.0 }
 0x221   : > { %v1721_v20 = vmul.f32 1.442695, %v1693_v63  ;;  %v1725_v22 = vmul.f32 1.442695, %v1695_v10  ;;  %v1697_v29 = vmin.f32 %v3815_v23, 0.0  ;;  %v1699_v32 = vmin.f32 %v3818_v24, 0.0 }
 0x222   : > { %v1698_v42 = vmin.f32 %v3821_v25, 0.0  ;;  %v1700_v48 = vmin.f32 %v3824_v0, 0.0  ;;  %v1723_v54 = vmul.f32 1.442695, %v1694_v28  ;;  %v1727_v1 = vmul.f32 1.442695, %v1696_v31 }
 0x223   : > { %3151 = vpow2.f32 %v1721_v20  ;;  %v1729_v40 = vmul.f32 1.442695, %v1697_v29  ;;  %v1733_v47 = vmul.f32 1.442695, %v1699_v32  ;;  %vm1665_vm1 = vcmp.gt.f32.partialorder %v3801_v2, 0.0 }
 0x224   : > { %3153 = vpow2.f32 %v1725_v22  ;;  %v1567_v36 = vpop.f32.mrb[36].mxu1  ;;  %v1638_v38 = vpop.f32.mrb[44].mxu0  ;;  %v1731_v8 = vmul.f32 1.442695, %v1698_v42  ;;  %v1735_v10 = vmul.f32 1.442695, %v1700_v48 }
 0x225   : > { %v1569_v44 = vpop.f32.mrb[37].mxu1  ;;  %v1640_v45 = vpop.f32.mrb[45].mxu0  ;;  %v3833_v50 = vadd.f32 %v1567_v36, %v3792_v57  ;;  %3155 = vpow2.f32 %v1729_v40  ;;  %v3836_v55 = vadd.f32 %v1638_v38, %v3794_v58  ;;  %vm1667_vm2 = vcmp.gt.f32.partialorder %v3804_v62, 0.0 }
 0x226   : > { %v1571_v52 = vpop.f32.mrb[38].mxu1  ;;  %v1642_v53 = vpop.f32.mrb[46].mxu0  ;;  %v3839_v56 = vadd.f32 %v1569_v44, %v3796_v59  ;;  %3157 = vpow2.f32 %v1733_v47  ;;  %v3843_v6 = vadd.f32 %v1640_v45, %v3798_v61  ;;  %vm1669_vm3 = vcmp.gt.f32.partialorder %v3815_v23, 0.0 }
 0x227   : > { %v1573_v60 = vpop.f32.mrb[39].mxu1  ;;  %v1644_v49 = vpop.f32.mrb[47].mxu0  ;;  %v1701_v3 = vmin.f32 %v3833_v50, 0.0  ;;  %v1703_v63 = vmin.f32 %v3836_v55, 0.0  ;;  %3159 = vpow2.f32 %v1723_v54  ;;  %v3848_v20 = vadd.f32 %v1571_v52, %v3792_v57 }
 0x228   : > { %v1702_v14 = vmin.f32 %v3839_v56, 0.0  ;;  %v3851_v22 = vadd.f32 %v1642_v53, %v3794_v58  ;;  %3161 = vpow2.f32 %v1727_v1  ;;  %v1704_v29 = vmin.f32 %v3843_v6, 0.0 }
 0x229   : > { %v1737_v16 = vmul.f32 1.442695, %v1701_v3  ;;  %v1741_v28 = vmul.f32 1.442695, %v1703_v63  ;;  %v3855_v31 = vadd.f32 %v1573_v60, %v3796_v59  ;;  %3163 = vpow2.f32 %v1731_v8 }
 0x22a   : > { %v1739_v40 = vmul.f32 1.442695, %v1702_v14  ;;  %v1705_v42 = vmin.f32 %v3848_v20, 0.0  ;;  %3165 = vpow2.f32 %v1735_v10  ;;  %v1707_v48 = vmin.f32 %v3851_v22, 0.0 }
 0x22b   : > { %v3860_v52 = vadd.f32 %v1644_v49, %v3798_v61  ;;  %3167 = vpow2.f32 %v1737_v16  ;;  %v1743_v8 = vmul.f32 1.442695, %v1704_v29  ;;  %v1706_v63 = vmin.f32 %v3855_v31, 0.0 }
 0x22c   : > { %v1577_v32 = vpop.f32.mrb[40].mxu1  ;;  %v1648_v36 = vpop.f32.mrb[48].mxu0  ;;  %3169 = vpow2.f32 %v1741_v28  ;;  %vm1671_vm4 = vcmp.gt.f32.partialorder %v3818_v24, 0.0  ;;  %v1745_v14 = vmul.f32 1.442695, %v1705_v42  ;;  %vm1666_vm5 = vcmp.gt.f32.partialorder %v3809_v12, 0.0 }
 0x22d   : > { %v3152_v38 = vpop.eup %3151  ;;  %v1579_v44 = vpop.f32.mrb[41].mxu1  ;;  %3171 = vpow2.f32 %v1739_v40  ;;  %v1749_v18 = vmul.f32 1.442695, %v1707_v48  ;;  %v1747_v7 = vmul.f32 1.442695, %v1706_v63  ;;  %v1708_v16 = vmin.f32 %v3860_v52, 0.0 }
 0x22e   : > { %v1650_v45 = vpop.f32.mrb[49].mxu0  ;;  %v3154_v47 = vpop.eup %3153  ;;  %v2592_v3 = vadd.f32 -1.0, %v3152_v38  ;;  %v3873_v9 = vadd.f32 %v1577_v32, %v3792_v57  ;;  %v3876_v28 = vadd.f32 %v1648_v36, %v3794_v58  ;;  %v3879_v29 = vadd.f32 %v1579_v44, %v3796_v59 }
 0x22f   : > { %v1581_v53 = vpop.f32.mrb[42].mxu1  ;;  %v1652_v54 = vpop.f32.mrb[50].mxu0  ;;  %v2594_v10 = vadd.f32 -1.0, %v3154_v47  ;;  %3173 = vpow2.f32 %v1743_v8  ;;  %v3915_v5 = vadd.f32 %v1650_v45, %v3798_v61  ;;  %vm1670_vm6 = vcmp.gt.f32.partialorder %v3821_v25, 0.0 }
 0x230   : > { %v3865_v60 = vpop.f32.mrb[43].mxu1  ;;  %v3867_v1 = vpop.f32.mrb[51].mxu0  ;;  %v3884_v38 = vsel %vm1665_vm1, %v3801_v2, %v2592_v3  ;;  %3175 = vpow2.f32 %v1745_v14  ;;  %vm1668_vm7 = vcmp.gt.f32.partialorder %v3812_v4, 0.0  ;;  %vm1672_vm8 = vcmp.gt.f32.partialorder %v3824_v0, 0.0 }
 0x231   : > { %v3156_v49 = vpop.eup %3155  ;;  %v3896_v44 = vsel %vm1667_vm2, %v3804_v62, %v2594_v10  ;;  %3177 = vpow2.f32 %v1749_v18  ;;  %v1709_v62 = vmin.f32 %v3873_v9, 0.0  ;;  %v1711_v10 = vmin.f32 %v3876_v28, 0.0 }
 0x232   : > { %v3158_v15 = vpop.eup %3157  ;;  %v2596_v21 = vadd.f32 -1.0, %v3156_v49  ;;  %3179 = vpow2.f32 %v1747_v7  ;;  %v3918_v18 = vadd.f32 %v1581_v53, %v3792_v57  ;;  %v3921_v7 = vadd.f32 %v1652_v54, %v3794_v58 }
 0x233   : > { %v2598_v51 = vadd.f32 -1.0, %v3158_v15  ;;  %v1751_v15 = vmul.f32 1.442695, %v1708_v16  ;;  %v3160_v36 = vpop.eup %3159  ;;  %v1753_v2 = vmul.f32 1.442695, %v1709_v62  ;;  %v3930_v54 = vadd.f32 %v3865_v60, %v3796_v59 }
 0x234   : > { %v3889_v40 = vsel %vm1669_vm3, %v3815_v23, %v2596_v21  ;;  %v1587_v32 = vpop.f32.mrb[44].mxu1  ;;  %v3891_v42 = vpop.f32.mrb[52].mxu0  ;;  %v1715_v53 = vmin.f32 %v3921_v7, 0.0  ;;  %vm1674_vm9 = vcmp.gt.f32.partialorder %v3839_v56, 0.0  ;;  %vm1678_vm10 = vcmp.gt.f32.partialorder %v3855_v31, 0.0 }
 0x235   : > { %v3903_v47 = vsel %vm1671_vm4, %v3818_v24, %v2598_v51  ;;  %v3905_v21 = vpop.f32.mrb[45].mxu1  ;;  %v3907_v23 = vpop.f32.mrb[53].mxu0  ;;  %v1710_v51 = vmin.f32 %v3879_v29, 0.0  ;;  %3181 = vpow2.f32 %v1751_v15  ;;  %v1713_v15 = vmin.f32 %v3918_v18, 0.0 }
 0x236   : > { %v3162_v48 = vpop.eup %3161  ;;  %v1591_v8 = vpop.f32.mrb[46].mxu1  ;;  %3183 = vpow2.f32 %v1753_v2  ;;  %v3934_v2 = vadd.f32 %v3867_v1, %v3798_v61  ;;  %v1714_v60 = vmin.f32 %v3930_v54, 0.0  ;;  %vm1676_vm11 = vcmp.gt.f32.partialorder %v3843_v6, 0.0 }
 0x237   : > { %v1662_v63 = vpop.f32.mrb[54].mxu0  ;;  %v3164_v49 = vpop.eup %3163  ;;  %v1757_v8 = vmul.f32 1.442695, %v1711_v10  ;;  %v1761_v62 = vmul.f32 1.442695, %v1713_v15  ;;  %v2595_v15 = vadd.f32 -1.0, %v3162_v48 }
 0x238   : > { %v1592_v24 = vpop.f32.mrb[47].mxu1  ;;  %v1663_v14 = vpop.f32.mrb[55].mxu0  ;;  %v1755_v63 = vmul.f32 1.442695, %v1710_v51  ;;  %v2593_v51 = vadd.f32 -1.0, %v3160_v36  ;;  %v2597_v46 = vadd.f32 -1.0, %v3164_v49 }
 0x239   : > { %v3166_v16 = vpop.eup %3165  ;;  %v1712_v24 = vmin.f32 %v3915_v5, 0.0  ;;  %3185 = vpow2.f32 %v1757_v8  ;;  %v1765_v8 = vmul.f32 1.442695, %v1715_v53  ;;  %vm1673_vm12 = vcmp.gt.f32.partialorder %v3833_v50, 0.0 }
 0x23a   : > { %v3168_v3 = vpop.eup %3167  ;;  %3187 = vpow2.f32 %v1755_v63  ;;  %v3939_v63 = vadd.f32 %v1587_v32, %v3792_v57  ;;  %v2599_v36 = vadd.f32 -1.0, %v3166_v16  ;;  %v1716_v57 = vmin.f32 %v3934_v2, 0.0 }
 0x23b   : > { %v3170_v35 = vpop.eup %3169  ;;  %v1759_v45 = vmul.f32 1.442695, %v1712_v24  ;;  %v3944_v33 = vadd.f32 -1.0, %v3168_v3  ;;  %vm1677_vm13 = vcmp.gt.f32.partialorder %v3848_v20, 0.0  ;;  %vm1680_vm14 = vcmp.gt.f32.partialorder %v3860_v52, 0.0 }
 0x23c   : > { %v3172_v14 = vpop.eup %3171  ;;  %v3949_v48 = vadd.f32 -1.0, %v3170_v35  ;;  %v1717_v16 = vmin.f32 %v3939_v63, 0.0  ;;  %v1767_v53 = vmul.f32 1.442695, %v1716_v57  ;;  %v3964_v35 = vadd.f32 %v3907_v23, %v3798_v61 }
 0x23d   : > { %v3174_v10 = vpop.eup %3173  ;;  %3189 = vpow2.f32 %v1759_v45  ;;  %v2601_v49 = vadd.f32 -1.0, %v3172_v14  ;;  %v1763_v45 = vmul.f32 1.442695, %v1714_v60  ;;  %vm1675_vm15 = vcmp.gt.f32.partialorder %v3836_v55, 0.0 }
 0x23e   : > { %v3176_v24 = vpop.eup %3175  ;;  %3191 = vpow2.f32 %v1761_v62  ;;  %v3956_v62 = vadd.f32 %v3891_v42, %v3794_v58  ;;  %v2603_v14 = vadd.f32 -1.0, %v3174_v10  ;;  %vm1679_vm0 = vcmp.gt.f32.partialorder %v3851_v22, 0.0 }
 0x23f   : > { %v3178_v1 = vpop.eup %3177  ;;  %3193 = vpow2.f32 %v1765_v8  ;;  %v3960_v8 = vadd.f32 %v3905_v21, %v3796_v59  ;;  %vm1681_vm1 = vcmp.gt.f32.partialorder %v3873_v9, 0.0  ;;  %v1769_v60 = vmul.f32 1.442695, %v1717_v16 }
 0x240   : > { %v3180_v32 = vpop.eup %3179  ;;  %3195 = vpow2.f32 %v1763_v45  ;;  %v1810_v58 = vsel %vm1670_vm6, %v3821_v25, %v2597_v46  ;;  %v2604_v59 = vadd.f32 -1.0, %v3176_v24  ;;  %vm1683_vm2 = vcmp.gt.f32.partialorder %v3876_v28, 0.0 }
 0x241   : > { %v3182_v3 = vpop.eup %3181  ;;  %v2605_v21 = vadd.f32 -1.0, %v3180_v32  ;;  %vm1685_vm3 = vcmp.gt.f32.partialorder %v3918_v18, 0.0  ;;  %vm1687_vm4 = vcmp.gt.f32.partialorder %v3921_v7, 0.0  ;;  %3197 = vpow2.f32 %v1767_v53 }
 0x242   : > { %v3184_v42 = vpop.eup %3183  ;;  %v1718_v61 = vmin.f32 %v3960_v8, 0.0  ;;  %v2606_v10 = vadd.f32 -1.0, %v3178_v1  ;;  %v2607_v57 = vadd.f32 -1.0, %v3182_v3  ;;  %v1720_v45 = vmin.f32 %v3964_v35, 0.0 }
 0x243   : > { %v3186_v23 = vpop.eup %3185  ;;  %v1806_v46 = vsel %vm1666_vm5, %v3809_v12, %v2593_v51  ;;  %v2608_v24 = vadd.f32 -1.0, %v3184_v42  ;;  %v1719_v32 = vmin.f32 %v3956_v62, 0.0  ;;  %3199 = vpow2.f32 %v1769_v60 }
 0x244   : > { %v3188_v25 = vpop.eup %3187  ;;  %v1771_v16 = vmul.f32 1.442695, %v1718_v61  ;;  %v1834_v43 = vpack.c.bf16 %v1810_v58, %v1806_v46  ;;  %v1775_v41 = vmul.f32 1.442695, %v1720_v45  ;;  %v1808_v53 = vsel %vm1668_vm7, %v3812_v4, %v2595_v15  ;;  %v4137_v46 = vld [vmem:[#allocation9_spill] sm:$0xff] }
 0x245   : > { %v1812_v1 = vsel %vm1672_vm8, %v3824_v0, %v2599_v36  ;;  %v1814_v51 = vsel %vm1674_vm9, %v3839_v56, %v2601_v49  ;;  %v1818_v60 = vsel %vm1678_vm10, %v3855_v31, %v2605_v21  ;;  %v2610_v42 = vadd.f32 -1.0, %v3186_v23 }
 0x246   : > { %3201 = vpow2.f32 %v1771_v16  ;;  %2144 = vmatprep.mubr.bf16.mxu1 %v1834_v43  ;;  %v1836_v12 = vpack.c.bf16 %v1812_v1, %v1808_v53  ;;  %v2609_v61 = vadd.f32 -1.0, %v3188_v25  ;;  %v4135_v4 = vpack.c.bf16 %v3889_v40, %v3884_v38  ;;  %v4138_v25 = vld [vmem:[#allocation10_spill] sm:$0xff]  ;;  %v4141_v16 = vld [vmem:[#allocation13_spill] sm:$0xff]  ;;  %v4065_v1 = vld [vmem:[%s4109_s6] ss:$0 sm:$0xff] }
 0x247   : > { %v3190_v3 = vpop.eup %3189  ;;  %v1838_v0 = vpack.c.bf16 %v1818_v60, %v1814_v51  ;;  %v1816_v43 = vsel %vm1676_vm11, %v3843_v6, %v2603_v14  ;;  %v1820_v56 = vsel %vm1680_vm14, %v3860_v52, %v2607_v57  ;;  %v1813_v31 = vsel %vm1673_vm12, %v3833_v50, %v3944_v33 }
 0x248   : > { %v3192_v58 = vpop.eup %3191  ;;  %2145 = vmatmul.mubr.bf16.vlgmr.msra.gmra.mrb[48].mxu1 %v4135_v4  ;;  %2208 = vmatprep.mubr.bf16.mxu0 %v1836_v12  ;;  %v1817_v38 = vsel %vm1677_vm13, %v3848_v20, %v2604_v59  ;;  %v2611_v40 = vadd.f32 -1.0, %v3190_v3  ;;  %v4136_v49 = vpack.c.bf16 %v3903_v47, %v3896_v44  ;;  %3203 = vpow2.f32 %v1775_v41 }
 0x249   : > { %v3194_v15 = vpop.eup %3193  ;;  %v2612_v36 = vadd.f32 -1.0, %v3192_v58  ;;  %2953 = vmatpush3.bf16.msra.mxu1 %v3633_v11  ;;  %v1840_v11 = vpack.c.bf16 %v1820_v56, %v1816_v43  ;;  %v1837_v14 = vpack.c.bf16 %v1817_v38, %v1813_v31  ;;  %2152 = vmatprep.mubr.bf16.mxu1 %v1838_v0  ;;  %v1815_v33 = vsel %vm1675_vm15, %v3836_v55, %v3949_v48 }
 0x24a   : > { %v2614_v6 = vadd.f32 -1.0, %v3194_v15  ;;  %2209 = vmatmul.mubr.bf16.vlgmr.msra.gmra.mrb[56].mxu0 %v4136_v49  ;;  %2946 = vmatprep.subr.bf16.mxu1 %v3641_v13  ;;  %v1819_v50 = vsel %vm1679_vm0, %v3851_v22, %v2606_v10  ;;  %v1821_v20 = vsel %vm1681_vm1, %v3873_v9, %v2608_v24  ;;  %v3196_v52 = vpop.eup %3195  ;;  %v1823_v44 = vsel %vm1683_vm2, %v3876_v28, %v2610_v42 }
 0x24b   : > { %2216 = vmatprep.mubr.bf16.mxu0 %v1840_v11  ;;  %v1839_v13 = vpack.c.bf16 %v1819_v50, %v1815_v33  ;;  %v1825_v41 = vsel %vm1685_vm3, %v3918_v18, %v2612_v36  ;;  %v3198_v22 = vpop.eup %3197  ;;  %v2613_v47 = vadd.f32 -1.0, %v3196_v52  ;;  %vm1682_vm5 = vcmp.gt.f32.partialorder %v3879_v29, 0.0 }
 0x24c   : > { %v1827_v55 = vsel %vm1687_vm4, %v3921_v7, %v2614_v6  ;;  %v1841_v9 = vpack.c.bf16 %v1825_v41, %v1821_v20  ;;  %vm1686_vm6 = vcmp.gt.f32.partialorder %v3930_v54, 0.0  ;;  %v2615_v59 = vadd.f32 -1.0, %v3198_v22 }
 0x24d   : > { %2954 = vmatpush3.bf16.msra.mxu1 %v3677_v26  ;;  %v1843_v48 = vpack.c.bf16 %v1827_v55, %v1823_v44  ;;  %v1773_v18 = vmul.f32 1.442695, %v1719_v32  ;;  %vm1684_vm7 = vcmp.gt.f32.partialorder %v3915_v5, 0.0  ;;  %vm1688_vm8 = vcmp.gt.f32.partialorder %v3934_v2, 0.0  ;;  %v3200_v21 = vpop.eup %3199  ;;  %v4139_v32 = vld [vmem:[#allocation11_spill] sm:$0xff] }
 0x24e   : > { %2947 = vmatprep.subr.bf16.mxu1 %v3686_v27  ;;  %v1822_v28 = vsel %vm1682_vm5, %v3879_v29, %v2609_v61  ;;  %v1826_v7 = vsel %vm1686_vm6, %v3930_v54, %v2613_v47  ;;  %v1824_v23 = vsel %vm1684_vm7, %v3915_v5, %v2611_v40  ;;  %v1828_v10 = vsel %vm1688_vm8, %v3934_v2, %v2615_v59 }
 0x24f   : > { %v1842_v26 = vpack.c.bf16 %v1826_v7, %v1822_v28  ;;  %v1844_v45 = vpack.c.bf16 %v1828_v10, %v1824_v23  ;;  %3205 = vpow2.f32 %v1773_v18  ;;  %vm1690_vm9 = vcmp.gt.f32.partialorder %v3960_v8, 0.0 }
 0x250   : > { %2153 = vmatmul.mubr.bf16.gmra.mrb[52].mxu1 %v1837_v14  ;;  %v3202_v57 = vpop.eup %3201  ;;  %v2616_v2 = vadd.f32 -1.0, %v3200_v21  ;;  %vm1689_vm10 = vcmp.gt.f32.partialorder %v3939_v63, 0.0  ;;  %vm1692_vm11 = vcmp.gt.f32.partialorder %v3964_v35, 0.0  ;;  %vm1691_vm12 = vcmp.gt.f32.partialorder %v3956_v62, 0.0 }
 0x251   : > { %2955 = vmatpush3.bf16.msra.mxu1 %v3694_v17  ;;  %v2617_v27 = vadd.f32 -1.0, %v3202_v57  ;;  %2160 = vmatprep.mubr.bf16.mxu1 %v1842_v26  ;;  %vm2388_vm13 = vcmask 519168   ;;  %vm2395_vm14 = vcmask 518144  }
 0x252   : > { %2217 = vmatmul.mubr.bf16.gmra.mrb[60].mxu0 %v1839_v13  ;;  %2948 = vmatprep.subr.bf16.mxu1 %v3704_v30  ;;  %v3204_v54 = vpop.eup %3203  ;;  %v1829_v30 = vsel %vm1689_vm10, %v3939_v63, %v2616_v2 }
 0x253   : > { %2224 = vmatprep.mubr.bf16.mxu0 %v1844_v45  ;;  %v1830_v29 = vsel %vm1690_vm9, %v3960_v8, %v2617_v27  ;;  %v2619_v17 = vadd.f32 -1.0, %v3204_v54 }
 0x254   : > { %v1846_v5 = vpack.c.bf16 %v1830_v29, %v1830_v29 }
 0x255   : > { %2956 = vmatpush3.bf16.msra.mxu1 %v3712_v19  ;;  %v1832_v19 = vsel %vm1692_vm11, %v3964_v35, %v2619_v17 }
 0x256   : > { %2949 = vmatprep.subr.bf16.mxu1 %v3722_v34  ;;  %v1845_v34 = vpack.c.bf16 %v1829_v30, %v1829_v30 }
 0x258   : > { %2161 = vmatmul.mubr.bf16.gmra.mrb[56].mxu1 %v1841_v9 }
 0x259   : > { %2957 = vmatpush3.bf16.msra.mxu1 %v3730_v37  ;;  %2168 = vmatprep.mubr.bf16.mxu1 %v1846_v5  ;;  %v3206_v8 = vpop.eup %3205  ;;  %v1848_v37 = vpack.c.bf16 %v1832_v19, %v1832_v19 }
 0x25a   : > { %2225 = vmatmul.mubr.bf16.gmra.mrb[64].mxu0 %v1843_v48  ;;  %2950 = vmatprep.subr.bf16.mxu1 %v3740_v39  ;;  %v2618_v24 = vadd.f32 -1.0, %v3206_v8  ;;  %v4140_v39 = vld [vmem:[#allocation12_spill] sm:$0xff] }
 0x25c   : > { %v1831_v63 = vsel %vm1691_vm12, %v3956_v62, %v2618_v24 }
 0x25d   : > { %2958 = vmatpush3.bf16.msra.mxu1 %v4137_v46  ;;  %v1847_v35 = vpack.c.bf16 %v1831_v63, %v1831_v63 }
 0x25e   : > { %2951 = vmatprep.subr.bf16.mxu1 %v4138_v25 }
 0x260   : > { %2169 = vmatmul.mubr.bf16.gmra.mrb[60].mxu1 %v1845_v34 }
 0x261   : > { %2959 = vmatpush3.bf16.msra.mxu1 %v4139_v32  ;;  %2232 = vmatprep.mubr.bf16.mxu1 %v1848_v37 }
 0x262   : > { %2952 = vmatprep.subr.bf16.mxu1 %v4140_v39 }
 0x265   : > { %2960 = vmatpush3.bf16.msra.mxu1 %v4141_v16 }
 0x268   : > { %2233 = vmatmul.mubr.bf16.vlgmr.msra.gmra.mrb[64].mxu1 %v1847_v35 }
 0x31b   : > { %v2857_v53 = vpop.f32.mrb[48].mxu1 }
 0x31c   : > { %v2858_v3 = vpop.f32.mrb[49].mxu1 }
 0x31d   : > { %v2897_v12 = vpop.f32.mrb[56].mxu0  ;;  %v2859_v51 = vadd.f32 %v2858_v3, %v2857_v53  ;;  %v2860_v60 = vpop.f32.mrb[50].mxu1 }
 0x31e   : > { %v2898_v58 = vpop.f32.mrb[57].mxu0  ;;  %v2861_v42 = vpop.f32.mrb[51].mxu1 }
 0x31f   : > { %v2147_v61 = vadd.f32 %v2859_v51, %v4065_v1  ;;  %v2899_v4 = vadd.f32 %v2898_v58, %v2897_v12  ;;  %v2900_v62 = vpop.f32.mrb[58].mxu0  ;;  %v2862_v0 = vadd.f32 %v2861_v42, %v2860_v60 }
 0x320   : > { %v2901_v43 = vpop.f32.mrb[59].mxu0 }
 0x321   : > { %v2211_v15 = vadd.f32 %v2899_v4, %v2147_v61  ;;  %v2150_v36 = vadd.f32 %v2862_v0, %v4065_v1  ;;  %v2902_v56 = vadd.f32 %v2901_v43, %v2900_v62 }
 0x323   : > { %v2240_v31 = vsub.f32 0.0, %v2211_v15  ;;  %v2214_v38 = vadd.f32 %v2902_v56, %v2150_v36  ;;  %v2863_v40 = vpop.f32.mrb[52].mxu1 }
 0x324   : > { %v2864_v6 = vpop.f32.mrb[53].mxu1 }
 0x325   : > { %v2247_v49 = vmul.f32 1.442695, %v2240_v31  ;;  %v2241_v11 = vsub.f32 0.0, %v2214_v38  ;;  %v2903_v14 = vpop.f32.mrb[60].mxu0  ;;  %v2865_v33 = vadd.f32 %v2864_v6, %v2863_v40  ;;  %v2866_v50 = vpop.f32.mrb[54].mxu1 }
 0x326   : > { %v2904_v20 = vpop.f32.mrb[61].mxu0  ;;  %v2867_v52 = vpop.f32.mrb[55].mxu1 }
 0x327   : > { %3207 = vpow2.f32 %v2247_v49  ;;  %v2249_v13 = vmul.f32 1.442695, %v2241_v11  ;;  %v2155_v41 = vadd.f32 %v2865_v33, %v4065_v1  ;;  %v2905_v44 = vadd.f32 %v2904_v20, %v2903_v14  ;;  %v2906_v55 = vpop.f32.mrb[62].mxu0 }
 0x328   : > { %v2868_v22 = vadd.f32 %v2867_v52, %v2866_v50  ;;  %v2907_v47 = vpop.f32.mrb[63].mxu0 }
 0x329   : > { %3209 = vpow2.f32 %v2249_v13  ;;  %v2219_v9 = vadd.f32 %v2905_v44, %v2155_v41  ;;  %v2908_v48 = vadd.f32 %v2907_v47, %v2906_v55 }
 0x32a   : > { %v2158_v59 = vadd.f32 %v2868_v22, %v4065_v1 }
 0x32b   : > { %v2242_v18 = vsub.f32 0.0, %v2219_v9  ;;  %v2869_v28 = vpop.f32.mrb[56].mxu1 }
 0x32c   : > { %v2222_v7 = vadd.f32 %v2908_v48, %v2158_v59  ;;  %v2870_v21 = vpop.f32.mrb[57].mxu1 }
 0x32d   : > { %v2251_v26 = vmul.f32 1.442695, %v2242_v18  ;;  %v2909_v23 = vpop.f32.mrb[64].mxu0  ;;  %v2871_v10 = vadd.f32 %v2870_v21, %v2869_v28  ;;  %v2872_v57 = vpop.f32.mrb[58].mxu1 }
 0x32e   : > { %v2243_v45 = vsub.f32 0.0, %v2222_v7  ;;  %v2910_v27 = vpop.f32.mrb[65].mxu0  ;;  %v2873_v29 = vpop.f32.mrb[59].mxu1 }
 0x32f   : > { %3211 = vpow2.f32 %v2251_v26  ;;  %v2163_v54 = vadd.f32 %v2871_v10, %v4065_v1  ;;  %v2911_v5 = vadd.f32 %v2910_v27, %v2909_v23  ;;  %v2912_v2 = vpop.f32.mrb[66].mxu0  ;;  %v2874_v17 = vadd.f32 %v2873_v29, %v2872_v57 }
 0x330   : > { %v2253_v30 = vmul.f32 1.442695, %v2243_v45  ;;  %v2913_v8 = vpop.f32.mrb[67].mxu0 }
 0x331   : > { %v3208_v19 = vpop.eup %3207  ;;  %v2227_v46 = vadd.f32 %v2911_v5, %v2163_v54  ;;  %v2166_v34 = vadd.f32 %v2874_v17, %v4065_v1  ;;  %v2914_v25 = vadd.f32 %v2913_v8, %v2912_v2  ;;  %v4142_v54 = vld [vmem:[#allocation3_spill] sm:$0xff]  ;;  %v4143_v8 = vld [vmem:[#allocation5_spill] sm:$0xff] }
 0x332   : > { %v2261_v24 = vadd.f32 1.0, %v3208_v19  ;;  %3213 = vpow2.f32 %v2253_v30 }
 0x333   : > { %v3210_v37 = vpop.eup %3209  ;;  %v2244_v32 = vsub.f32 0.0, %v2227_v46  ;;  %v2230_v39 = vadd.f32 %v2914_v25, %v2166_v34  ;;  %v2875_v63 = vpop.f32.mrb[60].mxu1 }
 0x334   : > { %3215 = vrcp.f32 %v2261_v24  ;;  %v2262_v16 = vadd.f32 1.0, %v3210_v37  ;;  %v2876_v35 = vpop.f32.mrb[61].mxu1  ;;  %v4144_v24 = vld [vmem:[#allocation2_spill] sm:$0xff] }
 0x335   : > { %v2255_v53 = vmul.f32 1.442695, %v2244_v32  ;;  %v2245_v3 = vsub.f32 0.0, %v2230_v39  ;;  %v2877_v12 = vadd.f32 %v2876_v35, %v2875_v63  ;;  %v2878_v51 = vpop.f32.mrb[62].mxu1 }
 0x336   : > { %v2879_v60 = vpop.f32.mrb[63].mxu1  ;;  %v4146_v51 = vld [vmem:[#allocation7_spill] sm:$0xff] }
 0x337   : > { %3217 = vpow2.f32 %v2255_v53  ;;  %v2257_v58 = vmul.f32 1.442695, %v2245_v3  ;;  %v2171_v15 = vadd.f32 %v2877_v12, %v4065_v1 }
 0x338   : > { %3219 = vrcp.f32 %v2262_v16  ;;  %v4145_v16 = vld [vmem:[#allocation4_spill] sm:$0xff] }
 0x339   : > { %v3212_v42 = vpop.eup %3211  ;;  %3221 = vpow2.f32 %v2257_v58 }
 0x33a   : > { %v2263_v61 = vadd.f32 1.0, %v3212_v42 }
 0x33b   : > { %v2915_v4 = vpop.f32.mrb[64].mxu1 }
 0x33c   : > { %v3214_v62 = vpop.eup %3213  ;;  %3223 = vrcp.f32 %v2263_v61  ;;  %v2916_v0 = vpop.f32.mrb[65].mxu1  ;;  %v4147_v61 = vld [vmem:[#allocation8_spill] sm:$0xff] }
 0x33d   : > { %v2264_v43 = vadd.f32 1.0, %v3214_v62  ;;  %v2917_v36 = vadd.f32 %v2916_v0, %v2915_v4  ;;  %v2918_v56 = vpop.f32.mrb[66].mxu1 }
 0x33e   : > { %v3216_v31 = vpop.eup %3215  ;;  %v2919_v38 = vpop.f32.mrb[67].mxu1 }
 0x33f   : > { %v2235_v40 = vadd.f32 %v2917_v36, %v2171_v15  ;;  %2282 = vrot.lane.b32.xlu0 %v3216_v31, %s3244_s28  ;;  %3225 = vrcp.f32 %v2264_v43  ;;  %v4148_v36 = vld [vmem:[#allocation6_spill] sm:$0xff] }
 0x341   : > { %v3218_v6 = vpop.eup %3217  ;;  %v2246_v49 = vsub.f32 0.0, %v2235_v40 }
 0x342   : > { %v3220_v11 = vpop.eup %3219  ;;  %v2265_v14 = vadd.f32 1.0, %v3218_v6 }
 0x343   : > { %v3222_v33 = vpop.eup %3221  ;;  %v2259_v50 = vmul.f32 1.442695, %v2246_v49  ;;  %2284 = vrot.lane.b32.xlu0 %v3220_v11, %s3244_s28 }
 0x344   : > { %3227 = vrcp.f32 %v2265_v14  ;;  %v2266_v20 = vadd.f32 1.0, %v3222_v33 }
 0x345   : > { %3229 = vpow2.f32 %v2259_v50 }
 0x346   : > { %v3224_v52 = vpop.eup %3223  ;;  %3231 = vrcp.f32 %v2266_v20 }
 0x347   : > { %2286 = vrot.lane.b32.xlu1 %v3224_v52, %s3244_s28 }
 0x349   : > { %v3226_v1 = vpop.eup %3225 }
 0x34b   : > { %2288 = vrot.lane.b32.xlu1 %v3226_v1, %s3244_s28 }
 0x34e   : > { %v3228_v13 = vpop.eup %3227 }
 0x34f   : > { %v3230_v41 = vpop.eup %3229  ;;  %2290 = vrot.lane.b32.xlu0 %v3228_v13, %s3244_s28 }
 0x350   : > { %v3232_v44 = vpop.eup %3231  ;;  %v2267_v55 = vadd.f32 1.0, %v3230_v41 }
 0x351   : > { %2292 = vrot.lane.b32.xlu1 %v3232_v44, %s3244_s28 }
 0x352   : > { %3233 = vrcp.f32 %v2267_v55 }
 0x35c   : > { %v3234_v22 = vpop.eup %3233 }
 0x35d   : > { %2294 = vrot.lane.b32.xlu0 %v3234_v22, %s3244_s28 }
 0x3b1   : > { %v2283_v47 = vpop.permute.xlu0 %2282 }
 0x3b2   : > { %v2303_v9 = vadd.f32 %v3216_v31, %v2283_v47 }
 0x3b4   : > { %2312 = vperm.xlu1 %2973, %v2303_v9  }
 0x3b5   : > { %v2285_v48 = vpop.permute.xlu0 %2284 }
 0x3b6   : > { %v2304_v59 = vadd.f32 %v3220_v11, %v2285_v48 }
 0x3b8   : > { %2317 = vperm.xlu0 %2974, %v2304_v59  }
 0x3b9   : > { %v2287_v18 = vpop.permute.xlu1 %2286 }
 0x3ba   : > { %v2305_v28 = vadd.f32 %v3224_v52, %v2287_v18 }
 0x3bc   : > { %2322 = vperm.xlu1 %2973, %v2305_v28  }
 0x3bd   : > { %v2289_v7 = vpop.permute.xlu1 %2288 }
 0x3be   : > { %v2306_v21 = vadd.f32 %v3226_v1, %v2289_v7 }
 0x3c0   : > { %2327 = vperm.xlu1 %2973, %v2306_v21  }
 0x3c1   : > { %v2291_v26 = vpop.permute.xlu0 %2290 }
 0x3c2   : > { %v2307_v23 = vadd.f32 %v3228_v13, %v2291_v26 }
 0x3c3   : > { %v2293_v10 = vpop.permute.xlu1 %2292 }
 0x3c4   : > { %v2308_v57 = vadd.f32 %v3232_v44, %v2293_v10  ;;  %2332 = vperm.xlu0 %2974, %v2307_v23  }
 0x3c6   : > { %2337 = vperm.xlu1 %2973, %v2308_v57  }
 0x3cf   : > { %v2295_v45 = vpop.permute.xlu0 %2294 }
 0x3d0   : > { %v2309_v27 = vadd.f32 %v3234_v22, %v2295_v45 }
 0x3d2   : > { %2342 = vperm.xlu0 %2974, %v2309_v27  }
 0x433   : > { %v2313_v29 = vpop.permute.xlu1 %2312 }
 0x434   : > { %v2345_v5 = vmul.f32 %v2313_v29, %v4142_v54 }
 0x436   : > { %v2352_v2 = vmax.f32 %v2345_v5, 0.0 }
 0x437   : > { %v2318_v17 = vpop.permute.xlu0 %2317 }
 0x438   : > { %v2662_v30 = vpack.c.bf16 %v2352_v2, %v2352_v2  ;;  %v2346_v19 = vmul.f32 %v2318_v17, %v4143_v8 }
 0x43a   : > { %2389 = vst.msk [vmem:[%s4079_s9] sm:$0xf] %vm2388_vm13, %v2662_v30  ;;  %v2353_v46 = vmax.f32 %v2346_v19, 0.0 }
 0x43b   : > { %v2323_v34 = vpop.permute.xlu1 %2322 }
 0x43c   : > { %v2663_v25 = vpack.c.bf16 %v2353_v46, %v2353_v46  ;;  %v2347_v37 = vmul.f32 %v2323_v34, %v4144_v24 }
 0x43e   : > { %2390 = vst.msk [vmem:[%s4079_s9 + $0x4] sm:$0xf] %vm2388_vm13, %v2663_v25  ;;  %v2354_v32 = vmax.f32 %v2347_v37, 0.0 }
 0x43f   : > { %v2328_v39 = vpop.permute.xlu1 %2327 }
 0x440   : > { %v2664_v63 = vpack.c.bf16 %v2354_v32, %v2354_v32  ;;  %v2348_v35 = vmul.f32 %v2328_v39, %v4145_v16 }
 0x442   : > { %2391 = vst.msk [vmem:[%s4079_s9 + $0x8] sm:$0xf] %vm2388_vm13, %v2664_v63  ;;  %v2355_v53 = vmax.f32 %v2348_v35, 0.0 }
 0x443   : > { %v2333_v3 = vpop.permute.xlu0 %2332 }
 0x444   : > { %v2665_v12 = vpack.c.bf16 %v2355_v53, %v2355_v53  ;;  %v2349_v60 = vmul.f32 %v2333_v3, %v4146_v51 }
 0x445   : > { %v2338_v58 = vpop.permute.xlu1 %2337 }
 0x446   : > { %2392 = vst.msk [vmem:[%s4079_s9 + $0xc] sm:$0xf] %vm2388_vm13, %v2665_v12  ;;  %v2356_v42 = vmax.f32 %v2349_v60, 0.0  ;;  %v2350_v4 = vmul.f32 %v2338_v58, %v4147_v61 }
 0x448   : > { %v2666_v62 = vpack.c.bf16 %v2356_v42, %v2356_v42  ;;  %v2357_v0 = vmax.f32 %v2350_v4, 0.0 }
 0x44a   : > { %2393 = vst.msk [vmem:[%s4079_s9 + $0x10] sm:$0xf] %vm2388_vm13, %v2666_v62  ;;  %v2667_v43 = vpack.c.bf16 %v2357_v0, %v2357_v0 }
 0x44c   : > { %2394 = vst.msk [vmem:[%s4079_s9 + $0x14] sm:$0xf] %vm2388_vm13, %v2667_v43 }
 0x451   : > { %v2343_v15 = vpop.permute.xlu0 %2342 }
 0x452   : > { %v2351_v56 = vmul.f32 %v2343_v15, %v4148_v36 }
 0x454   : > { %v2358_v31 = vmax.f32 %v2351_v56, 0.0 }
 0x456   : > { %v2668_v38 = vpack.c.bf16 %v2358_v31, %v2358_v31 }
 0x458   : > { %2396 = vst.msk [vmem:[%s4079_s9 + $0x18] sm:$0x7] %vm2395_vm14, %v2668_v38 }
 0x459 PF: > { %s17_s24 = sadd.s32 1, %s3241_s24  }
 0x45a   : > { %p14_p4 = scmp.ge.s32.totalorder %s17_s24, 4  }
 0x45c   :  { %16 = sbr.rel (!%p14_p4) target bundleno = 1 (0x1), region = 78 }

// kernel: nature_cnn_amm_forward.9
= control target key start
LH: loop header
LB: loop body
LE: loop exit
PB: predicated region body
PF: predicated region fallthrough
CT: control target
= control target key end

     0   :  { %8 = vsyncpa [#allocation3], 0  ;;  %v466_v39 = vlaneseq  ;;  %v4718_v40 = vmov 1966171168   ;;  %s6233_s0 = inlined_call_operand.vmem [shape: bf16[2,3456], index: 0, kind: input, shape index: {}]   ;;  %s6234_s1 = inlined_call_operand.vmem [shape: bf16[3456,256], index: 1, kind: input, shape index: {}]   ;;  %s6235_s2 = inlined_call_operand.vmem [shape: f32[1,256], index: 2, kind: input, shape index: {}]   ;;  %s6236_s3 = inlined_call_operand.hbm [shape: f32[2,256], index: 3, kind: output, shape index: {}]  }
   0x1   :  { %v4026_v0 = vld [vmem:[%s6234_s1 + $0x4] ss:$8 sps:$4 sm:$0xff]   ;;  %v4030_v2 = vld [vmem:[%s6234_s1] ss:$8 sps:$4 sm:$0xff]   ;;  %v4032_v4 = vld [vmem:[%s6234_s1 + $0x14] ss:$8 sps:$4 sm:$0xff]   ;;  %v497_v41 = vunpack.c.l.s4 %v4718_v40 }
   0x2   :  { %v4028_v1 = vld [vmem:[%s6234_s1 + $0x704] ss:$8 sps:$4 sm:$0xff]   ;;  %v4031_v3 = vld [vmem:[%s6234_s1 + $0x700] ss:$8 sps:$4 sm:$0xff]   ;;  %2916 = vmatprep.subr.bf16.mxu1 %v4026_v0  ;;  %v4034_v5 = vld [vmem:[%s6234_s1 + $0x714] ss:$8 sps:$4 sm:$0xff]  }
   0x3   :  { %3203 = vmatprep.subr.bf16.mxu0 %v4028_v1  ;;  %2917 = vmatpush1.bf16.msra.mxu1 %v4030_v2  ;;  %v4036_v6 = vld [vmem:[%s6234_s1 + $0x10] ss:$8 sps:$4 sm:$0xff]   ;;  %v4038_v8 = vld [vmem:[%s6234_s1 + $0x24] ss:$8 sps:$4 sm:$0xff]   ;;  %v4042_v10 = vld [vmem:[%s6234_s1 + $0x20] ss:$8 sps:$4 sm:$0xff]   ;;  %v498_v48 = vunpack.c.0.s8 %v497_v41 }
   0x4   :  { %3204 = vmatpush1.bf16.msra.mxu0 %v4031_v3  ;;  %2918 = vmatprep.subr.bf16.mxu1 %v4032_v4  ;;  %v4037_v7 = vld [vmem:[%s6234_s1 + $0x710] ss:$8 sps:$4 sm:$0xff]   ;;  %v4040_v9 = vld [vmem:[%s6234_s1 + $0x724] ss:$8 sps:$4 sm:$0xff]   ;;  %v4043_v11 = vld [vmem:[%s6234_s1 + $0x720] ss:$8 sps:$4 sm:$0xff]  }
   0x5   :  { %3205 = vmatprep.subr.bf16.mxu0 %v4034_v5  ;;  %v4044_v12 = vld [vmem:[%s6234_s1 + $0x34] ss:$8 sps:$4 sm:$0xff]   ;;  %v4048_v14 = vld [vmem:[%s6234_s1 + $0x30] ss:$8 sps:$4 sm:$0xff]   ;;  %v4050_v16 = vld [vmem:[%s6234_s1 + $0x44] ss:$8 sps:$4 sm:$0xff]  }
   0x6   :  { %v4046_v13 = vld [vmem:[%s6234_s1 + $0x734] ss:$8 sps:$4 sm:$0xff]   ;;  %v4049_v15 = vld [vmem:[%s6234_s1 + $0x730] ss:$8 sps:$4 sm:$0xff]   ;;  %v4052_v17 = vld [vmem:[%s6234_s1 + $0x744] ss:$8 sps:$4 sm:$0xff]  }
   0x7   :  { %2919 = vmatpush1.bf16.msra.mxu1 %v4036_v6  ;;  %v4054_v18 = vld [vmem:[%s6234_s1 + $0x40] ss:$8 sps:$4 sm:$0xff]   ;;  %v4056_v20 = vld [vmem:[%s6234_s1 + $0x54] ss:$8 sps:$4 sm:$0xff]   ;;  %v4060_v22 = vld [vmem:[%s6234_s1 + $0x50] ss:$8 sps:$4 sm:$0xff]  }
   0x8   :  { %3206 = vmatpush1.bf16.msra.mxu0 %v4037_v7  ;;  %2920 = vmatprep.subr.bf16.mxu1 %v4038_v8  ;;  %v4055_v19 = vld [vmem:[%s6234_s1 + $0x740] ss:$8 sps:$4 sm:$0xff]   ;;  %v4058_v21 = vld [vmem:[%s6234_s1 + $0x754] ss:$8 sps:$4 sm:$0xff]   ;;  %v4061_v23 = vld [vmem:[%s6234_s1 + $0x750] ss:$8 sps:$4 sm:$0xff]  }
   0x9   :  { %3207 = vmatprep.subr.bf16.mxu0 %v4040_v9  ;;  %v4062_v24 = vld [vmem:[%s6234_s1 + $0x64] ss:$8 sps:$4 sm:$0xff]   ;;  %v4066_v26 = vld [vmem:[%s6234_s1 + $0x60] ss:$8 sps:$4 sm:$0xff]   ;;  %v4068_v28 = vld [vmem:[%s6234_s1 + $0x74] ss:$8 sps:$4 sm:$0xff]  }
   0xa   :  { %v4064_v25 = vld [vmem:[%s6234_s1 + $0x764] ss:$8 sps:$4 sm:$0xff]   ;;  %v4067_v27 = vld [vmem:[%s6234_s1 + $0x760] ss:$8 sps:$4 sm:$0xff]   ;;  %v4070_v29 = vld [vmem:[%s6234_s1 + $0x774] ss:$8 sps:$4 sm:$0xff]  }
   0xb   :  { %2921 = vmatpush1.bf16.msra.mxu1 %v4042_v10  ;;  %v4072_v30 = vld [vmem:[%s6234_s1 + $0x70] ss:$8 sps:$4 sm:$0xff]   ;;  %v4074_v32 = vld [vmem:[%s6234_s1 + $0x84] ss:$8 sps:$4 sm:$0xff]   ;;  %v4078_v34 = vld [vmem:[%s6234_s1 + $0x80] ss:$8 sps:$4 sm:$0xff]  }
   0xc   :  { %3208 = vmatpush1.bf16.msra.mxu0 %v4043_v11  ;;  %2922 = vmatprep.subr.bf16.mxu1 %v4044_v12  ;;  %v4073_v31 = vld [vmem:[%s6234_s1 + $0x770] ss:$8 sps:$4 sm:$0xff]   ;;  %v4076_v33 = vld [vmem:[%s6234_s1 + $0x784] ss:$8 sps:$4 sm:$0xff]   ;;  %v4079_v35 = vld [vmem:[%s6234_s1 + $0x780] ss:$8 sps:$4 sm:$0xff]  }
   0xd   :  { %3209 = vmatprep.subr.bf16.mxu0 %v4046_v13  ;;  %v4080_v36 = vld [vmem:[%s6234_s1 + $0x94] ss:$8 sps:$4 sm:$0xff]   ;;  %v4084_v38 = vld [vmem:[%s6234_s1 + $0x90] ss:$8 sps:$4 sm:$0xff]   ;;  %v4086_v43 = vld [vmem:[%s6234_s1 + $0xa4] ss:$8 sps:$4 sm:$0xff]  }
   0xe   :  { %v4082_v37 = vld [vmem:[%s6234_s1 + $0x794] ss:$8 sps:$4 sm:$0xff]   ;;  %v4085_v42 = vld [vmem:[%s6234_s1 + $0x790] ss:$8 sps:$4 sm:$0xff]   ;;  %v4088_v44 = vld [vmem:[%s6234_s1 + $0x7a4] ss:$8 sps:$4 sm:$0xff]  }
   0xf   :  { %2923 = vmatpush1.bf16.msra.mxu1 %v4048_v14  ;;  %v4090_v45 = vld [vmem:[%s6234_s1 + $0xa0] ss:$8 sps:$4 sm:$0xff]   ;;  %v4876_v47 = vshrl.u32 %v466_v39, 7  ;;  %v4092_v49 = vld [vmem:[%s6234_s1 + $0xb4] ss:$8 sps:$4 sm:$0xff]  }
  0x10   :  { %3210 = vmatpush1.bf16.msra.mxu0 %v4049_v15  ;;  %2924 = vmatprep.subr.bf16.mxu1 %v4050_v16  ;;  %v4091_v46 = vld [vmem:[%s6234_s1 + $0x7a0] ss:$8 sps:$4 sm:$0xff]   ;;  %v4094_v50 = vld [vmem:[%s6234_s1 + $0x7b4] ss:$8 sps:$4 sm:$0xff]   ;;  %v4096_v51 = vld [vmem:[%s6234_s1 + $0xb0] ss:$8 sps:$4 sm:$0xff]  }
  0x11   :  { %3211 = vmatprep.subr.bf16.mxu0 %v4052_v17  ;;  %v4097_v52 = vld [vmem:[%s6234_s1 + $0x7b0] ss:$8 sps:$4 sm:$0xff]   ;;  %v4894_v54 = vsub.s32 %v498_v48, %v4876_v47  ;;  %v4098_v55 = vld [vmem:[%s6234_s1 + $0xc4] ss:$8 sps:$4 sm:$0xff]   ;;  %v4102_v58 = vld [vmem:[%s6234_s1 + $0xc0] ss:$8 sps:$4 sm:$0xff]  }
  0x12   :  { %v4122_v53 = vld [vmem:[%s6233_s0] ss:$27 sps:$4 sm:$0xff]   ;;  %v4125_v56 = vld [vmem:[%s6233_s0 + $0x36] ss:$27 sps:$4 sm:$0xff]   ;;  %v4100_v57 = vld [vmem:[%s6234_s1 + $0x7c4] ss:$8 sps:$4 sm:$0xff]  }
  0x13   :  { %2925 = vmatpush1.bf16.msra.mxu1 %v4054_v18  ;;  %v502_v59 = vrot.slane %v4122_v53, %v4894_v54  ;;  %v4103_v60 = vld [vmem:[%s6234_s1 + $0x7c0] ss:$8 sps:$4 sm:$0xff]   ;;  %v516_v61 = vrot.slane %v4125_v56, %v4894_v54  ;;  %v4104_v0 = vld [vmem:[%s6234_s1 + $0xd4] ss:$8 sps:$4 sm:$0xff]   ;;  %v4108_v6 = vld [vmem:[%s6234_s1 + $0xd0] ss:$8 sps:$4 sm:$0xff]  }
  0x14   :  { %3212 = vmatpush1.bf16.msra.mxu0 %v4055_v19  ;;  %2926 = vmatprep.subr.bf16.mxu1 %v4056_v20  ;;  %v4131_v62 = vld [vmem:[%s6233_s0 + $0xc] ss:$27 sps:$4 sm:$0xff]   ;;  %v4133_v63 = vld [vmem:[%s6233_s0 + $0x42] ss:$27 sps:$4 sm:$0xff]   ;;  %v4109_v7 = vld [vmem:[%s6234_s1 + $0x7d0] ss:$8 sps:$4 sm:$0xff]  }
  0x15   :  { %3213 = vmatprep.subr.bf16.mxu0 %v4058_v21  ;;  %v525_v1 = vcombine.high %v502_v59, %v516_v61  ;;  %v4106_v2 = vld [vmem:[%s6234_s1 + $0x7d4] ss:$8 sps:$4 sm:$0xff]   ;;  %v577_v3 = vrot.slane %v4131_v62, %v4894_v54  ;;  %v591_v4 = vrot.slane %v4133_v63, %v4894_v54  ;;  %v4110_v9 = vld [vmem:[%s6234_s1 + $0xe4] ss:$8 sps:$4 sm:$0xff]   ;;  %v4114_v12 = vld [vmem:[%s6234_s1 + $0xe0] ss:$8 sps:$4 sm:$0xff]   ;;  %v524_v18 = vcombine.low %v502_v59, %v516_v61 }
  0x16   :  { %v4112_v10 = vld [vmem:[%s6234_s1 + $0x7e4] ss:$8 sps:$4 sm:$0xff]   ;;  %v4115_v13 = vld [vmem:[%s6234_s1 + $0x7e0] ss:$8 sps:$4 sm:$0xff]   ;;  %v4116_v16 = vld [vmem:[%s6234_s1 + $0xf4] ss:$8 sps:$4 sm:$0xff]  }
  0x17   :  { %2927 = vmatpush1.bf16.msra.mxu1 %v4060_v22  ;;  %v548_v5 = vrot.slane %v525_v1, %v4894_v54  ;;  %v595_v8 = vcombine.high %v577_v3, %v591_v4  ;;  %v594_v15 = vcombine.low %v577_v3, %v591_v4  ;;  %v4118_v17 = vld [vmem:[%s6234_s1 + $0x7f4] ss:$8 sps:$4 sm:$0xff]   ;;  %v4120_v19 = vld [vmem:[%s6234_s1 + $0xf0] ss:$8 sps:$4 sm:$0xff]   ;;  %v4130_v22 = vld [vmem:[%s6234_s1 + $0x104] ss:$8 sps:$4 sm:$0xff]  }
  0x18   :  { %3214 = vmatpush1.bf16.msra.mxu0 %v4061_v23  ;;  %2928 = vmatprep.subr.bf16.mxu1 %v4062_v24  ;;  %v4121_v20 = vld [vmem:[%s6234_s1 + $0x7f0] ss:$8 sps:$4 sm:$0xff]   ;;  %v4137_v23 = vld [vmem:[%s6234_s1 + $0x804] ss:$8 sps:$4 sm:$0xff]   ;;  %v4973_v24 = vrot.slane %v524_v18, %v4894_v54  ;;  %v4171_v53 = vld [vmem:[%s6234_s1 + $0x860] ss:$8 sps:$4 sm:$0xff]  }
  0x19   :  { %3215 = vmatprep.subr.bf16.mxu0 %v4064_v25  ;;  %2948 = vmatprep.mubr.bf16.mxu1 %v548_v5  ;;  %v4941_v11 = vrot.slane %v595_v8, %v4894_v54  ;;  %v4964_v21 = vrot.slane %v594_v15, %v4894_v54  ;;  %v4128_v25 = vld [vmem:[%s6234_s1 + $0x100] ss:$8 sps:$4 sm:$0xff]   ;;  %v4150_v39 = vld [vmem:[%s6234_s1 + $0x130] ss:$8 sps:$4 sm:$0xff]   ;;  %v4158_v41 = vld [vmem:[%s6234_s1 + $0x144] ss:$8 sps:$4 sm:$0xff]  }
  0x1a   :  { %v4153_v40 = vld [vmem:[%s6234_s1 + $0x830] ss:$8 sps:$4 sm:$0xff]   ;;  %v4182_v59 = vld [vmem:[%s6234_s1 + $0x184] ss:$8 sps:$4 sm:$0xff]   ;;  %v4180_v1 = vld [vmem:[%s6234_s1 + $0x180] ss:$8 sps:$4 sm:$0xff]  }
  0x1b   :  { %2929 = vmatpush1.bf16.msra.mxu1 %v4066_v26  ;;  %v627_v14 = vcombine.high %v4941_v11, %v4941_v11  ;;  %v4135_v26 = vld [vmem:[%s6234_s1 + $0x800] ss:$8 sps:$4 sm:$0xff]   ;;  %v4162_v48 = vld [vmem:[%s6234_s1 + $0x150] ss:$8 sps:$4 sm:$0xff]   ;;  %v4185_v62 = vld [vmem:[%s6234_s1 + $0x884] ss:$8 sps:$4 sm:$0xff]  }
  0x1c   :  { %3216 = vmatpush1.bf16.msra.mxu0 %v4067_v27  ;;  %2930 = vmatprep.subr.bf16.mxu1 %v4068_v28  ;;  %v625_v27 = vcombine.high %v4964_v21, %v4964_v21  ;;  %v4140_v28 = vld [vmem:[%s6234_s1 + $0x114] ss:$8 sps:$4 sm:$0xff]   ;;  %v4174_v56 = vld [vmem:[%s6234_s1 + $0x170] ss:$8 sps:$4 sm:$0xff]   ;;  %v4233_v61 = vld [vmem:[%s6233_s0 + $0x46] ss:$27 sps:$4 sm:$0xff]  }
  0x1d   :  { %3217 = vmatprep.subr.bf16.mxu0 %v4070_v29  ;;  %3235 = vmatprep.mubr.bf16.mxu0 %v627_v14  ;;  %v558_v29 = vcombine.high %v548_v5, %v548_v5  ;;  %v4188_v3 = vld [vmem:[%s6234_s1 + $0x194] ss:$8 sps:$4 sm:$0xff]   ;;  %v4189_v8 = vld [vmem:[%s6234_s1 + $0x890] ss:$8 sps:$4 sm:$0xff]   ;;  %v4206_v18 = vld [vmem:[%s6234_s1 + $0x1c4] ss:$8 sps:$4 sm:$0xff]  }
  0x1e   :  { %v4191_v5 = vld [vmem:[%s6234_s1 + $0x894] ss:$8 sps:$4 sm:$0xff]  }
  0x1f   :  { %2931 = vmatpush1.bf16.msra.mxu1 %v4072_v30  ;;  %v4143_v30 = vld [vmem:[%s6234_s1 + $0x814] ss:$8 sps:$4 sm:$0xff]  }
  0x20   :  { %3218 = vmatpush1.bf16.msra.mxu0 %v4073_v31  ;;  %2932 = vmatprep.subr.bf16.mxu1 %v4074_v32  ;;  %v4138_v31 = vld [vmem:[%s6234_s1 + $0x110] ss:$8 sps:$4 sm:$0xff]   ;;  %v4200_v14 = vld [vmem:[%s6234_s1 + $0x1b4] ss:$8 sps:$4 sm:$0xff]  }
  0x21   :  { %3219 = vmatprep.subr.bf16.mxu0 %v4076_v33  ;;  %v4141_v32 = vld [vmem:[%s6234_s1 + $0x810] ss:$8 sps:$4 sm:$0xff]   ;;  %v4146_v33 = vld [vmem:[%s6234_s1 + $0x124] ss:$8 sps:$4 sm:$0xff]   ;;  %v4203_v15 = vld [vmem:[%s6234_s1 + $0x8b4] ss:$8 sps:$4 sm:$0xff]  }
  0x23   :  { %2933 = vmatpush1.bf16.msra.mxu1 %v4078_v34  ;;  %v4149_v34 = vld [vmem:[%s6234_s1 + $0x824] ss:$8 sps:$4 sm:$0xff]  }
  0x24   :  { %3220 = vmatpush1.bf16.msra.mxu0 %v4079_v35  ;;  %2934 = vmatprep.subr.bf16.mxu1 %v4080_v36  ;;  %v4144_v35 = vld [vmem:[%s6234_s1 + $0x120] ss:$8 sps:$4 sm:$0xff]  }
  0x25   :  { %3221 = vmatprep.subr.bf16.mxu0 %v4082_v37  ;;  %v4147_v36 = vld [vmem:[%s6234_s1 + $0x820] ss:$8 sps:$4 sm:$0xff]   ;;  %v4152_v37 = vld [vmem:[%s6234_s1 + $0x134] ss:$8 sps:$4 sm:$0xff]  }
  0x27   :  { %2935 = vmatpush1.bf16.msra.mxu1 %v4084_v38  ;;  %v4155_v38 = vld [vmem:[%s6234_s1 + $0x834] ss:$8 sps:$4 sm:$0xff]  }
  0x28   :  { %3222 = vmatpush1.bf16.msra.mxu0 %v4085_v42  ;;  %2936 = vmatprep.subr.bf16.mxu1 %v4086_v43  ;;  %v4161_v42 = vld [vmem:[%s6234_s1 + $0x844] ss:$8 sps:$4 sm:$0xff]   ;;  %v4156_v43 = vld [vmem:[%s6234_s1 + $0x140] ss:$8 sps:$4 sm:$0xff]  }
  0x29   :  { %3223 = vmatprep.subr.bf16.mxu0 %v4088_v44  ;;  %v4159_v44 = vld [vmem:[%s6234_s1 + $0x840] ss:$8 sps:$4 sm:$0xff]  }
  0x2b   :  { %2937 = vmatpush1.bf16.msra.mxu1 %v4090_v45  ;;  %v4164_v45 = vld [vmem:[%s6234_s1 + $0x154] ss:$8 sps:$4 sm:$0xff]  }
  0x2c   :  { %3224 = vmatpush1.bf16.msra.mxu0 %v4091_v46  ;;  %2938 = vmatprep.subr.bf16.mxu1 %v4092_v49  ;;  %v4167_v46 = vld [vmem:[%s6234_s1 + $0x854] ss:$8 sps:$4 sm:$0xff]   ;;  %v4165_v49 = vld [vmem:[%s6234_s1 + $0x850] ss:$8 sps:$4 sm:$0xff]  }
  0x2d   :  { %3225 = vmatprep.subr.bf16.mxu0 %v4094_v50  ;;  %v4170_v50 = vld [vmem:[%s6234_s1 + $0x164] ss:$8 sps:$4 sm:$0xff]  }
  0x2f   :  { %2939 = vmatpush1.bf16.msra.mxu1 %v4096_v51  ;;  %v4173_v51 = vld [vmem:[%s6234_s1 + $0x864] ss:$8 sps:$4 sm:$0xff]  }
  0x30   :  { %3226 = vmatpush1.bf16.msra.mxu0 %v4097_v52  ;;  %2940 = vmatprep.subr.bf16.mxu1 %v4098_v55  ;;  %v4168_v52 = vld [vmem:[%s6234_s1 + $0x160] ss:$8 sps:$4 sm:$0xff]   ;;  %v4176_v55 = vld [vmem:[%s6234_s1 + $0x174] ss:$8 sps:$4 sm:$0xff]  }
  0x31   :  { %3227 = vmatprep.subr.bf16.mxu0 %v4100_v57  ;;  %v4179_v57 = vld [vmem:[%s6234_s1 + $0x874] ss:$8 sps:$4 sm:$0xff]  }
  0x33   :  { %2941 = vmatpush1.bf16.msra.mxu1 %v4102_v58  ;;  %v4177_v58 = vld [vmem:[%s6234_s1 + $0x870] ss:$8 sps:$4 sm:$0xff]  }
  0x34   :  { %3228 = vmatpush1.bf16.msra.mxu0 %v4103_v60  ;;  %2942 = vmatprep.subr.bf16.mxu1 %v4104_v0  ;;  %v4231_v60 = vld [vmem:[%s6233_s0 + $0x10] ss:$27 sps:$4 sm:$0xff]   ;;  %v5084_v0 = vrot.slane %v4233_v61, %v4894_v54 }
  0x35   :  { %3229 = vmatprep.subr.bf16.mxu0 %v4106_v2  ;;  %v5081_v63 = vrot.slane %v4231_v60, %v4894_v54  ;;  %v4183_v2 = vld [vmem:[%s6234_s1 + $0x880] ss:$8 sps:$4 sm:$0xff]   ;;  %v4255_v60 = vld [vmem:[%s6234_s1 + $0x934] ss:$8 sps:$4 sm:$0xff]   ;;  %v4250_v61 = vld [vmem:[%s6234_s1 + $0x230] ss:$8 sps:$4 sm:$0xff]  }
  0x37   :  { %2943 = vmatpush1.bf16.msra.mxu1 %v4108_v6  ;;  %v661_v4 = vcombine.high %v5081_v63, %v5084_v0 }
  0x38   :  { %3230 = vmatpush1.bf16.msra.mxu0 %v4109_v7  ;;  %2944 = vmatprep.subr.bf16.mxu1 %v4110_v9  ;;  %v4186_v7 = vld [vmem:[%s6234_s1 + $0x190] ss:$8 sps:$4 sm:$0xff]   ;;  %v4194_v9 = vld [vmem:[%s6234_s1 + $0x1a4] ss:$8 sps:$4 sm:$0xff]  }
  0x39   :  { %3231 = vmatprep.subr.bf16.mxu0 %v4112_v10  ;;  %v5101_v6 = vrot.slane %v661_v4, %v4894_v54  ;;  %v4197_v10 = vld [vmem:[%s6234_s1 + $0x8a4] ss:$8 sps:$4 sm:$0xff]   ;;  %v4267_v4 = vld [vmem:[%s6234_s1 + $0x954] ss:$8 sps:$4 sm:$0xff]  }
  0x3b   :  { %2945 = vmatpush1.bf16.msra.mxu1 %v4114_v12  ;;  %v4192_v12 = vld [vmem:[%s6234_s1 + $0x1a0] ss:$8 sps:$4 sm:$0xff]  }
  0x3c   :  { %3232 = vmatpush1.bf16.msra.mxu0 %v4115_v13  ;;  %2946 = vmatprep.subr.bf16.mxu1 %v4116_v16  ;;  %v4195_v13 = vld [vmem:[%s6234_s1 + $0x8a0] ss:$8 sps:$4 sm:$0xff]   ;;  %v4198_v16 = vld [vmem:[%s6234_s1 + $0x1b0] ss:$8 sps:$4 sm:$0xff]  }
  0x3d   :  { %3233 = vmatprep.subr.bf16.mxu0 %v4118_v17  ;;  %v4201_v17 = vld [vmem:[%s6234_s1 + $0x8b0] ss:$8 sps:$4 sm:$0xff]  }
  0x3f   :  { %2947 = vmatpush1.bf16.msra.mxu1 %v4120_v19  ;;  %v4209_v19 = vld [vmem:[%s6234_s1 + $0x8c4] ss:$8 sps:$4 sm:$0xff]  }
  0x40   :  { %3234 = vmatpush1.bf16.msra.mxu0 %v4121_v20  ;;  %2957 = vmatprep.subr.bf16.mxu1 %v4130_v22  ;;  %v4204_v20 = vld [vmem:[%s6234_s1 + $0x1c0] ss:$8 sps:$4 sm:$0xff]  }
  0x41   :  { %3244 = vmatprep.subr.bf16.mxu0 %v4137_v23  ;;  %v4207_v22 = vld [vmem:[%s6234_s1 + $0x8c0] ss:$8 sps:$4 sm:$0xff]   ;;  %v4212_v23 = vld [vmem:[%s6234_s1 + $0x1d4] ss:$8 sps:$4 sm:$0xff]  }
  0x42   :  { %2949 = vmatmul.mubr.bf16.vlgmr.msra.gmra.mrb[0].mxu1 %v4973_v24 }
  0x43   :  { %2958 = vmatpush1.bf16.msra.mxu1 %v4128_v25  ;;  %3236 = vmatmul.mubr.bf16.vlgmr.msra.gmra.mrb[0].mxu0 %v625_v27  ;;  %v4215_v25 = vld [vmem:[%s6234_s1 + $0x8d4] ss:$8 sps:$4 sm:$0xff]   ;;  %v4210_v27 = vld [vmem:[%s6234_s1 + $0x1d0] ss:$8 sps:$4 sm:$0xff]  }
  0x44   :  { %3245 = vmatpush1.bf16.msra.mxu0 %v4135_v26  ;;  %2959 = vmatprep.subr.bf16.mxu1 %v4140_v28  ;;  %v4124_v26 = vld [vmem:[%s6233_s0 + $0x4] ss:$27 sps:$4 sm:$0xff]   ;;  %v4213_v28 = vld [vmem:[%s6234_s1 + $0x8d0] ss:$8 sps:$4 sm:$0xff]  }
  0x45   :  { %3246 = vmatprep.subr.bf16.mxu0 %v4143_v30  ;;  %2989 = vmatprep.mubr.bf16.mxu1 %v558_v29  ;;  %v4218_v29 = vld [vmem:[%s6234_s1 + $0x1e4] ss:$8 sps:$4 sm:$0xff]   ;;  %v4127_v30 = vld [vmem:[%s6233_s0 + $0x3a] ss:$27 sps:$4 sm:$0xff]  }
  0x46   :  { %3276 = vmatprep.mubr.bf16.mxu0 %v5101_v6 }
  0x47   :  { %2960 = vmatpush1.bf16.msra.mxu1 %v4138_v31  ;;  %v4221_v31 = vld [vmem:[%s6234_s1 + $0x8e4] ss:$8 sps:$4 sm:$0xff]  }
  0x48   :  { %3247 = vmatpush1.bf16.msra.mxu0 %v4141_v32  ;;  %2961 = vmatprep.subr.bf16.mxu1 %v4146_v33  ;;  %v4216_v32 = vld [vmem:[%s6234_s1 + $0x1e0] ss:$8 sps:$4 sm:$0xff]  }
  0x49   :  { %3248 = vmatprep.subr.bf16.mxu0 %v4149_v34  ;;  %v4219_v33 = vld [vmem:[%s6234_s1 + $0x8e0] ss:$8 sps:$4 sm:$0xff]   ;;  %v4224_v34 = vld [vmem:[%s6234_s1 + $0x1f4] ss:$8 sps:$4 sm:$0xff]  }
  0x4b   :  { %2962 = vmatpush1.bf16.msra.mxu1 %v4144_v35  ;;  %v4227_v35 = vld [vmem:[%s6234_s1 + $0x8f4] ss:$8 sps:$4 sm:$0xff]  }
  0x4c   :  { %3249 = vmatpush1.bf16.msra.mxu0 %v4147_v36  ;;  %2963 = vmatprep.subr.bf16.mxu1 %v4152_v37  ;;  %v5183_v36 = vrot.slane %v4124_v26, %v4894_v54  ;;  %v5186_v37 = vrot.slane %v4127_v30, %v4894_v54  ;;  %v4294_v26 = vld [vmem:[%s6234_s1 + $0x2a4] ss:$8 sps:$4 sm:$0xff]   ;;  %v4300_v30 = vld [vmem:[%s6234_s1 + $0x2b4] ss:$8 sps:$4 sm:$0xff]  }
  0x4d   :  { %3250 = vmatprep.subr.bf16.mxu0 %v4155_v38  ;;  %v4222_v38 = vld [vmem:[%s6234_s1 + $0x1f0] ss:$8 sps:$4 sm:$0xff]  }
  0x4f   :  { %2964 = vmatpush1.bf16.msra.mxu1 %v4150_v39  ;;  %v660_v39 = vcombine.low %v5081_v63, %v5084_v0  ;;  %v4258_v63 = vld [vmem:[%s6234_s1 + $0x244] ss:$8 sps:$4 sm:$0xff]  }
  0x50   :  { %3251 = vmatpush1.bf16.msra.mxu0 %v4153_v40  ;;  %2965 = vmatprep.subr.bf16.mxu1 %v4158_v41  ;;  %v4225_v40 = vld [vmem:[%s6234_s1 + $0x8f0] ss:$8 sps:$4 sm:$0xff]   ;;  %v4230_v41 = vld [vmem:[%s6234_s1 + $0x204] ss:$8 sps:$4 sm:$0xff]  }
  0x51   :  { %3252 = vmatprep.subr.bf16.mxu0 %v4161_v42  ;;  %v4237_v42 = vld [vmem:[%s6234_s1 + $0x904] ss:$8 sps:$4 sm:$0xff]  }
  0x52   :  { %v4261_v0 = vld [vmem:[%s6234_s1 + $0x944] ss:$8 sps:$4 sm:$0xff]  }
  0x53   :  { %2966 = vmatpush1.bf16.msra.mxu1 %v4156_v43  ;;  %v527_v43 = vcombine.high %v5183_v36, %v5186_v37 }
  0x54   :  { %3253 = vmatpush1.bf16.msra.mxu0 %v4159_v44  ;;  %2967 = vmatprep.subr.bf16.mxu1 %v4164_v45  ;;  %v556_v44 = vcombine.high %v4973_v24, %v4973_v24  ;;  %v4228_v45 = vld [vmem:[%s6234_s1 + $0x200] ss:$8 sps:$4 sm:$0xff]   ;;  %v4243_v24 = vld [vmem:[%s6234_s1 + $0x914] ss:$8 sps:$4 sm:$0xff]  }
  0x55   :  { %3254 = vmatprep.subr.bf16.mxu0 %v4167_v46  ;;  %v5210_v46 = vrot.slane %v660_v39, %v4894_v54  ;;  %v4307_v39 = vld [vmem:[%s6234_s1 + $0x9c0] ss:$8 sps:$4 sm:$0xff]  }
  0x57   :  { %2968 = vmatpush1.bf16.msra.mxu1 %v4162_v48  ;;  %v4235_v48 = vld [vmem:[%s6234_s1 + $0x900] ss:$8 sps:$4 sm:$0xff]  }
  0x58   :  { %3255 = vmatpush1.bf16.msra.mxu0 %v4165_v49  ;;  %2969 = vmatprep.subr.bf16.mxu1 %v4170_v50  ;;  %v4240_v49 = vld [vmem:[%s6234_s1 + $0x214] ss:$8 sps:$4 sm:$0xff]   ;;  %v5222_v50 = vrot.slane %v527_v43, %v4894_v54  ;;  %v4313_v43 = vld [vmem:[%s6234_s1 + $0x9d0] ss:$8 sps:$4 sm:$0xff]  }
  0x59   :  { %3256 = vmatprep.subr.bf16.mxu0 %v4173_v51  ;;  %v694_v51 = vcombine.high %v5101_v6, %v5101_v6  ;;  %v4265_v6 = vld [vmem:[%s6234_s1 + $0x950] ss:$8 sps:$4 sm:$0xff]  }
  0x5b   :  { %2970 = vmatpush1.bf16.msra.mxu1 %v4168_v52  ;;  %v4238_v52 = vld [vmem:[%s6234_s1 + $0x210] ss:$8 sps:$4 sm:$0xff]  }
  0x5c   :  { %3257 = vmatpush1.bf16.msra.mxu0 %v4171_v53  ;;  %2971 = vmatprep.subr.bf16.mxu1 %v4176_v55  ;;  %v4241_v53 = vld [vmem:[%s6234_s1 + $0x910] ss:$8 sps:$4 sm:$0xff]   ;;  %v4246_v55 = vld [vmem:[%s6234_s1 + $0x224] ss:$8 sps:$4 sm:$0xff]  }
  0x5d   :  { %3258 = vmatprep.subr.bf16.mxu0 %v4179_v57  ;;  %v4244_v57 = vld [vmem:[%s6234_s1 + $0x220] ss:$8 sps:$4 sm:$0xff]  }
  0x5f   :  { %2972 = vmatpush1.bf16.msra.mxu1 %v4174_v56  ;;  %v4249_v56 = vld [vmem:[%s6234_s1 + $0x924] ss:$8 sps:$4 sm:$0xff]  }
  0x60   :  { %3259 = vmatpush1.bf16.msra.mxu0 %v4177_v58  ;;  %2973 = vmatprep.subr.bf16.mxu1 %v4182_v59  ;;  %v4247_v58 = vld [vmem:[%s6234_s1 + $0x920] ss:$8 sps:$4 sm:$0xff]   ;;  %v4252_v59 = vld [vmem:[%s6234_s1 + $0x234] ss:$8 sps:$4 sm:$0xff]  }
  0x61   :  { %3260 = vmatprep.subr.bf16.mxu0 %v4185_v62  ;;  %v4253_v62 = vld [vmem:[%s6234_s1 + $0x930] ss:$8 sps:$4 sm:$0xff]  }
  0x63   :  { %2974 = vmatpush1.bf16.msra.mxu1 %v4180_v1  ;;  %v4256_v1 = vld [vmem:[%s6234_s1 + $0x240] ss:$8 sps:$4 sm:$0xff]  }
  0x64   :  { %3261 = vmatpush1.bf16.msra.mxu0 %v4183_v2  ;;  %2975 = vmatprep.subr.bf16.mxu1 %v4188_v3  ;;  %v4259_v2 = vld [vmem:[%s6234_s1 + $0x940] ss:$8 sps:$4 sm:$0xff]   ;;  %v4264_v3 = vld [vmem:[%s6234_s1 + $0x254] ss:$8 sps:$4 sm:$0xff]  }
  0x65   :  { %3262 = vmatprep.subr.bf16.mxu0 %v4191_v5  ;;  %v4262_v5 = vld [vmem:[%s6234_s1 + $0x250] ss:$8 sps:$4 sm:$0xff]  }
  0x67   :  { %2976 = vmatpush1.bf16.msra.mxu1 %v4186_v7  ;;  %v4270_v7 = vld [vmem:[%s6234_s1 + $0x264] ss:$8 sps:$4 sm:$0xff]  }
  0x68   :  { %3263 = vmatpush1.bf16.msra.mxu0 %v4189_v8  ;;  %2977 = vmatprep.subr.bf16.mxu1 %v4194_v9  ;;  %v4273_v8 = vld [vmem:[%s6234_s1 + $0x964] ss:$8 sps:$4 sm:$0xff]   ;;  %v4268_v9 = vld [vmem:[%s6234_s1 + $0x260] ss:$8 sps:$4 sm:$0xff]  }
  0x69   :  { %3264 = vmatprep.subr.bf16.mxu0 %v4197_v10  ;;  %v4271_v10 = vld [vmem:[%s6234_s1 + $0x960] ss:$8 sps:$4 sm:$0xff]  }
  0x6b   :  { %2978 = vmatpush1.bf16.msra.mxu1 %v4192_v12  ;;  %v4276_v12 = vld [vmem:[%s6234_s1 + $0x274] ss:$8 sps:$4 sm:$0xff]  }
  0x6c   :  { %3265 = vmatpush1.bf16.msra.mxu0 %v4195_v13  ;;  %2979 = vmatprep.subr.bf16.mxu1 %v4200_v14  ;;  %v4279_v13 = vld [vmem:[%s6234_s1 + $0x974] ss:$8 sps:$4 sm:$0xff]   ;;  %v4274_v14 = vld [vmem:[%s6234_s1 + $0x270] ss:$8 sps:$4 sm:$0xff]  }
  0x6d   :  { %3266 = vmatprep.subr.bf16.mxu0 %v4203_v15  ;;  %v4277_v15 = vld [vmem:[%s6234_s1 + $0x970] ss:$8 sps:$4 sm:$0xff]  }
  0x6f   :  { %2980 = vmatpush1.bf16.msra.mxu1 %v4198_v16  ;;  %v4282_v16 = vld [vmem:[%s6234_s1 + $0x284] ss:$8 sps:$4 sm:$0xff]  }
  0x70   :  { %3267 = vmatpush1.bf16.msra.mxu0 %v4201_v17  ;;  %2981 = vmatprep.subr.bf16.mxu1 %v4206_v18  ;;  %v4285_v17 = vld [vmem:[%s6234_s1 + $0x984] ss:$8 sps:$4 sm:$0xff]   ;;  %v4280_v18 = vld [vmem:[%s6234_s1 + $0x280] ss:$8 sps:$4 sm:$0xff]  }
  0x71   :  { %3268 = vmatprep.subr.bf16.mxu0 %v4209_v19  ;;  %v4283_v19 = vld [vmem:[%s6234_s1 + $0x980] ss:$8 sps:$4 sm:$0xff]  }
  0x73   :  { %2982 = vmatpush1.bf16.msra.mxu1 %v4204_v20  ;;  %v4288_v20 = vld [vmem:[%s6234_s1 + $0x294] ss:$8 sps:$4 sm:$0xff]  }
  0x74   :  { %3269 = vmatpush1.bf16.msra.mxu0 %v4207_v22  ;;  %2983 = vmatprep.subr.bf16.mxu1 %v4212_v23  ;;  %v4291_v22 = vld [vmem:[%s6234_s1 + $0x994] ss:$8 sps:$4 sm:$0xff]   ;;  %v4286_v23 = vld [vmem:[%s6234_s1 + $0x290] ss:$8 sps:$4 sm:$0xff]  }
  0x75   :  { %3270 = vmatprep.subr.bf16.mxu0 %v4215_v25  ;;  %v4289_v25 = vld [vmem:[%s6234_s1 + $0x990] ss:$8 sps:$4 sm:$0xff]  }
  0x77   :  { %2984 = vmatpush1.bf16.msra.mxu1 %v4210_v27  ;;  %v4297_v27 = vld [vmem:[%s6234_s1 + $0x9a4] ss:$8 sps:$4 sm:$0xff]  }
  0x78   :  { %3271 = vmatpush1.bf16.msra.mxu0 %v4213_v28  ;;  %2985 = vmatprep.subr.bf16.mxu1 %v4218_v29  ;;  %v4292_v28 = vld [vmem:[%s6234_s1 + $0x2a0] ss:$8 sps:$4 sm:$0xff]  }
  0x79   :  { %3272 = vmatprep.subr.bf16.mxu0 %v4221_v31  ;;  %v4295_v29 = vld [vmem:[%s6234_s1 + $0x9a0] ss:$8 sps:$4 sm:$0xff]   ;;  %v4303_v31 = vld [vmem:[%s6234_s1 + $0x9b4] ss:$8 sps:$4 sm:$0xff]  }
  0x7b   :  { %2986 = vmatpush1.bf16.msra.mxu1 %v4216_v32  ;;  %v4298_v32 = vld [vmem:[%s6234_s1 + $0x2b0] ss:$8 sps:$4 sm:$0xff]  }
  0x7c   :  { %3273 = vmatpush1.bf16.msra.mxu0 %v4219_v33  ;;  %2987 = vmatprep.subr.bf16.mxu1 %v4224_v34  ;;  %v4301_v33 = vld [vmem:[%s6234_s1 + $0x9b0] ss:$8 sps:$4 sm:$0xff]   ;;  %v4306_v34 = vld [vmem:[%s6234_s1 + $0x2c4] ss:$8 sps:$4 sm:$0xff]  }
  0x7d   :  { %3274 = vmatprep.subr.bf16.mxu0 %v4227_v35  ;;  %v4309_v35 = vld [vmem:[%s6234_s1 + $0x9c4] ss:$8 sps:$4 sm:$0xff]  }
  0x7f   :  { %2988 = vmatpush1.bf16.msra.mxu1 %v4222_v38  ;;  %v4304_v38 = vld [vmem:[%s6234_s1 + $0x2c0] ss:$8 sps:$4 sm:$0xff]  }
  0x80   :  { %3275 = vmatpush1.bf16.msra.mxu0 %v4225_v40  ;;  %2998 = vmatprep.subr.bf16.mxu1 %v4230_v41  ;;  %v4312_v40 = vld [vmem:[%s6234_s1 + $0x2d4] ss:$8 sps:$4 sm:$0xff]  }
  0x81   :  { %3285 = vmatprep.subr.bf16.mxu0 %v4237_v42  ;;  %v4315_v41 = vld [vmem:[%s6234_s1 + $0x9d4] ss:$8 sps:$4 sm:$0xff]   ;;  %v4310_v42 = vld [vmem:[%s6234_s1 + $0x2d0] ss:$8 sps:$4 sm:$0xff]  }
  0x82   :  { %2990 = vmatmul.mubr.bf16.vlgmr.msra.gmra.mrb[0].mxu1 %v556_v44  ;;  %v4318_v44 = vld [vmem:[%s6234_s1 + $0x2e4] ss:$8 sps:$4 sm:$0xff]  }
  0x83   :  { %2999 = vmatpush1.bf16.msra.mxu1 %v4228_v45  ;;  %3277 = vmatmul.mubr.bf16.vlgmr.msra.gmra.mrb[0].mxu0 %v5210_v46  ;;  %v4321_v45 = vld [vmem:[%s6234_s1 + $0x9e4] ss:$8 sps:$4 sm:$0xff]  }
  0x84   :  { %3286 = vmatpush1.bf16.msra.mxu0 %v4235_v48  ;;  %3000 = vmatprep.subr.bf16.mxu1 %v4240_v49  ;;  %v4427_v48 = vld [vmem:[%s6233_s0 + $0x14] ss:$27 sps:$4 sm:$0xff]   ;;  %v4428_v49 = vld [vmem:[%s6233_s0 + $0x4a] ss:$27 sps:$4 sm:$0xff]  }
  0x85   :  { %3287 = vmatprep.subr.bf16.mxu0 %v4243_v24  ;;  %3030 = vmatprep.mubr.bf16.mxu1 %v5222_v50  ;;  %v4316_v24 = vld [vmem:[%s6234_s1 + $0x2e0] ss:$8 sps:$4 sm:$0xff]  }
  0x86   :  { %3317 = vmatprep.mubr.bf16.mxu0 %v694_v51  ;;  %v4319_v51 = vld [vmem:[%s6234_s1 + $0x9e0] ss:$8 sps:$4 sm:$0xff]  }
  0x87   :  { %3001 = vmatpush1.bf16.msra.mxu1 %v4238_v52  ;;  %v4324_v52 = vld [vmem:[%s6234_s1 + $0x2f4] ss:$8 sps:$4 sm:$0xff]  }
  0x88   :  { %3288 = vmatpush1.bf16.msra.mxu0 %v4241_v53  ;;  %3002 = vmatprep.subr.bf16.mxu1 %v4246_v55  ;;  %v4327_v53 = vld [vmem:[%s6234_s1 + $0x9f4] ss:$8 sps:$4 sm:$0xff]   ;;  %v526_v55 = vcombine.low %v5183_v36, %v5186_v37  ;;  %v4330_v36 = vld [vmem:[%s6234_s1 + $0x304] ss:$8 sps:$4 sm:$0xff]  }
  0x89   :  { %3289 = vmatprep.subr.bf16.mxu0 %v4249_v56  ;;  %v5405_v56 = vrot.slane %v4427_v48, %v4894_v54  ;;  %v4333_v37 = vld [vmem:[%s6234_s1 + $0xa04] ss:$8 sps:$4 sm:$0xff]   ;;  %v4396_v48 = vld [vmem:[%s6234_s1 + $0x3b4] ss:$8 sps:$4 sm:$0xff]  }
  0x8b   :  { %3003 = vmatpush1.bf16.msra.mxu1 %v4244_v57  ;;  %v5408_v57 = vrot.slane %v4428_v49, %v4894_v54  ;;  %v4399_v49 = vld [vmem:[%s6234_s1 + $0xab4] ss:$8 sps:$4 sm:$0xff]  }
  0x8c   :  { %3290 = vmatpush1.bf16.msra.mxu0 %v4247_v58  ;;  %3004 = vmatprep.subr.bf16.mxu1 %v4252_v59  ;;  %v4322_v58 = vld [vmem:[%s6234_s1 + $0x2f0] ss:$8 sps:$4 sm:$0xff]  }
  0x8d   :  { %3291 = vmatprep.subr.bf16.mxu0 %v4255_v60  ;;  %v4325_v59 = vld [vmem:[%s6234_s1 + $0x9f0] ss:$8 sps:$4 sm:$0xff]   ;;  %v5423_v60 = vrot.slane %v526_v55, %v4894_v54  ;;  %v4400_v55 = vld [vmem:[%s6234_s1 + $0x3c0] ss:$8 sps:$4 sm:$0xff]  }
  0x8f   :  { %3005 = vmatpush1.bf16.msra.mxu1 %v4250_v61  ;;  %v663_v61 = vcombine.high %v5405_v56, %v5408_v57 }
  0x90   :  { %3292 = vmatpush1.bf16.msra.mxu0 %v4253_v62  ;;  %3006 = vmatprep.subr.bf16.mxu1 %v4258_v63  ;;  %v4328_v62 = vld [vmem:[%s6234_s1 + $0x300] ss:$8 sps:$4 sm:$0xff]  }
  0x91   :  { %3293 = vmatprep.subr.bf16.mxu0 %v4261_v0  ;;  %v4331_v63 = vld [vmem:[%s6234_s1 + $0xa00] ss:$8 sps:$4 sm:$0xff]   ;;  %v692_v0 = vcombine.high %v5210_v46, %v5210_v46  ;;  %v4334_v46 = vld [vmem:[%s6234_s1 + $0x310] ss:$8 sps:$4 sm:$0xff]  }
  0x93   :  { %3007 = vmatpush1.bf16.msra.mxu1 %v4256_v1  ;;  %v4336_v1 = vld [vmem:[%s6234_s1 + $0x314] ss:$8 sps:$4 sm:$0xff]  }
  0x94   :  { %3294 = vmatpush1.bf16.msra.mxu0 %v4259_v2  ;;  %3008 = vmatprep.subr.bf16.mxu1 %v4264_v3  ;;  %v4339_v2 = vld [vmem:[%s6234_s1 + $0xa14] ss:$8 sps:$4 sm:$0xff]   ;;  %v559_v3 = vcombine.high %v5222_v50, %v5222_v50  ;;  %v4342_v50 = vld [vmem:[%s6234_s1 + $0x324] ss:$8 sps:$4 sm:$0xff]  }
  0x95   :  { %3295 = vmatprep.subr.bf16.mxu0 %v4267_v4  ;;  %v5445_v4 = vrot.slane %v663_v61, %v4894_v54  ;;  %v4409_v61 = vld [vmem:[%s6234_s1 + $0xad0] ss:$8 sps:$4 sm:$0xff]  }
  0x97   :  { %3009 = vmatpush1.bf16.msra.mxu1 %v4262_v5  ;;  %v4337_v5 = vld [vmem:[%s6234_s1 + $0xa10] ss:$8 sps:$4 sm:$0xff]  }
  0x98   :  { %3296 = vmatpush1.bf16.msra.mxu0 %v4265_v6  ;;  %3010 = vmatprep.subr.bf16.mxu1 %v4270_v7  ;;  %v4345_v6 = vld [vmem:[%s6234_s1 + $0xa24] ss:$8 sps:$4 sm:$0xff]   ;;  %v4340_v7 = vld [vmem:[%s6234_s1 + $0x320] ss:$8 sps:$4 sm:$0xff]  }
  0x99   :  { %3297 = vmatprep.subr.bf16.mxu0 %v4273_v8  ;;  %v4343_v8 = vld [vmem:[%s6234_s1 + $0xa20] ss:$8 sps:$4 sm:$0xff]  }
  0x9b   :  { %3011 = vmatpush1.bf16.msra.mxu1 %v4268_v9  ;;  %v4348_v9 = vld [vmem:[%s6234_s1 + $0x334] ss:$8 sps:$4 sm:$0xff]  }
  0x9c   :  { %3298 = vmatpush1.bf16.msra.mxu0 %v4271_v10  ;;  %3012 = vmatprep.subr.bf16.mxu1 %v4276_v12  ;;  %v4351_v10 = vld [vmem:[%s6234_s1 + $0xa34] ss:$8 sps:$4 sm:$0xff]   ;;  %v4346_v12 = vld [vmem:[%s6234_s1 + $0x330] ss:$8 sps:$4 sm:$0xff]  }
  0x9d   :  { %3299 = vmatprep.subr.bf16.mxu0 %v4279_v13  ;;  %v4349_v13 = vld [vmem:[%s6234_s1 + $0xa30] ss:$8 sps:$4 sm:$0xff]  }
  0x9f   :  { %3013 = vmatpush1.bf16.msra.mxu1 %v4274_v14  ;;  %v4354_v14 = vld [vmem:[%s6234_s1 + $0x344] ss:$8 sps:$4 sm:$0xff]  }
  0xa0   :  { %3300 = vmatpush1.bf16.msra.mxu0 %v4277_v15  ;;  %3014 = vmatprep.subr.bf16.mxu1 %v4282_v16  ;;  %v4357_v15 = vld [vmem:[%s6234_s1 + $0xa44] ss:$8 sps:$4 sm:$0xff]   ;;  %v4352_v16 = vld [vmem:[%s6234_s1 + $0x340] ss:$8 sps:$4 sm:$0xff]  }
  0xa1   :  { %3301 = vmatprep.subr.bf16.mxu0 %v4285_v17  ;;  %v4355_v17 = vld [vmem:[%s6234_s1 + $0xa40] ss:$8 sps:$4 sm:$0xff]  }
  0xa3   :  { %3015 = vmatpush1.bf16.msra.mxu1 %v4280_v18  ;;  %v4360_v18 = vld [vmem:[%s6234_s1 + $0x354] ss:$8 sps:$4 sm:$0xff]  }
  0xa4   :  { %3302 = vmatpush1.bf16.msra.mxu0 %v4283_v19  ;;  %3016 = vmatprep.subr.bf16.mxu1 %v4288_v20  ;;  %v4363_v19 = vld [vmem:[%s6234_s1 + $0xa54] ss:$8 sps:$4 sm:$0xff]   ;;  %v4358_v20 = vld [vmem:[%s6234_s1 + $0x350] ss:$8 sps:$4 sm:$0xff]  }
  0xa5   :  { %3303 = vmatprep.subr.bf16.mxu0 %v4291_v22  ;;  %v4361_v22 = vld [vmem:[%s6234_s1 + $0xa50] ss:$8 sps:$4 sm:$0xff]  }
  0xa7   :  { %3017 = vmatpush1.bf16.msra.mxu1 %v4286_v23  ;;  %v4366_v23 = vld [vmem:[%s6234_s1 + $0x364] ss:$8 sps:$4 sm:$0xff]  }
  0xa8   :  { %3304 = vmatpush1.bf16.msra.mxu0 %v4289_v25  ;;  %3018 = vmatprep.subr.bf16.mxu1 %v4294_v26  ;;  %v4369_v25 = vld [vmem:[%s6234_s1 + $0xa64] ss:$8 sps:$4 sm:$0xff]   ;;  %v4364_v26 = vld [vmem:[%s6234_s1 + $0x360] ss:$8 sps:$4 sm:$0xff]  }
  0xa9   :  { %3305 = vmatprep.subr.bf16.mxu0 %v4297_v27  ;;  %v4367_v27 = vld [vmem:[%s6234_s1 + $0xa60] ss:$8 sps:$4 sm:$0xff]  }
  0xab   :  { %3019 = vmatpush1.bf16.msra.mxu1 %v4292_v28  ;;  %v4372_v28 = vld [vmem:[%s6234_s1 + $0x374] ss:$8 sps:$4 sm:$0xff]  }
  0xac   :  { %3306 = vmatpush1.bf16.msra.mxu0 %v4295_v29  ;;  %3020 = vmatprep.subr.bf16.mxu1 %v4300_v30  ;;  %v4375_v29 = vld [vmem:[%s6234_s1 + $0xa74] ss:$8 sps:$4 sm:$0xff]   ;;  %v4370_v30 = vld [vmem:[%s6234_s1 + $0x370] ss:$8 sps:$4 sm:$0xff]  }
  0xad   :  { %3307 = vmatprep.subr.bf16.mxu0 %v4303_v31  ;;  %v4373_v31 = vld [vmem:[%s6234_s1 + $0xa70] ss:$8 sps:$4 sm:$0xff]  }
  0xaf   :  { %3021 = vmatpush1.bf16.msra.mxu1 %v4298_v32  ;;  %v4378_v32 = vld [vmem:[%s6234_s1 + $0x384] ss:$8 sps:$4 sm:$0xff]  }
  0xb0   :  { %3308 = vmatpush1.bf16.msra.mxu0 %v4301_v33  ;;  %3022 = vmatprep.subr.bf16.mxu1 %v4306_v34  ;;  %v4381_v33 = vld [vmem:[%s6234_s1 + $0xa84] ss:$8 sps:$4 sm:$0xff]   ;;  %v4376_v34 = vld [vmem:[%s6234_s1 + $0x380] ss:$8 sps:$4 sm:$0xff]  }
  0xb1   :  { %3309 = vmatprep.subr.bf16.mxu0 %v4309_v35  ;;  %v4379_v35 = vld [vmem:[%s6234_s1 + $0xa80] ss:$8 sps:$4 sm:$0xff]  }
  0xb3   :  { %3023 = vmatpush1.bf16.msra.mxu1 %v4304_v38  ;;  %v4384_v38 = vld [vmem:[%s6234_s1 + $0x394] ss:$8 sps:$4 sm:$0xff]  }
  0xb4   :  { %3310 = vmatpush1.bf16.msra.mxu0 %v4307_v39  ;;  %3024 = vmatprep.subr.bf16.mxu1 %v4312_v40  ;;  %v4387_v39 = vld [vmem:[%s6234_s1 + $0xa94] ss:$8 sps:$4 sm:$0xff]   ;;  %v4382_v40 = vld [vmem:[%s6234_s1 + $0x390] ss:$8 sps:$4 sm:$0xff]  }
  0xb5   :  { %3311 = vmatprep.subr.bf16.mxu0 %v4315_v41  ;;  %v4385_v41 = vld [vmem:[%s6234_s1 + $0xa90] ss:$8 sps:$4 sm:$0xff]  }
  0xb7   :  { %3025 = vmatpush1.bf16.msra.mxu1 %v4310_v42  ;;  %v4390_v42 = vld [vmem:[%s6234_s1 + $0x3a4] ss:$8 sps:$4 sm:$0xff]  }
  0xb8   :  { %3312 = vmatpush1.bf16.msra.mxu0 %v4313_v43  ;;  %3026 = vmatprep.subr.bf16.mxu1 %v4318_v44  ;;  %v4393_v43 = vld [vmem:[%s6234_s1 + $0xaa4] ss:$8 sps:$4 sm:$0xff]   ;;  %v4388_v44 = vld [vmem:[%s6234_s1 + $0x3a0] ss:$8 sps:$4 sm:$0xff]  }
  0xb9   :  { %3313 = vmatprep.subr.bf16.mxu0 %v4321_v45  ;;  %v4391_v45 = vld [vmem:[%s6234_s1 + $0xaa0] ss:$8 sps:$4 sm:$0xff]  }
  0xbb   :  { %3027 = vmatpush1.bf16.msra.mxu1 %v4316_v24  ;;  %v4394_v24 = vld [vmem:[%s6234_s1 + $0x3b0] ss:$8 sps:$4 sm:$0xff]  }
  0xbc   :  { %3314 = vmatpush1.bf16.msra.mxu0 %v4319_v51  ;;  %3028 = vmatprep.subr.bf16.mxu1 %v4324_v52  ;;  %v4397_v51 = vld [vmem:[%s6234_s1 + $0xab0] ss:$8 sps:$4 sm:$0xff]   ;;  %v4402_v52 = vld [vmem:[%s6234_s1 + $0x3c4] ss:$8 sps:$4 sm:$0xff]  }
  0xbd   :  { %3315 = vmatprep.subr.bf16.mxu0 %v4327_v53  ;;  %v4405_v53 = vld [vmem:[%s6234_s1 + $0xac4] ss:$8 sps:$4 sm:$0xff]  }
  0xbf   :  { %3029 = vmatpush1.bf16.msra.mxu1 %v4322_v58  ;;  %v4403_v58 = vld [vmem:[%s6234_s1 + $0xac0] ss:$8 sps:$4 sm:$0xff]  }
  0xc0   :  { %3316 = vmatpush1.bf16.msra.mxu0 %v4325_v59  ;;  %3039 = vmatprep.subr.bf16.mxu1 %v4330_v36  ;;  %v4408_v59 = vld [vmem:[%s6234_s1 + $0x3d4] ss:$8 sps:$4 sm:$0xff]  }
  0xc1   :  { %3326 = vmatprep.subr.bf16.mxu0 %v4333_v37  ;;  %v4411_v36 = vld [vmem:[%s6234_s1 + $0xad4] ss:$8 sps:$4 sm:$0xff]   ;;  %v4406_v37 = vld [vmem:[%s6234_s1 + $0x3d0] ss:$8 sps:$4 sm:$0xff]  }
  0xc2   :  { %3031 = vmatmul.mubr.bf16.vlgmr.msra.gmra.mrb[0].mxu1 %v5423_v60 }
  0xc3   :  { %3040 = vmatpush1.bf16.msra.mxu1 %v4328_v62  ;;  %3318 = vmatmul.mubr.bf16.vlgmr.msra.gmra.mrb[0].mxu0 %v692_v0  ;;  %v4414_v62 = vld [vmem:[%s6234_s1 + $0x3e4] ss:$8 sps:$4 sm:$0xff]  }
  0xc4   :  { %3327 = vmatpush1.bf16.msra.mxu0 %v4331_v63  ;;  %3041 = vmatprep.subr.bf16.mxu1 %v4336_v1  ;;  %v4417_v63 = vld [vmem:[%s6234_s1 + $0xae4] ss:$8 sps:$4 sm:$0xff]   ;;  %v4523_v1 = vld [vmem:[%s6233_s0 + $0x3e] ss:$27 sps:$4 sm:$0xff]  }
  0xc5   :  { %3328 = vmatprep.subr.bf16.mxu0 %v4339_v2  ;;  %3071 = vmatprep.mubr.bf16.mxu1 %v559_v3  ;;  %v4522_v0 = vld [vmem:[%s6233_s0 + $0x8] ss:$27 sps:$4 sm:$0xff]  }
  0xc6   :  { %3358 = vmatprep.mubr.bf16.mxu0 %v5445_v4  ;;  %v4412_v2 = vld [vmem:[%s6234_s1 + $0x3e0] ss:$8 sps:$4 sm:$0xff]  }
  0xc7   :  { %3042 = vmatpush1.bf16.msra.mxu1 %v4334_v46  ;;  %v4415_v3 = vld [vmem:[%s6234_s1 + $0xae0] ss:$8 sps:$4 sm:$0xff]   ;;  %v4420_v46 = vld [vmem:[%s6234_s1 + $0x3f4] ss:$8 sps:$4 sm:$0xff]  }
  0xc8   :  { %3329 = vmatpush1.bf16.msra.mxu0 %v4337_v5  ;;  %3043 = vmatprep.subr.bf16.mxu1 %v4342_v50  ;;  %v4423_v5 = vld [vmem:[%s6234_s1 + $0xaf4] ss:$8 sps:$4 sm:$0xff]   ;;  %v5623_v50 = vrot.slane %v4522_v0, %v4894_v54 }
  0xc9   :  { %3330 = vmatprep.subr.bf16.mxu0 %v4345_v6  ;;  %v5626_v6 = vrot.slane %v4523_v1, %v4894_v54  ;;  %v4494_v0 = vld [vmem:[%s6234_s1 + $0x4b4] ss:$8 sps:$4 sm:$0xff]  }
  0xca   :  { %v4497_v1 = vld [vmem:[%s6234_s1 + $0xbb4] ss:$8 sps:$4 sm:$0xff]  }
  0xcb   :  { %3044 = vmatpush1.bf16.msra.mxu1 %v4340_v7  ;;  %v4418_v7 = vld [vmem:[%s6234_s1 + $0x3f0] ss:$8 sps:$4 sm:$0xff]  }
  0xcc   :  { %3331 = vmatpush1.bf16.msra.mxu0 %v4343_v8  ;;  %3045 = vmatprep.subr.bf16.mxu1 %v4348_v9  ;;  %v662_v8 = vcombine.low %v5405_v56, %v5408_v57  ;;  %v4421_v9 = vld [vmem:[%s6234_s1 + $0xaf0] ss:$8 sps:$4 sm:$0xff]   ;;  %v557_v56 = vcombine.high %v5423_v60, %v5423_v60  ;;  %v4424_v57 = vld [vmem:[%s6234_s1 + $0x400] ss:$8 sps:$4 sm:$0xff]   ;;  %v4437_v60 = vld [vmem:[%s6234_s1 + $0xb14] ss:$8 sps:$4 sm:$0xff]  }
  0xcd   :  { %3332 = vmatprep.subr.bf16.mxu0 %v4351_v10  ;;  %v4426_v10 = vld [vmem:[%s6234_s1 + $0x404] ss:$8 sps:$4 sm:$0xff]  }
  0xcf   :  { %3046 = vmatpush1.bf16.msra.mxu1 %v4346_v12  ;;  %v4431_v12 = vld [vmem:[%s6234_s1 + $0xb04] ss:$8 sps:$4 sm:$0xff]  }
  0xd0   :  { %3333 = vmatpush1.bf16.msra.mxu0 %v4349_v13  ;;  %3047 = vmatprep.subr.bf16.mxu1 %v4354_v14  ;;  %v593_v13 = vcombine.high %v5623_v50, %v5626_v6  ;;  %v5650_v14 = vrot.slane %v662_v8, %v4894_v54  ;;  %v4501_v8 = vld [vmem:[%s6234_s1 + $0xbc0] ss:$8 sps:$4 sm:$0xff]  }
  0xd1   :  { %3334 = vmatprep.subr.bf16.mxu0 %v4357_v15  ;;  %v4429_v15 = vld [vmem:[%s6234_s1 + $0xb00] ss:$8 sps:$4 sm:$0xff]  }
  0xd3   :  { %3048 = vmatpush1.bf16.msra.mxu1 %v4352_v16  ;;  %v4434_v16 = vld [vmem:[%s6234_s1 + $0x414] ss:$8 sps:$4 sm:$0xff]  }
  0xd4   :  { %3335 = vmatpush1.bf16.msra.mxu0 %v4355_v17  ;;  %3049 = vmatprep.subr.bf16.mxu1 %v4360_v18  ;;  %v5662_v17 = vrot.slane %v593_v13, %v4894_v54  ;;  %v695_v18 = vcombine.high %v5445_v4, %v5445_v4  ;;  %v4443_v4 = vld [vmem:[%s6234_s1 + $0xb24] ss:$8 sps:$4 sm:$0xff]   ;;  %v4507_v13 = vld [vmem:[%s6234_s1 + $0xbd0] ss:$8 sps:$4 sm:$0xff]  }
  0xd5   :  { %3336 = vmatprep.subr.bf16.mxu0 %v4363_v19  ;;  %v4432_v19 = vld [vmem:[%s6234_s1 + $0x410] ss:$8 sps:$4 sm:$0xff]  }
  0xd7   :  { %3050 = vmatpush1.bf16.msra.mxu1 %v4358_v20  ;;  %v4435_v20 = vld [vmem:[%s6234_s1 + $0xb10] ss:$8 sps:$4 sm:$0xff]  }
  0xd8   :  { %3337 = vmatpush1.bf16.msra.mxu0 %v4361_v22  ;;  %3051 = vmatprep.subr.bf16.mxu1 %v4366_v23  ;;  %v4440_v22 = vld [vmem:[%s6234_s1 + $0x424] ss:$8 sps:$4 sm:$0xff]   ;;  %v4438_v23 = vld [vmem:[%s6234_s1 + $0x420] ss:$8 sps:$4 sm:$0xff]  }
  0xd9   :  { %3338 = vmatprep.subr.bf16.mxu0 %v4369_v25  ;;  %v4441_v25 = vld [vmem:[%s6234_s1 + $0xb20] ss:$8 sps:$4 sm:$0xff]  }
  0xdb   :  { %3052 = vmatpush1.bf16.msra.mxu1 %v4364_v26  ;;  %v4446_v26 = vld [vmem:[%s6234_s1 + $0x434] ss:$8 sps:$4 sm:$0xff]  }
  0xdc   :  { %3339 = vmatpush1.bf16.msra.mxu0 %v4367_v27  ;;  %3053 = vmatprep.subr.bf16.mxu1 %v4372_v28  ;;  %v4449_v27 = vld [vmem:[%s6234_s1 + $0xb34] ss:$8 sps:$4 sm:$0xff]   ;;  %v4444_v28 = vld [vmem:[%s6234_s1 + $0x430] ss:$8 sps:$4 sm:$0xff]  }
  0xdd   :  { %3340 = vmatprep.subr.bf16.mxu0 %v4375_v29  ;;  %v4447_v29 = vld [vmem:[%s6234_s1 + $0xb30] ss:$8 sps:$4 sm:$0xff]  }
  0xdf   :  { %3054 = vmatpush1.bf16.msra.mxu1 %v4370_v30  ;;  %v4452_v30 = vld [vmem:[%s6234_s1 + $0x444] ss:$8 sps:$4 sm:$0xff]  }
  0xe0   :  { %3341 = vmatpush1.bf16.msra.mxu0 %v4373_v31  ;;  %3055 = vmatprep.subr.bf16.mxu1 %v4378_v32  ;;  %v4455_v31 = vld [vmem:[%s6234_s1 + $0xb44] ss:$8 sps:$4 sm:$0xff]   ;;  %v4450_v32 = vld [vmem:[%s6234_s1 + $0x440] ss:$8 sps:$4 sm:$0xff]  }
  0xe1   :  { %3342 = vmatprep.subr.bf16.mxu0 %v4381_v33  ;;  %v4453_v33 = vld [vmem:[%s6234_s1 + $0xb40] ss:$8 sps:$4 sm:$0xff]  }
  0xe3   :  { %3056 = vmatpush1.bf16.msra.mxu1 %v4376_v34  ;;  %v4458_v34 = vld [vmem:[%s6234_s1 + $0x454] ss:$8 sps:$4 sm:$0xff]  }
  0xe4   :  { %3343 = vmatpush1.bf16.msra.mxu0 %v4379_v35  ;;  %3057 = vmatprep.subr.bf16.mxu1 %v4384_v38  ;;  %v4461_v35 = vld [vmem:[%s6234_s1 + $0xb54] ss:$8 sps:$4 sm:$0xff]   ;;  %v4456_v38 = vld [vmem:[%s6234_s1 + $0x450] ss:$8 sps:$4 sm:$0xff]  }
  0xe5   :  { %3344 = vmatprep.subr.bf16.mxu0 %v4387_v39  ;;  %v4459_v39 = vld [vmem:[%s6234_s1 + $0xb50] ss:$8 sps:$4 sm:$0xff]  }
  0xe7   :  { %3058 = vmatpush1.bf16.msra.mxu1 %v4382_v40  ;;  %v4464_v40 = vld [vmem:[%s6234_s1 + $0x464] ss:$8 sps:$4 sm:$0xff]  }
  0xe8   :  { %3345 = vmatpush1.bf16.msra.mxu0 %v4385_v41  ;;  %3059 = vmatprep.subr.bf16.mxu1 %v4390_v42  ;;  %v4467_v41 = vld [vmem:[%s6234_s1 + $0xb64] ss:$8 sps:$4 sm:$0xff]   ;;  %v4462_v42 = vld [vmem:[%s6234_s1 + $0x460] ss:$8 sps:$4 sm:$0xff]  }
  0xe9   :  { %3346 = vmatprep.subr.bf16.mxu0 %v4393_v43  ;;  %v4465_v43 = vld [vmem:[%s6234_s1 + $0xb60] ss:$8 sps:$4 sm:$0xff]  }
  0xeb   :  { %3060 = vmatpush1.bf16.msra.mxu1 %v4388_v44  ;;  %v4470_v44 = vld [vmem:[%s6234_s1 + $0x474] ss:$8 sps:$4 sm:$0xff]  }
  0xec   :  { %3347 = vmatpush1.bf16.msra.mxu0 %v4391_v45  ;;  %3061 = vmatprep.subr.bf16.mxu1 %v4396_v48  ;;  %v4473_v45 = vld [vmem:[%s6234_s1 + $0xb74] ss:$8 sps:$4 sm:$0xff]   ;;  %v4468_v48 = vld [vmem:[%s6234_s1 + $0x470] ss:$8 sps:$4 sm:$0xff]  }
  0xed   :  { %3348 = vmatprep.subr.bf16.mxu0 %v4399_v49  ;;  %v4471_v49 = vld [vmem:[%s6234_s1 + $0xb70] ss:$8 sps:$4 sm:$0xff]  }
  0xef   :  { %3062 = vmatpush1.bf16.msra.mxu1 %v4394_v24  ;;  %v4476_v24 = vld [vmem:[%s6234_s1 + $0x484] ss:$8 sps:$4 sm:$0xff]  }
  0xf0   :  { %3349 = vmatpush1.bf16.msra.mxu0 %v4397_v51  ;;  %3063 = vmatprep.subr.bf16.mxu1 %v4402_v52  ;;  %v4479_v51 = vld [vmem:[%s6234_s1 + $0xb84] ss:$8 sps:$4 sm:$0xff]   ;;  %v4474_v52 = vld [vmem:[%s6234_s1 + $0x480] ss:$8 sps:$4 sm:$0xff]  }
  0xf1   :  { %3350 = vmatprep.subr.bf16.mxu0 %v4405_v53  ;;  %v4477_v53 = vld [vmem:[%s6234_s1 + $0xb80] ss:$8 sps:$4 sm:$0xff]  }
  0xf3   :  { %3064 = vmatpush1.bf16.msra.mxu1 %v4400_v55  ;;  %v4482_v55 = vld [vmem:[%s6234_s1 + $0x494] ss:$8 sps:$4 sm:$0xff]  }
  0xf4   :  { %3351 = vmatpush1.bf16.msra.mxu0 %v4403_v58  ;;  %3065 = vmatprep.subr.bf16.mxu1 %v4408_v59  ;;  %v4485_v58 = vld [vmem:[%s6234_s1 + $0xb94] ss:$8 sps:$4 sm:$0xff]   ;;  %v4480_v59 = vld [vmem:[%s6234_s1 + $0x490] ss:$8 sps:$4 sm:$0xff]  }
  0xf5   :  { %3352 = vmatprep.subr.bf16.mxu0 %v4411_v36  ;;  %v4483_v36 = vld [vmem:[%s6234_s1 + $0xb90] ss:$8 sps:$4 sm:$0xff]  }
  0xf7   :  { %3066 = vmatpush1.bf16.msra.mxu1 %v4406_v37  ;;  %v4488_v37 = vld [vmem:[%s6234_s1 + $0x4a4] ss:$8 sps:$4 sm:$0xff]  }
  0xf8   :  { %3353 = vmatpush1.bf16.msra.mxu0 %v4409_v61  ;;  %3067 = vmatprep.subr.bf16.mxu1 %v4414_v62  ;;  %v4491_v61 = vld [vmem:[%s6234_s1 + $0xba4] ss:$8 sps:$4 sm:$0xff]   ;;  %v4486_v62 = vld [vmem:[%s6234_s1 + $0x4a0] ss:$8 sps:$4 sm:$0xff]  }
  0xf9   :  { %3354 = vmatprep.subr.bf16.mxu0 %v4417_v63  ;;  %v4489_v63 = vld [vmem:[%s6234_s1 + $0xba0] ss:$8 sps:$4 sm:$0xff]  }
  0xfb   :  { %3068 = vmatpush1.bf16.msra.mxu1 %v4412_v2  ;;  %v4492_v2 = vld [vmem:[%s6234_s1 + $0x4b0] ss:$8 sps:$4 sm:$0xff]  }
  0xfc   :  { %3355 = vmatpush1.bf16.msra.mxu0 %v4415_v3  ;;  %3069 = vmatprep.subr.bf16.mxu1 %v4420_v46  ;;  %v4495_v3 = vld [vmem:[%s6234_s1 + $0xbb0] ss:$8 sps:$4 sm:$0xff]   ;;  %v4500_v46 = vld [vmem:[%s6234_s1 + $0x4c4] ss:$8 sps:$4 sm:$0xff]  }
  0xfd   :  { %3356 = vmatprep.subr.bf16.mxu0 %v4423_v5  ;;  %v4503_v5 = vld [vmem:[%s6234_s1 + $0xbc4] ss:$8 sps:$4 sm:$0xff]  }
  0xff   :  { %3070 = vmatpush1.bf16.msra.mxu1 %v4418_v7  ;;  %v4498_v7 = vld [vmem:[%s6234_s1 + $0x4c0] ss:$8 sps:$4 sm:$0xff]  }
 0x100   :  { %3357 = vmatpush1.bf16.msra.mxu0 %v4421_v9  ;;  %3080 = vmatprep.subr.bf16.mxu1 %v4426_v10  ;;  %v4506_v9 = vld [vmem:[%s6234_s1 + $0x4d4] ss:$8 sps:$4 sm:$0xff]  }
 0x101   :  { %3367 = vmatprep.subr.bf16.mxu0 %v4431_v12  ;;  %v4509_v10 = vld [vmem:[%s6234_s1 + $0xbd4] ss:$8 sps:$4 sm:$0xff]   ;;  %v4504_v12 = vld [vmem:[%s6234_s1 + $0x4d0] ss:$8 sps:$4 sm:$0xff]  }
 0x102   :  { %3072 = vmatmul.mubr.bf16.vlgmr.msra.gmra.mrb[0].mxu1 %v557_v56  ;;  %v4512_v56 = vld [vmem:[%s6234_s1 + $0x4e4] ss:$8 sps:$4 sm:$0xff]  }
 0x103   :  { %3081 = vmatpush1.bf16.msra.mxu1 %v4424_v57  ;;  %3359 = vmatmul.mubr.bf16.vlgmr.msra.gmra.mrb[0].mxu0 %v5650_v14  ;;  %v4515_v57 = vld [vmem:[%s6234_s1 + $0xbe4] ss:$8 sps:$4 sm:$0xff]  }
 0x104   :  { %3368 = vmatpush1.bf16.msra.mxu0 %v4429_v15  ;;  %3082 = vmatprep.subr.bf16.mxu1 %v4434_v16  ;;  %v4623_v15 = vld [vmem:[%s6233_s0 + $0x18] ss:$27 sps:$4 sm:$0x77]   ;;  %v4624_v16 = vld [vmem:[%s6233_s0 + $0x4e] ss:$27 sps:$4 sm:$0x77]  }
 0x105   :  { %3369 = vmatprep.subr.bf16.mxu0 %v4437_v60  ;;  %3112 = vmatprep.mubr.bf16.mxu1 %v5662_v17  ;;  %v4510_v60 = vld [vmem:[%s6234_s1 + $0x4e0] ss:$8 sps:$4 sm:$0xff]  }
 0x106   :  { %3399 = vmatprep.mubr.bf16.mxu0 %v695_v18  ;;  %v4513_v18 = vld [vmem:[%s6234_s1 + $0xbe0] ss:$8 sps:$4 sm:$0xff]  }
 0x107   :  { %3083 = vmatpush1.bf16.msra.mxu1 %v4432_v19  ;;  %v4518_v19 = vld [vmem:[%s6234_s1 + $0x4f4] ss:$8 sps:$4 sm:$0xff]  }
 0x108   :  { %3370 = vmatpush1.bf16.msra.mxu0 %v4435_v20  ;;  %3084 = vmatprep.subr.bf16.mxu1 %v4440_v22  ;;  %v4521_v20 = vld [vmem:[%s6234_s1 + $0xbf4] ss:$8 sps:$4 sm:$0xff]   ;;  %v592_v22 = vcombine.low %v5623_v50, %v5626_v6  ;;  %v4526_v50 = vld [vmem:[%s6234_s1 + $0x504] ss:$8 sps:$4 sm:$0xff]  }
 0x109   :  { %3371 = vmatprep.subr.bf16.mxu0 %v4443_v4  ;;  %v5845_v4 = vrot.slane %v4623_v15, %v4894_v54  ;;  %v4529_v6 = vld [vmem:[%s6234_s1 + $0xc04] ss:$8 sps:$4 sm:$0xff]   ;;  %v4592_v15 = vld [vmem:[%s6234_s1 + $0x5b4] ss:$8 sps:$4 sm:$0xff]  }
 0x10b   :  { %3085 = vmatpush1.bf16.msra.mxu1 %v4438_v23  ;;  %v5848_v23 = vrot.slane %v4624_v16, %v4894_v54  ;;  %v4595_v16 = vld [vmem:[%s6234_s1 + $0xcb4] ss:$8 sps:$4 sm:$0xff]  }
 0x10c   :  { %3372 = vmatpush1.bf16.msra.mxu0 %v4441_v25  ;;  %3086 = vmatprep.subr.bf16.mxu1 %v4446_v26  ;;  %v4516_v25 = vld [vmem:[%s6234_s1 + $0x4f0] ss:$8 sps:$4 sm:$0xff]  }
 0x10d   :  { %3373 = vmatprep.subr.bf16.mxu0 %v4449_v27  ;;  %v4519_v26 = vld [vmem:[%s6234_s1 + $0xbf0] ss:$8 sps:$4 sm:$0xff]   ;;  %v5863_v27 = vrot.slane %v592_v22, %v4894_v54  ;;  %v4596_v22 = vld [vmem:[%s6234_s1 + $0x5c0] ss:$8 sps:$4 sm:$0xff]  }
 0x10f   :  { %3087 = vmatpush1.bf16.msra.mxu1 %v4444_v28  ;;  %v713_v28 = vcombine.high %v5845_v4, %v5848_v23 }
 0x110   :  { %3374 = vmatpush1.bf16.msra.mxu0 %v4447_v29  ;;  %3088 = vmatprep.subr.bf16.mxu1 %v4452_v30  ;;  %v4524_v29 = vld [vmem:[%s6234_s1 + $0x500] ss:$8 sps:$4 sm:$0xff]   ;;  %v693_v30 = vcombine.high %v5650_v14, %v5650_v14 }
 0x111   :  { %3375 = vmatprep.subr.bf16.mxu0 %v4455_v31  ;;  %v4527_v31 = vld [vmem:[%s6234_s1 + $0xc00] ss:$8 sps:$4 sm:$0xff]   ;;  %v727_v14 = vrot.slane %v713_v28, %v4894_v54  ;;  %v4605_v28 = vld [vmem:[%s6234_s1 + $0xcd0] ss:$8 sps:$4 sm:$0xff]  }
 0x113   :  { %3089 = vmatpush1.bf16.msra.mxu1 %v4450_v32  ;;  %v4532_v32 = vld [vmem:[%s6234_s1 + $0x514] ss:$8 sps:$4 sm:$0xff]  }
 0x114   :  { %3376 = vmatpush1.bf16.msra.mxu0 %v4453_v33  ;;  %3090 = vmatprep.subr.bf16.mxu1 %v4458_v34  ;;  %v4535_v33 = vld [vmem:[%s6234_s1 + $0xc14] ss:$8 sps:$4 sm:$0xff]   ;;  %v626_v34 = vcombine.high %v5662_v17, %v5662_v17  ;;  %v4538_v17 = vld [vmem:[%s6234_s1 + $0x524] ss:$8 sps:$4 sm:$0xff]  }
 0x115   :  { %3377 = vmatprep.subr.bf16.mxu0 %v4461_v35  ;;  %v4530_v35 = vld [vmem:[%s6234_s1 + $0x510] ss:$8 sps:$4 sm:$0xff]  }
 0x117   :  { %3091 = vmatpush1.bf16.msra.mxu1 %v4456_v38  ;;  %v4533_v38 = vld [vmem:[%s6234_s1 + $0xc10] ss:$8 sps:$4 sm:$0xff]  }
 0x118   :  { %3378 = vmatpush1.bf16.msra.mxu0 %v4459_v39  ;;  %3092 = vmatprep.subr.bf16.mxu1 %v4464_v40  ;;  %v4541_v39 = vld [vmem:[%s6234_s1 + $0xc24] ss:$8 sps:$4 sm:$0xff]   ;;  %v4536_v40 = vld [vmem:[%s6234_s1 + $0x520] ss:$8 sps:$4 sm:$0xff]  }
 0x119   :  { %3379 = vmatprep.subr.bf16.mxu0 %v4467_v41  ;;  %v4539_v41 = vld [vmem:[%s6234_s1 + $0xc20] ss:$8 sps:$4 sm:$0xff]  }
 0x11b   :  { %3093 = vmatpush1.bf16.msra.mxu1 %v4462_v42  ;;  %v4544_v42 = vld [vmem:[%s6234_s1 + $0x534] ss:$8 sps:$4 sm:$0xff]  }
 0x11c   :  { %3380 = vmatpush1.bf16.msra.mxu0 %v4465_v43  ;;  %3094 = vmatprep.subr.bf16.mxu1 %v4470_v44  ;;  %v4547_v43 = vld [vmem:[%s6234_s1 + $0xc34] ss:$8 sps:$4 sm:$0xff]   ;;  %v4542_v44 = vld [vmem:[%s6234_s1 + $0x530] ss:$8 sps:$4 sm:$0xff]  }
 0x11d   :  { %3381 = vmatprep.subr.bf16.mxu0 %v4473_v45  ;;  %v4545_v45 = vld [vmem:[%s6234_s1 + $0xc30] ss:$8 sps:$4 sm:$0xff]  }
 0x11f   :  { %3095 = vmatpush1.bf16.msra.mxu1 %v4468_v48  ;;  %v4550_v48 = vld [vmem:[%s6234_s1 + $0x544] ss:$8 sps:$4 sm:$0xff]  }
 0x120   :  { %3382 = vmatpush1.bf16.msra.mxu0 %v4471_v49  ;;  %3096 = vmatprep.subr.bf16.mxu1 %v4476_v24  ;;  %v4553_v49 = vld [vmem:[%s6234_s1 + $0xc44] ss:$8 sps:$4 sm:$0xff]   ;;  %v4548_v24 = vld [vmem:[%s6234_s1 + $0x540] ss:$8 sps:$4 sm:$0xff]  }
 0x121   :  { %3383 = vmatprep.subr.bf16.mxu0 %v4479_v51  ;;  %v4551_v51 = vld [vmem:[%s6234_s1 + $0xc40] ss:$8 sps:$4 sm:$0xff]  }
 0x123   :  { %3097 = vmatpush1.bf16.msra.mxu1 %v4474_v52  ;;  %v4556_v52 = vld [vmem:[%s6234_s1 + $0x554] ss:$8 sps:$4 sm:$0xff]  }
 0x124   :  { %3384 = vmatpush1.bf16.msra.mxu0 %v4477_v53  ;;  %3098 = vmatprep.subr.bf16.mxu1 %v4482_v55  ;;  %v4559_v53 = vld [vmem:[%s6234_s1 + $0xc54] ss:$8 sps:$4 sm:$0xff]   ;;  %v4554_v55 = vld [vmem:[%s6234_s1 + $0x550] ss:$8 sps:$4 sm:$0xff]  }
 0x125   :  { %3385 = vmatprep.subr.bf16.mxu0 %v4485_v58  ;;  %v4557_v58 = vld [vmem:[%s6234_s1 + $0xc50] ss:$8 sps:$4 sm:$0xff]  }
 0x127   :  { %3099 = vmatpush1.bf16.msra.mxu1 %v4480_v59  ;;  %v4562_v59 = vld [vmem:[%s6234_s1 + $0x564] ss:$8 sps:$4 sm:$0xff]  }
 0x128   :  { %3386 = vmatpush1.bf16.msra.mxu0 %v4483_v36  ;;  %3100 = vmatprep.subr.bf16.mxu1 %v4488_v37  ;;  %v4565_v36 = vld [vmem:[%s6234_s1 + $0xc64] ss:$8 sps:$4 sm:$0xff]   ;;  %v4560_v37 = vld [vmem:[%s6234_s1 + $0x560] ss:$8 sps:$4 sm:$0xff]  }
 0x129   :  { %3387 = vmatprep.subr.bf16.mxu0 %v4491_v61  ;;  %v4563_v61 = vld [vmem:[%s6234_s1 + $0xc60] ss:$8 sps:$4 sm:$0xff]  }
 0x12b   :  { %3101 = vmatpush1.bf16.msra.mxu1 %v4486_v62  ;;  %v4568_v62 = vld [vmem:[%s6234_s1 + $0x574] ss:$8 sps:$4 sm:$0xff]  }
 0x12c   :  { %3388 = vmatpush1.bf16.msra.mxu0 %v4489_v63  ;;  %3102 = vmatprep.subr.bf16.mxu1 %v4494_v0  ;;  %v4571_v63 = vld [vmem:[%s6234_s1 + $0xc74] ss:$8 sps:$4 sm:$0xff]   ;;  %v4566_v0 = vld [vmem:[%s6234_s1 + $0x570] ss:$8 sps:$4 sm:$0xff]  }
 0x12d   :  { %3389 = vmatprep.subr.bf16.mxu0 %v4497_v1  ;;  %v4569_v1 = vld [vmem:[%s6234_s1 + $0xc70] ss:$8 sps:$4 sm:$0xff]  }
 0x12f   :  { %3103 = vmatpush1.bf16.msra.mxu1 %v4492_v2  ;;  %v4574_v2 = vld [vmem:[%s6234_s1 + $0x584] ss:$8 sps:$4 sm:$0xff]  }
 0x130   :  { %3390 = vmatpush1.bf16.msra.mxu0 %v4495_v3  ;;  %3104 = vmatprep.subr.bf16.mxu1 %v4500_v46  ;;  %v4577_v3 = vld [vmem:[%s6234_s1 + $0xc84] ss:$8 sps:$4 sm:$0xff]   ;;  %v4572_v46 = vld [vmem:[%s6234_s1 + $0x580] ss:$8 sps:$4 sm:$0xff]  }
 0x131   :  { %3391 = vmatprep.subr.bf16.mxu0 %v4503_v5  ;;  %v4575_v5 = vld [vmem:[%s6234_s1 + $0xc80] ss:$8 sps:$4 sm:$0xff]  }
 0x133   :  { %3105 = vmatpush1.bf16.msra.mxu1 %v4498_v7  ;;  %v4580_v7 = vld [vmem:[%s6234_s1 + $0x594] ss:$8 sps:$4 sm:$0xff]  }
 0x134   :  { %3392 = vmatpush1.bf16.msra.mxu0 %v4501_v8  ;;  %3106 = vmatprep.subr.bf16.mxu1 %v4506_v9  ;;  %v4583_v8 = vld [vmem:[%s6234_s1 + $0xc94] ss:$8 sps:$4 sm:$0xff]   ;;  %v4578_v9 = vld [vmem:[%s6234_s1 + $0x590] ss:$8 sps:$4 sm:$0xff]  }
 0x135   :  { %3393 = vmatprep.subr.bf16.mxu0 %v4509_v10  ;;  %v4581_v10 = vld [vmem:[%s6234_s1 + $0xc90] ss:$8 sps:$4 sm:$0xff]  }
 0x137   :  { %3107 = vmatpush1.bf16.msra.mxu1 %v4504_v12  ;;  %v4586_v12 = vld [vmem:[%s6234_s1 + $0x5a4] ss:$8 sps:$4 sm:$0xff]  }
 0x138   :  { %3394 = vmatpush1.bf16.msra.mxu0 %v4507_v13  ;;  %3108 = vmatprep.subr.bf16.mxu1 %v4512_v56  ;;  %v4589_v13 = vld [vmem:[%s6234_s1 + $0xca4] ss:$8 sps:$4 sm:$0xff]   ;;  %v4584_v56 = vld [vmem:[%s6234_s1 + $0x5a0] ss:$8 sps:$4 sm:$0xff]  }
 0x139   :  { %3395 = vmatprep.subr.bf16.mxu0 %v4515_v57  ;;  %v4587_v57 = vld [vmem:[%s6234_s1 + $0xca0] ss:$8 sps:$4 sm:$0xff]  }
 0x13b   :  { %3109 = vmatpush1.bf16.msra.mxu1 %v4510_v60  ;;  %v4590_v60 = vld [vmem:[%s6234_s1 + $0x5b0] ss:$8 sps:$4 sm:$0xff]  }
 0x13c   :  { %3396 = vmatpush1.bf16.msra.mxu0 %v4513_v18  ;;  %3110 = vmatprep.subr.bf16.mxu1 %v4518_v19  ;;  %v4593_v18 = vld [vmem:[%s6234_s1 + $0xcb0] ss:$8 sps:$4 sm:$0xff]   ;;  %v4598_v19 = vld [vmem:[%s6234_s1 + $0x5c4] ss:$8 sps:$4 sm:$0xff]  }
 0x13d   :  { %3397 = vmatprep.subr.bf16.mxu0 %v4521_v20  ;;  %v4601_v20 = vld [vmem:[%s6234_s1 + $0xcc4] ss:$8 sps:$4 sm:$0xff]  }
 0x13f   :  { %3111 = vmatpush1.bf16.msra.mxu1 %v4516_v25  ;;  %v4599_v25 = vld [vmem:[%s6234_s1 + $0xcc0] ss:$8 sps:$4 sm:$0xff]  }
 0x140   :  { %3398 = vmatpush1.bf16.msra.mxu0 %v4519_v26  ;;  %3121 = vmatprep.subr.bf16.mxu1 %v4526_v50  ;;  %v4604_v26 = vld [vmem:[%s6234_s1 + $0x5d4] ss:$8 sps:$4 sm:$0xff]  }
 0x141   :  { %3408 = vmatprep.subr.bf16.mxu0 %v4529_v6  ;;  %v4607_v50 = vld [vmem:[%s6234_s1 + $0xcd4] ss:$8 sps:$4 sm:$0xff]   ;;  %v4602_v6 = vld [vmem:[%s6234_s1 + $0x5d0] ss:$8 sps:$4 sm:$0xff]  }
 0x142   :  { %3113 = vmatmul.mubr.bf16.vlgmr.msra.gmra.mrb[0].mxu1 %v5863_v27 }
 0x143   :  { %3122 = vmatpush1.bf16.msra.mxu1 %v4524_v29  ;;  %3400 = vmatmul.mubr.bf16.vlgmr.msra.gmra.mrb[0].mxu0 %v693_v30  ;;  %v4610_v29 = vld [vmem:[%s6234_s1 + $0x5e4] ss:$8 sps:$4 sm:$0xff]  }
 0x144   :  { %3409 = vmatpush1.bf16.msra.mxu0 %v4527_v31  ;;  %3123 = vmatprep.subr.bf16.mxu1 %v4532_v32  ;;  %v4613_v30 = vld [vmem:[%s6234_s1 + $0xce4] ss:$8 sps:$4 sm:$0xff]   ;;  %v4608_v31 = vld [vmem:[%s6234_s1 + $0x5e0] ss:$8 sps:$4 sm:$0xff]  }
 0x145   :  { %3410 = vmatprep.subr.bf16.mxu0 %v4535_v33  ;;  %3153 = vmatprep.mubr.bf16.mxu1 %v626_v34  ;;  %v4611_v32 = vld [vmem:[%s6234_s1 + $0xce0] ss:$8 sps:$4 sm:$0xff]   ;;  %v4616_v33 = vld [vmem:[%s6234_s1 + $0x5f4] ss:$8 sps:$4 sm:$0xff]  }
 0x146   :  { %3440 = vmatprep.mubr.bf16.mxu0 %v727_v14  ;;  %v4619_v34 = vld [vmem:[%s6234_s1 + $0xcf4] ss:$8 sps:$4 sm:$0xff]   ;;  %v4614_v14 = vld [vmem:[%s6234_s1 + $0x5f0] ss:$8 sps:$4 sm:$0xff]  }
 0x147   :  { %3124 = vmatpush1.bf16.msra.mxu1 %v4530_v35  ;;  %v712_v35 = vcombine.low %v5845_v4, %v5848_v23  ;;  %v4620_v4 = vld [vmem:[%s6234_s1 + $0x600] ss:$8 sps:$4 sm:$0xff]  }
 0x148   :  { %3411 = vmatpush1.bf16.msra.mxu0 %v4533_v38  ;;  %3125 = vmatprep.subr.bf16.mxu1 %v4538_v17  ;;  %v4617_v38 = vld [vmem:[%s6234_s1 + $0xcf0] ss:$8 sps:$4 sm:$0xff]   ;;  %v4622_v17 = vld [vmem:[%s6234_s1 + $0x604] ss:$8 sps:$4 sm:$0xff]  }
 0x149   :  { %3412 = vmatprep.subr.bf16.mxu0 %v4541_v39  ;;  %v4627_v39 = vld [vmem:[%s6234_s1 + $0xd04] ss:$8 sps:$4 sm:$0xff]   ;;  %v6073_v23 = vrot.slane %v712_v35, %v4894_v54  ;;  %v4628_v54 = vld [vmem:[%s6234_s1 + $0x610] ss:$8 sps:$4 sm:$0xff]  }
 0x14b   :  { %3126 = vmatpush1.bf16.msra.mxu1 %v4536_v40  ;;  %v624_v40 = vcombine.high %v5863_v27, %v5863_v27  ;;  %v4633_v27 = vld [vmem:[%s6234_s1 + $0xd14] ss:$8 sps:$4 sm:$0xff]  }
 0x14c   :  { %3413 = vmatpush1.bf16.msra.mxu0 %v4539_v41  ;;  %3127 = vmatprep.subr.bf16.mxu1 %v4544_v42  ;;  %v4625_v41 = vld [vmem:[%s6234_s1 + $0xd00] ss:$8 sps:$4 sm:$0xff]   ;;  %v4630_v42 = vld [vmem:[%s6234_s1 + $0x614] ss:$8 sps:$4 sm:$0xff]  }
 0x14d   :  { %3414 = vmatprep.subr.bf16.mxu0 %v4547_v43  ;;  %v4631_v43 = vld [vmem:[%s6234_s1 + $0xd10] ss:$8 sps:$4 sm:$0xff]  }
 0x14f   :  { %3128 = vmatpush1.bf16.msra.mxu1 %v4542_v44  ;;  %v4636_v44 = vld [vmem:[%s6234_s1 + $0x624] ss:$8 sps:$4 sm:$0xff]  }
 0x150   :  { %3415 = vmatpush1.bf16.msra.mxu0 %v4545_v45  ;;  %3129 = vmatprep.subr.bf16.mxu1 %v4550_v48  ;;  %v4639_v45 = vld [vmem:[%s6234_s1 + $0xd24] ss:$8 sps:$4 sm:$0xff]   ;;  %v4719_v48 = vmov 0  }
 0x151   :  { %3416 = vmatprep.subr.bf16.mxu0 %v4553_v49  ;;  %v4634_v49 = vld [vmem:[%s6234_s1 + $0x620] ss:$8 sps:$4 sm:$0xff]  }
 0x153   :  { %3130 = vmatpush1.bf16.msra.mxu1 %v4548_v24  ;;  %v4637_v24 = vld [vmem:[%s6234_s1 + $0xd20] ss:$8 sps:$4 sm:$0xff]  }
 0x154   :  { %3417 = vmatpush1.bf16.msra.mxu0 %v4551_v51  ;;  %3131 = vmatprep.subr.bf16.mxu1 %v4556_v52  ;;  %v4642_v51 = vld [vmem:[%s6234_s1 + $0x634] ss:$8 sps:$4 sm:$0xff]   ;;  %v4640_v52 = vld [vmem:[%s6234_s1 + $0x630] ss:$8 sps:$4 sm:$0xff]  }
 0x155   :  { %3418 = vmatprep.subr.bf16.mxu0 %v4559_v53  ;;  %v4643_v53 = vld [vmem:[%s6234_s1 + $0xd30] ss:$8 sps:$4 sm:$0xff]  }
 0x157   :  { %3132 = vmatpush1.bf16.msra.mxu1 %v4554_v55  ;;  %v4648_v55 = vld [vmem:[%s6234_s1 + $0x644] ss:$8 sps:$4 sm:$0xff]  }
 0x158   :  { %3419 = vmatpush1.bf16.msra.mxu0 %v4557_v58  ;;  %3133 = vmatprep.subr.bf16.mxu1 %v4562_v59  ;;  %v4651_v58 = vld [vmem:[%s6234_s1 + $0xd44] ss:$8 sps:$4 sm:$0xff]   ;;  %v4646_v59 = vld [vmem:[%s6234_s1 + $0x640] ss:$8 sps:$4 sm:$0xff]  }
 0x159   :  { %3420 = vmatprep.subr.bf16.mxu0 %v4565_v36  ;;  %v4649_v36 = vld [vmem:[%s6234_s1 + $0xd40] ss:$8 sps:$4 sm:$0xff]  }
 0x15b   :  { %3134 = vmatpush1.bf16.msra.mxu1 %v4560_v37  ;;  %v4654_v37 = vld [vmem:[%s6234_s1 + $0x654] ss:$8 sps:$4 sm:$0xff]  }
 0x15c   :  { %3421 = vmatpush1.bf16.msra.mxu0 %v4563_v61  ;;  %3135 = vmatprep.subr.bf16.mxu1 %v4568_v62  ;;  %v4657_v61 = vld [vmem:[%s6234_s1 + $0xd54] ss:$8 sps:$4 sm:$0xff]   ;;  %v4652_v62 = vld [vmem:[%s6234_s1 + $0x650] ss:$8 sps:$4 sm:$0xff]  }
 0x15d   :  { %3422 = vmatprep.subr.bf16.mxu0 %v4571_v63  ;;  %v4655_v63 = vld [vmem:[%s6234_s1 + $0xd50] ss:$8 sps:$4 sm:$0xff]  }
 0x15f   :  { %3136 = vmatpush1.bf16.msra.mxu1 %v4566_v0  ;;  %v4660_v0 = vld [vmem:[%s6234_s1 + $0x664] ss:$8 sps:$4 sm:$0xff]  }
 0x160   :  { %3423 = vmatpush1.bf16.msra.mxu0 %v4569_v1  ;;  %3137 = vmatprep.subr.bf16.mxu1 %v4574_v2  ;;  %v4663_v1 = vld [vmem:[%s6234_s1 + $0xd64] ss:$8 sps:$4 sm:$0xff]   ;;  %v4658_v2 = vld [vmem:[%s6234_s1 + $0x660] ss:$8 sps:$4 sm:$0xff]  }
 0x161   :  { %3424 = vmatprep.subr.bf16.mxu0 %v4577_v3  ;;  %v4661_v3 = vld [vmem:[%s6234_s1 + $0xd60] ss:$8 sps:$4 sm:$0xff]  }
 0x163   :  { %3138 = vmatpush1.bf16.msra.mxu1 %v4572_v46  ;;  %v4666_v46 = vld [vmem:[%s6234_s1 + $0x674] ss:$8 sps:$4 sm:$0xff]  }
 0x164   :  { %3425 = vmatpush1.bf16.msra.mxu0 %v4575_v5  ;;  %3139 = vmatprep.subr.bf16.mxu1 %v4580_v7  ;;  %v4669_v5 = vld [vmem:[%s6234_s1 + $0xd74] ss:$8 sps:$4 sm:$0xff]   ;;  %v4664_v7 = vld [vmem:[%s6234_s1 + $0x670] ss:$8 sps:$4 sm:$0xff]  }
 0x165   :  { %3426 = vmatprep.subr.bf16.mxu0 %v4583_v8  ;;  %v4667_v8 = vld [vmem:[%s6234_s1 + $0xd70] ss:$8 sps:$4 sm:$0xff]  }
 0x167   :  { %3140 = vmatpush1.bf16.msra.mxu1 %v4578_v9  ;;  %v4672_v9 = vld [vmem:[%s6234_s1 + $0x684] ss:$8 sps:$4 sm:$0xff]  }
 0x168   :  { %3427 = vmatpush1.bf16.msra.mxu0 %v4581_v10  ;;  %3141 = vmatprep.subr.bf16.mxu1 %v4586_v12  ;;  %v4670_v10 = vld [vmem:[%s6234_s1 + $0x680] ss:$8 sps:$4 sm:$0xff]   ;;  %v728_v12 = vcombine.high %v6073_v23, %v6073_v23 }
 0x169   :  { %3428 = vmatprep.subr.bf16.mxu0 %v4589_v13  ;;  %v4675_v13 = vld [vmem:[%s6234_s1 + $0x694] ss:$8 sps:$4 sm:$0xff]  }
 0x16b   :  { %3142 = vmatpush1.bf16.msra.mxu1 %v4584_v56  ;;  %v4673_v56 = vld [vmem:[%s6234_s1 + $0x690] ss:$8 sps:$4 sm:$0xff]  }
 0x16c   :  { %3429 = vmatpush1.bf16.msra.mxu0 %v4587_v57  ;;  %3143 = vmatprep.subr.bf16.mxu1 %v4592_v15  ;;  %v4678_v57 = vld [vmem:[%s6234_s1 + $0x6a4] ss:$8 sps:$4 sm:$0xff]   ;;  %v4676_v15 = vld [vmem:[%s6234_s1 + $0x6a0] ss:$8 sps:$4 sm:$0xff]  }
 0x16d   :  { %3430 = vmatprep.subr.bf16.mxu0 %v4595_v16  ;;  %v4681_v16 = vld [vmem:[%s6234_s1 + $0x6b4] ss:$8 sps:$4 sm:$0xff]  }
 0x16f   :  { %3144 = vmatpush1.bf16.msra.mxu1 %v4590_v60  ;;  %v4679_v60 = vld [vmem:[%s6234_s1 + $0x6b0] ss:$8 sps:$4 sm:$0xff]  }
 0x170   :  { %3431 = vmatpush1.bf16.msra.mxu0 %v4593_v18  ;;  %3145 = vmatprep.subr.bf16.mxu1 %v4598_v19  ;;  %v4684_v18 = vld [vmem:[%s6234_s1 + $0x6c4] ss:$8 sps:$4 sm:$0xff]   ;;  %v4682_v19 = vld [vmem:[%s6234_s1 + $0x6c0] ss:$8 sps:$4 sm:$0xff]  }
 0x171   :  { %3432 = vmatprep.subr.bf16.mxu0 %v4601_v20  ;;  %v4687_v20 = vld [vmem:[%s6234_s1 + $0x6d4] ss:$8 sps:$4 sm:$0xff]  }
 0x173   :  { %3146 = vmatpush1.bf16.msra.mxu1 %v4596_v22  ;;  %v4685_v22 = vld [vmem:[%s6234_s1 + $0x6d0] ss:$8 sps:$4 sm:$0xff]  }
 0x174   :  { %3433 = vmatpush1.bf16.msra.mxu0 %v4599_v25  ;;  %3147 = vmatprep.subr.bf16.mxu1 %v4604_v26  ;;  %v4690_v25 = vld [vmem:[%s6234_s1 + $0x6e4] ss:$8 sps:$4 sm:$0xff]   ;;  %v4688_v26 = vld [vmem:[%s6234_s1 + $0x6e0] ss:$8 sps:$4 sm:$0xff]  }
 0x175   :  { %3434 = vmatprep.subr.bf16.mxu0 %v4607_v50  ;;  %v4693_v50 = vld [vmem:[%s6234_s1 + $0x6f4] ss:$8 sps:$4 sm:$0xff]  }
 0x177   :  { %3148 = vmatpush1.bf16.msra.mxu1 %v4602_v6  ;;  %v4691_v6 = vld [vmem:[%s6234_s1 + $0x6f0] ss:$8 sps:$4 sm:$0xff]  }
 0x178   :  { %3435 = vmatpush1.bf16.msra.mxu0 %v4605_v28  ;;  %3149 = vmatprep.subr.bf16.mxu1 %v4610_v29 }
 0x179   :  { %3436 = vmatprep.subr.bf16.mxu0 %v4613_v30 }
 0x17b   :  { %3150 = vmatpush1.bf16.msra.mxu1 %v4608_v31 }
 0x17c   :  { %3437 = vmatpush1.bf16.msra.mxu0 %v4611_v32  ;;  %3151 = vmatprep.subr.bf16.mxu1 %v4616_v33  ;;  %v468_v32 = vsub.s32 0, %v4876_v47  ;;  %v464_v33 = vld [vmem:[%s6235_s2] sm:$0x3] }
 0x17d   :  { %3438 = vmatprep.subr.bf16.mxu0 %v4619_v34  ;;  %v472_v34 = vsub.s32 1, %v4876_v47 }
 0x17f   :  { %3152 = vmatpush1.bf16.msra.mxu1 %v4614_v14  ;;  %v4720_v14 = vmov 1983009808  }
 0x180   :  { %3439 = vmatpush1.bf16.msra.mxu0 %v4617_v38  ;;  %3162 = vmatprep.subr.bf16.mxu1 %v4622_v17  ;;  %v3495_v35 = vunpack.c.l.s4 %v4720_v14  ;;  %v469_v38 = vrot.slane %v464_v33, %v468_v32  ;;  %v473_v17 = vrot.slane %v464_v33, %v472_v34 }
 0x181   :  { %3449 = vmatprep.subr.bf16.mxu0 %v4627_v39 }
 0x182   :  { %3154 = vmatmul.mubr.bf16.vlgmr.msra.gmra.mrb[0].mxu1 %v624_v40  ;;  %v3496_v40 = vunpack.c.0.s8 %v3495_v35 }
 0x183   :  { %3163 = vmatpush1.bf16.msra.mxu1 %v4620_v4  ;;  %3441 = vmatmul.mubr.bf16.vlgmr.msra.gmra.mrb[0].mxu0 %v6073_v23 }
 0x184   :  { %3450 = vmatpush1.bf16.msra.mxu0 %v4625_v41  ;;  %3164 = vmatprep.subr.bf16.mxu1 %v4630_v42 }
 0x185   :  { %3451 = vmatprep.subr.bf16.mxu0 %v4633_v27  ;;  %3481 = vmatprep.mubr.bf16.mxu0 %v4719_v48 }
 0x186   :  { %3194 = vmatprep.mubr.bf16.mxu1 %v4941_v11  ;;  %v4645_v11 = vld [vmem:[%s6234_s1 + $0xd34] ss:$8 sps:$4 sm:$0xff]  }
 0x187   :  { %3165 = vmatpush1.bf16.msra.mxu1 %v4628_v54 }
 0x188   :  { %3452 = vmatpush1.bf16.msra.mxu0 %v4631_v43  ;;  %3166 = vmatprep.subr.bf16.mxu1 %v4636_v44  ;;  %v3499_v43 = vsub.s32 %v3496_v40, %v4876_v47 }
 0x189   :  { %3453 = vmatprep.subr.bf16.mxu0 %v4639_v45 }
 0x18b   :  { %3167 = vmatpush1.bf16.msra.mxu1 %v4634_v49 }
 0x18c   :  { %3454 = vmatpush1.bf16.msra.mxu0 %v4637_v24  ;;  %3168 = vmatprep.subr.bf16.mxu1 %v4642_v51 }
 0x18d   :  { %3455 = vmatprep.subr.bf16.mxu0 %v4645_v11 }
 0x18f   :  { %3169 = vmatpush1.bf16.msra.mxu1 %v4640_v52 }
 0x190   :  { %3456 = vmatpush1.bf16.msra.mxu0 %v4643_v53  ;;  %3170 = vmatprep.subr.bf16.mxu1 %v4648_v55 }
 0x191   :  { %3457 = vmatprep.subr.bf16.mxu0 %v4651_v58 }
 0x193   :  { %3171 = vmatpush1.bf16.msra.mxu1 %v4646_v59 }
 0x194   :  { %3458 = vmatpush1.bf16.msra.mxu0 %v4649_v36  ;;  %3172 = vmatprep.subr.bf16.mxu1 %v4654_v37 }
 0x195   :  { %3459 = vmatprep.subr.bf16.mxu0 %v4657_v61 }
 0x197   :  { %3173 = vmatpush1.bf16.msra.mxu1 %v4652_v62 }
 0x198   :  { %3460 = vmatpush1.bf16.msra.mxu0 %v4655_v63  ;;  %3174 = vmatprep.subr.bf16.mxu1 %v4660_v0 }
 0x199   :  { %3461 = vmatprep.subr.bf16.mxu0 %v4663_v1 }
 0x19b   :  { %3175 = vmatpush1.bf16.msra.mxu1 %v4658_v2 }
 0x19c   :  { %3462 = vmatpush1.bf16.msra.mxu0 %v4661_v3  ;;  %3176 = vmatprep.subr.bf16.mxu1 %v4666_v46 }
 0x19d   :  { %3463 = vmatprep.subr.bf16.mxu0 %v4669_v5 }
 0x19f   :  { %3177 = vmatpush1.bf16.msra.mxu1 %v4664_v7 }
 0x1a0   :  { %3464 = vmatpush1.bf16.msra.mxu0 %v4667_v8  ;;  %3178 = vmatprep.subr.bf16.mxu1 %v4672_v9 }
 0x1a3   :  { %3482 = vmatmul.mubr.bf16.vlgmr.msra.gmra.mrb[0].mxu0 %v728_v12  ;;  %3179 = vmatpush1.bf16.msra.mxu1 %v4670_v10 }
 0x1a4   :  { %3180 = vmatprep.subr.bf16.mxu1 %v4675_v13 }
 0x1a7   :  { %3181 = vmatpush1.bf16.msra.mxu1 %v4673_v56 }
 0x1a8   :  { %3182 = vmatprep.subr.bf16.mxu1 %v4678_v57 }
 0x1ab   :  { %3183 = vmatpush1.bf16.msra.mxu1 %v4676_v15 }
 0x1ac   :  { %3184 = vmatprep.subr.bf16.mxu1 %v4681_v16 }
 0x1af   :  { %3185 = vmatpush1.bf16.msra.mxu1 %v4679_v60 }
 0x1b0   :  { %3186 = vmatprep.subr.bf16.mxu1 %v4684_v18 }
 0x1b3   :  { %3187 = vmatpush1.bf16.msra.mxu1 %v4682_v19 }
 0x1b4   :  { %3188 = vmatprep.subr.bf16.mxu1 %v4687_v20 }
 0x1b7   :  { %3189 = vmatpush1.bf16.msra.mxu1 %v4685_v22 }
 0x1b8   :  { %3190 = vmatprep.subr.bf16.mxu1 %v4690_v25 }
 0x1bb   :  { %3191 = vmatpush1.bf16.msra.mxu1 %v4688_v26 }
 0x1bc   :  { %3192 = vmatprep.subr.bf16.mxu1 %v4693_v50 }
 0x1bf   :  { %3193 = vmatpush1.bf16.msra.mxu1 %v4691_v6 }
 0x1c2   :  { %3195 = vmatmul.mubr.bf16.vlgmr.msra.gmra.mrb[0].mxu1 %v4964_v21 }
 0x276   :  { %v3483_v28 = vpop.f32.mrb[0].mxu0 }
 0x277   :  { %v3485_v29 = vpop.f32.mrb[1].mxu0 }
 0x278   :  { %v3487_v30 = vpop.f32.mrb[2].mxu0 }
 0x279   :  { %v3488_v31 = vpop.f32.mrb[3].mxu0 }
 0x295   :  { %v3196_v39 = vpop.f32.mrb[0].mxu1 }
 0x296   :  { %v3968_v4 = vadd.f32 %v3196_v39, %v469_v38  ;;  %v3198_v21 = vpop.f32.mrb[1].mxu1 }
 0x297   :  { %v3970_v23 = vadd.f32 %v3198_v21, %v473_v17  ;;  %v3200_v41 = vpop.f32.mrb[2].mxu1 }
 0x298   :  { %v3969_v42 = vadd.f32 %v3968_v4, %v3483_v28  ;;  %v3201_v27 = vpop.f32.mrb[3].mxu1 }
 0x299   :  { %v3971_v54 = vadd.f32 %v3970_v23, %v3485_v29 }
 0x29b   :  { %v3492_v44 = vcombine.low %v3969_v42, %v3971_v54  ;;  %v3493_v45 = vcombine.high %v3969_v42, %v3971_v54 }
 0x29d   :  { %v3500_v48 = vrot.slane %v3492_v44, %v3499_v43  ;;  %v3507_v49 = vrot.slane %v3493_v45, %v3499_v43  ;;  %3966 = vst.sshfl [vmem:[#allocation2] sm:$0x33 pattern:$0x76325410] %v3492_v44 }
 0x29e   :  { %3967 = vst.sshfl [vmem:[#allocation2 + $0x8] sm:$0x33 pattern:$0x76325410] %v3493_v45 }
 0x29f   :  { %v3508_v24 = vcombine.high %v3500_v48, %v3500_v48  ;;  %v3509_v51 = vcombine.high %v3507_v49, %v3507_v49 }
 0x2a1   :  { %3515 = vst [vmem:[#allocation2 + $0x4] sm:$0xf] %v3508_v24  ;;  %3517 = vst [vmem:[#allocation2 + $0xc] sm:$0xf] %v3509_v51 }
 0x2a2   :  { %3522 = vsyncadd [#allocation3], 192  ;;  %s4721_s1 = smov [#allocation2]  }
 0x2a3   :  { %s3523_s2 = sshll.u32 %s4721_s1, 4  ;;  %s3524_s2 = int_to_ptr.vmem [resolvable:$true] %s3523_s2 }
 0x2a4   :  { %s4694_s6 = scalar_lea.vmem %s3524_s2, 64  ;;  %s4698_s7 = scalar_lea.vmem %s3524_s2, 256 }
 0x2a5   :  { %p4695_p0 = scmp.ne.s32.totalorder %s3524_s2, %s4694_s6  ;;  %p4699_p1 = scmp.lt.s32.totalorder %s3524_s2, %s3524_s2 }
 0x2a6   :  { %p4700_p2 = scmp.lt.s32.totalorder %s4698_s7, %s4694_s6 }
 0x2a8   :  { %p4701_p3 = por %p4700_p2, %p4699_p1 }
 0x2aa   :  { %p4702_p4 = pnand %p4701_p3, %p4695_p0 }
 0x2ac   :  { %4705 = shalt.err (!%p4702_p4)
}
 0x2ad   :  { %s4706_s10 = scalar_lea.hbm %s6236_s3, 64 }
 0x2ae   :  { %p4707_p5 = scmp.ne.s32.totalorder %s6236_s3, %s4706_s10  ;;  %p4710_p6 = scmp.lt.u32.totalorder %s4706_s10, %s6236_s3 }
 0x2b0   :  { %p4712_p7 = pnand %p4710_p6, %p4707_p5 }
 0x2b2   :  { %4715 = shalt.err (!%p4712_p7)
}
 0x2b3   :  { %s4722_s15 = smov 64   ;;  %s4723_s16 = smov 4  }
 0x2b4   :  { %3529 = dma.vmem_to_hbm [thread:$0]  %s3524_s2, 64, %s6236_s3, [#allocation3], %s4722_s15, %s4722_s15, %s4723_s16  }
 0x2b5   :  { %4716 = dma.done.wait [#allocation3], 256  }
 0x2b6   :  { %4717 = vsyncadd [#allocation3], 4294967040 }
 0x2b7   :  { %3533 = vsyncpa [#allocation3], 1 }

</bundles_post_ra>
